<compile_context>
chip_gen: v6e
topology: v6e:2x2x1
jax: 0.10.0
libtpu: 0.0.40
codegen_flags: <defaults>
</compile_context>

<pallas_src>
import functools

import jax
import jax.numpy as jnp
import numpy as np
from jax.experimental import pallas as pl
from jax.experimental.pallas import tpu as pltpu


PAD_L = 8  # left halo width so interior stores start on a sublane-tile boundary


def _block3_width(w4):
    """Block-3 compute width: W//4 rounded up to a multiple of 8 (layout rule)."""
    return w4 if w4 % 8 == 0 else ((w4 + 7) // 8) * 8


# ------------------------------ in-kernel helpers ---------------------------------

def _zero_halo(pad_ref, H, w_valid, w_read):
    """Zero exactly the halo cells the 3x3 taps read but the interior never writes.

    pad_ref: (B, H+2, >= PAD_L + w_read + 1, C).  Interior (rows 1..H, cols
    PAD_L..PAD_L+w_valid-1) is fully rewritten each step, so only these strips
    need zeroing (and we do it every step -> megacore-safe, no persistence).
    """
    B = pad_ref.shape[0]
    C = pad_ref.shape[-1]
    zrow = jnp.zeros((B, 1, w_read + 2, C), jnp.float32)
    pad_ref[:, 0:1, PAD_L - 1:PAD_L + w_read + 1, :] = zrow            # top halo row
    pad_ref[:, H + 1:H + 2, PAD_L - 1:PAD_L + w_read + 1, :] = zrow    # bottom halo row
    pad_ref[:, 1:H + 1, PAD_L - 1:PAD_L, :] = jnp.zeros((B, H, 1, C), jnp.float32)
    rw = w_read - w_valid + 1                                          # right halo strip
    pad_ref[:, 1:H + 1, PAD_L + w_valid:PAD_L + w_read + 1, :] = (
        jnp.zeros((B, H, rw, C), jnp.float32))


def _write_interior(pad_ref, val, H, W):
    """Write an (B, H, W, C) activation into the interior of a padded scratch."""
    pad_ref[:, 1:H + 1, PAD_L:PAD_L + W, :] = val


def _conv3x3_relu(pad_ref, col_ref, w_ref, b_ref, H, W):
    """3x3 'SAME' conv + bias + ReLU as im2col + ONE MXU matmul.

    pad_ref: (B, H+2, >=PAD_L+W+1, Cin) zero-halo padded activation
    col_ref: (B, H, W, 9*Cin) im2col staging scratch (fully rewritten here)
    w_ref  : (9*Cin, Cout) weights, rows ordered (ky, kx, cin)
    b_ref  : (1, Cout)
    Returns (B, H, W, Cout) float32.  Requires W % 8 == 0 so the
    (B,H,W,K) <-> (B*H*W, K) reshapes are layout-preserving.
    """
    B = col_ref.shape[0]
    cin = pad_ref.shape[-1]
    cout = w_ref.shape[-1]
    for k in range(9):
        ky, kx = divmod(k, 3)
        col_ref[:, :, :, k * cin:(k + 1) * cin] = (
            pad_ref[:, ky:ky + H, PAD_L - 1 + kx:PAD_L - 1 + kx + W, :])
    a = col_ref[...].reshape(B * H * W, 9 * cin)
    y = jnp.dot(a, w_ref[...], preferred_element_type=jnp.float32)
    y = jnp.maximum(y + b_ref[...], 0.0)          # bias + ReLU once, in f32
    return y.reshape(B, H, W, cout)


def _maxpool2x2(t_ref, w_valid):
    """kernel=2/stride=2 max pool of the first w_valid columns of (B,H,W,C)."""
    B, H, _, C = t_ref.shape
    wo = w_valid // 2
    even = t_ref[:, :, pl.ds(0, wo, stride=2), :]   # columns 0,2,4,...
    odd = t_ref[:, :, pl.ds(1, wo, stride=2), :]    # columns 1,3,5,...
    m = jnp.maximum(even, odd)                      # pooled over W -> (B, H, wo, C)
    m = m.reshape(B, H // 2, 2, wo, C)              # leading-dim split (layout-free)
    return jnp.maximum(m[:, :, 0], m[:, :, 1])      # pooled over H -> (B, H//2, wo, C)


# --------------------------------- fused kernel -----------------------------------

def _fused_cnn_kernel(x_ref,
                      w1, b1, w2, b2, w3, b3, w4, b4, w5, b5, w6, b6,
                      o_ref,
                      p1, p2, p3, p4, p5, p6,
                      c1, c2, c3, c4, c5, c6,
                      t2, t4, t6,
                      *, H, W):
    H2, W2, H4, W4 = H // 2, W // 2, H // 4, W // 4
    W3 = _block3_width(W4)          # block-3 compute width; pad columns discarded

    # ------------------ block 1 (H x W) ------------------
    _zero_halo(p1, H, W, W)
    _write_interior(p1, x_ref[...], H, W)
    y = _conv3x3_relu(p1, c1, w1, b1, H, W)
    _zero_halo(p2, H, W, W)
    _write_interior(p2, y, H, W)
    t2[...] = _conv3x3_relu(p2, c2, w2, b2, H, W)
    y = _maxpool2x2(t2, W)

    # ------------------ block 2 (H/2 x W/2) --------------
    _zero_halo(p3, H2, W2, W2)
    _write_interior(p3, y, H2, W2)
    y = _conv3x3_relu(p3, c3, w3, b3, H2, W2)
    _zero_halo(p4, H2, W2, W2)
    _write_interior(p4, y, H2, W2)
    t4[...] = _conv3x3_relu(p4, c4, w4, b4, H2, W2)
    y = _maxpool2x2(t4, W2)

    # nn.Dropout2d(p=0.05) is the identity in eval mode.
    # TODO(synk): training-mode per-channel (2d) dropout is not implemented.

    # ------------------ block 3 (H/4 x W/4, width padded to W3) --------------
    _zero_halo(p5, H4, W4, W3)
    _write_interior(p5, y, H4, W4)
    y = _conv3x3_relu(p5, c5, w5, b5, H4, W3)          # columns >= W4 are discarded
    _zero_halo(p6, H4, W4, W3)
    _write_interior(p6, y[:, :, :W4, :], H4, W4)       # keep only valid columns
    t6[...] = _conv3x3_relu(p6, c6, w6, b6, H4, W3)
    o_ref[...] = _maxpool2x2(t6, W4).astype(o_ref.dtype)


# ------------------------------ module forward pass -------------------------------

def _pick_batch_tile(n, max_tile=8):
    """Largest divisor of n (<= max_tile) that keeps >= 2 grid steps (v7x: 2 TCs)."""
    best = 1
    for t in range(1, min(n, max_tile) + 1):
        if n % t == 0 and (n // t >= 2 or n == 1):
            best = t
    return best


def moderate_cnn_conv_blocks(x_nchw, params, *, batch_tile=None):
    """Forward pass of ModerateCNNContainerConvBlocks.  x_nchw: (N, 3, H, W)."""
    x = jnp.transpose(x_nchw, (0, 2, 3, 1)).astype(jnp.float32)   # NCHW -> NHWC
    N, H, W, Cin = x.shape
    assert H % 8 == 0 and W % 16 == 0, (H, W)

    filters = [w.shape[-1] for (w, _) in params]
    chans = [Cin] + filters
    H2, W2, H4, W4 = H // 2, W // 2, H // 4, W // 4
    W3 = _block3_width(W4)
    Ho, Wo = H // 8, W // 8

    B = batch_tile if batch_tile is not None else _pick_batch_tile(N)
    assert N % B == 0, (N, B)

    inputs = [x]
    in_specs = [pl.BlockSpec((B, H, W, Cin), lambda n: (n, 0, 0, 0))]
    for (w, b) in params:
        ci, co = w.shape[2], w.shape[3]
        inputs.append(w.reshape(9 * ci, co).astype(jnp.float32))   # rows (ky,kx,cin)
        inputs.append(b.reshape(1, co).astype(jnp.float32))
        in_specs.append(pl.BlockSpec((9 * ci, co), lambda n: (0, 0)))
        in_specs.append(pl.BlockSpec((1, co), lambda n: (0, 0)))

    f32 = jnp.float32
    scratch_shapes = [
        # zero-halo padded activations (only halo strips re-zeroed each step)
        pltpu.VMEM((B, H + 2, PAD_L + W + 1, chans[0]), f32),      # p1: conv1 input
        pltpu.VMEM((B, H + 2, PAD_L + W + 1, chans[1]), f32),      # p2: conv1 out
        pltpu.VMEM((B, H2 + 2, PAD_L + W2 + 1, chans[2]), f32),    # p3: pool1 out
        pltpu.VMEM((B, H2 + 2, PAD_L + W2 + 1, chans[3]), f32),    # p4: conv3 out
        pltpu.VMEM((B, H4 + 2, PAD_L + W3 + 1, chans[4]), f32),    # p5: pool2 out
        pltpu.VMEM((B, H4 + 2, PAD_L + W3 + 1, chans[5]), f32),    # p6: conv5 out
        # im2col staging slabs: one MXU matmul per conv with K = 9*Cin
        pltpu.VMEM((B, H, W, 9 * chans[0]), f32),                  # c1
        pltpu.VMEM((B, H, W, 9 * chans[1]), f32),                  # c2
        pltpu.VMEM((B, H2, W2, 9 * chans[2]), f32),                # c3
        pltpu.VMEM((B, H2, W2, 9 * chans[3]), f32),                # c4
        pltpu.VMEM((B, H4, W3, 9 * chans[4]), f32),                # c5
        pltpu.VMEM((B, H4, W3, 9 * chans[5]), f32),                # c6
        # pre-pool activations
        pltpu.VMEM((B, H, W, chans[2]), f32),                      # t2
        pltpu.VMEM((B, H2, W2, chans[4]), f32),                    # t4
        pltpu.VMEM((B, H4, W3, chans[6]), f32),                    # t6
    ]

    kern = functools.partial(_fused_cnn_kernel, H=H, W=W)
    out = pl.pallas_call(
        kern,
        out_shape=jax.ShapeDtypeStruct((N, Ho, Wo, chans[6]), jnp.float32),
        grid_spec=pltpu.PrefetchScalarGridSpec(
            num_scalar_prefetch=0,
            grid=(N // B,),
            in_specs=in_specs,
            out_specs=pl.BlockSpec((B, Ho, Wo, chans[6]), lambda n: (n, 0, 0, 0)),
            scratch_shapes=scratch_shapes,
        ),
        compiler_params=pltpu.CompilerParams(
            dimension_semantics=("parallel",),
            vmem_limit_bytes=64 * 1024 * 1024,
        ),
    )(*inputs)
    return jnp.transpose(out, (0, 3, 1, 2))       # NHWC -> NCHW


# ----------------------------------- params ---------------------------------------

def init_params(key, num_filters):
    # Deterministic synthetic init (the module __init__ only defines shapes).
    chans = [3] + list(num_filters)
    params = []
    for i in range(6):
        cin, cout = chans[i], chans[i + 1]
        key, kw, kb = jax.random.split(key, 3)
        scale = 1.0 / np.sqrt(cin * 9)
        w = jax.random.normal(kw, (3, 3, cin, cout), jnp.float32) * scale   # HWIO
        b = jax.random.normal(kb, (cout,), jnp.float32) * scale
        params.append((w, b))
    return params


# ------------------------------- pure-JAX reference -------------------------------

def _reference(x_nchw, params):
    x = jnp.transpose(x_nchw, (0, 2, 3, 1))

    def conv(x, w, b):
        y = jax.lax.conv_general_dilated(
            x, w, window_strides=(1, 1), padding="SAME",
            dimension_numbers=("NHWC", "HWIO", "NHWC"),
            precision=jax.lax.Precision.HIGHEST)
        return jax.nn.relu(y + b)

    def pool(x):
        n, h, w, c = x.shape
        return x.reshape(n, h // 2, 2, w // 2, 2, c).max(axis=(2, 4))

    x = conv(x, *params[0]); x = conv(x, *params[1]); x = pool(x)
    x = conv(x, *params[2]); x = conv(x, *params[3]); x = pool(x)
    x = conv(x, *params[4]); x = conv(x, *params[5]); x = pool(x)
    return jnp.transpose(x, (0, 3, 1, 2))


if __name__ == "__main__":
    key = jax.random.PRNGKey(0)
    kx, kp = jax.random.split(key)

    num_filters = [8, 16, 16, 32, 32, 64]
    x = jax.random.normal(kx, (2, 3, 16, 16), jnp.float32)   # NCHW, like PyTorch
    params = init_params(kp, num_filters)

    fwd = jax.jit(moderate_cnn_conv_blocks)
    out = jax.block_until_ready(fwd(x, params))
    assert out.shape == (2, num_filters[-1], 2, 2), out.shape

    ref = jax.block_until_ready(_reference(x, params))
    np.testing.assert_allclose(np.asarray(out), np.asarray(ref), rtol=2e-3, atol=2e-3)

    print("KERNEL_OK")
</pallas_src>

<mosaic_0001>
module attributes {stable_mosaic.version = 11 : i64} {
  func.func @_fused_cnn_kernel(%arg0: i32, %arg1: memref<1x16x16x3xf32, #tpu.memory_space<vmem>>, %arg2: memref<27x8xf32, #tpu.memory_space<vmem>>, %arg3: memref<1x8xf32, #tpu.memory_space<vmem>>, %arg4: memref<72x16xf32, #tpu.memory_space<vmem>>, %arg5: memref<1x16xf32, #tpu.memory_space<vmem>>, %arg6: memref<144x16xf32, #tpu.memory_space<vmem>>, %arg7: memref<1x16xf32, #tpu.memory_space<vmem>>, %arg8: memref<144x32xf32, #tpu.memory_space<vmem>>, %arg9: memref<1x32xf32, #tpu.memory_space<vmem>>, %arg10: memref<288x32xf32, #tpu.memory_space<vmem>>, %arg11: memref<1x32xf32, #tpu.memory_space<vmem>>, %arg12: memref<288x64xf32, #tpu.memory_space<vmem>>, %arg13: memref<1x64xf32, #tpu.memory_space<vmem>>, %arg14: memref<1x2x2x64xf32, #tpu.memory_space<vmem>>, %arg15: memref<1x18x25x3xf32, #tpu.memory_space<vmem>>, %arg16: memref<1x18x25x8xf32, #tpu.memory_space<vmem>>, %arg17: memref<1x10x17x16xf32, #tpu.memory_space<vmem>>, %arg18: memref<1x10x17x16xf32, #tpu.memory_space<vmem>>, %arg19: memref<1x6x17x32xf32, #tpu.memory_space<vmem>>, %arg20: memref<1x6x17x32xf32, #tpu.memory_space<vmem>>, %arg21: memref<1x16x16x27xf32, #tpu.memory_space<vmem>>, %arg22: memref<1x16x16x72xf32, #tpu.memory_space<vmem>>, %arg23: memref<1x8x8x144xf32, #tpu.memory_space<vmem>>, %arg24: memref<1x8x8x144xf32, #tpu.memory_space<vmem>>, %arg25: memref<1x4x8x288xf32, #tpu.memory_space<vmem>>, %arg26: memref<1x4x8x288xf32, #tpu.memory_space<vmem>>, %arg27: memref<1x16x16x16xf32, #tpu.memory_space<vmem>>, %arg28: memref<1x8x8x32xf32, #tpu.memory_space<vmem>>, %arg29: memref<1x4x8x64xf32, #tpu.memory_space<vmem>>) attributes {dimension_semantics = [#tpu.dimension_semantics<parallel>], iteration_bounds = array<i64: 2>, scalar_prefetch = 0 : i64, scratch_operands = 15 : i64, tpu.core_type = #tpu.core_type<tc>, window_params = [{transform_indices = @transform_0, window_bounds = array<i64: 1, 16, 16, 3>}, {pipeline_mode = #tpu.pipeline_mode<synchronous>, transform_indices = @transform_1, window_bounds = array<i64: 27, 8>}, {pipeline_mode = #tpu.pipeline_mode<synchronous>, transform_indices = @transform_2, window_bounds = array<i64: 1, 8>}, {pipeline_mode = #tpu.pipeline_mode<synchronous>, transform_indices = @transform_3, window_bounds = array<i64: 72, 16>}, {pipeline_mode = #tpu.pipeline_mode<synchronous>, transform_indices = @transform_4, window_bounds = array<i64: 1, 16>}, {pipeline_mode = #tpu.pipeline_mode<synchronous>, transform_indices = @transform_5, window_bounds = array<i64: 144, 16>}, {pipeline_mode = #tpu.pipeline_mode<synchronous>, transform_indices = @transform_6, window_bounds = array<i64: 1, 16>}, {pipeline_mode = #tpu.pipeline_mode<synchronous>, transform_indices = @transform_7, window_bounds = array<i64: 144, 32>}, {pipeline_mode = #tpu.pipeline_mode<synchronous>, transform_indices = @transform_8, window_bounds = array<i64: 1, 32>}, {pipeline_mode = #tpu.pipeline_mode<synchronous>, transform_indices = @transform_9, window_bounds = array<i64: 288, 32>}, {pipeline_mode = #tpu.pipeline_mode<synchronous>, transform_indices = @transform_10, window_bounds = array<i64: 1, 32>}, {pipeline_mode = #tpu.pipeline_mode<synchronous>, transform_indices = @transform_11, window_bounds = array<i64: 288, 64>}, {pipeline_mode = #tpu.pipeline_mode<synchronous>, transform_indices = @transform_12, window_bounds = array<i64: 1, 64>}, {transform_indices = @transform_13, window_bounds = array<i64: 1, 2, 2, 64>}]} {
    %cst = arith.constant 0.000000e+00 : f32
    %0 = vector.broadcast %cst : f32 to vector<1x1x18x3xf32>
    %c0 = arith.constant 0 : index
    %c0_0 = arith.constant 0 : index
    %c7 = arith.constant 7 : index
    %c0_1 = arith.constant 0 : index
    %1 = vector.load %arg15[%c0, %c0_0, %c7, %c0_1] : memref<1x18x25x3xf32, #tpu.memory_space<vmem>>, vector<1x1x18x3xf32>
    tpu.vector_store %arg15[%c0, %c0_0, %c7, %c0_1], %0 {strides = array<i32>} : memref<1x18x25x3xf32, #tpu.memory_space<vmem>>, vector<1x1x18x3xf32>,
    %c0_2 = arith.constant 0 : index
    %c17 = arith.constant 17 : index
    %c7_3 = arith.constant 7 : index
    %c0_4 = arith.constant 0 : index
    %2 = vector.load %arg15[%c0_2, %c17, %c7_3, %c0_4] : memref<1x18x25x3xf32, #tpu.memory_space<vmem>>, vector<1x1x18x3xf32>
    tpu.vector_store %arg15[%c0_2, %c17, %c7_3, %c0_4], %0 {strides = array<i32>} : memref<1x18x25x3xf32, #tpu.memory_space<vmem>>, vector<1x1x18x3xf32>,
    %cst_5 = arith.constant 0.000000e+00 : f32
    %3 = vector.broadcast %cst_5 : f32 to vector<1x16x1x3xf32>
    %c0_6 = arith.constant 0 : index
    %c1 = arith.constant 1 : index
    %c7_7 = arith.constant 7 : index
    %c0_8 = arith.constant 0 : index
    %4 = vector.load %arg15[%c0_6, %c1, %c7_7, %c0_8] : memref<1x18x25x3xf32, #tpu.memory_space<vmem>>, vector<1x16x1x3xf32>
    tpu.vector_store %arg15[%c0_6, %c1, %c7_7, %c0_8], %3 {strides = array<i32>} : memref<1x18x25x3xf32, #tpu.memory_space<vmem>>, vector<1x16x1x3xf32>,
    %cst_9 = arith.constant 0.000000e+00 : f32
    %5 = vector.broadcast %cst_9 : f32 to vector<1x16x1x3xf32>
    %c0_10 = arith.constant 0 : index
    %c1_11 = arith.constant 1 : index
    %c24 = arith.constant 24 : index
    %c0_12 = arith.constant 0 : index
    %6 = vector.load %arg15[%c0_10, %c1_11, %c24, %c0_12] : memref<1x18x25x3xf32, #tpu.memory_space<vmem>>, vector<1x16x1x3xf32>
    tpu.vector_store %arg15[%c0_10, %c1_11, %c24, %c0_12], %5 {strides = array<i32>} : memref<1x18x25x3xf32, #tpu.memory_space<vmem>>, vector<1x16x1x3xf32>,
    %c0_13 = arith.constant 0 : index
    %c0_14 = arith.constant 0 : index
    %c0_15 = arith.constant 0 : index
    %c0_16 = arith.constant 0 : index
    %7 = vector.load %arg1[%c0_13, %c0_14, %c0_15, %c0_16] : memref<1x16x16x3xf32, #tpu.memory_space<vmem>>, vector<1x16x16x3xf32>
    %c0_17 = arith.constant 0 : index
    %c1_18 = arith.constant 1 : index
    %c8 = arith.constant 8 : index
    %c0_19 = arith.constant 0 : index
    %8 = vector.load %arg15[%c0_17, %c1_18, %c8, %c0_19] : memref<1x18x25x3xf32, #tpu.memory_space<vmem>>, vector<1x16x16x3xf32>
    tpu.vector_store %arg15[%c0_17, %c1_18, %c8, %c0_19], %7 {strides = array<i32>} : memref<1x18x25x3xf32, #tpu.memory_space<vmem>>, vector<1x16x16x3xf32>,
    %c0_20 = arith.constant 0 : index
    %c0_21 = arith.constant 0 : index
    %c7_22 = arith.constant 7 : index
    %c0_23 = arith.constant 0 : index
    %9 = vector.load %arg15[%c0_20, %c0_21, %c7_22, %c0_23] : memref<1x18x25x3xf32, #tpu.memory_space<vmem>>, vector<1x16x16x3xf32>
    %c0_24 = arith.constant 0 : index
    %c0_25 = arith.constant 0 : index
    %c0_26 = arith.constant 0 : index
    %c0_27 = arith.constant 0 : index
    %10 = vector.load %arg21[%c0_24, %c0_25, %c0_26, %c0_27] : memref<1x16x16x27xf32, #tpu.memory_space<vmem>>, vector<1x16x16x3xf32>
    tpu.vector_store %arg21[%c0_24, %c0_25, %c0_26, %c0_27], %9 {strides = array<i32>} : memref<1x16x16x27xf32, #tpu.memory_space<vmem>>, vector<1x16x16x3xf32>,
    %c0_28 = arith.constant 0 : index
    %c0_29 = arith.constant 0 : index
    %c8_30 = arith.constant 8 : index
    %c0_31 = arith.constant 0 : index
    %11 = vector.load %arg15[%c0_28, %c0_29, %c8_30, %c0_31] : memref<1x18x25x3xf32, #tpu.memory_space<vmem>>, vector<1x16x16x3xf32>
    %c0_32 = arith.constant 0 : index
    %c0_33 = arith.constant 0 : index
    %c0_34 = arith.constant 0 : index
    %c3 = arith.constant 3 : index
    %12 = vector.load %arg21[%c0_32, %c0_33, %c0_34, %c3] : memref<1x16x16x27xf32, #tpu.memory_space<vmem>>, vector<1x16x16x3xf32>
    tpu.vector_store %arg21[%c0_32, %c0_33, %c0_34, %c3], %11 {strides = array<i32>} : memref<1x16x16x27xf32, #tpu.memory_space<vmem>>, vector<1x16x16x3xf32>,
    %c0_35 = arith.constant 0 : index
    %c0_36 = arith.constant 0 : index
    %c9 = arith.constant 9 : index
    %c0_37 = arith.constant 0 : index
    %13 = vector.load %arg15[%c0_35, %c0_36, %c9, %c0_37] : memref<1x18x25x3xf32, #tpu.memory_space<vmem>>, vector<1x16x16x3xf32>
    %c0_38 = arith.constant 0 : index
    %c0_39 = arith.constant 0 : index
    %c0_40 = arith.constant 0 : index
    %c6 = arith.constant 6 : index
    %14 = vector.load %arg21[%c0_38, %c0_39, %c0_40, %c6] : memref<1x16x16x27xf32, #tpu.memory_space<vmem>>, vector<1x16x16x3xf32>
    tpu.vector_store %arg21[%c0_38, %c0_39, %c0_40, %c6], %13 {strides = array<i32>} : memref<1x16x16x27xf32, #tpu.memory_space<vmem>>, vector<1x16x16x3xf32>,
    %c0_41 = arith.constant 0 : index
    %c1_42 = arith.constant 1 : index
    %c7_43 = arith.constant 7 : index
    %c0_44 = arith.constant 0 : index
    %15 = vector.load %arg15[%c0_41, %c1_42, %c7_43, %c0_44] : memref<1x18x25x3xf32, #tpu.memory_space<vmem>>, vector<1x16x16x3xf32>
    %c0_45 = arith.constant 0 : index
    %c0_46 = arith.constant 0 : index
    %c0_47 = arith.constant 0 : index
    %c9_48 = arith.constant 9 : index
    %16 = vector.load %arg21[%c0_45, %c0_46, %c0_47, %c9_48] : memref<1x16x16x27xf32, #tpu.memory_space<vmem>>, vector<1x16x16x3xf32>
    tpu.vector_store %arg21[%c0_45, %c0_46, %c0_47, %c9_48], %15 {strides = array<i32>} : memref<1x16x16x27xf32, #tpu.memory_space<vmem>>, vector<1x16x16x3xf32>,
    %c0_49 = arith.constant 0 : index
    %c1_50 = arith.constant 1 : index
    %c8_51 = arith.constant 8 : index
    %c0_52 = arith.constant 0 : index
    %17 = vector.load %arg15[%c0_49, %c1_50, %c8_51, %c0_52] : memref<1x18x25x3xf32, #tpu.memory_space<vmem>>, vector<1x16x16x3xf32>
    %c0_53 = arith.constant 0 : index
    %c0_54 = arith.constant 0 : index
    %c0_55 = arith.constant 0 : index
    %c12 = arith.constant 12 : index
    %18 = vector.load %arg21[%c0_53, %c0_54, %c0_55, %c12] : memref<1x16x16x27xf32, #tpu.memory_space<vmem>>, vector<1x16x16x3xf32>
    tpu.vector_store %arg21[%c0_53, %c0_54, %c0_55, %c12], %17 {strides = array<i32>} : memref<1x16x16x27xf32, #tpu.memory_space<vmem>>, vector<1x16x16x3xf32>,
    %c0_56 = arith.constant 0 : index
    %c1_57 = arith.constant 1 : index
    %c9_58 = arith.constant 9 : index
    %c0_59 = arith.constant 0 : index
    %19 = vector.load %arg15[%c0_56, %c1_57, %c9_58, %c0_59] : memref<1x18x25x3xf32, #tpu.memory_space<vmem>>, vector<1x16x16x3xf32>
    %c0_60 = arith.constant 0 : index
    %c0_61 = arith.constant 0 : index
    %c0_62 = arith.constant 0 : index
    %c15 = arith.constant 15 : index
    %20 = vector.load %arg21[%c0_60, %c0_61, %c0_62, %c15] : memref<1x16x16x27xf32, #tpu.memory_space<vmem>>, vector<1x16x16x3xf32>
    tpu.vector_store %arg21[%c0_60, %c0_61, %c0_62, %c15], %19 {strides = array<i32>} : memref<1x16x16x27xf32, #tpu.memory_space<vmem>>, vector<1x16x16x3xf32>,
    %c0_63 = arith.constant 0 : index
    %c2 = arith.constant 2 : index
    %c7_64 = arith.constant 7 : index
    %c0_65 = arith.constant 0 : index
    %21 = vector.load %arg15[%c0_63, %c2, %c7_64, %c0_65] : memref<1x18x25x3xf32, #tpu.memory_space<vmem>>, vector<1x16x16x3xf32>
    %c0_66 = arith.constant 0 : index
    %c0_67 = arith.constant 0 : index
    %c0_68 = arith.constant 0 : index
    %c18 = arith.constant 18 : index
    %22 = vector.load %arg21[%c0_66, %c0_67, %c0_68, %c18] : memref<1x16x16x27xf32, #tpu.memory_space<vmem>>, vector<1x16x16x3xf32>
    tpu.vector_store %arg21[%c0_66, %c0_67, %c0_68, %c18], %21 {strides = array<i32>} : memref<1x16x16x27xf32, #tpu.memory_space<vmem>>, vector<1x16x16x3xf32>,
    %c0_69 = arith.constant 0 : index
    %c2_70 = arith.constant 2 : index
    %c8_71 = arith.constant 8 : index
    %c0_72 = arith.constant 0 : index
    %23 = vector.load %arg15[%c0_69, %c2_70, %c8_71, %c0_72] : memref<1x18x25x3xf32, #tpu.memory_space<vmem>>, vector<1x16x16x3xf32>
    %c0_73 = arith.constant 0 : index
    %c0_74 = arith.constant 0 : index
    %c0_75 = arith.constant 0 : index
    %c21 = arith.constant 21 : index
    %24 = vector.load %arg21[%c0_73, %c0_74, %c0_75, %c21] : memref<1x16x16x27xf32, #tpu.memory_space<vmem>>, vector<1x16x16x3xf32>
    tpu.vector_store %arg21[%c0_73, %c0_74, %c0_75, %c21], %23 {strides = array<i32>} : memref<1x16x16x27xf32, #tpu.memory_space<vmem>>, vector<1x16x16x3xf32>,
    %c0_76 = arith.constant 0 : index
    %c2_77 = arith.constant 2 : index
    %c9_78 = arith.constant 9 : index
    %c0_79 = arith.constant 0 : index
    %25 = vector.load %arg15[%c0_76, %c2_77, %c9_78, %c0_79] : memref<1x18x25x3xf32, #tpu.memory_space<vmem>>, vector<1x16x16x3xf32>
    %c0_80 = arith.constant 0 : index
    %c0_81 = arith.constant 0 : index
    %c0_82 = arith.constant 0 : index
    %c24_83 = arith.constant 24 : index
    %26 = vector.load %arg21[%c0_80, %c0_81, %c0_82, %c24_83] : memref<1x16x16x27xf32, #tpu.memory_space<vmem>>, vector<1x16x16x3xf32>
    tpu.vector_store %arg21[%c0_80, %c0_81, %c0_82, %c24_83], %25 {strides = array<i32>} : memref<1x16x16x27xf32, #tpu.memory_space<vmem>>, vector<1x16x16x3xf32>,
    %c0_84 = arith.constant 0 : index
    %c0_85 = arith.constant 0 : index
    %c0_86 = arith.constant 0 : index
    %c0_87 = arith.constant 0 : index
    %27 = vector.load %arg21[%c0_84, %c0_85, %c0_86, %c0_87] : memref<1x16x16x27xf32, #tpu.memory_space<vmem>>, vector<1x16x16x27xf32>
    %28 = vector.shape_cast %27 : vector<1x16x16x27xf32> to vector<256x27xf32>
    %c0_88 = arith.constant 0 : index
    %c0_89 = arith.constant 0 : index
    %29 = vector.load %arg2[%c0_88, %c0_89] : memref<27x8xf32, #tpu.memory_space<vmem>>, vector<27x8xf32>
    %cst_90 = arith.constant dense<0.000000e+00> : vector<256x8xf32>
    %30 = tpu.matmul %28, %29, %cst_90 {dimension_numbers = #tpu.dot_dimension_numbers<[1], [0], [0], [1], [0, 0, 1, 1], [], []>} : vector<256x27xf32>, vector<27x8xf32>, vector<256x8xf32> -> vector<256x8xf32>
    %c0_91 = arith.constant 0 : index
    %c0_92 = arith.constant 0 : index
    %31 = vector.load %arg3[%c0_91, %c0_92] : memref<1x8xf32, #tpu.memory_space<vmem>>, vector<1x8xf32>
    %32 = vector.broadcast %31 : vector<1x8xf32> to vector<256x8xf32>
    %33 = arith.addf %30, %32 : vector<256x8xf32>
    %cst_93 = arith.constant 0.000000e+00 : f32
    %34 = vector.broadcast %cst_93 : f32 to vector<256x8xf32>
    %35 = arith.maximumf %33, %34 : vector<256x8xf32>
    %36 = vector.shape_cast %35 : vector<256x8xf32> to vector<1x16x16x8xf32>
    %cst_94 = arith.constant 0.000000e+00 : f32
    %37 = vector.broadcast %cst_94 : f32 to vector<1x1x18x8xf32>
    %c0_95 = arith.constant 0 : index
    %c0_96 = arith.constant 0 : index
    %c7_97 = arith.constant 7 : index
    %c0_98 = arith.constant 0 : index
    %38 = vector.load %arg16[%c0_95, %c0_96, %c7_97, %c0_98] : memref<1x18x25x8xf32, #tpu.memory_space<vmem>>, vector<1x1x18x8xf32>
    tpu.vector_store %arg16[%c0_95, %c0_96, %c7_97, %c0_98], %37 {strides = array<i32>} : memref<1x18x25x8xf32, #tpu.memory_space<vmem>>, vector<1x1x18x8xf32>,
    %c0_99 = arith.constant 0 : index
    %c17_100 = arith.constant 17 : index
    %c7_101 = arith.constant 7 : index
    %c0_102 = arith.constant 0 : index
    %39 = vector.load %arg16[%c0_99, %c17_100, %c7_101, %c0_102] : memref<1x18x25x8xf32, #tpu.memory_space<vmem>>, vector<1x1x18x8xf32>
    tpu.vector_store %arg16[%c0_99, %c17_100, %c7_101, %c0_102], %37 {strides = array<i32>} : memref<1x18x25x8xf32, #tpu.memory_space<vmem>>, vector<1x1x18x8xf32>,
    %cst_103 = arith.constant 0.000000e+00 : f32
    %40 = vector.broadcast %cst_103 : f32 to vector<1x16x1x8xf32>
    %c0_104 = arith.constant 0 : index
    %c1_105 = arith.constant 1 : index
    %c7_106 = arith.constant 7 : index
    %c0_107 = arith.constant 0 : index
    %41 = vector.load %arg16[%c0_104, %c1_105, %c7_106, %c0_107] : memref<1x18x25x8xf32, #tpu.memory_space<vmem>>, vector<1x16x1x8xf32>
    tpu.vector_store %arg16[%c0_104, %c1_105, %c7_106, %c0_107], %40 {strides = array<i32>} : memref<1x18x25x8xf32, #tpu.memory_space<vmem>>, vector<1x16x1x8xf32>,
    %cst_108 = arith.constant 0.000000e+00 : f32
    %42 = vector.broadcast %cst_108 : f32 to vector<1x16x1x8xf32>
    %c0_109 = arith.constant 0 : index
    %c1_110 = arith.constant 1 : index
    %c24_111 = arith.constant 24 : index
    %c0_112 = arith.constant 0 : index
    %43 = vector.load %arg16[%c0_109, %c1_110, %c24_111, %c0_112] : memref<1x18x25x8xf32, #tpu.memory_space<vmem>>, vector<1x16x1x8xf32>
    tpu.vector_store %arg16[%c0_109, %c1_110, %c24_111, %c0_112], %42 {strides = array<i32>} : memref<1x18x25x8xf32, #tpu.memory_space<vmem>>, vector<1x16x1x8xf32>,
    %c0_113 = arith.constant 0 : index
    %c1_114 = arith.constant 1 : index
    %c8_115 = arith.constant 8 : index
    %c0_116 = arith.constant 0 : index
    %44 = vector.load %arg16[%c0_113, %c1_114, %c8_115, %c0_116] : memref<1x18x25x8xf32, #tpu.memory_space<vmem>>, vector<1x16x16x8xf32>
    tpu.vector_store %arg16[%c0_113, %c1_114, %c8_115, %c0_116], %36 {strides = array<i32>} : memref<1x18x25x8xf32, #tpu.memory_space<vmem>>, vector<1x16x16x8xf32>,
    %c0_117 = arith.constant 0 : index
    %c0_118 = arith.constant 0 : index
    %c7_119 = arith.constant 7 : index
    %c0_120 = arith.constant 0 : index
    %45 = vector.load %arg16[%c0_117, %c0_118, %c7_119, %c0_120] : memref<1x18x25x8xf32, #tpu.memory_space<vmem>>, vector<1x16x16x8xf32>
    %c0_121 = arith.constant 0 : index
    %c0_122 = arith.constant 0 : index
    %c0_123 = arith.constant 0 : index
    %c0_124 = arith.constant 0 : index
    %46 = vector.load %arg22[%c0_121, %c0_122, %c0_123, %c0_124] : memref<1x16x16x72xf32, #tpu.memory_space<vmem>>, vector<1x16x16x8xf32>
    tpu.vector_store %arg22[%c0_121, %c0_122, %c0_123, %c0_124], %45 {strides = array<i32>} : memref<1x16x16x72xf32, #tpu.memory_space<vmem>>, vector<1x16x16x8xf32>,
    %c0_125 = arith.constant 0 : index
    %c0_126 = arith.constant 0 : index
    %c8_127 = arith.constant 8 : index
    %c0_128 = arith.constant 0 : index
    %47 = vector.load %arg16[%c0_125, %c0_126, %c8_127, %c0_128] : memref<1x18x25x8xf32, #tpu.memory_space<vmem>>, vector<1x16x16x8xf32>
    %c0_129 = arith.constant 0 : index
    %c0_130 = arith.constant 0 : index
    %c0_131 = arith.constant 0 : index
    %c8_132 = arith.constant 8 : index
    %48 = vector.load %arg22[%c0_129, %c0_130, %c0_131, %c8_132] : memref<1x16x16x72xf32, #tpu.memory_space<vmem>>, vector<1x16x16x8xf32>
    tpu.vector_store %arg22[%c0_129, %c0_130, %c0_131, %c8_132], %47 {strides = array<i32>} : memref<1x16x16x72xf32, #tpu.memory_space<vmem>>, vector<1x16x16x8xf32>,
    %c0_133 = arith.constant 0 : index
    %c0_134 = arith.constant 0 : index
    %c9_135 = arith.constant 9 : index
    %c0_136 = arith.constant 0 : index
    %49 = vector.load %arg16[%c0_133, %c0_134, %c9_135, %c0_136] : memref<1x18x25x8xf32, #tpu.memory_space<vmem>>, vector<1x16x16x8xf32>
    %c0_137 = arith.constant 0 : index
    %c0_138 = arith.constant 0 : index
    %c0_139 = arith.constant 0 : index
    %c16 = arith.constant 16 : index
    %50 = vector.load %arg22[%c0_137, %c0_138, %c0_139, %c16] : memref<1x16x16x72xf32, #tpu.memory_space<vmem>>, vector<1x16x16x8xf32>
    tpu.vector_store %arg22[%c0_137, %c0_138, %c0_139, %c16], %49 {strides = array<i32>} : memref<1x16x16x72xf32, #tpu.memory_space<vmem>>, vector<1x16x16x8xf32>,
    %c0_140 = arith.constant 0 : index
    %c1_141 = arith.constant 1 : index
    %c7_142 = arith.constant 7 : index
    %c0_143 = arith.constant 0 : index
    %51 = vector.load %arg16[%c0_140, %c1_141, %c7_142, %c0_143] : memref<1x18x25x8xf32, #tpu.memory_space<vmem>>, vector<1x16x16x8xf32>
    %c0_144 = arith.constant 0 : index
    %c0_145 = arith.constant 0 : index
    %c0_146 = arith.constant 0 : index
    %c24_147 = arith.constant 24 : index
    %52 = vector.load %arg22[%c0_144, %c0_145, %c0_146, %c24_147] : memref<1x16x16x72xf32, #tpu.memory_space<vmem>>, vector<1x16x16x8xf32>
    tpu.vector_store %arg22[%c0_144, %c0_145, %c0_146, %c24_147], %51 {strides = array<i32>} : memref<1x16x16x72xf32, #tpu.memory_space<vmem>>, vector<1x16x16x8xf32>,
    %c0_148 = arith.constant 0 : index
    %c1_149 = arith.constant 1 : index
    %c8_150 = arith.constant 8 : index
    %c0_151 = arith.constant 0 : index
    %53 = vector.load %arg16[%c0_148, %c1_149, %c8_150, %c0_151] : memref<1x18x25x8xf32, #tpu.memory_space<vmem>>, vector<1x16x16x8xf32>
    %c0_152 = arith.constant 0 : index
    %c0_153 = arith.constant 0 : index
    %c0_154 = arith.constant 0 : index
    %c32 = arith.constant 32 : index
    %54 = vector.load %arg22[%c0_152, %c0_153, %c0_154, %c32] : memref<1x16x16x72xf32, #tpu.memory_space<vmem>>, vector<1x16x16x8xf32>
    tpu.vector_store %arg22[%c0_152, %c0_153, %c0_154, %c32], %53 {strides = array<i32>} : memref<1x16x16x72xf32, #tpu.memory_space<vmem>>, vector<1x16x16x8xf32>,
    %c0_155 = arith.constant 0 : index
    %c1_156 = arith.constant 1 : index
    %c9_157 = arith.constant 9 : index
    %c0_158 = arith.constant 0 : index
    %55 = vector.load %arg16[%c0_155, %c1_156, %c9_157, %c0_158] : memref<1x18x25x8xf32, #tpu.memory_space<vmem>>, vector<1x16x16x8xf32>
    %c0_159 = arith.constant 0 : index
    %c0_160 = arith.constant 0 : index
    %c0_161 = arith.constant 0 : index
    %c40 = arith.constant 40 : index
    %56 = vector.load %arg22[%c0_159, %c0_160, %c0_161, %c40] : memref<1x16x16x72xf32, #tpu.memory_space<vmem>>, vector<1x16x16x8xf32>
    tpu.vector_store %arg22[%c0_159, %c0_160, %c0_161, %c40], %55 {strides = array<i32>} : memref<1x16x16x72xf32, #tpu.memory_space<vmem>>, vector<1x16x16x8xf32>,
    %c0_162 = arith.constant 0 : index
    %c2_163 = arith.constant 2 : index
    %c7_164 = arith.constant 7 : index
    %c0_165 = arith.constant 0 : index
    %57 = vector.load %arg16[%c0_162, %c2_163, %c7_164, %c0_165] : memref<1x18x25x8xf32, #tpu.memory_space<vmem>>, vector<1x16x16x8xf32>
    %c0_166 = arith.constant 0 : index
    %c0_167 = arith.constant 0 : index
    %c0_168 = arith.constant 0 : index
    %c48 = arith.constant 48 : index
    %58 = vector.load %arg22[%c0_166, %c0_167, %c0_168, %c48] : memref<1x16x16x72xf32, #tpu.memory_space<vmem>>, vector<1x16x16x8xf32>
    tpu.vector_store %arg22[%c0_166, %c0_167, %c0_168, %c48], %57 {strides = array<i32>} : memref<1x16x16x72xf32, #tpu.memory_space<vmem>>, vector<1x16x16x8xf32>,
    %c0_169 = arith.constant 0 : index
    %c2_170 = arith.constant 2 : index
    %c8_171 = arith.constant 8 : index
    %c0_172 = arith.constant 0 : index
    %59 = vector.load %arg16[%c0_169, %c2_170, %c8_171, %c0_172] : memref<1x18x25x8xf32, #tpu.memory_space<vmem>>, vector<1x16x16x8xf32>
    %c0_173 = arith.constant 0 : index
    %c0_174 = arith.constant 0 : index
    %c0_175 = arith.constant 0 : index
    %c56 = arith.constant 56 : index
    %60 = vector.load %arg22[%c0_173, %c0_174, %c0_175, %c56] : memref<1x16x16x72xf32, #tpu.memory_space<vmem>>, vector<1x16x16x8xf32>
    tpu.vector_store %arg22[%c0_173, %c0_174, %c0_175, %c56], %59 {strides = array<i32>} : memref<1x16x16x72xf32, #tpu.memory_space<vmem>>, vector<1x16x16x8xf32>,
    %c0_176 = arith.constant 0 : index
    %c2_177 = arith.constant 2 : index
    %c9_178 = arith.constant 9 : index
    %c0_179 = arith.constant 0 : index
    %61 = vector.load %arg16[%c0_176, %c2_177, %c9_178, %c0_179] : memref<1x18x25x8xf32, #tpu.memory_space<vmem>>, vector<1x16x16x8xf32>
    %c0_180 = arith.constant 0 : index
    %c0_181 = arith.constant 0 : index
    %c0_182 = arith.constant 0 : index
    %c64 = arith.constant 64 : index
    %62 = vector.load %arg22[%c0_180, %c0_181, %c0_182, %c64] : memref<1x16x16x72xf32, #tpu.memory_space<vmem>>, vector<1x16x16x8xf32>
    tpu.vector_store %arg22[%c0_180, %c0_181, %c0_182, %c64], %61 {strides = array<i32>} : memref<1x16x16x72xf32, #tpu.memory_space<vmem>>, vector<1x16x16x8xf32>,
    %c0_183 = arith.constant 0 : index
    %c0_184 = arith.constant 0 : index
    %c0_185 = arith.constant 0 : index
    %c0_186 = arith.constant 0 : index
    %63 = vector.load %arg22[%c0_183, %c0_184, %c0_185, %c0_186] : memref<1x16x16x72xf32, #tpu.memory_space<vmem>>, vector<1x16x16x72xf32>
    %64 = vector.shape_cast %63 : vector<1x16x16x72xf32> to vector<256x72xf32>
    %c0_187 = arith.constant 0 : index
    %c0_188 = arith.constant 0 : index
    %65 = vector.load %arg4[%c0_187, %c0_188] : memref<72x16xf32, #tpu.memory_space<vmem>>, vector<72x16xf32>
    %cst_189 = arith.constant dense<0.000000e+00> : vector<256x16xf32>
    %66 = tpu.matmul %64, %65, %cst_189 {dimension_numbers = #tpu.dot_dimension_numbers<[1], [0], [0], [1], [0, 0, 1, 1], [], []>} : vector<256x72xf32>, vector<72x16xf32>, vector<256x16xf32> -> vector<256x16xf32>
    %c0_190 = arith.constant 0 : index
    %c0_191 = arith.constant 0 : index
    %67 = vector.load %arg5[%c0_190, %c0_191] : memref<1x16xf32, #tpu.memory_space<vmem>>, vector<1x16xf32>
    %68 = vector.broadcast %67 : vector<1x16xf32> to vector<256x16xf32>
    %69 = arith.addf %66, %68 : vector<256x16xf32>
    %cst_192 = arith.constant 0.000000e+00 : f32
    %70 = vector.broadcast %cst_192 : f32 to vector<256x16xf32>
    %71 = arith.maximumf %69, %70 : vector<256x16xf32>
    %72 = vector.shape_cast %71 : vector<256x16xf32> to vector<1x16x16x16xf32>
    %c0_193 = arith.constant 0 : index
    %c0_194 = arith.constant 0 : index
    %c0_195 = arith.constant 0 : index
    %c0_196 = arith.constant 0 : index
    %73 = vector.load %arg27[%c0_193, %c0_194, %c0_195, %c0_196] : memref<1x16x16x16xf32, #tpu.memory_space<vmem>>, vector<1x16x16x16xf32>
    tpu.vector_store %arg27[%c0_193, %c0_194, %c0_195, %c0_196], %72 {strides = array<i32>} : memref<1x16x16x16xf32, #tpu.memory_space<vmem>>, vector<1x16x16x16xf32>,
    %c0_197 = arith.constant 0 : index
    %c0_198 = arith.constant 0 : index
    %c0_199 = arith.constant 0 : index
    %c0_200 = arith.constant 0 : index
    %74 = tpu.strided_load %arg27[%c0_197, %c0_198, %c0_199, %c0_200] {strides = array<i32: 1, 1, 2, 1>} : memref<1x16x16x16xf32, #tpu.memory_space<vmem>>, vector<1x16x8x16xf32>
    %c0_201 = arith.constant 0 : index
    %c0_202 = arith.constant 0 : index
    %c1_203 = arith.constant 1 : index
    %c0_204 = arith.constant 0 : index
    %75 = tpu.strided_load %arg27[%c0_201, %c0_202, %c1_203, %c0_204] {strides = array<i32: 1, 1, 2, 1>} : memref<1x16x16x16xf32, #tpu.memory_space<vmem>>, vector<1x16x8x16xf32>
    %76 = arith.maximumf %74, %75 : vector<1x16x8x16xf32>
    %77 = vector.shape_cast %76 : vector<1x16x8x16xf32> to vector<1x8x2x8x16xf32>
    %78 = vector.extract_strided_slice %77 {offsets = [0, 0, 0, 0, 0], sizes = [1, 8, 1, 8, 16], strides = [1, 1, 1, 1, 1]} : vector<1x8x2x8x16xf32> to vector<1x8x1x8x16xf32>
    %79 = vector.shape_cast %78 : vector<1x8x1x8x16xf32> to vector<1x8x8x16xf32>
    %80 = vector.extract_strided_slice %77 {offsets = [0, 0, 1, 0, 0], sizes = [1, 8, 1, 8, 16], strides = [1, 1, 1, 1, 1]} : vector<1x8x2x8x16xf32> to vector<1x8x1x8x16xf32>
    %81 = vector.shape_cast %80 : vector<1x8x1x8x16xf32> to vector<1x8x8x16xf32>
    %82 = arith.maximumf %79, %81 : vector<1x8x8x16xf32>
    %cst_205 = arith.constant 0.000000e+00 : f32
    %83 = vector.broadcast %cst_205 : f32 to vector<1x1x10x16xf32>
    %c0_206 = arith.constant 0 : index
    %c0_207 = arith.constant 0 : index
    %c7_208 = arith.constant 7 : index
    %c0_209 = arith.constant 0 : index
    %84 = vector.load %arg17[%c0_206, %c0_207, %c7_208, %c0_209] : memref<1x10x17x16xf32, #tpu.memory_space<vmem>>, vector<1x1x10x16xf32>
    tpu.vector_store %arg17[%c0_206, %c0_207, %c7_208, %c0_209], %83 {strides = array<i32>} : memref<1x10x17x16xf32, #tpu.memory_space<vmem>>, vector<1x1x10x16xf32>,
    %c0_210 = arith.constant 0 : index
    %c9_211 = arith.constant 9 : index
    %c7_212 = arith.constant 7 : index
    %c0_213 = arith.constant 0 : index
    %85 = vector.load %arg17[%c0_210, %c9_211, %c7_212, %c0_213] : memref<1x10x17x16xf32, #tpu.memory_space<vmem>>, vector<1x1x10x16xf32>
    tpu.vector_store %arg17[%c0_210, %c9_211, %c7_212, %c0_213], %83 {strides = array<i32>} : memref<1x10x17x16xf32, #tpu.memory_space<vmem>>, vector<1x1x10x16xf32>,
    %cst_214 = arith.constant 0.000000e+00 : f32
    %86 = vector.broadcast %cst_214 : f32 to vector<1x8x1x16xf32>
    %c0_215 = arith.constant 0 : index
    %c1_216 = arith.constant 1 : index
    %c7_217 = arith.constant 7 : index
    %c0_218 = arith.constant 0 : index
    %87 = vector.load %arg17[%c0_215, %c1_216, %c7_217, %c0_218] : memref<1x10x17x16xf32, #tpu.memory_space<vmem>>, vector<1x8x1x16xf32>
    tpu.vector_store %arg17[%c0_215, %c1_216, %c7_217, %c0_218], %86 {strides = array<i32>} : memref<1x10x17x16xf32, #tpu.memory_space<vmem>>, vector<1x8x1x16xf32>,
    %cst_219 = arith.constant 0.000000e+00 : f32
    %88 = vector.broadcast %cst_219 : f32 to vector<1x8x1x16xf32>
    %c0_220 = arith.constant 0 : index
    %c1_221 = arith.constant 1 : index
    %c16_222 = arith.constant 16 : index
    %c0_223 = arith.constant 0 : index
    %89 = vector.load %arg17[%c0_220, %c1_221, %c16_222, %c0_223] : memref<1x10x17x16xf32, #tpu.memory_space<vmem>>, vector<1x8x1x16xf32>
    tpu.vector_store %arg17[%c0_220, %c1_221, %c16_222, %c0_223], %88 {strides = array<i32>} : memref<1x10x17x16xf32, #tpu.memory_space<vmem>>, vector<1x8x1x16xf32>,
    %c0_224 = arith.constant 0 : index
    %c1_225 = arith.constant 1 : index
    %c8_226 = arith.constant 8 : index
    %c0_227 = arith.constant 0 : index
    %90 = vector.load %arg17[%c0_224, %c1_225, %c8_226, %c0_227] : memref<1x10x17x16xf32, #tpu.memory_space<vmem>>, vector<1x8x8x16xf32>
    tpu.vector_store %arg17[%c0_224, %c1_225, %c8_226, %c0_227], %82 {strides = array<i32>} : memref<1x10x17x16xf32, #tpu.memory_space<vmem>>, vector<1x8x8x16xf32>,
    %c0_228 = arith.constant 0 : index
    %c0_229 = arith.constant 0 : index
    %c7_230 = arith.constant 7 : index
    %c0_231 = arith.constant 0 : index
    %91 = vector.load %arg17[%c0_228, %c0_229, %c7_230, %c0_231] : memref<1x10x17x16xf32, #tpu.memory_space<vmem>>, vector<1x8x8x16xf32>
    %c0_232 = arith.constant 0 : index
    %c0_233 = arith.constant 0 : index
    %c0_234 = arith.constant 0 : index
    %c0_235 = arith.constant 0 : index
    %92 = vector.load %arg23[%c0_232, %c0_233, %c0_234, %c0_235] : memref<1x8x8x144xf32, #tpu.memory_space<vmem>>, vector<1x8x8x16xf32>
    tpu.vector_store %arg23[%c0_232, %c0_233, %c0_234, %c0_235], %91 {strides = array<i32>} : memref<1x8x8x144xf32, #tpu.memory_space<vmem>>, vector<1x8x8x16xf32>,
    %c0_236 = arith.constant 0 : index
    %c0_237 = arith.constant 0 : index
    %c8_238 = arith.constant 8 : index
    %c0_239 = arith.constant 0 : index
    %93 = vector.load %arg17[%c0_236, %c0_237, %c8_238, %c0_239] : memref<1x10x17x16xf32, #tpu.memory_space<vmem>>, vector<1x8x8x16xf32>
    %c0_240 = arith.constant 0 : index
    %c0_241 = arith.constant 0 : index
    %c0_242 = arith.constant 0 : index
    %c16_243 = arith.constant 16 : index
    %94 = vector.load %arg23[%c0_240, %c0_241, %c0_242, %c16_243] : memref<1x8x8x144xf32, #tpu.memory_space<vmem>>, vector<1x8x8x16xf32>
    tpu.vector_store %arg23[%c0_240, %c0_241, %c0_242, %c16_243], %93 {strides = array<i32>} : memref<1x8x8x144xf32, #tpu.memory_space<vmem>>, vector<1x8x8x16xf32>,
    %c0_244 = arith.constant 0 : index
    %c0_245 = arith.constant 0 : index
    %c9_246 = arith.constant 9 : index
    %c0_247 = arith.constant 0 : index
    %95 = vector.load %arg17[%c0_244, %c0_245, %c9_246, %c0_247] : memref<1x10x17x16xf32, #tpu.memory_space<vmem>>, vector<1x8x8x16xf32>
    %c0_248 = arith.constant 0 : index
    %c0_249 = arith.constant 0 : index
    %c0_250 = arith.constant 0 : index
    %c32_251 = arith.constant 32 : index
    %96 = vector.load %arg23[%c0_248, %c0_249, %c0_250, %c32_251] : memref<1x8x8x144xf32, #tpu.memory_space<vmem>>, vector<1x8x8x16xf32>
    tpu.vector_store %arg23[%c0_248, %c0_249, %c0_250, %c32_251], %95 {strides = array<i32>} : memref<1x8x8x144xf32, #tpu.memory_space<vmem>>, vector<1x8x8x16xf32>,
    %c0_252 = arith.constant 0 : index
    %c1_253 = arith.constant 1 : index
    %c7_254 = arith.constant 7 : index
    %c0_255 = arith.constant 0 : index
    %97 = vector.load %arg17[%c0_252, %c1_253, %c7_254, %c0_255] : memref<1x10x17x16xf32, #tpu.memory_space<vmem>>, vector<1x8x8x16xf32>
    %c0_256 = arith.constant 0 : index
    %c0_257 = arith.constant 0 : index
    %c0_258 = arith.constant 0 : index
    %c48_259 = arith.constant 48 : index
    %98 = vector.load %arg23[%c0_256, %c0_257, %c0_258, %c48_259] : memref<1x8x8x144xf32, #tpu.memory_space<vmem>>, vector<1x8x8x16xf32>
    tpu.vector_store %arg23[%c0_256, %c0_257, %c0_258, %c48_259], %97 {strides = array<i32>} : memref<1x8x8x144xf32, #tpu.memory_space<vmem>>, vector<1x8x8x16xf32>,
    %c0_260 = arith.constant 0 : index
    %c1_261 = arith.constant 1 : index
    %c8_262 = arith.constant 8 : index
    %c0_263 = arith.constant 0 : index
    %99 = vector.load %arg17[%c0_260, %c1_261, %c8_262, %c0_263] : memref<1x10x17x16xf32, #tpu.memory_space<vmem>>, vector<1x8x8x16xf32>
    %c0_264 = arith.constant 0 : index
    %c0_265 = arith.constant 0 : index
    %c0_266 = arith.constant 0 : index
    %c64_267 = arith.constant 64 : index
    %100 = vector.load %arg23[%c0_264, %c0_265, %c0_266, %c64_267] : memref<1x8x8x144xf32, #tpu.memory_space<vmem>>, vector<1x8x8x16xf32>
    tpu.vector_store %arg23[%c0_264, %c0_265, %c0_266, %c64_267], %99 {strides = array<i32>} : memref<1x8x8x144xf32, #tpu.memory_space<vmem>>, vector<1x8x8x16xf32>,
    %c0_268 = arith.constant 0 : index
    %c1_269 = arith.constant 1 : index
    %c9_270 = arith.constant 9 : index
    %c0_271 = arith.constant 0 : index
    %101 = vector.load %arg17[%c0_268, %c1_269, %c9_270, %c0_271] : memref<1x10x17x16xf32, #tpu.memory_space<vmem>>, vector<1x8x8x16xf32>
    %c0_272 = arith.constant 0 : index
    %c0_273 = arith.constant 0 : index
    %c0_274 = arith.constant 0 : index
    %c80 = arith.constant 80 : index
    %102 = vector.load %arg23[%c0_272, %c0_273, %c0_274, %c80] : memref<1x8x8x144xf32, #tpu.memory_space<vmem>>, vector<1x8x8x16xf32>
    tpu.vector_store %arg23[%c0_272, %c0_273, %c0_274, %c80], %101 {strides = array<i32>} : memref<1x8x8x144xf32, #tpu.memory_space<vmem>>, vector<1x8x8x16xf32>,
    %c0_275 = arith.constant 0 : index
    %c2_276 = arith.constant 2 : index
    %c7_277 = arith.constant 7 : index
    %c0_278 = arith.constant 0 : index
    %103 = vector.load %arg17[%c0_275, %c2_276, %c7_277, %c0_278] : memref<1x10x17x16xf32, #tpu.memory_space<vmem>>, vector<1x8x8x16xf32>
    %c0_279 = arith.constant 0 : index
    %c0_280 = arith.constant 0 : index
    %c0_281 = arith.constant 0 : index
    %c96 = arith.constant 96 : index
    %104 = vector.load %arg23[%c0_279, %c0_280, %c0_281, %c96] : memref<1x8x8x144xf32, #tpu.memory_space<vmem>>, vector<1x8x8x16xf32>
    tpu.vector_store %arg23[%c0_279, %c0_280, %c0_281, %c96], %103 {strides = array<i32>} : memref<1x8x8x144xf32, #tpu.memory_space<vmem>>, vector<1x8x8x16xf32>,
    %c0_282 = arith.constant 0 : index
    %c2_283 = arith.constant 2 : index
    %c8_284 = arith.constant 8 : index
    %c0_285 = arith.constant 0 : index
    %105 = vector.load %arg17[%c0_282, %c2_283, %c8_284, %c0_285] : memref<1x10x17x16xf32, #tpu.memory_space<vmem>>, vector<1x8x8x16xf32>
    %c0_286 = arith.constant 0 : index
    %c0_287 = arith.constant 0 : index
    %c0_288 = arith.constant 0 : index
    %c112 = arith.constant 112 : index
    %106 = vector.load %arg23[%c0_286, %c0_287, %c0_288, %c112] : memref<1x8x8x144xf32, #tpu.memory_space<vmem>>, vector<1x8x8x16xf32>
    tpu.vector_store %arg23[%c0_286, %c0_287, %c0_288, %c112], %105 {strides = array<i32>} : memref<1x8x8x144xf32, #tpu.memory_space<vmem>>, vector<1x8x8x16xf32>,
    %c0_289 = arith.constant 0 : index
    %c2_290 = arith.constant 2 : index
    %c9_291 = arith.constant 9 : index
    %c0_292 = arith.constant 0 : index
    %107 = vector.load %arg17[%c0_289, %c2_290, %c9_291, %c0_292] : memref<1x10x17x16xf32, #tpu.memory_space<vmem>>, vector<1x8x8x16xf32>
    %c0_293 = arith.constant 0 : index
    %c0_294 = arith.constant 0 : index
    %c0_295 = arith.constant 0 : index
    %c128 = arith.constant 128 : index
    %108 = vector.load %arg23[%c0_293, %c0_294, %c0_295, %c128] : memref<1x8x8x144xf32, #tpu.memory_space<vmem>>, vector<1x8x8x16xf32>
    tpu.vector_store %arg23[%c0_293, %c0_294, %c0_295, %c128], %107 {strides = array<i32>} : memref<1x8x8x144xf32, #tpu.memory_space<vmem>>, vector<1x8x8x16xf32>,
    %c0_296 = arith.constant 0 : index
    %c0_297 = arith.constant 0 : index
    %c0_298 = arith.constant 0 : index
    %c0_299 = arith.constant 0 : index
    %109 = vector.load %arg23[%c0_296, %c0_297, %c0_298, %c0_299] : memref<1x8x8x144xf32, #tpu.memory_space<vmem>>, vector<1x8x8x144xf32>
    %110 = vector.shape_cast %109 : vector<1x8x8x144xf32> to vector<64x144xf32>
    %c0_300 = arith.constant 0 : index
    %c0_301 = arith.constant 0 : index
    %111 = vector.load %arg6[%c0_300, %c0_301] : memref<144x16xf32, #tpu.memory_space<vmem>>, vector<144x16xf32>
    %cst_302 = arith.constant dense<0.000000e+00> : vector<64x16xf32>
    %112 = tpu.matmul %110, %111, %cst_302 {dimension_numbers = #tpu.dot_dimension_numbers<[1], [0], [0], [1], [0, 0, 1, 1], [], []>} : vector<64x144xf32>, vector<144x16xf32>, vector<64x16xf32> -> vector<64x16xf32>
    %c0_303 = arith.constant 0 : index
    %c0_304 = arith.constant 0 : index
    %113 = vector.load %arg7[%c0_303, %c0_304] : memref<1x16xf32, #tpu.memory_space<vmem>>, vector<1x16xf32>
    %114 = vector.broadcast %113 : vector<1x16xf32> to vector<64x16xf32>
    %115 = arith.addf %112, %114 : vector<64x16xf32>
    %cst_305 = arith.constant 0.000000e+00 : f32
    %116 = vector.broadcast %cst_305 : f32 to vector<64x16xf32>
    %117 = arith.maximumf %115, %116 : vector<64x16xf32>
    %118 = vector.shape_cast %117 : vector<64x16xf32> to vector<1x8x8x16xf32>
    %cst_306 = arith.constant 0.000000e+00 : f32
    %119 = vector.broadcast %cst_306 : f32 to vector<1x1x10x16xf32>
    %c0_307 = arith.constant 0 : index
    %c0_308 = arith.constant 0 : index
    %c7_309 = arith.constant 7 : index
    %c0_310 = arith.constant 0 : index
    %120 = vector.load %arg18[%c0_307, %c0_308, %c7_309, %c0_310] : memref<1x10x17x16xf32, #tpu.memory_space<vmem>>, vector<1x1x10x16xf32>
    tpu.vector_store %arg18[%c0_307, %c0_308, %c7_309, %c0_310], %119 {strides = array<i32>} : memref<1x10x17x16xf32, #tpu.memory_space<vmem>>, vector<1x1x10x16xf32>,
    %c0_311 = arith.constant 0 : index
    %c9_312 = arith.constant 9 : index
    %c7_313 = arith.constant 7 : index
    %c0_314 = arith.constant 0 : index
    %121 = vector.load %arg18[%c0_311, %c9_312, %c7_313, %c0_314] : memref<1x10x17x16xf32, #tpu.memory_space<vmem>>, vector<1x1x10x16xf32>
    tpu.vector_store %arg18[%c0_311, %c9_312, %c7_313, %c0_314], %119 {strides = array<i32>} : memref<1x10x17x16xf32, #tpu.memory_space<vmem>>, vector<1x1x10x16xf32>,
    %cst_315 = arith.constant 0.000000e+00 : f32
    %122 = vector.broadcast %cst_315 : f32 to vector<1x8x1x16xf32>
    %c0_316 = arith.constant 0 : index
    %c1_317 = arith.constant 1 : index
    %c7_318 = arith.constant 7 : index
    %c0_319 = arith.constant 0 : index
    %123 = vector.load %arg18[%c0_316, %c1_317, %c7_318, %c0_319] : memref<1x10x17x16xf32, #tpu.memory_space<vmem>>, vector<1x8x1x16xf32>
    tpu.vector_store %arg18[%c0_316, %c1_317, %c7_318, %c0_319], %122 {strides = array<i32>} : memref<1x10x17x16xf32, #tpu.memory_space<vmem>>, vector<1x8x1x16xf32>,
    %cst_320 = arith.constant 0.000000e+00 : f32
    %124 = vector.broadcast %cst_320 : f32 to vector<1x8x1x16xf32>
    %c0_321 = arith.constant 0 : index
    %c1_322 = arith.constant 1 : index
    %c16_323 = arith.constant 16 : index
    %c0_324 = arith.constant 0 : index
    %125 = vector.load %arg18[%c0_321, %c1_322, %c16_323, %c0_324] : memref<1x10x17x16xf32, #tpu.memory_space<vmem>>, vector<1x8x1x16xf32>
    tpu.vector_store %arg18[%c0_321, %c1_322, %c16_323, %c0_324], %124 {strides = array<i32>} : memref<1x10x17x16xf32, #tpu.memory_space<vmem>>, vector<1x8x1x16xf32>,
    %c0_325 = arith.constant 0 : index
    %c1_326 = arith.constant 1 : index
    %c8_327 = arith.constant 8 : index
    %c0_328 = arith.constant 0 : index
    %126 = vector.load %arg18[%c0_325, %c1_326, %c8_327, %c0_328] : memref<1x10x17x16xf32, #tpu.memory_space<vmem>>, vector<1x8x8x16xf32>
    tpu.vector_store %arg18[%c0_325, %c1_326, %c8_327, %c0_328], %118 {strides = array<i32>} : memref<1x10x17x16xf32, #tpu.memory_space<vmem>>, vector<1x8x8x16xf32>,
    %c0_329 = arith.constant 0 : index
    %c0_330 = arith.constant 0 : index
    %c7_331 = arith.constant 7 : index
    %c0_332 = arith.constant 0 : index
    %127 = vector.load %arg18[%c0_329, %c0_330, %c7_331, %c0_332] : memref<1x10x17x16xf32, #tpu.memory_space<vmem>>, vector<1x8x8x16xf32>
    %c0_333 = arith.constant 0 : index
    %c0_334 = arith.constant 0 : index
    %c0_335 = arith.constant 0 : index
    %c0_336 = arith.constant 0 : index
    %128 = vector.load %arg24[%c0_333, %c0_334, %c0_335, %c0_336] : memref<1x8x8x144xf32, #tpu.memory_space<vmem>>, vector<1x8x8x16xf32>
    tpu.vector_store %arg24[%c0_333, %c0_334, %c0_335, %c0_336], %127 {strides = array<i32>} : memref<1x8x8x144xf32, #tpu.memory_space<vmem>>, vector<1x8x8x16xf32>,
    %c0_337 = arith.constant 0 : index
    %c0_338 = arith.constant 0 : index
    %c8_339 = arith.constant 8 : index
    %c0_340 = arith.constant 0 : index
    %129 = vector.load %arg18[%c0_337, %c0_338, %c8_339, %c0_340] : memref<1x10x17x16xf32, #tpu.memory_space<vmem>>, vector<1x8x8x16xf32>
    %c0_341 = arith.constant 0 : index
    %c0_342 = arith.constant 0 : index
    %c0_343 = arith.constant 0 : index
    %c16_344 = arith.constant 16 : index
    %130 = vector.load %arg24[%c0_341, %c0_342, %c0_343, %c16_344] : memref<1x8x8x144xf32, #tpu.memory_space<vmem>>, vector<1x8x8x16xf32>
    tpu.vector_store %arg24[%c0_341, %c0_342, %c0_343, %c16_344], %129 {strides = array<i32>} : memref<1x8x8x144xf32, #tpu.memory_space<vmem>>, vector<1x8x8x16xf32>,
    %c0_345 = arith.constant 0 : index
    %c0_346 = arith.constant 0 : index
    %c9_347 = arith.constant 9 : index
    %c0_348 = arith.constant 0 : index
    %131 = vector.load %arg18[%c0_345, %c0_346, %c9_347, %c0_348] : memref<1x10x17x16xf32, #tpu.memory_space<vmem>>, vector<1x8x8x16xf32>
    %c0_349 = arith.constant 0 : index
    %c0_350 = arith.constant 0 : index
    %c0_351 = arith.constant 0 : index
    %c32_352 = arith.constant 32 : index
    %132 = vector.load %arg24[%c0_349, %c0_350, %c0_351, %c32_352] : memref<1x8x8x144xf32, #tpu.memory_space<vmem>>, vector<1x8x8x16xf32>
    tpu.vector_store %arg24[%c0_349, %c0_350, %c0_351, %c32_352], %131 {strides = array<i32>} : memref<1x8x8x144xf32, #tpu.memory_space<vmem>>, vector<1x8x8x16xf32>,
    %c0_353 = arith.constant 0 : index
    %c1_354 = arith.constant 1 : index
    %c7_355 = arith.constant 7 : index
    %c0_356 = arith.constant 0 : index
    %133 = vector.load %arg18[%c0_353, %c1_354, %c7_355, %c0_356] : memref<1x10x17x16xf32, #tpu.memory_space<vmem>>, vector<1x8x8x16xf32>
    %c0_357 = arith.constant 0 : index
    %c0_358 = arith.constant 0 : index
    %c0_359 = arith.constant 0 : index
    %c48_360 = arith.constant 48 : index
    %134 = vector.load %arg24[%c0_357, %c0_358, %c0_359, %c48_360] : memref<1x8x8x144xf32, #tpu.memory_space<vmem>>, vector<1x8x8x16xf32>
    tpu.vector_store %arg24[%c0_357, %c0_358, %c0_359, %c48_360], %133 {strides = array<i32>} : memref<1x8x8x144xf32, #tpu.memory_space<vmem>>, vector<1x8x8x16xf32>,
    %c0_361 = arith.constant 0 : index
    %c1_362 = arith.constant 1 : index
    %c8_363 = arith.constant 8 : index
    %c0_364 = arith.constant 0 : index
    %135 = vector.load %arg18[%c0_361, %c1_362, %c8_363, %c0_364] : memref<1x10x17x16xf32, #tpu.memory_space<vmem>>, vector<1x8x8x16xf32>
    %c0_365 = arith.constant 0 : index
    %c0_366 = arith.constant 0 : index
    %c0_367 = arith.constant 0 : index
    %c64_368 = arith.constant 64 : index
    %136 = vector.load %arg24[%c0_365, %c0_366, %c0_367, %c64_368] : memref<1x8x8x144xf32, #tpu.memory_space<vmem>>, vector<1x8x8x16xf32>
    tpu.vector_store %arg24[%c0_365, %c0_366, %c0_367, %c64_368], %135 {strides = array<i32>} : memref<1x8x8x144xf32, #tpu.memory_space<vmem>>, vector<1x8x8x16xf32>,
    %c0_369 = arith.constant 0 : index
    %c1_370 = arith.constant 1 : index
    %c9_371 = arith.constant 9 : index
    %c0_372 = arith.constant 0 : index
    %137 = vector.load %arg18[%c0_369, %c1_370, %c9_371, %c0_372] : memref<1x10x17x16xf32, #tpu.memory_space<vmem>>, vector<1x8x8x16xf32>
    %c0_373 = arith.constant 0 : index
    %c0_374 = arith.constant 0 : index
    %c0_375 = arith.constant 0 : index
    %c80_376 = arith.constant 80 : index
    %138 = vector.load %arg24[%c0_373, %c0_374, %c0_375, %c80_376] : memref<1x8x8x144xf32, #tpu.memory_space<vmem>>, vector<1x8x8x16xf32>
    tpu.vector_store %arg24[%c0_373, %c0_374, %c0_375, %c80_376], %137 {strides = array<i32>} : memref<1x8x8x144xf32, #tpu.memory_space<vmem>>, vector<1x8x8x16xf32>,
    %c0_377 = arith.constant 0 : index
    %c2_378 = arith.constant 2 : index
    %c7_379 = arith.constant 7 : index
    %c0_380 = arith.constant 0 : index
    %139 = vector.load %arg18[%c0_377, %c2_378, %c7_379, %c0_380] : memref<1x10x17x16xf32, #tpu.memory_space<vmem>>, vector<1x8x8x16xf32>
    %c0_381 = arith.constant 0 : index
    %c0_382 = arith.constant 0 : index
    %c0_383 = arith.constant 0 : index
    %c96_384 = arith.constant 96 : index
    %140 = vector.load %arg24[%c0_381, %c0_382, %c0_383, %c96_384] : memref<1x8x8x144xf32, #tpu.memory_space<vmem>>, vector<1x8x8x16xf32>
    tpu.vector_store %arg24[%c0_381, %c0_382, %c0_383, %c96_384], %139 {strides = array<i32>} : memref<1x8x8x144xf32, #tpu.memory_space<vmem>>, vector<1x8x8x16xf32>,
    %c0_385 = arith.constant 0 : index
    %c2_386 = arith.constant 2 : index
    %c8_387 = arith.constant 8 : index
    %c0_388 = arith.constant 0 : index
    %141 = vector.load %arg18[%c0_385, %c2_386, %c8_387, %c0_388] : memref<1x10x17x16xf32, #tpu.memory_space<vmem>>, vector<1x8x8x16xf32>
    %c0_389 = arith.constant 0 : index
    %c0_390 = arith.constant 0 : index
    %c0_391 = arith.constant 0 : index
    %c112_392 = arith.constant 112 : index
    %142 = vector.load %arg24[%c0_389, %c0_390, %c0_391, %c112_392] : memref<1x8x8x144xf32, #tpu.memory_space<vmem>>, vector<1x8x8x16xf32>
    tpu.vector_store %arg24[%c0_389, %c0_390, %c0_391, %c112_392], %141 {strides = array<i32>} : memref<1x8x8x144xf32, #tpu.memory_space<vmem>>, vector<1x8x8x16xf32>,
    %c0_393 = arith.constant 0 : index
    %c2_394 = arith.constant 2 : index
    %c9_395 = arith.constant 9 : index
    %c0_396 = arith.constant 0 : index
    %143 = vector.load %arg18[%c0_393, %c2_394, %c9_395, %c0_396] : memref<1x10x17x16xf32, #tpu.memory_space<vmem>>, vector<1x8x8x16xf32>
    %c0_397 = arith.constant 0 : index
    %c0_398 = arith.constant 0 : index
    %c0_399 = arith.constant 0 : index
    %c128_400 = arith.constant 128 : index
    %144 = vector.load %arg24[%c0_397, %c0_398, %c0_399, %c128_400] : memref<1x8x8x144xf32, #tpu.memory_space<vmem>>, vector<1x8x8x16xf32>
    tpu.vector_store %arg24[%c0_397, %c0_398, %c0_399, %c128_400], %143 {strides = array<i32>} : memref<1x8x8x144xf32, #tpu.memory_space<vmem>>, vector<1x8x8x16xf32>,
    %c0_401 = arith.constant 0 : index
    %c0_402 = arith.constant 0 : index
    %c0_403 = arith.constant 0 : index
    %c0_404 = arith.constant 0 : index
    %145 = vector.load %arg24[%c0_401, %c0_402, %c0_403, %c0_404] : memref<1x8x8x144xf32, #tpu.memory_space<vmem>>, vector<1x8x8x144xf32>
    %146 = vector.shape_cast %145 : vector<1x8x8x144xf32> to vector<64x144xf32>
    %c0_405 = arith.constant 0 : index
    %c0_406 = arith.constant 0 : index
    %147 = vector.load %arg8[%c0_405, %c0_406] : memref<144x32xf32, #tpu.memory_space<vmem>>, vector<144x32xf32>
    %cst_407 = arith.constant dense<0.000000e+00> : vector<64x32xf32>
    %148 = tpu.matmul %146, %147, %cst_407 {dimension_numbers = #tpu.dot_dimension_numbers<[1], [0], [0], [1], [0, 0, 1, 1], [], []>} : vector<64x144xf32>, vector<144x32xf32>, vector<64x32xf32> -> vector<64x32xf32>
    %c0_408 = arith.constant 0 : index
    %c0_409 = arith.constant 0 : index
    %149 = vector.load %arg9[%c0_408, %c0_409] : memref<1x32xf32, #tpu.memory_space<vmem>>, vector<1x32xf32>
    %150 = vector.broadcast %149 : vector<1x32xf32> to vector<64x32xf32>
    %151 = arith.addf %148, %150 : vector<64x32xf32>
    %cst_410 = arith.constant 0.000000e+00 : f32
    %152 = vector.broadcast %cst_410 : f32 to vector<64x32xf32>
    %153 = arith.maximumf %151, %152 : vector<64x32xf32>
    %154 = vector.shape_cast %153 : vector<64x32xf32> to vector<1x8x8x32xf32>
    %c0_411 = arith.constant 0 : index
    %c0_412 = arith.constant 0 : index
    %c0_413 = arith.constant 0 : index
    %c0_414 = arith.constant 0 : index
    %155 = vector.load %arg28[%c0_411, %c0_412, %c0_413, %c0_414] : memref<1x8x8x32xf32, #tpu.memory_space<vmem>>, vector<1x8x8x32xf32>
    tpu.vector_store %arg28[%c0_411, %c0_412, %c0_413, %c0_414], %154 {strides = array<i32>} : memref<1x8x8x32xf32, #tpu.memory_space<vmem>>, vector<1x8x8x32xf32>,
    %c0_415 = arith.constant 0 : index
    %c0_416 = arith.constant 0 : index
    %c0_417 = arith.constant 0 : index
    %c0_418 = arith.constant 0 : index
    %156 = tpu.strided_load %arg28[%c0_415, %c0_416, %c0_417, %c0_418] {strides = array<i32: 1, 1, 2, 1>} : memref<1x8x8x32xf32, #tpu.memory_space<vmem>>, vector<1x8x4x32xf32>
    %c0_419 = arith.constant 0 : index
    %c0_420 = arith.constant 0 : index
    %c1_421 = arith.constant 1 : index
    %c0_422 = arith.constant 0 : index
    %157 = tpu.strided_load %arg28[%c0_419, %c0_420, %c1_421, %c0_422] {strides = array<i32: 1, 1, 2, 1>} : memref<1x8x8x32xf32, #tpu.memory_space<vmem>>, vector<1x8x4x32xf32>
    %158 = arith.maximumf %156, %157 : vector<1x8x4x32xf32>
    %159 = vector.shape_cast %158 : vector<1x8x4x32xf32> to vector<1x4x2x4x32xf32>
    %160 = vector.extract_strided_slice %159 {offsets = [0, 0, 0, 0, 0], sizes = [1, 4, 1, 4, 32], strides = [1, 1, 1, 1, 1]} : vector<1x4x2x4x32xf32> to vector<1x4x1x4x32xf32>
    %161 = vector.shape_cast %160 : vector<1x4x1x4x32xf32> to vector<1x4x4x32xf32>
    %162 = vector.extract_strided_slice %159 {offsets = [0, 0, 1, 0, 0], sizes = [1, 4, 1, 4, 32], strides = [1, 1, 1, 1, 1]} : vector<1x4x2x4x32xf32> to vector<1x4x1x4x32xf32>
    %163 = vector.shape_cast %162 : vector<1x4x1x4x32xf32> to vector<1x4x4x32xf32>
    %164 = arith.maximumf %161, %163 : vector<1x4x4x32xf32>
    %cst_423 = arith.constant 0.000000e+00 : f32
    %165 = vector.broadcast %cst_423 : f32 to vector<1x1x10x32xf32>
    %c0_424 = arith.constant 0 : index
    %c0_425 = arith.constant 0 : index
    %c7_426 = arith.constant 7 : index
    %c0_427 = arith.constant 0 : index
    %166 = vector.load %arg19[%c0_424, %c0_425, %c7_426, %c0_427] : memref<1x6x17x32xf32, #tpu.memory_space<vmem>>, vector<1x1x10x32xf32>
    tpu.vector_store %arg19[%c0_424, %c0_425, %c7_426, %c0_427], %165 {strides = array<i32>} : memref<1x6x17x32xf32, #tpu.memory_space<vmem>>, vector<1x1x10x32xf32>,
    %c0_428 = arith.constant 0 : index
    %c5 = arith.constant 5 : index
    %c7_429 = arith.constant 7 : index
    %c0_430 = arith.constant 0 : index
    %167 = vector.load %arg19[%c0_428, %c5, %c7_429, %c0_430] : memref<1x6x17x32xf32, #tpu.memory_space<vmem>>, vector<1x1x10x32xf32>
    tpu.vector_store %arg19[%c0_428, %c5, %c7_429, %c0_430], %165 {strides = array<i32>} : memref<1x6x17x32xf32, #tpu.memory_space<vmem>>, vector<1x1x10x32xf32>,
    %cst_431 = arith.constant 0.000000e+00 : f32
    %168 = vector.broadcast %cst_431 : f32 to vector<1x4x1x32xf32>
    %c0_432 = arith.constant 0 : index
    %c1_433 = arith.constant 1 : index
    %c7_434 = arith.constant 7 : index
    %c0_435 = arith.constant 0 : index
    %169 = vector.load %arg19[%c0_432, %c1_433, %c7_434, %c0_435] : memref<1x6x17x32xf32, #tpu.memory_space<vmem>>, vector<1x4x1x32xf32>
    tpu.vector_store %arg19[%c0_432, %c1_433, %c7_434, %c0_435], %168 {strides = array<i32>} : memref<1x6x17x32xf32, #tpu.memory_space<vmem>>, vector<1x4x1x32xf32>,
    %cst_436 = arith.constant 0.000000e+00 : f32
    %170 = vector.broadcast %cst_436 : f32 to vector<1x4x5x32xf32>
    %c0_437 = arith.constant 0 : index
    %c1_438 = arith.constant 1 : index
    %c12_439 = arith.constant 12 : index
    %c0_440 = arith.constant 0 : index
    %171 = vector.load %arg19[%c0_437, %c1_438, %c12_439, %c0_440] : memref<1x6x17x32xf32, #tpu.memory_space<vmem>>, vector<1x4x5x32xf32>
    tpu.vector_store %arg19[%c0_437, %c1_438, %c12_439, %c0_440], %170 {strides = array<i32>} : memref<1x6x17x32xf32, #tpu.memory_space<vmem>>, vector<1x4x5x32xf32>,
    %c0_441 = arith.constant 0 : index
    %c1_442 = arith.constant 1 : index
    %c8_443 = arith.constant 8 : index
    %c0_444 = arith.constant 0 : index
    %172 = vector.load %arg19[%c0_441, %c1_442, %c8_443, %c0_444] : memref<1x6x17x32xf32, #tpu.memory_space<vmem>>, vector<1x4x4x32xf32>
    tpu.vector_store %arg19[%c0_441, %c1_442, %c8_443, %c0_444], %164 {strides = array<i32>} : memref<1x6x17x32xf32, #tpu.memory_space<vmem>>, vector<1x4x4x32xf32>,
    %c0_445 = arith.constant 0 : index
    %c0_446 = arith.constant 0 : index
    %c7_447 = arith.constant 7 : index
    %c0_448 = arith.constant 0 : index
    %173 = vector.load %arg19[%c0_445, %c0_446, %c7_447, %c0_448] : memref<1x6x17x32xf32, #tpu.memory_space<vmem>>, vector<1x4x8x32xf32>
    %c0_449 = arith.constant 0 : index
    %c0_450 = arith.constant 0 : index
    %c0_451 = arith.constant 0 : index
    %c0_452 = arith.constant 0 : index
    %174 = vector.load %arg25[%c0_449, %c0_450, %c0_451, %c0_452] : memref<1x4x8x288xf32, #tpu.memory_space<vmem>>, vector<1x4x8x32xf32>
    tpu.vector_store %arg25[%c0_449, %c0_450, %c0_451, %c0_452], %173 {strides = array<i32>} : memref<1x4x8x288xf32, #tpu.memory_space<vmem>>, vector<1x4x8x32xf32>,
    %c0_453 = arith.constant 0 : index
    %c0_454 = arith.constant 0 : index
    %c8_455 = arith.constant 8 : index
    %c0_456 = arith.constant 0 : index
    %175 = vector.load %arg19[%c0_453, %c0_454, %c8_455, %c0_456] : memref<1x6x17x32xf32, #tpu.memory_space<vmem>>, vector<1x4x8x32xf32>
    %c0_457 = arith.constant 0 : index
    %c0_458 = arith.constant 0 : index
    %c0_459 = arith.constant 0 : index
    %c32_460 = arith.constant 32 : index
    %176 = vector.load %arg25[%c0_457, %c0_458, %c0_459, %c32_460] : memref<1x4x8x288xf32, #tpu.memory_space<vmem>>, vector<1x4x8x32xf32>
    tpu.vector_store %arg25[%c0_457, %c0_458, %c0_459, %c32_460], %175 {strides = array<i32>} : memref<1x4x8x288xf32, #tpu.memory_space<vmem>>, vector<1x4x8x32xf32>,
    %c0_461 = arith.constant 0 : index
    %c0_462 = arith.constant 0 : index
    %c9_463 = arith.constant 9 : index
    %c0_464 = arith.constant 0 : index
    %177 = vector.load %arg19[%c0_461, %c0_462, %c9_463, %c0_464] : memref<1x6x17x32xf32, #tpu.memory_space<vmem>>, vector<1x4x8x32xf32>
    %c0_465 = arith.constant 0 : index
    %c0_466 = arith.constant 0 : index
    %c0_467 = arith.constant 0 : index
    %c64_468 = arith.constant 64 : index
    %178 = vector.load %arg25[%c0_465, %c0_466, %c0_467, %c64_468] : memref<1x4x8x288xf32, #tpu.memory_space<vmem>>, vector<1x4x8x32xf32>
    tpu.vector_store %arg25[%c0_465, %c0_466, %c0_467, %c64_468], %177 {strides = array<i32>} : memref<1x4x8x288xf32, #tpu.memory_space<vmem>>, vector<1x4x8x32xf32>,
    %c0_469 = arith.constant 0 : index
    %c1_470 = arith.constant 1 : index
    %c7_471 = arith.constant 7 : index
    %c0_472 = arith.constant 0 : index
    %179 = vector.load %arg19[%c0_469, %c1_470, %c7_471, %c0_472] : memref<1x6x17x32xf32, #tpu.memory_space<vmem>>, vector<1x4x8x32xf32>
    %c0_473 = arith.constant 0 : index
    %c0_474 = arith.constant 0 : index
    %c0_475 = arith.constant 0 : index
    %c96_476 = arith.constant 96 : index
    %180 = vector.load %arg25[%c0_473, %c0_474, %c0_475, %c96_476] : memref<1x4x8x288xf32, #tpu.memory_space<vmem>>, vector<1x4x8x32xf32>
    tpu.vector_store %arg25[%c0_473, %c0_474, %c0_475, %c96_476], %179 {strides = array<i32>} : memref<1x4x8x288xf32, #tpu.memory_space<vmem>>, vector<1x4x8x32xf32>,
    %c0_477 = arith.constant 0 : index
    %c1_478 = arith.constant 1 : index
    %c8_479 = arith.constant 8 : index
    %c0_480 = arith.constant 0 : index
    %181 = vector.load %arg19[%c0_477, %c1_478, %c8_479, %c0_480] : memref<1x6x17x32xf32, #tpu.memory_space<vmem>>, vector<1x4x8x32xf32>
    %c0_481 = arith.constant 0 : index
    %c0_482 = arith.constant 0 : index
    %c0_483 = arith.constant 0 : index
    %c128_484 = arith.constant 128 : index
    %182 = vector.load %arg25[%c0_481, %c0_482, %c0_483, %c128_484] : memref<1x4x8x288xf32, #tpu.memory_space<vmem>>, vector<1x4x8x32xf32>
    tpu.vector_store %arg25[%c0_481, %c0_482, %c0_483, %c128_484], %181 {strides = array<i32>} : memref<1x4x8x288xf32, #tpu.memory_space<vmem>>, vector<1x4x8x32xf32>,
    %c0_485 = arith.constant 0 : index
    %c1_486 = arith.constant 1 : index
    %c9_487 = arith.constant 9 : index
    %c0_488 = arith.constant 0 : index
    %183 = vector.load %arg19[%c0_485, %c1_486, %c9_487, %c0_488] : memref<1x6x17x32xf32, #tpu.memory_space<vmem>>, vector<1x4x8x32xf32>
    %c0_489 = arith.constant 0 : index
    %c0_490 = arith.constant 0 : index
    %c0_491 = arith.constant 0 : index
    %c160 = arith.constant 160 : index
    %184 = vector.load %arg25[%c0_489, %c0_490, %c0_491, %c160] : memref<1x4x8x288xf32, #tpu.memory_space<vmem>>, vector<1x4x8x32xf32>
    tpu.vector_store %arg25[%c0_489, %c0_490, %c0_491, %c160], %183 {strides = array<i32>} : memref<1x4x8x288xf32, #tpu.memory_space<vmem>>, vector<1x4x8x32xf32>,
    %c0_492 = arith.constant 0 : index
    %c2_493 = arith.constant 2 : index
    %c7_494 = arith.constant 7 : index
    %c0_495 = arith.constant 0 : index
    %185 = vector.load %arg19[%c0_492, %c2_493, %c7_494, %c0_495] : memref<1x6x17x32xf32, #tpu.memory_space<vmem>>, vector<1x4x8x32xf32>
    %c0_496 = arith.constant 0 : index
    %c0_497 = arith.constant 0 : index
    %c0_498 = arith.constant 0 : index
    %c192 = arith.constant 192 : index
    %186 = vector.load %arg25[%c0_496, %c0_497, %c0_498, %c192] : memref<1x4x8x288xf32, #tpu.memory_space<vmem>>, vector<1x4x8x32xf32>
    tpu.vector_store %arg25[%c0_496, %c0_497, %c0_498, %c192], %185 {strides = array<i32>} : memref<1x4x8x288xf32, #tpu.memory_space<vmem>>, vector<1x4x8x32xf32>,
    %c0_499 = arith.constant 0 : index
    %c2_500 = arith.constant 2 : index
    %c8_501 = arith.constant 8 : index
    %c0_502 = arith.constant 0 : index
    %187 = vector.load %arg19[%c0_499, %c2_500, %c8_501, %c0_502] : memref<1x6x17x32xf32, #tpu.memory_space<vmem>>, vector<1x4x8x32xf32>
    %c0_503 = arith.constant 0 : index
    %c0_504 = arith.constant 0 : index
    %c0_505 = arith.constant 0 : index
    %c224 = arith.constant 224 : index
    %188 = vector.load %arg25[%c0_503, %c0_504, %c0_505, %c224] : memref<1x4x8x288xf32, #tpu.memory_space<vmem>>, vector<1x4x8x32xf32>
    tpu.vector_store %arg25[%c0_503, %c0_504, %c0_505, %c224], %187 {strides = array<i32>} : memref<1x4x8x288xf32, #tpu.memory_space<vmem>>, vector<1x4x8x32xf32>,
    %c0_506 = arith.constant 0 : index
    %c2_507 = arith.constant 2 : index
    %c9_508 = arith.constant 9 : index
    %c0_509 = arith.constant 0 : index
    %189 = vector.load %arg19[%c0_506, %c2_507, %c9_508, %c0_509] : memref<1x6x17x32xf32, #tpu.memory_space<vmem>>, vector<1x4x8x32xf32>
    %c0_510 = arith.constant 0 : index
    %c0_511 = arith.constant 0 : index
    %c0_512 = arith.constant 0 : index
    %c256 = arith.constant 256 : index
    %190 = vector.load %arg25[%c0_510, %c0_511, %c0_512, %c256] : memref<1x4x8x288xf32, #tpu.memory_space<vmem>>, vector<1x4x8x32xf32>
    tpu.vector_store %arg25[%c0_510, %c0_511, %c0_512, %c256], %189 {strides = array<i32>} : memref<1x4x8x288xf32, #tpu.memory_space<vmem>>, vector<1x4x8x32xf32>,
    %c0_513 = arith.constant 0 : index
    %c0_514 = arith.constant 0 : index
    %c0_515 = arith.constant 0 : index
    %c0_516 = arith.constant 0 : index
    %191 = vector.load %arg25[%c0_513, %c0_514, %c0_515, %c0_516] : memref<1x4x8x288xf32, #tpu.memory_space<vmem>>, vector<1x4x8x288xf32>
    %192 = vector.shape_cast %191 : vector<1x4x8x288xf32> to vector<32x288xf32>
    %c0_517 = arith.constant 0 : index
    %c0_518 = arith.constant 0 : index
    %193 = vector.load %arg10[%c0_517, %c0_518] : memref<288x32xf32, #tpu.memory_space<vmem>>, vector<288x32xf32>
    %cst_519 = arith.constant dense<0.000000e+00> : vector<32x32xf32>
    %194 = tpu.matmul %192, %193, %cst_519 {dimension_numbers = #tpu.dot_dimension_numbers<[1], [0], [0], [1], [0, 0, 1, 1], [], []>} : vector<32x288xf32>, vector<288x32xf32>, vector<32x32xf32> -> vector<32x32xf32>
    %c0_520 = arith.constant 0 : index
    %c0_521 = arith.constant 0 : index
    %195 = vector.load %arg11[%c0_520, %c0_521] : memref<1x32xf32, #tpu.memory_space<vmem>>, vector<1x32xf32>
    %196 = vector.broadcast %195 : vector<1x32xf32> to vector<32x32xf32>
    %197 = arith.addf %194, %196 : vector<32x32xf32>
    %cst_522 = arith.constant 0.000000e+00 : f32
    %198 = vector.broadcast %cst_522 : f32 to vector<32x32xf32>
    %199 = arith.maximumf %197, %198 : vector<32x32xf32>
    %200 = vector.shape_cast %199 : vector<32x32xf32> to vector<1x4x8x32xf32>
    %cst_523 = arith.constant 0.000000e+00 : f32
    %201 = vector.broadcast %cst_523 : f32 to vector<1x1x10x32xf32>
    %c0_524 = arith.constant 0 : index
    %c0_525 = arith.constant 0 : index
    %c7_526 = arith.constant 7 : index
    %c0_527 = arith.constant 0 : index
    %202 = vector.load %arg20[%c0_524, %c0_525, %c7_526, %c0_527] : memref<1x6x17x32xf32, #tpu.memory_space<vmem>>, vector<1x1x10x32xf32>
    tpu.vector_store %arg20[%c0_524, %c0_525, %c7_526, %c0_527], %201 {strides = array<i32>} : memref<1x6x17x32xf32, #tpu.memory_space<vmem>>, vector<1x1x10x32xf32>,
    %c0_528 = arith.constant 0 : index
    %c5_529 = arith.constant 5 : index
    %c7_530 = arith.constant 7 : index
    %c0_531 = arith.constant 0 : index
    %203 = vector.load %arg20[%c0_528, %c5_529, %c7_530, %c0_531] : memref<1x6x17x32xf32, #tpu.memory_space<vmem>>, vector<1x1x10x32xf32>
    tpu.vector_store %arg20[%c0_528, %c5_529, %c7_530, %c0_531], %201 {strides = array<i32>} : memref<1x6x17x32xf32, #tpu.memory_space<vmem>>, vector<1x1x10x32xf32>,
    %cst_532 = arith.constant 0.000000e+00 : f32
    %204 = vector.broadcast %cst_532 : f32 to vector<1x4x1x32xf32>
    %c0_533 = arith.constant 0 : index
    %c1_534 = arith.constant 1 : index
    %c7_535 = arith.constant 7 : index
    %c0_536 = arith.constant 0 : index
    %205 = vector.load %arg20[%c0_533, %c1_534, %c7_535, %c0_536] : memref<1x6x17x32xf32, #tpu.memory_space<vmem>>, vector<1x4x1x32xf32>
    tpu.vector_store %arg20[%c0_533, %c1_534, %c7_535, %c0_536], %204 {strides = array<i32>} : memref<1x6x17x32xf32, #tpu.memory_space<vmem>>, vector<1x4x1x32xf32>,
    %cst_537 = arith.constant 0.000000e+00 : f32
    %206 = vector.broadcast %cst_537 : f32 to vector<1x4x5x32xf32>
    %c0_538 = arith.constant 0 : index
    %c1_539 = arith.constant 1 : index
    %c12_540 = arith.constant 12 : index
    %c0_541 = arith.constant 0 : index
    %207 = vector.load %arg20[%c0_538, %c1_539, %c12_540, %c0_541] : memref<1x6x17x32xf32, #tpu.memory_space<vmem>>, vector<1x4x5x32xf32>
    tpu.vector_store %arg20[%c0_538, %c1_539, %c12_540, %c0_541], %206 {strides = array<i32>} : memref<1x6x17x32xf32, #tpu.memory_space<vmem>>, vector<1x4x5x32xf32>,
    %208 = vector.extract_strided_slice %200 {offsets = [0, 0, 0, 0], sizes = [1, 4, 4, 32], strides = [1, 1, 1, 1]} : vector<1x4x8x32xf32> to vector<1x4x4x32xf32>
    %c0_542 = arith.constant 0 : index
    %c1_543 = arith.constant 1 : index
    %c8_544 = arith.constant 8 : index
    %c0_545 = arith.constant 0 : index
    %209 = vector.load %arg20[%c0_542, %c1_543, %c8_544, %c0_545] : memref<1x6x17x32xf32, #tpu.memory_space<vmem>>, vector<1x4x4x32xf32>
    tpu.vector_store %arg20[%c0_542, %c1_543, %c8_544, %c0_545], %208 {strides = array<i32>} : memref<1x6x17x32xf32, #tpu.memory_space<vmem>>, vector<1x4x4x32xf32>,
    %c0_546 = arith.constant 0 : index
    %c0_547 = arith.constant 0 : index
    %c7_548 = arith.constant 7 : index
    %c0_549 = arith.constant 0 : index
    %210 = vector.load %arg20[%c0_546, %c0_547, %c7_548, %c0_549] : memref<1x6x17x32xf32, #tpu.memory_space<vmem>>, vector<1x4x8x32xf32>
    %c0_550 = arith.constant 0 : index
    %c0_551 = arith.constant 0 : index
    %c0_552 = arith.constant 0 : index
    %c0_553 = arith.constant 0 : index
    %211 = vector.load %arg26[%c0_550, %c0_551, %c0_552, %c0_553] : memref<1x4x8x288xf32, #tpu.memory_space<vmem>>, vector<1x4x8x32xf32>
    tpu.vector_store %arg26[%c0_550, %c0_551, %c0_552, %c0_553], %210 {strides = array<i32>} : memref<1x4x8x288xf32, #tpu.memory_space<vmem>>, vector<1x4x8x32xf32>,
    %c0_554 = arith.constant 0 : index
    %c0_555 = arith.constant 0 : index
    %c8_556 = arith.constant 8 : index
    %c0_557 = arith.constant 0 : index
    %212 = vector.load %arg20[%c0_554, %c0_555, %c8_556, %c0_557] : memref<1x6x17x32xf32, #tpu.memory_space<vmem>>, vector<1x4x8x32xf32>
    %c0_558 = arith.constant 0 : index
    %c0_559 = arith.constant 0 : index
    %c0_560 = arith.constant 0 : index
    %c32_561 = arith.constant 32 : index
    %213 = vector.load %arg26[%c0_558, %c0_559, %c0_560, %c32_561] : memref<1x4x8x288xf32, #tpu.memory_space<vmem>>, vector<1x4x8x32xf32>
    tpu.vector_store %arg26[%c0_558, %c0_559, %c0_560, %c32_561], %212 {strides = array<i32>} : memref<1x4x8x288xf32, #tpu.memory_space<vmem>>, vector<1x4x8x32xf32>,
    %c0_562 = arith.constant 0 : index
    %c0_563 = arith.constant 0 : index
    %c9_564 = arith.constant 9 : index
    %c0_565 = arith.constant 0 : index
    %214 = vector.load %arg20[%c0_562, %c0_563, %c9_564, %c0_565] : memref<1x6x17x32xf32, #tpu.memory_space<vmem>>, vector<1x4x8x32xf32>
    %c0_566 = arith.constant 0 : index
    %c0_567 = arith.constant 0 : index
    %c0_568 = arith.constant 0 : index
    %c64_569 = arith.constant 64 : index
    %215 = vector.load %arg26[%c0_566, %c0_567, %c0_568, %c64_569] : memref<1x4x8x288xf32, #tpu.memory_space<vmem>>, vector<1x4x8x32xf32>
    tpu.vector_store %arg26[%c0_566, %c0_567, %c0_568, %c64_569], %214 {strides = array<i32>} : memref<1x4x8x288xf32, #tpu.memory_space<vmem>>, vector<1x4x8x32xf32>,
    %c0_570 = arith.constant 0 : index
    %c1_571 = arith.constant 1 : index
    %c7_572 = arith.constant 7 : index
    %c0_573 = arith.constant 0 : index
    %216 = vector.load %arg20[%c0_570, %c1_571, %c7_572, %c0_573] : memref<1x6x17x32xf32, #tpu.memory_space<vmem>>, vector<1x4x8x32xf32>
    %c0_574 = arith.constant 0 : index
    %c0_575 = arith.constant 0 : index
    %c0_576 = arith.constant 0 : index
    %c96_577 = arith.constant 96 : index
    %217 = vector.load %arg26[%c0_574, %c0_575, %c0_576, %c96_577] : memref<1x4x8x288xf32, #tpu.memory_space<vmem>>, vector<1x4x8x32xf32>
    tpu.vector_store %arg26[%c0_574, %c0_575, %c0_576, %c96_577], %216 {strides = array<i32>} : memref<1x4x8x288xf32, #tpu.memory_space<vmem>>, vector<1x4x8x32xf32>,
    %c0_578 = arith.constant 0 : index
    %c1_579 = arith.constant 1 : index
    %c8_580 = arith.constant 8 : index
    %c0_581 = arith.constant 0 : index
    %218 = vector.load %arg20[%c0_578, %c1_579, %c8_580, %c0_581] : memref<1x6x17x32xf32, #tpu.memory_space<vmem>>, vector<1x4x8x32xf32>
    %c0_582 = arith.constant 0 : index
    %c0_583 = arith.constant 0 : index
    %c0_584 = arith.constant 0 : index
    %c128_585 = arith.constant 128 : index
    %219 = vector.load %arg26[%c0_582, %c0_583, %c0_584, %c128_585] : memref<1x4x8x288xf32, #tpu.memory_space<vmem>>, vector<1x4x8x32xf32>
    tpu.vector_store %arg26[%c0_582, %c0_583, %c0_584, %c128_585], %218 {strides = array<i32>} : memref<1x4x8x288xf32, #tpu.memory_space<vmem>>, vector<1x4x8x32xf32>,
    %c0_586 = arith.constant 0 : index
    %c1_587 = arith.constant 1 : index
    %c9_588 = arith.constant 9 : index
    %c0_589 = arith.constant 0 : index
    %220 = vector.load %arg20[%c0_586, %c1_587, %c9_588, %c0_589] : memref<1x6x17x32xf32, #tpu.memory_space<vmem>>, vector<1x4x8x32xf32>
    %c0_590 = arith.constant 0 : index
    %c0_591 = arith.constant 0 : index
    %c0_592 = arith.constant 0 : index
    %c160_593 = arith.constant 160 : index
    %221 = vector.load %arg26[%c0_590, %c0_591, %c0_592, %c160_593] : memref<1x4x8x288xf32, #tpu.memory_space<vmem>>, vector<1x4x8x32xf32>
    tpu.vector_store %arg26[%c0_590, %c0_591, %c0_592, %c160_593], %220 {strides = array<i32>} : memref<1x4x8x288xf32, #tpu.memory_space<vmem>>, vector<1x4x8x32xf32>,
    %c0_594 = arith.constant 0 : index
    %c2_595 = arith.constant 2 : index
    %c7_596 = arith.constant 7 : index
    %c0_597 = arith.constant 0 : index
    %222 = vector.load %arg20[%c0_594, %c2_595, %c7_596, %c0_597] : memref<1x6x17x32xf32, #tpu.memory_space<vmem>>, vector<1x4x8x32xf32>
    %c0_598 = arith.constant 0 : index
    %c0_599 = arith.constant 0 : index
    %c0_600 = arith.constant 0 : index
    %c192_601 = arith.constant 192 : index
    %223 = vector.load %arg26[%c0_598, %c0_599, %c0_600, %c192_601] : memref<1x4x8x288xf32, #tpu.memory_space<vmem>>, vector<1x4x8x32xf32>
    tpu.vector_store %arg26[%c0_598, %c0_599, %c0_600, %c192_601], %222 {strides = array<i32>} : memref<1x4x8x288xf32, #tpu.memory_space<vmem>>, vector<1x4x8x32xf32>,
    %c0_602 = arith.constant 0 : index
    %c2_603 = arith.constant 2 : index
    %c8_604 = arith.constant 8 : index
    %c0_605 = arith.constant 0 : index
    %224 = vector.load %arg20[%c0_602, %c2_603, %c8_604, %c0_605] : memref<1x6x17x32xf32, #tpu.memory_space<vmem>>, vector<1x4x8x32xf32>
    %c0_606 = arith.constant 0 : index
    %c0_607 = arith.constant 0 : index
    %c0_608 = arith.constant 0 : index
    %c224_609 = arith.constant 224 : index
    %225 = vector.load %arg26[%c0_606, %c0_607, %c0_608, %c224_609] : memref<1x4x8x288xf32, #tpu.memory_space<vmem>>, vector<1x4x8x32xf32>
    tpu.vector_store %arg26[%c0_606, %c0_607, %c0_608, %c224_609], %224 {strides = array<i32>} : memref<1x4x8x288xf32, #tpu.memory_space<vmem>>, vector<1x4x8x32xf32>,
    %c0_610 = arith.constant 0 : index
    %c2_611 = arith.constant 2 : index
    %c9_612 = arith.constant 9 : index
    %c0_613 = arith.constant 0 : index
    %226 = vector.load %arg20[%c0_610, %c2_611, %c9_612, %c0_613] : memref<1x6x17x32xf32, #tpu.memory_space<vmem>>, vector<1x4x8x32xf32>
    %c0_614 = arith.constant 0 : index
    %c0_615 = arith.constant 0 : index
    %c0_616 = arith.constant 0 : index
    %c256_617 = arith.constant 256 : index
    %227 = vector.load %arg26[%c0_614, %c0_615, %c0_616, %c256_617] : memref<1x4x8x288xf32, #tpu.memory_space<vmem>>, vector<1x4x8x32xf32>
    tpu.vector_store %arg26[%c0_614, %c0_615, %c0_616, %c256_617], %226 {strides = array<i32>} : memref<1x4x8x288xf32, #tpu.memory_space<vmem>>, vector<1x4x8x32xf32>,
    %c0_618 = arith.constant 0 : index
    %c0_619 = arith.constant 0 : index
    %c0_620 = arith.constant 0 : index
    %c0_621 = arith.constant 0 : index
    %228 = vector.load %arg26[%c0_618, %c0_619, %c0_620, %c0_621] : memref<1x4x8x288xf32, #tpu.memory_space<vmem>>, vector<1x4x8x288xf32>
    %229 = vector.shape_cast %228 : vector<1x4x8x288xf32> to vector<32x288xf32>
    %c0_622 = arith.constant 0 : index
    %c0_623 = arith.constant 0 : index
    %230 = vector.load %arg12[%c0_622, %c0_623] : memref<288x64xf32, #tpu.memory_space<vmem>>, vector<288x64xf32>
    %cst_624 = arith.constant dense<0.000000e+00> : vector<32x64xf32>
    %231 = tpu.matmul %229, %230, %cst_624 {dimension_numbers = #tpu.dot_dimension_numbers<[1], [0], [0], [1], [0, 0, 1, 1], [], []>} : vector<32x288xf32>, vector<288x64xf32>, vector<32x64xf32> -> vector<32x64xf32>
    %c0_625 = arith.constant 0 : index
    %c0_626 = arith.constant 0 : index
    %232 = vector.load %arg13[%c0_625, %c0_626] : memref<1x64xf32, #tpu.memory_space<vmem>>, vector<1x64xf32>
    %233 = vector.broadcast %232 : vector<1x64xf32> to vector<32x64xf32>
    %234 = arith.addf %231, %233 : vector<32x64xf32>
    %cst_627 = arith.constant 0.000000e+00 : f32
    %235 = vector.broadcast %cst_627 : f32 to vector<32x64xf32>
    %236 = arith.maximumf %234, %235 : vector<32x64xf32>
    %237 = vector.shape_cast %236 : vector<32x64xf32> to vector<1x4x8x64xf32>
    %c0_628 = arith.constant 0 : index
    %c0_629 = arith.constant 0 : index
    %c0_630 = arith.constant 0 : index
    %c0_631 = arith.constant 0 : index
    %238 = vector.load %arg29[%c0_628, %c0_629, %c0_630, %c0_631] : memref<1x4x8x64xf32, #tpu.memory_space<vmem>>, vector<1x4x8x64xf32>
    tpu.vector_store %arg29[%c0_628, %c0_629, %c0_630, %c0_631], %237 {strides = array<i32>} : memref<1x4x8x64xf32, #tpu.memory_space<vmem>>, vector<1x4x8x64xf32>,
    %c0_632 = arith.constant 0 : index
    %c0_633 = arith.constant 0 : index
    %c0_634 = arith.constant 0 : index
    %c0_635 = arith.constant 0 : index
    %239 = tpu.strided_load %arg29[%c0_632, %c0_633, %c0_634, %c0_635] {strides = array<i32: 1, 1, 2, 1>} : memref<1x4x8x64xf32, #tpu.memory_space<vmem>>, vector<1x4x2x64xf32>
    %c0_636 = arith.constant 0 : index
    %c0_637 = arith.constant 0 : index
    %c1_638 = arith.constant 1 : index
    %c0_639 = arith.constant 0 : index
    %240 = tpu.strided_load %arg29[%c0_636, %c0_637, %c1_638, %c0_639] {strides = array<i32: 1, 1, 2, 1>} : memref<1x4x8x64xf32, #tpu.memory_space<vmem>>, vector<1x4x2x64xf32>
    %241 = arith.maximumf %239, %240 : vector<1x4x2x64xf32>
    %242 = vector.shape_cast %241 : vector<1x4x2x64xf32> to vector<1x2x2x2x64xf32>
    %243 = vector.extract_strided_slice %242 {offsets = [0, 0, 0, 0, 0], sizes = [1, 2, 1, 2, 64], strides = [1, 1, 1, 1, 1]} : vector<1x2x2x2x64xf32> to vector<1x2x1x2x64xf32>
    %244 = vector.shape_cast %243 : vector<1x2x1x2x64xf32> to vector<1x2x2x64xf32>
    %245 = vector.extract_strided_slice %242 {offsets = [0, 0, 1, 0, 0], sizes = [1, 2, 1, 2, 64], strides = [1, 1, 1, 1, 1]} : vector<1x2x2x2x64xf32> to vector<1x2x1x2x64xf32>
    %246 = vector.shape_cast %245 : vector<1x2x1x2x64xf32> to vector<1x2x2x64xf32>
    %247 = arith.maximumf %244, %246 : vector<1x2x2x64xf32>
    %c0_640 = arith.constant 0 : index
    %c0_641 = arith.constant 0 : index
    %c0_642 = arith.constant 0 : index
    %c0_643 = arith.constant 0 : index
    %248 = vector.load %arg14[%c0_640, %c0_641, %c0_642, %c0_643] : memref<1x2x2x64xf32, #tpu.memory_space<vmem>>, vector<1x2x2x64xf32>
    tpu.vector_store %arg14[%c0_640, %c0_641, %c0_642, %c0_643], %247 {strides = array<i32>} : memref<1x2x2x64xf32, #tpu.memory_space<vmem>>, vector<1x2x2x64xf32>,
    return
  }
  func.func @transform_0(%arg0: i32) -> (i32, i32, i32, i32) {
    %c0_i32 = arith.constant 0 : i32
    %c0_i32_0 = arith.constant 0 : i32
    %c0_i32_1 = arith.constant 0 : i32
    %c0_i32_2 = arith.constant 0 : i32
    return %arg0, %c0_i32, %c0_i32_0, %c0_i32_1 : i32, i32, i32, i32
  }
  func.func @transform_1(%arg0: i32) -> (i32, i32) {
    %c0_i32 = arith.constant 0 : i32
    %c0_i32_0 = arith.constant 0 : i32
    %c0_i32_1 = arith.constant 0 : i32
    return %c0_i32, %c0_i32_0 : i32, i32
  }
  func.func @transform_2(%arg0: i32) -> (i32, i32) {
    %c0_i32 = arith.constant 0 : i32
    %c0_i32_0 = arith.constant 0 : i32
    %c0_i32_1 = arith.constant 0 : i32
    return %c0_i32, %c0_i32_0 : i32, i32
  }
  func.func @transform_3(%arg0: i32) -> (i32, i32) {
    %c0_i32 = arith.constant 0 : i32
    %c0_i32_0 = arith.constant 0 : i32
    %c0_i32_1 = arith.constant 0 : i32
    return %c0_i32, %c0_i32_0 : i32, i32
  }
  func.func @transform_4(%arg0: i32) -> (i32, i32) {
    %c0_i32 = arith.constant 0 : i32
    %c0_i32_0 = arith.constant 0 : i32
    %c0_i32_1 = arith.constant 0 : i32
    return %c0_i32, %c0_i32_0 : i32, i32
  }
  func.func @transform_5(%arg0: i32) -> (i32, i32) {
    %c0_i32 = arith.constant 0 : i32
    %c0_i32_0 = arith.constant 0 : i32
    %c0_i32_1 = arith.constant 0 : i32
    return %c0_i32, %c0_i32_0 : i32, i32
  }
  func.func @transform_6(%arg0: i32) -> (i32, i32) {
    %c0_i32 = arith.constant 0 : i32
    %c0_i32_0 = arith.constant 0 : i32
    %c0_i32_1 = arith.constant 0 : i32
    return %c0_i32, %c0_i32_0 : i32, i32
  }
  func.func @transform_7(%arg0: i32) -> (i32, i32) {
    %c0_i32 = arith.constant 0 : i32
    %c0_i32_0 = arith.constant 0 : i32
    %c0_i32_1 = arith.constant 0 : i32
    return %c0_i32, %c0_i32_0 : i32, i32
  }
  func.func @transform_8(%arg0: i32) -> (i32, i32) {
    %c0_i32 = arith.constant 0 : i32
    %c0_i32_0 = arith.constant 0 : i32
    %c0_i32_1 = arith.constant 0 : i32
    return %c0_i32, %c0_i32_0 : i32, i32
  }
  func.func @transform_9(%arg0: i32) -> (i32, i32) {
    %c0_i32 = arith.constant 0 : i32
    %c0_i32_0 = arith.constant 0 : i32
    %c0_i32_1 = arith.constant 0 : i32
    return %c0_i32, %c0_i32_0 : i32, i32
  }
  func.func @transform_10(%arg0: i32) -> (i32, i32) {
    %c0_i32 = arith.constant 0 : i32
    %c0_i32_0 = arith.constant 0 : i32
    %c0_i32_1 = arith.constant 0 : i32
    return %c0_i32, %c0_i32_0 : i32, i32
  }
  func.func @transform_11(%arg0: i32) -> (i32, i32) {
    %c0_i32 = arith.constant 0 : i32
    %c0_i32_0 = arith.constant 0 : i32
    %c0_i32_1 = arith.constant 0 : i32
    return %c0_i32, %c0_i32_0 : i32, i32
  }
  func.func @transform_12(%arg0: i32) -> (i32, i32) {
    %c0_i32 = arith.constant 0 : i32
    %c0_i32_0 = arith.constant 0 : i32
    %c0_i32_1 = arith.constant 0 : i32
    return %c0_i32, %c0_i32_0 : i32, i32
  }
  func.func @transform_13(%arg0: i32) -> (i32, i32, i32, i32) {
    %c0_i32 = arith.constant 0 : i32
    %c0_i32_0 = arith.constant 0 : i32
    %c0_i32_1 = arith.constant 0 : i32
    %c0_i32_2 = arith.constant 0 : i32
    return %arg0, %c0_i32, %c0_i32_0, %c0_i32_1 : i32, i32, i32, i32
  }
}

</mosaic_0001>

<bundles_post_ra>
// kernel: moderate_cnn_conv_blocks.1
= control target key start
LH: loop header
LB: loop body
LE: loop exit
PB: predicated region body
PF: predicated region fallthrough
CT: control target
= control target key end

     0   :  { %s10576_s0 = inlined_call_operand.vmem [shape: f32[2,16,16,3], index: 0, kind: input, shape index: {}]   ;;  %s10577_s1 = inlined_call_operand.vmem [shape: f32[27,8], index: 1, kind: input, shape index: {}]   ;;  %s10578_s2 = inlined_call_operand.vmem [shape: f32[1,8], index: 2, kind: input, shape index: {}]   ;;  %s10579_s3 = inlined_call_operand.vmem [shape: f32[72,16], index: 3, kind: input, shape index: {}]   ;;  %s10580_s4 = inlined_call_operand.vmem [shape: f32[1,16], index: 4, kind: input, shape index: {}]   ;;  %s10581_s5 = inlined_call_operand.hbm [shape: f32[144,16], index: 5, kind: input, shape index: {}]   ;;  %s10582_s6 = inlined_call_operand.vmem [shape: f32[1,16], index: 6, kind: input, shape index: {}]   ;;  %s10583_s7 = inlined_call_operand.hbm [shape: f32[144,32], index: 7, kind: input, shape index: {}]   ;;  %s10584_s8 = inlined_call_operand.vmem [shape: f32[1,32], index: 8, kind: input, shape index: {}]   ;;  %s10585_s9 = inlined_call_operand.vmem [shape: f32[288,32], index: 9, kind: input, shape index: {}]   ;;  %s10586_s10 = inlined_call_operand.vmem [shape: f32[1,32], index: 10, kind: input, shape index: {}]   ;;  %s10587_s11 = inlined_call_operand.vmem [shape: f32[288,64], index: 11, kind: input, shape index: {}]   ;;  %s10588_s12 = inlined_call_operand.vmem [shape: f32[1,64], index: 12, kind: input, shape index: {}]   ;;  %s10589_s13 = inlined_call_operand.hbm [shape: f32[2,2,2,64], index: 13, kind: output, shape index: {}]  }
   0x1   :  { %10610 = sst [smem:[#allocation29_spill]] %s10576_s0 }
   0x2   :  { %18 = vsyncpa [#allocation18], 0 }
   0x3   :  { %19 = vsyncpa [#allocation21], 0 }
   0x4   :  { %20 = vsyncpa [#allocation19], 0 }
   0x5   :  { %22 = vsyncpa [#allocation19 + $0x1], 0  ;;  %s7743_s25 = smov 0   ;;  %s7745_s26 = smov 0  }
   0x6   :  { %s7747_s27 = smov 0   ;;  %s7749_s28 = smov 0  }
   0x7 LB: > { %10611 = sst [smem:[#allocation26_spill]] %s7642_s27  ;;  %s7764_s29 = sadd.s32 4294967295, %s7646_s28   ;;  %s7646_s28 = sphi %s7749_s28, %s10632_s28   ;;  %s7642_s27 = sphi %s7747_s27, %s10634_s27   ;;  %s7638_s26 = sphi %s7745_s26, %s10636_s26   ;;  %s7634_s25 = sphi %s7743_s25, %s10635_s25  }
   0x8   : > { %s6997_s30 = sadd.s32 4294967294, %s7646_s28   ;;  %s7768_s14 = sadd.s32 1, %s7646_s28  }
   0x9   : > { %10612 = sst [smem:[#allocation27_spill]] %s7768_s14  ;;  %s313_s15 = sadd.s32 1, %s7642_s27 }
   0xa   : > { %s310_s16 = ssub.s32 %s7646_s28, %s7768_s14  ;;  %p323_p0 = scmp.ne.s32.totalorder %s7642_s27, %s7638_s26 }
   0xb   : > { %p311_p1 = scmp.eq.s32.totalorder %s310_s16, 0  ;;  %p324_p2 = scmp.eq.s32.totalorder %s7764_s29, 1 }
   0xc   : > { %p329_p3 = scmp.ne.s32.totalorder %s7638_s26, %s7634_s25  ;;  %p330_p4 = scmp.eq.s32.totalorder %s6997_s30, 1 }
   0xd   : > { %s7779_s17 = scalar_select %p311_p1, %s7642_s27, %s313_s15  }
   0xe   : > { %p7781_p5 = por %p324_p2, %p323_p0  ;;  %p7785_p6 = por %p330_p4, %p329_p3 }
   0xf   : > { %10613 = sst [smem:[#allocation28_spill]] %s7779_s17  ;;  %p6998_p7 = scmp.ge.s32.totalorder %s7646_s28, 1 }
  0x10   : > { %s10615_s19 = scalar_select %p7785_p6, 1, 0 }
  0x11   : > { %p337_p8 = scmp.lt.s32.totalorder %s7646_s28, 3  ;;  %p10591_p9 = scmp.eq.s32.totalorder %s7764_s29, 0 }
  0x12   : > { %s7648_s21 = smov [#allocation17]   ;;  %s7649_s24 = smov [#allocation20]  }
  0x13   : > { %p7792_p10 = pnand %p6998_p7, %p337_p8  ;;  %s361_s22 = sshll.u32 %s7648_s21, 4  ;;  %s362_s22 = int_to_ptr.vmem [resolvable:$true] %s361_s22 }
  0x14   : > { %s377_s30 = sshll.u32 %s7649_s24, 4  ;;  %s7537_s15 = scalar_lea.vmem %s362_s22, 2304  ;;  %s378_s30 = int_to_ptr.vmem [resolvable:$true] %s377_s30 }
  0x15   : > { %p7451_p11 = pneg %p7792_p10  ;;  %p7538_p0 = scmp.ne.s32.totalorder %s362_s22, %s7537_s15 }
  0x16   : > { %p7545_p3 = scmp.lt.s32.totalorder %s362_s22, %s362_s22  ;;  %p7546_p4 = scmp.lt.s32.totalorder %s7537_s15, %s7537_s15 }
  0x17   : > { %p7800_p12 = pnand %p10591_p9, %p7451_p11 }
  0x18   : > { %p7547_p7 = por %p7546_p4, %p7545_p3 }
  0x19   : > { %p7528_p13 = pneg %p7800_p12 }
  0x1b   : > { %p7540_p1 = pnand %p7538_p0, %p7528_p13 }
  0x1d   : > { %p7541_p2 = pneg %p7540_p1 }
  0x1f   : > { %p7548_p8 = pnand %p7547_p7, %p7541_p2 }
  0x21   : > { %7551 = shalt.err (!%p7548_p8)
}
  0x22   : > { %s7650_s16 = smov 128   ;;  %s7651_s21 = smov 8  }
  0x23   : > { %7454 = dma.hbm_to_vmem [thread:$0]  (!%p7800_p12), %s10581_s5, 2304, %s362_s22, [#allocation18], %s7650_s16, %s7650_s16, %s7651_s21  }
  0x24   : > { %s7563_s27 = scalar_lea.vmem %s378_s30, 2304  ;;  %p7571_p9 = scmp.lt.s32.totalorder %s378_s30, %s378_s30 }
  0x25   : > { %p7564_p11 = scmp.ne.s32.totalorder %s378_s30, %s7563_s27  ;;  %p7572_p6 = scmp.lt.s32.totalorder %s7563_s27, %s7563_s27 }
  0x27   : > { %p7566_p0 = pnand %p7564_p11, %p7528_p13  ;;  %p7573_p3 = por %p7572_p6, %p7571_p9 }
  0x29   : > { %p7567_p1 = pneg %p7566_p0 }
  0x2b   : > { %p7574_p2 = pnand %p7573_p3, %p7567_p1 }
  0x2d   : > { %7577 = shalt.err (!%p7574_p2)
}
  0x2e   : > { %7457 = dma.hbm_to_vmem [thread:$0]  (!%p7800_p12), %s10583_s7, 2304, %s378_s30, [#allocation21], %s7650_s16, %s7650_s16, %s7651_s21  }
  0x2f   : > { %416 = sbr.rel (%p7792_p10) target bundleno = 2885 (0xb45), region = 72  ;;  %p10618_p4 = scmp.eq.s32.totalorder (!%p7792_p10), %s7764_s29, 0 }
  0x34   : > { %7621 = dma.done.wait (%p10618_p4), [#allocation18], 2304   ;;  %p10619_p13 = pmov %p10618_p4 }
  0x35   : > { %p10620_p7 = pmov %p10618_p4 }
  0x36   : > { %7623 = vsyncadd (%p10619_p13), [#allocation18], 4294964992 }
  0x37   : > { %7625 = dma.done.wait (%p10620_p7), [#allocation21], 2304   ;;  %p10621_p6 = pmov %p10618_p4 }
  0x38   : > { %vm469_vm0 = vcmask 23552   ;;  %v7652_v0 = vmov 0.0   ;;  %vm472_vm1 = vcmask 17408   ;;  %p464_p9 = scmp.lt.s32.totalorder %s7764_s29, 1  ;;  %vm479_vm2 = vcmask 16384   ;;  %s10622_s0 = sld [smem:[#allocation29_spill]] }
  0x39   : > { %7627 = vsyncadd (%p10621_p6), [#allocation21], 4294964992  ;;  %470 = vst.msk [vmem:[#allocation2 + $0x7] sm:$0xff] %vm469_vm0, %v7652_v0  ;;  %s10594_s23 = smov 6   ;;  %s7654_s30 = smov 3   ;;  %vm2325_vm3 = vcmask 1042432  }
  0x3a   : > { %471 = vst.msk [vmem:[#allocation2 + $0xf] sm:$0xff] %vm469_vm0, %v7652_v0  ;;  %475 = vst.msk [vmem:[#allocation2 + $0x227] sm:$0xff] %vm469_vm0, %v7652_v0  ;;  %s465_s27 = scalar_select %p464_p9, %s7764_s29, 1  ;;  %v2220_v36 = vld [vmem:[%s10577_s1 + $0x18] sm:$0x7]  ;;  %v2219_v37 = vld [vmem:[%s10577_s1 + $0x10] sm:$0xff] }
  0x3b   : > { %476 = vst.msk [vmem:[#allocation2 + $0x22f] sm:$0xff] %vm469_vm0, %v7652_v0  ;;  %s10600_s16 = smov 9   ;;  %s7656_s21 = smov 12   ;;  %7291 = vmatprep.subr.msk.mxu0 %vm2325_vm3, %v2220_v36  ;;  %v2218_v40 = vld [vmem:[%s10577_s1 + $0x8] sm:$0xff]  ;;  %v2217_v41 = vld [vmem:[%s10577_s1] sm:$0xff]  ;;  %vm800_vm4 = vcmask 48152  }
  0x3c   : > { %473 = vst.msk [vmem:[#allocation2 + $0x17] sm:$0x3] %vm472_vm1, %v7652_v0  ;;  %477 = vst.msk [vmem:[#allocation2 + $0x237] sm:$0x3] %vm472_vm1, %v7652_v0  ;;  %s7108_s14 = sshll.u32 %s465_s27, 8  ;;  %s10598_s24 = smov 15   ;;  %7292 = vmatpush3.msk.msra.mxu0 %vm2325_vm3, %v2220_v36 }
  0x3d   : > { %480 = vst.msk [vmem:[#allocation2 + $0x27] sm:$0x1] %vm479_vm2, %v7652_v0  ;;  %481 = vst.msk [vmem:[#allocation2 + $0x47] sm:$0x1] %vm479_vm2, %v7652_v0  ;;  %s10596_s15 = smov 18   ;;  %s7659_s27 = smov 21   ;;  %7293 = vmatprep.subr.mxu0 %v2219_v37 }
  0x3e   : > { %482 = vst.msk [vmem:[#allocation2 + $0x67] sm:$0x1] %vm479_vm2, %v7652_v0  ;;  %483 = vst.msk [vmem:[#allocation2 + $0x87] sm:$0x1] %vm479_vm2, %v7652_v0  ;;  %s7913_s22 = scalar_lea.vmem %s10622_s0, %s7108_s14  ;;  %7294 = vmatpush3.msra.mxu0 %v2219_v37  ;;  %s10602_s14 = smov 24   ;;  %vm993_vm5 = vcmask 72752  }
  0x3f   : > { %484 = vst.msk [vmem:[#allocation2 + $0xa7] sm:$0x1] %vm479_vm2, %v7652_v0  ;;  %485 = vst.msk [vmem:[#allocation2 + $0xc7] sm:$0x1] %vm479_vm2, %v7652_v0  ;;  %v512_v1 = vld [vmem:[%s7913_s22] sm:$0xff]  ;;  %v513_v2 = vld [vmem:[%s7913_s22 + $0x8] sm:$0xff]  ;;  %7295 = vmatprep.subr.mxu0 %v2218_v40 }
  0x40   : > { %486 = vst.msk [vmem:[#allocation2 + $0xe7] sm:$0x1] %vm479_vm2, %v7652_v0  ;;  %487 = vst.msk [vmem:[#allocation2 + $0x107] sm:$0x1] %vm479_vm2, %v7652_v0  ;;  %v514_v3 = vld [vmem:[%s7913_s22 + $0x10] sm:$0xff]  ;;  %v515_v6 = vld [vmem:[%s7913_s22 + $0x18] sm:$0xff]  ;;  %7296 = vmatpush3.msra.mxu0 %v2218_v40 }
  0x41   : > { %488 = vst.msk [vmem:[#allocation2 + $0x127] sm:$0x1] %vm479_vm2, %v7652_v0  ;;  %489 = vst.msk [vmem:[#allocation2 + $0x147] sm:$0x1] %vm479_vm2, %v7652_v0  ;;  %v833_v4 = vld [vmem:[#allocation2 + $0x9] sm:$0xff]  ;;  %v516_v9 = vld [vmem:[%s7913_s22 + $0x20] sm:$0xff]  ;;  %7297 = vmatprep.subr.mxu0 %v2217_v41 }
  0x42   : > { %490 = vst.msk [vmem:[#allocation2 + $0x167] sm:$0x1] %vm479_vm2, %v7652_v0  ;;  %491 = vst.msk [vmem:[#allocation2 + $0x187] sm:$0x1] %vm479_vm2, %v7652_v0  ;;  %v640_v5 = vld [vmem:[#allocation2 + $0x8] sm:$0xff]  ;;  %897 = vrot.lane.b32.xlu1 %v833_v4, %s10594_s23  ;;  %v518_v11 = vld [vmem:[%s7913_s22 + $0x30] sm:$0xff]  ;;  %7298 = vmatpush3.msra.mxu0 %v2217_v41 }
  0x43   : > { %492 = vst.msk [vmem:[#allocation2 + $0x1a7] sm:$0x1] %vm479_vm2, %v7652_v0  ;;  %493 = vst.msk [vmem:[#allocation2 + $0x1c7] sm:$0x1] %vm479_vm2, %v7652_v0  ;;  %704 = vrot.lane.b32.xlu0 %v640_v5, %s7654_s30  ;;  %v834_v7 = vld [vmem:[#allocation2 + $0x11] sm:$0xff]  ;;  %v517_v10 = vld [vmem:[%s7913_s22 + $0x28] sm:$0xff]  ;;  %5265 = vmatprep.subr.mxu0 %v7652_v0 }
  0x44   : > { %494 = vst.msk [vmem:[#allocation2 + $0x1e7] sm:$0x1] %vm479_vm2, %v7652_v0  ;;  %495 = vst.msk [vmem:[#allocation2 + $0x207] sm:$0x1] %vm479_vm2, %v7652_v0  ;;  %v641_v8 = vld [vmem:[#allocation2 + $0x10] sm:$0xff]  ;;  %v519_v12 = vld [vmem:[%s7913_s22 + $0x38] sm:$0xff] }
  0x45   : > { %496 = vst.msk [vmem:[#allocation2 + $0x38] sm:$0x1] %vm479_vm2, %v7652_v0  ;;  %497 = vst.msk [vmem:[#allocation2 + $0x58] sm:$0x1] %vm479_vm2, %v7652_v0  ;;  %v576_v13 = vld [vmem:[#allocation2 + $0x7] sm:$0xff]  ;;  %v577_v14 = vld [vmem:[#allocation2 + $0xf] sm:$0xff] }
  0x46   : > { %498 = vst.msk [vmem:[#allocation2 + $0x78] sm:$0x1] %vm479_vm2, %v7652_v0  ;;  %499 = vst.msk [vmem:[#allocation2 + $0x98] sm:$0x1] %vm479_vm2, %v7652_v0  ;;  %v520_v15 = vld [vmem:[%s7913_s22 + $0x40] sm:$0xff]  ;;  %v521_v16 = vld [vmem:[%s7913_s22 + $0x48] sm:$0xff]  ;;  %899 = vrot.lane.b32.xlu1 %v834_v7, %s10594_s23 }
  0x47   : > { %500 = vst.msk [vmem:[#allocation2 + $0xb8] sm:$0x1] %vm479_vm2, %v7652_v0  ;;  %501 = vst.msk [vmem:[#allocation2 + $0xd8] sm:$0x1] %vm479_vm2, %v7652_v0  ;;  %706 = vrot.lane.b32.xlu0 %v641_v8, %s7654_s30  ;;  %v522_v30 = vld [vmem:[%s7913_s22 + $0x50] sm:$0xff]  ;;  %v523_v32 = vld [vmem:[%s7913_s22 + $0x58] sm:$0xff] }
  0x48   : > { %502 = vst.msk [vmem:[#allocation2 + $0xf8] sm:$0x1] %vm479_vm2, %v7652_v0  ;;  %503 = vst.msk [vmem:[#allocation2 + $0x118] sm:$0x1] %vm479_vm2, %v7652_v0  ;;  %v524_v43 = vld [vmem:[%s7913_s22 + $0x60] sm:$0xff]  ;;  %v525_v45 = vld [vmem:[%s7913_s22 + $0x68] sm:$0xff] }
  0x49   : > { %504 = vst.msk [vmem:[#allocation2 + $0x138] sm:$0x1] %vm479_vm2, %v7652_v0  ;;  %505 = vst.msk [vmem:[#allocation2 + $0x158] sm:$0x1] %vm479_vm2, %v7652_v0  ;;  %v526_v51 = vld [vmem:[%s7913_s22 + $0x70] sm:$0xff]  ;;  %v527_v53 = vld [vmem:[%s7913_s22 + $0x78] sm:$0xff] }
  0x4a   : > { %506 = vst.msk [vmem:[#allocation2 + $0x178] sm:$0x1] %vm479_vm2, %v7652_v0  ;;  %507 = vst.msk [vmem:[#allocation2 + $0x198] sm:$0x1] %vm479_vm2, %v7652_v0  ;;  %v528_v59 = vld [vmem:[%s7913_s22 + $0x80] sm:$0xff]  ;;  %vm1186_vm6 = vcmask 97352  }
  0x4b   : > { %508 = vst.msk [vmem:[#allocation2 + $0x1b8] sm:$0x1] %vm479_vm2, %v7652_v0  ;;  %509 = vst.msk [vmem:[#allocation2 + $0x1d8] sm:$0x1] %vm479_vm2, %v7652_v0  ;;  %vm1379_vm7 = vcmask 121952   ;;  %vm1572_vm8 = vcmask 146552  }
  0x4c   : > { %510 = vst.msk [vmem:[#allocation2 + $0x1f8] sm:$0x1] %vm479_vm2, %v7652_v0  ;;  %511 = vst.msk [vmem:[#allocation2 + $0x218] sm:$0x1] %vm479_vm2, %v7652_v0  ;;  %vm1766_vm9 = vcmask 171152   ;;  %vm1959_vm10 = vcmask 195752  }
  0x4d   : > { %544 = vst.msk [vmem:[#allocation2 + $0x28] sm:$0xff] %vm469_vm0, %v512_v1  ;;  %545 = vst.msk [vmem:[#allocation2 + $0x30] sm:$0xff] %vm469_vm0, %v513_v2  ;;  %v529_v2 = vld [vmem:[%s7913_s22 + $0x88] sm:$0xff]  ;;  %vm2152_vm11 = vcmask 220352   ;;  %vm2228_vm12 = vcmask 220160   ;;  %vm2586_vm13 = vcmask 64512  }
  0x4e   : > { %546 = vst.msk [vmem:[#allocation2 + $0x48] sm:$0xff] %vm469_vm0, %v514_v3  ;;  %547 = vst.msk [vmem:[#allocation2 + $0x50] sm:$0xff] %vm469_vm0, %v515_v6  ;;  %vm2596_vm14 = vcmask 57344   ;;  %vm2589_vm15 = vcmask 58368   ;;  %s7664_s17 = smov 40   ;;  %vm3078_vm1 = vcmask 195712  }
  0x4f   : > { %548 = vst.msk [vmem:[#allocation2 + $0x68] sm:$0xff] %vm469_vm0, %v516_v9  ;;  %549 = vst.msk [vmem:[#allocation2 + $0x70] sm:$0xff] %vm469_vm0, %v517_v10  ;;  %vm3271_vm2 = vcmask 261312   ;;  %vm3464_vm3 = vcmask 326912   ;;  %s10628_s20 = smov 96   ;;  %s461_s0 = sand.u32 1, %s7638_s26  }
  0x50   : > { %550 = vst.msk [vmem:[#allocation2 + $0x88] sm:$0xff] %vm469_vm0, %v518_v11  ;;  %551 = vst.msk [vmem:[#allocation2 + $0x90] sm:$0xff] %vm469_vm0, %v519_v12 }
  0x51   : > { %608 = vst.msk [vmem:[#allocation8] sm:$0xff] %vm469_vm0, %v576_v13  ;;  %609 = vst.msk [vmem:[#allocation8 + $0x8] sm:$0xff] %vm469_vm0, %v577_v14 }
  0x52   : > { %552 = vst.msk [vmem:[#allocation2 + $0xa8] sm:$0xff] %vm469_vm0, %v520_v15  ;;  %553 = vst.msk [vmem:[#allocation2 + $0xb0] sm:$0xff] %vm469_vm0, %v521_v16 }
  0x53   : > { %554 = vst.msk [vmem:[#allocation2 + $0xc8] sm:$0xff] %vm469_vm0, %v522_v30  ;;  %555 = vst.msk [vmem:[#allocation2 + $0xd0] sm:$0xff] %vm469_vm0, %v523_v32 }
  0x54   : > { %v1027_v17 = vld [vmem:[#allocation2 + $0x2f] sm:$0xff]  ;;  %v1026_v18 = vld [vmem:[#allocation2 + $0x27] sm:$0xff]  ;;  %556 = vst.msk [vmem:[#allocation2 + $0xe8] sm:$0xff] %vm469_vm0, %v524_v43  ;;  %557 = vst.msk [vmem:[#allocation2 + $0xf0] sm:$0xff] %vm469_vm0, %v525_v45 }
  0x55   : > { %v1606_v19 = vld [vmem:[#allocation2 + $0x47] sm:$0xff]  ;;  %610 = vst.msk [vmem:[#allocation8 + $0x10] sm:$0xff] %vm469_vm0, %v1026_v18  ;;  %611 = vst.msk [vmem:[#allocation8 + $0x18] sm:$0xff] %vm469_vm0, %v1027_v17  ;;  %1092 = vrot.lane.b32.xlu1 %v1027_v17, %s10600_s16  ;;  %1090 = vrot.lane.b32.xlu0 %v1026_v18, %s10600_s16  ;;  %v1607_v20 = vld [vmem:[#allocation2 + $0x4f] sm:$0xff] }
  0x56   : > { %612 = vst.msk [vmem:[#allocation8 + $0x20] sm:$0xff] %vm469_vm0, %v1606_v19  ;;  %v642_v21 = vld [vmem:[#allocation2 + $0x28] sm:$0xff]  ;;  %613 = vst.msk [vmem:[#allocation8 + $0x28] sm:$0xff] %vm469_vm0, %v1607_v20  ;;  %v1220_v27 = vld [vmem:[#allocation2 + $0x30] sm:$0xff] }
  0x57   : > { %v7947_v22 = vld [vmem:[#allocation2 + $0x67] sm:$0xff]  ;;  %v7949_v23 = vld [vmem:[#allocation2 + $0x6f] sm:$0xff]  ;;  %558 = vst.msk [vmem:[#allocation2 + $0x108] sm:$0xff] %vm469_vm0, %v526_v51  ;;  %559 = vst.msk [vmem:[#allocation2 + $0x110] sm:$0xff] %vm469_vm0, %v527_v53 }
  0x58   : > { %614 = vst.msk [vmem:[#allocation8 + $0x30] sm:$0xff] %vm469_vm0, %v7947_v22  ;;  %615 = vst.msk [vmem:[#allocation8 + $0x38] sm:$0xff] %vm469_vm0, %v7949_v23  ;;  %v7957_v24 = vld [vmem:[#allocation2 + $0x87] sm:$0xff]  ;;  %v7959_v25 = vld [vmem:[#allocation2 + $0x8f] sm:$0xff] }
  0x59   : > { %708 = vrot.lane.b32.xlu1 %v642_v21, %s7654_s30  ;;  %1283 = vrot.lane.b32.xlu0 %v642_v21, %s7656_s21  ;;  %v1412_v26 = vld [vmem:[#allocation2 + $0x29] sm:$0xff]  ;;  %616 = vst.msk [vmem:[#allocation8 + $0x40] sm:$0xff] %vm469_vm0, %v7957_v24  ;;  %617 = vst.msk [vmem:[#allocation8 + $0x48] sm:$0xff] %vm469_vm0, %v7959_v25  ;;  %v1413_v31 = vld [vmem:[#allocation2 + $0x31] sm:$0xff] }
  0x5a   : > { %v7965_v28 = vld [vmem:[#allocation2 + $0xa7] sm:$0xff]  ;;  %v7967_v29 = vld [vmem:[#allocation2 + $0xaf] sm:$0xff]  ;;  %560 = vst.msk [vmem:[#allocation2 + $0x128] sm:$0xff] %vm469_vm0, %v528_v59  ;;  %561 = vst.msk [vmem:[#allocation2 + $0x130] sm:$0xff] %vm469_vm0, %v529_v2 }
  0x5b   : > { %618 = vst.msk [vmem:[#allocation8 + $0x50] sm:$0xff] %vm469_vm0, %v7965_v28  ;;  %619 = vst.msk [vmem:[#allocation8 + $0x58] sm:$0xff] %vm469_vm0, %v7967_v29  ;;  %v7982_v33 = vld [vmem:[#allocation2 + $0xc7] sm:$0xff]  ;;  %v7989_v35 = vld [vmem:[#allocation2 + $0xcf] sm:$0xff] }
  0x5c   : > { %620 = vst.msk [vmem:[#allocation8 + $0x60] sm:$0xff] %vm469_vm0, %v7982_v33  ;;  %v1799_v34 = vld [vmem:[#allocation2 + $0x48] sm:$0xff]  ;;  %621 = vst.msk [vmem:[#allocation8 + $0x68] sm:$0xff] %vm469_vm0, %v7989_v35  ;;  %v1800_v39 = vld [vmem:[#allocation2 + $0x50] sm:$0xff] }
  0x5d   : > { %1476 = vrot.lane.b32.xlu1 %v1412_v26, %s10598_s24  ;;  %1285 = vrot.lane.b32.xlu0 %v1220_v27, %s7656_s21  ;;  %v1992_v38 = vld [vmem:[#allocation2 + $0x49] sm:$0xff]  ;;  %v1993_v42 = vld [vmem:[#allocation2 + $0x51] sm:$0xff]  ;;  %2587 = vst.msk [vmem:[#allocation3 + $0x7] sm:$0xff] %vm2586_vm13, %v7652_v0  ;;  %2588 = vst.msk [vmem:[#allocation3 + $0xf] sm:$0xff] %vm2586_vm13, %v7652_v0 }
  0x5e   : > { %v8020_v44 = vld [vmem:[#allocation2 + $0xe7] sm:$0xff]  ;;  %v8032_v47 = vld [vmem:[#allocation2 + $0xef] sm:$0xff]  ;;  %2592 = vst.msk [vmem:[#allocation3 + $0x227] sm:$0xff] %vm2586_vm13, %v7652_v0  ;;  %2593 = vst.msk [vmem:[#allocation3 + $0x22f] sm:$0xff] %vm2586_vm13, %v7652_v0 }
  0x5f   : > { %622 = vst.msk [vmem:[#allocation8 + $0x70] sm:$0xff] %vm469_vm0, %v8020_v44  ;;  %v1801_v46 = vld [vmem:[#allocation2 + $0x68] sm:$0xff]  ;;  %623 = vst.msk [vmem:[#allocation8 + $0x78] sm:$0xff] %vm469_vm0, %v8032_v47  ;;  %v1802_v49 = vld [vmem:[#allocation2 + $0x70] sm:$0xff] }
  0x60   : > { %v1994_v48 = vld [vmem:[#allocation2 + $0x69] sm:$0xff]  ;;  %v1995_v50 = vld [vmem:[#allocation2 + $0x71] sm:$0xff]  ;;  %2597 = vst.msk [vmem:[#allocation3 + $0x27] sm:$0x1] %vm2596_vm14, %v7652_v0  ;;  %2598 = vst.msk [vmem:[#allocation3 + $0x47] sm:$0x1] %vm2596_vm14, %v7652_v0 }
  0x61   : > { %901 = vrot.lane.b32.xlu1 %v1412_v26, %s10594_s23  ;;  %710 = vrot.lane.b32.xlu0 %v1220_v27, %s7654_s30  ;;  %v8052_v52 = vld [vmem:[#allocation2 + $0x107] sm:$0xff]  ;;  %v8064_v55 = vld [vmem:[#allocation2 + $0x10f] sm:$0xff]  ;;  %v531_v26 = vld [vmem:[%s7913_s22 + $0x98] sm:$0xff]  ;;  %2599 = vst.msk [vmem:[#allocation3 + $0x67] sm:$0x1] %vm2596_vm14, %v7652_v0 }
  0x62   : > { %624 = vst.msk [vmem:[#allocation8 + $0x80] sm:$0xff] %vm469_vm0, %v8052_v52  ;;  %v1803_v54 = vld [vmem:[#allocation2 + $0x88] sm:$0xff]  ;;  %625 = vst.msk [vmem:[#allocation8 + $0x88] sm:$0xff] %vm469_vm0, %v8064_v55  ;;  %v1804_v57 = vld [vmem:[#allocation2 + $0x90] sm:$0xff] }
  0x63   : > { %v1996_v56 = vld [vmem:[#allocation2 + $0x89] sm:$0xff]  ;;  %v1997_v58 = vld [vmem:[#allocation2 + $0x91] sm:$0xff]  ;;  %563 = vst.msk [vmem:[#allocation2 + $0x150] sm:$0xff] %vm469_vm0, %v531_v26 }
  0x64   : > { %v8087_v1 = vld [vmem:[#allocation2 + $0x127] sm:$0xff]  ;;  %v8104_v8 = vld [vmem:[#allocation2 + $0x12f] sm:$0xff]  ;;  %2600 = vst.msk [vmem:[#allocation3 + $0x87] sm:$0x1] %vm2596_vm14, %v7652_v0  ;;  %2601 = vst.msk [vmem:[#allocation3 + $0xa7] sm:$0x1] %vm2596_vm14, %v7652_v0 }
  0x65   : > { %1670 = vrot.lane.b32.xlu1 %v1606_v19, %s10596_s15  ;;  %1478 = vrot.lane.b32.xlu0 %v1413_v31, %s10598_s24  ;;  %s10625_s24 = smov 18   ;;  %626 = vst.msk [vmem:[#allocation8 + $0x90] sm:$0xff] %vm469_vm0, %v8087_v1  ;;  %v1805_v5 = vld [vmem:[#allocation2 + $0xa8] sm:$0xff]  ;;  %627 = vst.msk [vmem:[#allocation8 + $0x98] sm:$0xff] %vm469_vm0, %v8104_v8  ;;  %v1806_v12 = vld [vmem:[#allocation2 + $0xb0] sm:$0xff] }
  0x66   : > { %v1998_v11 = vld [vmem:[#allocation2 + $0xa9] sm:$0xff]  ;;  %v1999_v17 = vld [vmem:[#allocation2 + $0xb1] sm:$0xff]  ;;  %2602 = vst.msk [vmem:[#allocation3 + $0xc7] sm:$0x1] %vm2596_vm14, %v7652_v0  ;;  %2603 = vst.msk [vmem:[#allocation3 + $0xe7] sm:$0x1] %vm2596_vm14, %v7652_v0 }
  0x67   : > { %v2000_v37 = vld [vmem:[#allocation2 + $0xc9] sm:$0xff]  ;;  %2604 = vst.msk [vmem:[#allocation3 + $0x107] sm:$0x1] %vm2596_vm14, %v7652_v0  ;;  %2605 = vst.msk [vmem:[#allocation3 + $0x127] sm:$0x1] %vm2596_vm14, %v7652_v0 }
  0x68   : > { %v1809_v59 = vld [vmem:[#allocation2 + $0xe8] sm:$0xff]  ;;  %2606 = vst.msk [vmem:[#allocation3 + $0x147] sm:$0x1] %vm2596_vm14, %v7652_v0  ;;  %2607 = vst.msk [vmem:[#allocation3 + $0x167] sm:$0x1] %vm2596_vm14, %v7652_v0 }
  0x69   : > { %1094 = vrot.lane.b32.xlu1 %v1606_v19, %s10600_s16  ;;  %903 = vrot.lane.b32.xlu0 %v1413_v31, %s10594_s23  ;;  %s10623_s23 = smov 15   ;;  %2608 = vst.msk [vmem:[#allocation3 + $0x187] sm:$0x1] %vm2596_vm14, %v7652_v0  ;;  %2609 = vst.msk [vmem:[#allocation3 + $0x1a7] sm:$0x1] %vm2596_vm14, %v7652_v0 }
  0x6a   : > { %2610 = vst.msk [vmem:[#allocation3 + $0x1c7] sm:$0x1] %vm2596_vm14, %v7652_v0  ;;  %2611 = vst.msk [vmem:[#allocation3 + $0x1e7] sm:$0x1] %vm2596_vm14, %v7652_v0 }
  0x6b   : > { %2612 = vst.msk [vmem:[#allocation3 + $0x207] sm:$0x1] %vm2596_vm14, %v7652_v0  ;;  %2613 = vst.msk [vmem:[#allocation3 + $0x38] sm:$0x1] %vm2596_vm14, %v7652_v0 }
  0x6c   : > { %2614 = vst.msk [vmem:[#allocation3 + $0x58] sm:$0x1] %vm2596_vm14, %v7652_v0  ;;  %2615 = vst.msk [vmem:[#allocation3 + $0x78] sm:$0x1] %vm2596_vm14, %v7652_v0 }
  0x6d   : > { %1863 = vrot.lane.b32.xlu1 %v1799_v34, %s7659_s27  ;;  %1672 = vrot.lane.b32.xlu0 %v1607_v20, %s10596_s15  ;;  %s10626_s15 = smov 9   ;;  %2616 = vst.msk [vmem:[#allocation3 + $0x98] sm:$0x1] %vm2596_vm14, %v7652_v0  ;;  %2617 = vst.msk [vmem:[#allocation3 + $0xb8] sm:$0x1] %vm2596_vm14, %v7652_v0 }
  0x6e   : > { %2618 = vst.msk [vmem:[#allocation3 + $0xd8] sm:$0x1] %vm2596_vm14, %v7652_v0  ;;  %2619 = vst.msk [vmem:[#allocation3 + $0xf8] sm:$0x1] %vm2596_vm14, %v7652_v0 }
  0x6f   : > { %2620 = vst.msk [vmem:[#allocation3 + $0x118] sm:$0x1] %vm2596_vm14, %v7652_v0  ;;  %2621 = vst.msk [vmem:[#allocation3 + $0x138] sm:$0x1] %vm2596_vm14, %v7652_v0 }
  0x70   : > { %2622 = vst.msk [vmem:[#allocation3 + $0x158] sm:$0x1] %vm2596_vm14, %v7652_v0  ;;  %2623 = vst.msk [vmem:[#allocation3 + $0x178] sm:$0x1] %vm2596_vm14, %v7652_v0 }
  0x71   : > { %1287 = vrot.lane.b32.xlu1 %v1799_v34, %s7656_s21  ;;  %1096 = vrot.lane.b32.xlu0 %v1607_v20, %s10600_s16  ;;  %s10624_s16 = smov 6   ;;  %v530_v20 = vld [vmem:[%s7913_s22 + $0x90] sm:$0xff]  ;;  %2624 = vst.msk [vmem:[#allocation3 + $0x198] sm:$0x1] %vm2596_vm14, %v7652_v0  ;;  %2625 = vst.msk [vmem:[#allocation3 + $0x1b8] sm:$0x1] %vm2596_vm14, %v7652_v0 }
  0x72   : > { %562 = vst.msk [vmem:[#allocation2 + $0x148] sm:$0xff] %vm469_vm0, %v530_v20 }
  0x73   : > { %2626 = vst.msk [vmem:[#allocation3 + $0x1d8] sm:$0x1] %vm2596_vm14, %v7652_v0  ;;  %2627 = vst.msk [vmem:[#allocation3 + $0x1f8] sm:$0x1] %vm2596_vm14, %v7652_v0 }
  0x74   : > { %2628 = vst.msk [vmem:[#allocation3 + $0x218] sm:$0x1] %vm2596_vm14, %v7652_v0  ;;  %vm4978_vm14 = vcmask 523648  }
  0x75   : > { %2056 = vrot.lane.b32.xlu1 %v1992_v38, %s10602_s14  ;;  %1865 = vrot.lane.b32.xlu0 %v1800_v39, %s7659_s27  ;;  %2590 = vst.msk [vmem:[#allocation3 + $0x17] sm:$0x3] %vm2589_vm15, %v7652_v0  ;;  %2594 = vst.msk [vmem:[#allocation3 + $0x237] sm:$0x3] %vm2589_vm15, %v7652_v0  ;;  %vm5027_vm15 = vcmask 654848  }
  0x79   : > { %1289 = vrot.lane.b32.xlu1 %v1800_v39, %s7656_s21  ;;  %712 = vrot.lane.b32.xlu0 %v1799_v34, %s7654_s30  ;;  %v8152_v32 = vld [vmem:[#allocation2 + $0x14f] sm:$0xff] }
  0x7a   : > { %629 = vst.msk [vmem:[#allocation8 + $0xa8] sm:$0xff] %vm469_vm0, %v8152_v32 }
  0x7d   : > { %2058 = vrot.lane.b32.xlu1 %v1993_v42, %s10602_s14  ;;  %1480 = vrot.lane.b32.xlu0 %v1992_v38, %s10623_s23 }
  0x81   : > { %905 = vrot.lane.b32.xlu1 %v1992_v38, %s10624_s16  ;;  %714 = vrot.lane.b32.xlu0 %v1800_v39, %s7654_s30  ;;  %v1808_v38 = vld [vmem:[#allocation2 + $0xd0] sm:$0xff] }
  0x85   : > { %1674 = vrot.lane.b32.xlu1 %v7947_v22, %s10625_s24  ;;  %1482 = vrot.lane.b32.xlu0 %v1993_v42, %s10623_s23 }
  0x89   : > { %1098 = vrot.lane.b32.xlu1 %v7947_v22, %s10626_s15  ;;  %907 = vrot.lane.b32.xlu0 %v1993_v42, %s10624_s16 }
  0x8d   : > { %1867 = vrot.lane.b32.xlu1 %v1801_v46, %s7659_s27  ;;  %1676 = vrot.lane.b32.xlu0 %v7949_v23, %s10625_s24 }
  0x91   : > { %1291 = vrot.lane.b32.xlu1 %v1801_v46, %s7656_s21  ;;  %1100 = vrot.lane.b32.xlu0 %v7949_v23, %s10626_s15 }
  0x95   : > { %2060 = vrot.lane.b32.xlu1 %v1994_v48, %s10602_s14  ;;  %1869 = vrot.lane.b32.xlu0 %v1802_v49, %s7659_s27 }
  0x99   : > { %1293 = vrot.lane.b32.xlu1 %v1802_v49, %s7656_s21  ;;  %716 = vrot.lane.b32.xlu0 %v1801_v46, %s7654_s30 }
  0x9d   : > { %2062 = vrot.lane.b32.xlu1 %v1995_v50, %s10602_s14  ;;  %1484 = vrot.lane.b32.xlu0 %v1994_v48, %s10623_s23 }
  0xa1   : > { %909 = vrot.lane.b32.xlu1 %v1994_v48, %s10624_s16  ;;  %718 = vrot.lane.b32.xlu0 %v1802_v49, %s7654_s30  ;;  %v532_v48 = vld [vmem:[%s7913_s22 + $0xa0] sm:$0xff] }
  0xa2   : > { %564 = vst.msk [vmem:[#allocation2 + $0x168] sm:$0xff] %vm469_vm0, %v532_v48 }
  0xa5   : > { %1678 = vrot.lane.b32.xlu1 %v7957_v24, %s10625_s24  ;;  %1486 = vrot.lane.b32.xlu0 %v1995_v50, %s10623_s23 }
  0xa9   : > { %1102 = vrot.lane.b32.xlu1 %v7957_v24, %s10626_s15  ;;  %911 = vrot.lane.b32.xlu0 %v1995_v50, %s10624_s16 }
  0xad   : > { %1871 = vrot.lane.b32.xlu1 %v1803_v54, %s7659_s27  ;;  %1680 = vrot.lane.b32.xlu0 %v7959_v25, %s10625_s24 }
  0xb1   : > { %1295 = vrot.lane.b32.xlu1 %v1803_v54, %s7656_s21  ;;  %1104 = vrot.lane.b32.xlu0 %v7959_v25, %s10626_s15  ;;  %v8136_v25 = vld [vmem:[#allocation2 + $0x147] sm:$0xff] }
  0xb2   : > { %628 = vst.msk [vmem:[#allocation8 + $0xa0] sm:$0xff] %vm469_vm0, %v8136_v25 }
  0xb4   : > { %v898_v60 = vpop.permute.xlu1 %897 }
  0xb5   : > { %2064 = vrot.lane.b32.xlu1 %v1996_v56, %s10602_s14  ;;  %1873 = vrot.lane.b32.xlu0 %v1804_v57, %s7659_s27  ;;  %v705_v61 = vpop.permute.xlu0 %704 }
  0xb6   : > { %801 = vst.msk [vmem:[#allocation8] sm:$0xff] %vm800_vm4, %v705_v61 }
  0xb7   : > { %994 = vst.msk [vmem:[#allocation8] sm:$0xff] %vm993_vm5, %v898_v60 }
  0xb8   : > { %v900_v62 = vpop.permute.xlu1 %899 }
  0xb9   : > { %1297 = vrot.lane.b32.xlu1 %v1804_v57, %s7656_s21  ;;  %720 = vrot.lane.b32.xlu0 %v1803_v54, %s7654_s30  ;;  %v707_v63 = vpop.permute.xlu0 %706  ;;  %v8186_v54 = vld [vmem:[#allocation2 + $0x167] sm:$0xff] }
  0xba   : > { %802 = vst.msk [vmem:[#allocation8 + $0x8] sm:$0xff] %vm800_vm4, %v707_v63 }
  0xbb   : > { %995 = vst.msk [vmem:[#allocation8 + $0x8] sm:$0xff] %vm993_vm5, %v900_v62 }
  0xbc   : > { %630 = vst.msk [vmem:[#allocation8 + $0xb0] sm:$0xff] %vm469_vm0, %v8186_v54 }
  0xbd   : > { %2066 = vrot.lane.b32.xlu1 %v1997_v58, %s10602_s14  ;;  %1488 = vrot.lane.b32.xlu0 %v1996_v56, %s10623_s23 }
  0xc1   : > { %913 = vrot.lane.b32.xlu1 %v1996_v56, %s10624_s16  ;;  %722 = vrot.lane.b32.xlu0 %v1804_v57, %s7654_s30  ;;  %v533_v56 = vld [vmem:[%s7913_s22 + $0xa8] sm:$0xff] }
  0xc2   : > { %565 = vst.msk [vmem:[#allocation2 + $0x170] sm:$0xff] %vm469_vm0, %v533_v56 }
  0xc5   : > { %1682 = vrot.lane.b32.xlu1 %v7965_v28, %s10625_s24  ;;  %1490 = vrot.lane.b32.xlu0 %v1997_v58, %s10623_s23 }
  0xc7   : > { %v1093_v3 = vpop.permute.xlu1 %1092  ;;  %v1091_v4 = vpop.permute.xlu0 %1090 }
  0xc8   : > { %1188 = vst.msk [vmem:[#allocation8 + $0x8] sm:$0xff] %vm1186_vm6, %v1093_v3  ;;  %1187 = vst.msk [vmem:[#allocation8] sm:$0xff] %vm1186_vm6, %v1091_v4  ;;  %v2002_v3 = vld [vmem:[#allocation2 + $0xe9] sm:$0xff] }
  0xc9   : > { %1106 = vrot.lane.b32.xlu1 %v7965_v28, %s10626_s15  ;;  %915 = vrot.lane.b32.xlu0 %v1997_v58, %s10624_s16  ;;  %v8202_v62 = vld [vmem:[#allocation2 + $0x16f] sm:$0xff] }
  0xca   : > { %631 = vst.msk [vmem:[#allocation8 + $0xb8] sm:$0xff] %vm469_vm0, %v8202_v62  ;;  %v1810_v4 = vld [vmem:[#allocation2 + $0xf0] sm:$0xff] }
  0xcb   : > { %v709_v6 = vpop.permute.xlu1 %708  ;;  %v1284_v7 = vpop.permute.xlu0 %1283 }
  0xcc   : > { %803 = vst.msk [vmem:[#allocation8 + $0x10] sm:$0xff] %vm800_vm4, %v709_v6 }
  0xcd   : > { %1380 = vst.msk [vmem:[#allocation8] sm:$0xff] %vm1379_vm7, %v1284_v7  ;;  %1875 = vrot.lane.b32.xlu1 %v1805_v5, %s7659_s27  ;;  %1684 = vrot.lane.b32.xlu0 %v7967_v29, %s10625_s24 }
  0xcf   : > { %v1477_v9 = vpop.permute.xlu1 %1476  ;;  %v1286_v10 = vpop.permute.xlu0 %1285 }
  0xd0   : > { %1573 = vst.msk [vmem:[#allocation8] sm:$0xff] %vm1572_vm8, %v1477_v9 }
  0xd1   : > { %1381 = vst.msk [vmem:[#allocation8 + $0x8] sm:$0xff] %vm1379_vm7, %v1286_v10  ;;  %1299 = vrot.lane.b32.xlu1 %v1805_v5, %s7656_s21  ;;  %1108 = vrot.lane.b32.xlu0 %v7967_v29, %s10626_s15  ;;  %v1807_v29 = vld [vmem:[#allocation2 + $0xc8] sm:$0xff] }
  0xd3   : > { %v902_v13 = vpop.permute.xlu1 %901  ;;  %v711_v14 = vpop.permute.xlu0 %710 }
  0xd4   : > { %996 = vst.msk [vmem:[#allocation8 + $0x10] sm:$0xff] %vm993_vm5, %v902_v13  ;;  %v534_v13 = vld [vmem:[%s7913_s22 + $0xb0] sm:$0xff] }
  0xd5   : > { %804 = vst.msk [vmem:[#allocation8 + $0x18] sm:$0xff] %vm800_vm4, %v711_v14  ;;  %2068 = vrot.lane.b32.xlu1 %v1998_v11, %s10602_s14  ;;  %1877 = vrot.lane.b32.xlu0 %v1806_v12, %s7659_s27 }
  0xd6   : > { %566 = vst.msk [vmem:[#allocation2 + $0x188] sm:$0xff] %vm469_vm0, %v534_v13 }
  0xd7   : > { %v1671_v15 = vpop.permute.xlu1 %1670  ;;  %v1479_v16 = vpop.permute.xlu0 %1478 }
  0xd8   : > { %1767 = vst.msk [vmem:[#allocation8] sm:$0xff] %vm1766_vm9, %v1671_v15 }
  0xd9   : > { %1574 = vst.msk [vmem:[#allocation8 + $0x8] sm:$0xff] %vm1572_vm8, %v1479_v16  ;;  %1301 = vrot.lane.b32.xlu1 %v1806_v12, %s7656_s21  ;;  %724 = vrot.lane.b32.xlu0 %v1805_v5, %s7654_s30 }
  0xdb   : > { %v1095_v18 = vpop.permute.xlu1 %1094  ;;  %v904_v19 = vpop.permute.xlu0 %903 }
  0xdc   : > { %1189 = vst.msk [vmem:[#allocation8 + $0x10] sm:$0xff] %vm1186_vm6, %v1095_v18 }
  0xdd   : > { %997 = vst.msk [vmem:[#allocation8 + $0x18] sm:$0xff] %vm993_vm5, %v904_v19  ;;  %2070 = vrot.lane.b32.xlu1 %v1999_v17, %s10602_s14  ;;  %1492 = vrot.lane.b32.xlu0 %v1998_v11, %s10623_s23  ;;  %v8236_v18 = vld [vmem:[#allocation2 + $0x187] sm:$0xff]  ;;  %v535_v19 = vld [vmem:[%s7913_s22 + $0xb8] sm:$0xff] }
  0xde   : > { %567 = vst.msk [vmem:[#allocation2 + $0x190] sm:$0xff] %vm469_vm0, %v535_v19  ;;  %632 = vst.msk [vmem:[#allocation8 + $0xc0] sm:$0xff] %vm469_vm0, %v8236_v18 }
  0xdf   : > { %v1864_v21 = vpop.permute.xlu1 %1863  ;;  %v1673_v22 = vpop.permute.xlu0 %1672 }
  0xe0   : > { %1960 = vst.msk [vmem:[#allocation8] sm:$0xff] %vm1959_vm10, %v1864_v21 }
  0xe1   : > { %1768 = vst.msk [vmem:[#allocation8 + $0x8] sm:$0xff] %vm1766_vm9, %v1673_v22  ;;  %917 = vrot.lane.b32.xlu1 %v1998_v11, %s10624_s16  ;;  %726 = vrot.lane.b32.xlu0 %v1806_v12, %s7654_s30  ;;  %v1811_v22 = vld [vmem:[#allocation2 + $0x108] sm:$0xff] }
  0xe3   : > { %v1288_v23 = vpop.permute.xlu1 %1287  ;;  %v1097_v24 = vpop.permute.xlu0 %1096 }
  0xe4   : > { %1382 = vst.msk [vmem:[#allocation8 + $0x10] sm:$0xff] %vm1379_vm7, %v1288_v23 }
  0xe5   : > { %1190 = vst.msk [vmem:[#allocation8 + $0x18] sm:$0xff] %vm1186_vm6, %v1097_v24  ;;  %1686 = vrot.lane.b32.xlu1 %v7982_v33, %s10625_s24  ;;  %1494 = vrot.lane.b32.xlu0 %v1999_v17, %s10623_s23  ;;  %v8252_v26 = vld [vmem:[#allocation2 + $0x18f] sm:$0xff] }
  0xe6   : > { %633 = vst.msk [vmem:[#allocation8 + $0xc8] sm:$0xff] %vm469_vm0, %v8252_v26 }
  0xe7   : > { %v2057_v27 = vpop.permute.xlu1 %2056  ;;  %v1866_v28 = vpop.permute.xlu0 %1865 }
  0xe8   : > { %2153 = vst.msk [vmem:[#allocation8] sm:$0xff] %vm2152_vm11, %v2057_v27 }
  0xe9   : > { %1961 = vst.msk [vmem:[#allocation8 + $0x8] sm:$0xff] %vm1959_vm10, %v1866_v28  ;;  %1110 = vrot.lane.b32.xlu1 %v7982_v33, %s10626_s15  ;;  %919 = vrot.lane.b32.xlu0 %v1999_v17, %s10624_s16 }
  0xeb   : > { %v1290_v30 = vpop.permute.xlu1 %1289  ;;  %v713_v31 = vpop.permute.xlu0 %712 }
  0xec   : > { %1383 = vst.msk [vmem:[#allocation8 + $0x18] sm:$0xff] %vm1379_vm7, %v1290_v30  ;;  %v8267_v30 = vld [vmem:[#allocation2 + $0x110] sm:$0xff] }
  0xed   : > { %805 = vst.msk [vmem:[#allocation8 + $0x20] sm:$0xff] %vm800_vm4, %v713_v31  ;;  %1879 = vrot.lane.b32.xlu1 %v1807_v29, %s7659_s27  ;;  %1688 = vrot.lane.b32.xlu0 %v7989_v35, %s10625_s24 }
  0xef   : > { %v2059_v33 = vpop.permute.xlu1 %2058  ;;  %v1481_v34 = vpop.permute.xlu0 %1480  ;;  %v2185_v36 = vld [vmem:[#allocation8] sm:$0xff] }
  0xf0   : > { %2154 = vst.msk [vmem:[#allocation8 + $0x8] sm:$0xff] %vm2152_vm11, %v2059_v33  ;;  %7299 = vmatprep.mubr.msk.f32.mxu0 %vm2228_vm12, %v2185_v36 }
  0xf1   : > { %1575 = vst.msk [vmem:[#allocation8 + $0x10] sm:$0xff] %vm1572_vm8, %v1481_v34  ;;  %1303 = vrot.lane.b32.xlu1 %v1807_v29, %s7656_s21  ;;  %1112 = vrot.lane.b32.xlu0 %v7989_v35, %s10626_s15  ;;  %v2001_v35 = vld [vmem:[#allocation2 + $0xd1] sm:$0xff] }
  0xf3   : > { %v906_v39 = vpop.permute.xlu1 %905  ;;  %v715_v40 = vpop.permute.xlu0 %714 }
  0xf4   : > { %998 = vst.msk [vmem:[#allocation8 + $0x20] sm:$0xff] %vm993_vm5, %v906_v39 }
  0xf5   : > { %806 = vst.msk [vmem:[#allocation8 + $0x28] sm:$0xff] %vm800_vm4, %v715_v40  ;;  %2072 = vrot.lane.b32.xlu1 %v2000_v37, %s10602_s14  ;;  %1881 = vrot.lane.b32.xlu0 %v1808_v38, %s7659_s27  ;;  %v536_v40 = vld [vmem:[%s7913_s22 + $0xc0] sm:$0xff] }
  0xf6   : > { %568 = vst.msk [vmem:[#allocation2 + $0x1a8] sm:$0xff] %vm469_vm0, %v536_v40 }
  0xf7   : > { %v1675_v41 = vpop.permute.xlu1 %1674  ;;  %v1483_v42 = vpop.permute.xlu0 %1482  ;;  %v2186_v43 = vld [vmem:[#allocation8 + $0x8] sm:$0xff] }
  0xf8   : > { %1769 = vst.msk [vmem:[#allocation8 + $0x10] sm:$0xff] %vm1766_vm9, %v1675_v41  ;;  %7300 = vmatmul.mubr.msk.f32.vlgmr.msra.gmra.mxu0 %vm2228_vm12, %v2186_v43 }
  0xf9   : > { %1576 = vst.msk [vmem:[#allocation8 + $0x18] sm:$0xff] %vm1572_vm8, %v1483_v42  ;;  %1305 = vrot.lane.b32.xlu1 %v1808_v38, %s7656_s21  ;;  %728 = vrot.lane.b32.xlu0 %v1807_v29, %s7654_s30  ;;  %v8265_v29 = vld [vmem:[#allocation2 + $0x109] sm:$0xff] }
  0xfb   : > { %v1099_v45 = vpop.permute.xlu1 %1098  ;;  %v908_v46 = vpop.permute.xlu0 %907 }
  0xfc   : > { %1191 = vst.msk [vmem:[#allocation8 + $0x20] sm:$0xff] %vm1186_vm6, %v1099_v45 }
  0xfd   : > { %999 = vst.msk [vmem:[#allocation8 + $0x28] sm:$0xff] %vm993_vm5, %v908_v46  ;;  %2074 = vrot.lane.b32.xlu1 %v2001_v35, %s10602_s14  ;;  %1496 = vrot.lane.b32.xlu0 %v2000_v37, %s10623_s23  ;;  %v8371_v45 = vld [vmem:[#allocation2 + $0x1a7] sm:$0xff] }
  0xfe   : > { %v537_v46 = vld [vmem:[%s7913_s22 + $0xc8] sm:$0xff]  ;;  %634 = vst.msk [vmem:[#allocation8 + $0xd0] sm:$0xff] %vm469_vm0, %v8371_v45 }
  0xff   : > { %v1868_v49 = vpop.permute.xlu1 %1867  ;;  %v1677_v50 = vpop.permute.xlu0 %1676  ;;  %569 = vst.msk [vmem:[#allocation2 + $0x1b0] sm:$0xff] %vm469_vm0, %v537_v46 }
 0x100   : > { %1962 = vst.msk [vmem:[#allocation8 + $0x10] sm:$0xff] %vm1959_vm10, %v1868_v49 }
 0x101   : > { %1770 = vst.msk [vmem:[#allocation8 + $0x18] sm:$0xff] %vm1766_vm9, %v1677_v50  ;;  %921 = vrot.lane.b32.xlu1 %v2000_v37, %s10624_s16  ;;  %730 = vrot.lane.b32.xlu0 %v1808_v38, %s7654_s30  ;;  %v1813_v50 = vld [vmem:[#allocation2 + $0x128] sm:$0xff] }
 0x103   : > { %v1292_v51 = vpop.permute.xlu1 %1291  ;;  %v1101_v53 = vpop.permute.xlu0 %1100 }
 0x104   : > { %1384 = vst.msk [vmem:[#allocation8 + $0x20] sm:$0xff] %vm1379_vm7, %v1292_v51 }
 0x105   : > { %1192 = vst.msk [vmem:[#allocation8 + $0x28] sm:$0xff] %vm1186_vm6, %v1101_v53  ;;  %1690 = vrot.lane.b32.xlu1 %v8020_v44, %s10625_s24  ;;  %1498 = vrot.lane.b32.xlu0 %v2001_v35, %s10623_s23 }
 0x106   : > { %v8389_v56 = vld [vmem:[#allocation2 + $0x1af] sm:$0xff] }
 0x107   : > { %v2061_v57 = vpop.permute.xlu1 %2060  ;;  %v1870_v58 = vpop.permute.xlu0 %1869  ;;  %635 = vst.msk [vmem:[#allocation8 + $0xd8] sm:$0xff] %vm469_vm0, %v8389_v56 }
 0x108   : > { %2155 = vst.msk [vmem:[#allocation8 + $0x10] sm:$0xff] %vm2152_vm11, %v2061_v57 }
 0x109   : > { %1963 = vst.msk [vmem:[#allocation8 + $0x18] sm:$0xff] %vm1959_vm10, %v1870_v58  ;;  %1114 = vrot.lane.b32.xlu1 %v8020_v44, %s10626_s15  ;;  %923 = vrot.lane.b32.xlu0 %v2001_v35, %s10624_s16 }
 0x10b   : > { %v1294_v60 = vpop.permute.xlu1 %1293  ;;  %v717_v61 = vpop.permute.xlu0 %716 }
 0x10c   : > { %1385 = vst.msk [vmem:[#allocation8 + $0x28] sm:$0xff] %vm1379_vm7, %v1294_v60  ;;  %v1814_v60 = vld [vmem:[#allocation2 + $0x130] sm:$0xff] }
 0x10d   : > { %807 = vst.msk [vmem:[#allocation8 + $0x30] sm:$0xff] %vm800_vm4, %v717_v61  ;;  %1883 = vrot.lane.b32.xlu1 %v1809_v59, %s7659_s27  ;;  %1692 = vrot.lane.b32.xlu0 %v8032_v47, %s10625_s24 }
 0x10f   : > { %v2063_v44 = vpop.permute.xlu1 %2062  ;;  %v1485_v63 = vpop.permute.xlu0 %1484  ;;  %v2187_v2 = vld [vmem:[#allocation8 + $0x10] sm:$0xff] }
 0x110   : > { %2156 = vst.msk [vmem:[#allocation8 + $0x18] sm:$0xff] %vm2152_vm11, %v2063_v44  ;;  %7302 = vmatprep.mubr.msk.f32.mxu0 %vm2228_vm12, %v2187_v2 }
 0x111   : > { %1577 = vst.msk [vmem:[#allocation8 + $0x20] sm:$0xff] %vm1572_vm8, %v1485_v63  ;;  %1307 = vrot.lane.b32.xlu1 %v1809_v59, %s7656_s21  ;;  %1116 = vrot.lane.b32.xlu0 %v8032_v47, %s10626_s15  ;;  %v2003_v47 = vld [vmem:[#allocation2 + $0xf1] sm:$0xff] }
 0x113   : > { %v910_v5 = vpop.permute.xlu1 %909  ;;  %v719_v6 = vpop.permute.xlu0 %718 }
 0x114   : > { %1000 = vst.msk [vmem:[#allocation8 + $0x30] sm:$0xff] %vm993_vm5, %v910_v5 }
 0x115   : > { %808 = vst.msk [vmem:[#allocation8 + $0x38] sm:$0xff] %vm800_vm4, %v719_v6  ;;  %2076 = vrot.lane.b32.xlu1 %v2002_v3, %s10602_s14  ;;  %1885 = vrot.lane.b32.xlu0 %v1810_v4, %s7659_s27  ;;  %v538_v6 = vld [vmem:[%s7913_s22 + $0xd0] sm:$0xff] }
 0x116   : > { %570 = vst.msk [vmem:[#allocation2 + $0x1c8] sm:$0xff] %vm469_vm0, %v538_v6 }
 0x117   : > { %v1679_v7 = vpop.permute.xlu1 %1678  ;;  %v1487_v9 = vpop.permute.xlu0 %1486  ;;  %v2188_v10 = vld [vmem:[#allocation8 + $0x18] sm:$0xff] }
 0x118   : > { %1771 = vst.msk [vmem:[#allocation8 + $0x20] sm:$0xff] %vm1766_vm9, %v1679_v7  ;;  %7303 = vmatmul.mubr.msk.f32.gmra.mxu0 %vm2228_vm12, %v2188_v10 }
 0x119   : > { %1578 = vst.msk [vmem:[#allocation8 + $0x28] sm:$0xff] %vm1572_vm8, %v1487_v9  ;;  %1309 = vrot.lane.b32.xlu1 %v1810_v4, %s7656_s21  ;;  %732 = vrot.lane.b32.xlu0 %v1809_v59, %s7654_s30  ;;  %v2006_v59 = vld [vmem:[#allocation2 + $0x129] sm:$0xff] }
 0x11b   : > { %v1103_v11 = vpop.permute.xlu1 %1102  ;;  %v912_v12 = vpop.permute.xlu0 %911 }
 0x11c   : > { %1193 = vst.msk [vmem:[#allocation8 + $0x30] sm:$0xff] %vm1186_vm6, %v1103_v11 }
 0x11d   : > { %1001 = vst.msk [vmem:[#allocation8 + $0x38] sm:$0xff] %vm993_vm5, %v912_v12  ;;  %2078 = vrot.lane.b32.xlu1 %v2003_v47, %s10602_s14  ;;  %1500 = vrot.lane.b32.xlu0 %v2002_v3, %s10623_s23  ;;  %v8423_v11 = vld [vmem:[#allocation2 + $0x1c7] sm:$0xff]  ;;  %v539_v12 = vld [vmem:[%s7913_s22 + $0xd8] sm:$0xff] }
 0x11e   : > { %571 = vst.msk [vmem:[#allocation2 + $0x1d0] sm:$0xff] %vm469_vm0, %v539_v12  ;;  %636 = vst.msk [vmem:[#allocation8 + $0xe0] sm:$0xff] %vm469_vm0, %v8423_v11 }
 0x11f   : > { %v1872_v14 = vpop.permute.xlu1 %1871  ;;  %v1681_v15 = vpop.permute.xlu0 %1680 }
 0x120   : > { %1964 = vst.msk [vmem:[#allocation8 + $0x20] sm:$0xff] %vm1959_vm10, %v1872_v14 }
 0x121   : > { %1772 = vst.msk [vmem:[#allocation8 + $0x28] sm:$0xff] %vm1766_vm9, %v1681_v15  ;;  %925 = vrot.lane.b32.xlu1 %v2002_v3, %s10624_s16  ;;  %734 = vrot.lane.b32.xlu0 %v1810_v4, %s7654_s30  ;;  %v1815_v15 = vld [vmem:[#allocation2 + $0x148] sm:$0xff] }
 0x123   : > { %v1296_v16 = vpop.permute.xlu1 %1295  ;;  %v1105_v17 = vpop.permute.xlu0 %1104 }
 0x124   : > { %1386 = vst.msk [vmem:[#allocation8 + $0x30] sm:$0xff] %vm1379_vm7, %v1296_v16 }
 0x125   : > { %1194 = vst.msk [vmem:[#allocation8 + $0x38] sm:$0xff] %vm1186_vm6, %v1105_v17  ;;  %1694 = vrot.lane.b32.xlu1 %v8052_v52, %s10625_s24  ;;  %1502 = vrot.lane.b32.xlu0 %v2003_v47, %s10623_s23  ;;  %v8439_v19 = vld [vmem:[#allocation2 + $0x1cf] sm:$0xff] }
 0x126   : > { %637 = vst.msk [vmem:[#allocation8 + $0xe8] sm:$0xff] %vm469_vm0, %v8439_v19 }
 0x127   : > { %v2065_v20 = vpop.permute.xlu1 %2064  ;;  %v1874_v21 = vpop.permute.xlu0 %1873 }
 0x128   : > { %2157 = vst.msk [vmem:[#allocation8 + $0x20] sm:$0xff] %vm2152_vm11, %v2065_v20 }
 0x129   : > { %1965 = vst.msk [vmem:[#allocation8 + $0x28] sm:$0xff] %vm1959_vm10, %v1874_v21  ;;  %1118 = vrot.lane.b32.xlu1 %v8052_v52, %s10626_s15  ;;  %927 = vrot.lane.b32.xlu0 %v2003_v47, %s10624_s16 }
 0x12b   : > { %v1298_v23 = vpop.permute.xlu1 %1297  ;;  %v721_v24 = vpop.permute.xlu0 %720 }
 0x12c   : > { %1387 = vst.msk [vmem:[#allocation8 + $0x38] sm:$0xff] %vm1379_vm7, %v1298_v23  ;;  %v1816_v23 = vld [vmem:[#allocation2 + $0x150] sm:$0xff] }
 0x12d   : > { %809 = vst.msk [vmem:[#allocation8 + $0x40] sm:$0xff] %vm800_vm4, %v721_v24  ;;  %1887 = vrot.lane.b32.xlu1 %v1811_v22, %s7659_s27  ;;  %1696 = vrot.lane.b32.xlu0 %v8064_v55, %s10625_s24 }
 0x12f   : > { %v2067_v52 = vpop.permute.xlu1 %2066  ;;  %v1489_v27 = vpop.permute.xlu0 %1488  ;;  %v2189_v28 = vld [vmem:[#allocation8 + $0x20] sm:$0xff] }
 0x130   : > { %2158 = vst.msk [vmem:[#allocation8 + $0x28] sm:$0xff] %vm2152_vm11, %v2067_v52  ;;  %7305 = vmatprep.mubr.msk.f32.mxu0 %vm2228_vm12, %v2189_v28 }
 0x131   : > { %1579 = vst.msk [vmem:[#allocation8 + $0x30] sm:$0xff] %vm1572_vm8, %v1489_v27  ;;  %1311 = vrot.lane.b32.xlu1 %v1811_v22, %s7656_s21  ;;  %1120 = vrot.lane.b32.xlu0 %v8064_v55, %s10626_s15  ;;  %v8281_v55 = vld [vmem:[#allocation2 + $0x111] sm:$0xff] }
 0x133   : > { %v914_v31 = vpop.permute.xlu1 %913  ;;  %v723_v33 = vpop.permute.xlu0 %722 }
 0x134   : > { %1002 = vst.msk [vmem:[#allocation8 + $0x40] sm:$0xff] %vm993_vm5, %v914_v31 }
 0x135   : > { %810 = vst.msk [vmem:[#allocation8 + $0x48] sm:$0xff] %vm800_vm4, %v723_v33  ;;  %2080 = vrot.lane.b32.xlu1 %v8265_v29, %s10602_s14  ;;  %1889 = vrot.lane.b32.xlu0 %v8267_v30, %s7659_s27  ;;  %v540_v33 = vld [vmem:[%s7913_s22 + $0xe0] sm:$0xff] }
 0x136   : > { %572 = vst.msk [vmem:[#allocation2 + $0x1e8] sm:$0xff] %vm469_vm0, %v540_v33 }
 0x137   : > { %v1683_v34 = vpop.permute.xlu1 %1682  ;;  %v1491_v36 = vpop.permute.xlu0 %1490  ;;  %v2190_v37 = vld [vmem:[#allocation8 + $0x28] sm:$0xff] }
 0x138   : > { %1773 = vst.msk [vmem:[#allocation8 + $0x30] sm:$0xff] %vm1766_vm9, %v1683_v34  ;;  %7306 = vmatmul.mubr.msk.f32.gmra.mxu0 %vm2228_vm12, %v2190_v37 }
 0x139   : > { %1580 = vst.msk [vmem:[#allocation8 + $0x38] sm:$0xff] %vm1572_vm8, %v1491_v36  ;;  %1313 = vrot.lane.b32.xlu1 %v8267_v30, %s7656_s21  ;;  %736 = vrot.lane.b32.xlu0 %v1811_v22, %s7654_s30  ;;  %v2008_v22 = vld [vmem:[#allocation2 + $0x149] sm:$0xff] }
 0x13b   : > { %v1107_v38 = vpop.permute.xlu1 %1106  ;;  %v916_v39 = vpop.permute.xlu0 %915 }
 0x13c   : > { %1195 = vst.msk [vmem:[#allocation8 + $0x40] sm:$0xff] %vm1186_vm6, %v1107_v38 }
 0x13d   : > { %1003 = vst.msk [vmem:[#allocation8 + $0x48] sm:$0xff] %vm993_vm5, %v916_v39  ;;  %2082 = vrot.lane.b32.xlu1 %v8281_v55, %s10602_s14  ;;  %1504 = vrot.lane.b32.xlu0 %v8265_v29, %s10623_s23  ;;  %v8473_v38 = vld [vmem:[#allocation2 + $0x1e7] sm:$0xff] }
 0x13e   : > { %v541_v39 = vld [vmem:[%s7913_s22 + $0xe8] sm:$0xff]  ;;  %638 = vst.msk [vmem:[#allocation8 + $0xf0] sm:$0xff] %vm469_vm0, %v8473_v38 }
 0x13f   : > { %v1876_v41 = vpop.permute.xlu1 %1875  ;;  %v1685_v42 = vpop.permute.xlu0 %1684  ;;  %573 = vst.msk [vmem:[#allocation2 + $0x1f0] sm:$0xff] %vm469_vm0, %v541_v39 }
 0x140   : > { %1966 = vst.msk [vmem:[#allocation8 + $0x30] sm:$0xff] %vm1959_vm10, %v1876_v41 }
 0x141   : > { %1774 = vst.msk [vmem:[#allocation8 + $0x38] sm:$0xff] %vm1766_vm9, %v1685_v42  ;;  %929 = vrot.lane.b32.xlu1 %v8265_v29, %s10624_s16  ;;  %738 = vrot.lane.b32.xlu0 %v8267_v30, %s7654_s30  ;;  %v1817_v42 = vld [vmem:[#allocation2 + $0x168] sm:$0xff] }
 0x143   : > { %v1300_v43 = vpop.permute.xlu1 %1299  ;;  %v1109_v35 = vpop.permute.xlu0 %1108 }
 0x144   : > { %1388 = vst.msk [vmem:[#allocation8 + $0x40] sm:$0xff] %vm1379_vm7, %v1300_v43 }
 0x145   : > { %1196 = vst.msk [vmem:[#allocation8 + $0x48] sm:$0xff] %vm1186_vm6, %v1109_v35  ;;  %1698 = vrot.lane.b32.xlu1 %v8087_v1, %s10625_s24  ;;  %1506 = vrot.lane.b32.xlu0 %v8281_v55, %s10623_s23 }
 0x146   : > { %v8489_v46 = vld [vmem:[#allocation2 + $0x1ef] sm:$0xff] }
 0x147   : > { %v2069_v48 = vpop.permute.xlu1 %2068  ;;  %v1878_v49 = vpop.permute.xlu0 %1877  ;;  %639 = vst.msk [vmem:[#allocation8 + $0xf8] sm:$0xff] %vm469_vm0, %v8489_v46 }
 0x148   : > { %2159 = vst.msk [vmem:[#allocation8 + $0x30] sm:$0xff] %vm2152_vm11, %v2069_v48 }
 0x149   : > { %1967 = vst.msk [vmem:[#allocation8 + $0x38] sm:$0xff] %vm1959_vm10, %v1878_v49  ;;  %1122 = vrot.lane.b32.xlu1 %v8087_v1, %s10626_s15  ;;  %931 = vrot.lane.b32.xlu0 %v8281_v55, %s10624_s16 }
 0x14b   : > { %v1302_v51 = vpop.permute.xlu1 %1301  ;;  %v725_v53 = vpop.permute.xlu0 %724 }
 0x14c   : > { %1389 = vst.msk [vmem:[#allocation8 + $0x48] sm:$0xff] %vm1379_vm7, %v1302_v51  ;;  %v1818_v51 = vld [vmem:[#allocation2 + $0x170] sm:$0xff] }
 0x14d   : > { %811 = vst.msk [vmem:[#allocation8 + $0x50] sm:$0xff] %vm800_vm4, %v725_v53  ;;  %1891 = vrot.lane.b32.xlu1 %v1813_v50, %s7659_s27  ;;  %1700 = vrot.lane.b32.xlu0 %v8104_v8, %s10625_s24 }
 0x14f   : > { %v2071_v1 = vpop.permute.xlu1 %2070  ;;  %v1493_v57 = vpop.permute.xlu0 %1492  ;;  %v2191_v58 = vld [vmem:[#allocation8 + $0x30] sm:$0xff] }
 0x150   : > { %2160 = vst.msk [vmem:[#allocation8 + $0x38] sm:$0xff] %vm2152_vm11, %v2071_v1  ;;  %7308 = vmatprep.mubr.msk.f32.mxu0 %vm2228_vm12, %v2191_v58 }
 0x151   : > { %1581 = vst.msk [vmem:[#allocation8 + $0x40] sm:$0xff] %vm1572_vm8, %v1493_v57  ;;  %1315 = vrot.lane.b32.xlu1 %v1813_v50, %s7656_s21  ;;  %1124 = vrot.lane.b32.xlu0 %v8104_v8, %s10626_s15  ;;  %v2007_v8 = vld [vmem:[#allocation2 + $0x131] sm:$0xff] }
 0x153   : > { %v918_v61 = vpop.permute.xlu1 %917  ;;  %v727_v44 = vpop.permute.xlu0 %726 }
 0x154   : > { %1004 = vst.msk [vmem:[#allocation8 + $0x50] sm:$0xff] %vm993_vm5, %v918_v61 }
 0x155   : > { %812 = vst.msk [vmem:[#allocation8 + $0x58] sm:$0xff] %vm800_vm4, %v727_v44  ;;  %2084 = vrot.lane.b32.xlu1 %v2006_v59, %s10602_s14  ;;  %1893 = vrot.lane.b32.xlu0 %v1814_v60, %s7659_s27  ;;  %v542_v44 = vld [vmem:[%s7913_s22 + $0xf0] sm:$0xff] }
 0x156   : > { %574 = vst.msk [vmem:[#allocation2 + $0x208] sm:$0xff] %vm469_vm0, %v542_v44 }
 0x157   : > { %v1687_v63 = vpop.permute.xlu1 %1686  ;;  %v1495_v2 = vpop.permute.xlu0 %1494  ;;  %v2192_v3 = vld [vmem:[#allocation8 + $0x38] sm:$0xff] }
 0x158   : > { %1775 = vst.msk [vmem:[#allocation8 + $0x40] sm:$0xff] %vm1766_vm9, %v1687_v63  ;;  %7309 = vmatmul.mubr.msk.f32.gmra.mxu0 %vm2228_vm12, %v2192_v3 }
 0x159   : > { %1582 = vst.msk [vmem:[#allocation8 + $0x48] sm:$0xff] %vm1572_vm8, %v1495_v2  ;;  %1317 = vrot.lane.b32.xlu1 %v1814_v60, %s7656_s21  ;;  %740 = vrot.lane.b32.xlu0 %v1813_v50, %s7654_s30  ;;  %v2010_v50 = vld [vmem:[#allocation2 + $0x169] sm:$0xff] }
 0x15b   : > { %v1111_v4 = vpop.permute.xlu1 %1110  ;;  %v920_v5 = vpop.permute.xlu0 %919 }
 0x15c   : > { %1197 = vst.msk [vmem:[#allocation8 + $0x50] sm:$0xff] %vm1186_vm6, %v1111_v4  ;;  %v543_v4 = vld [vmem:[%s7913_s22 + $0xf8] sm:$0xff]  ;;  %s7666_s22 = smov 56  }
 0x15d   : > { %1005 = vst.msk [vmem:[#allocation8 + $0x58] sm:$0xff] %vm993_vm5, %v920_v5  ;;  %2086 = vrot.lane.b32.xlu1 %v2007_v8, %s10602_s14  ;;  %1508 = vrot.lane.b32.xlu0 %v2006_v59, %s10623_s23 }
 0x15e   : > { %575 = vst.msk [vmem:[#allocation2 + $0x210] sm:$0xff] %vm469_vm0, %v543_v4  ;;  %vm2885_vm0 = vcmask 130112  }
 0x15f   : > { %v1880_v7 = vpop.permute.xlu1 %1879  ;;  %v1689_v9 = vpop.permute.xlu0 %1688 }
 0x160   : > { %1968 = vst.msk [vmem:[#allocation8 + $0x40] sm:$0xff] %vm1959_vm10, %v1880_v7  ;;  %v1819_v7 = vld [vmem:[#allocation2 + $0x188] sm:$0xff] }
 0x161   : > { %1776 = vst.msk [vmem:[#allocation8 + $0x48] sm:$0xff] %vm1766_vm9, %v1689_v9  ;;  %933 = vrot.lane.b32.xlu1 %v2006_v59, %s10624_s16  ;;  %742 = vrot.lane.b32.xlu0 %v1814_v60, %s7654_s30 }
 0x163   : > { %v1304_v10 = vpop.permute.xlu1 %1303  ;;  %v1113_v47 = vpop.permute.xlu0 %1112 }
 0x164   : > { %1390 = vst.msk [vmem:[#allocation8 + $0x50] sm:$0xff] %vm1379_vm7, %v1304_v10 }
 0x165   : > { %1198 = vst.msk [vmem:[#allocation8 + $0x58] sm:$0xff] %vm1186_vm6, %v1113_v47  ;;  %1702 = vrot.lane.b32.xlu1 %v8136_v25, %s10625_s24  ;;  %1510 = vrot.lane.b32.xlu0 %v2007_v8, %s10623_s23 }
 0x167   : > { %v2073_v13 = vpop.permute.xlu1 %2072  ;;  %v1882_v14 = vpop.permute.xlu0 %1881 }
 0x168   : > { %2161 = vst.msk [vmem:[#allocation8 + $0x40] sm:$0xff] %vm2152_vm11, %v2073_v13 }
 0x169   : > { %1969 = vst.msk [vmem:[#allocation8 + $0x48] sm:$0xff] %vm1959_vm10, %v1882_v14  ;;  %1126 = vrot.lane.b32.xlu1 %v8136_v25, %s10626_s15  ;;  %935 = vrot.lane.b32.xlu0 %v2007_v8, %s10624_s16  ;;  %v1820_v14 = vld [vmem:[#allocation2 + $0x190] sm:$0xff] }
 0x16b   : > { %v1306_v16 = vpop.permute.xlu1 %1305  ;;  %v729_v17 = vpop.permute.xlu0 %728 }
 0x16c   : > { %1391 = vst.msk [vmem:[#allocation8 + $0x58] sm:$0xff] %vm1379_vm7, %v1306_v16 }
 0x16d   : > { %813 = vst.msk [vmem:[#allocation8 + $0x60] sm:$0xff] %vm800_vm4, %v729_v17  ;;  %1895 = vrot.lane.b32.xlu1 %v1815_v15, %s7659_s27  ;;  %1704 = vrot.lane.b32.xlu0 %v8152_v32, %s10625_s24  ;;  %v8551_v17 = vld [vmem:[%s10578_s2] ss:$0 sm:$0xff] }
 0x16f   : > { %v2075_v25 = vpop.permute.xlu1 %2074  ;;  %v1497_v20 = vpop.permute.xlu0 %1496  ;;  %v2193_v21 = vld [vmem:[#allocation8 + $0x40] sm:$0xff] }
 0x170   : > { %2162 = vst.msk [vmem:[#allocation8 + $0x48] sm:$0xff] %vm2152_vm11, %v2075_v25  ;;  %7311 = vmatprep.mubr.msk.f32.mxu0 %vm2228_vm12, %v2193_v21 }
 0x171   : > { %1583 = vst.msk [vmem:[#allocation8 + $0x50] sm:$0xff] %vm1572_vm8, %v1497_v20  ;;  %1319 = vrot.lane.b32.xlu1 %v1815_v15, %s7656_s21  ;;  %1128 = vrot.lane.b32.xlu0 %v8152_v32, %s10626_s15  ;;  %v2009_v32 = vld [vmem:[#allocation2 + $0x151] sm:$0xff] }
 0x173   : > { %v922_v24 = vpop.permute.xlu1 %921  ;;  %v731_v52 = vpop.permute.xlu0 %730 }
 0x174   : > { %1006 = vst.msk [vmem:[#allocation8 + $0x60] sm:$0xff] %vm993_vm5, %v922_v24  ;;  %v2013_v24 = vld [vmem:[#allocation2 + $0x191] sm:$0xff] }
 0x175   : > { %814 = vst.msk [vmem:[#allocation8 + $0x68] sm:$0xff] %vm800_vm4, %v731_v52  ;;  %2088 = vrot.lane.b32.xlu1 %v2008_v22, %s10602_s14  ;;  %1897 = vrot.lane.b32.xlu0 %v1816_v23, %s7659_s27 }
 0x177   : > { %v1691_v27 = vpop.permute.xlu1 %1690  ;;  %v1499_v28 = vpop.permute.xlu0 %1498  ;;  %v2194_v29 = vld [vmem:[#allocation8 + $0x48] sm:$0xff] }
 0x178   : > { %1777 = vst.msk [vmem:[#allocation8 + $0x50] sm:$0xff] %vm1766_vm9, %v1691_v27  ;;  %7312 = vmatmul.mubr.msk.f32.gmra.mxu0 %vm2228_vm12, %v2194_v29 }
 0x179   : > { %1584 = vst.msk [vmem:[#allocation8 + $0x58] sm:$0xff] %vm1572_vm8, %v1499_v28  ;;  %1321 = vrot.lane.b32.xlu1 %v1816_v23, %s7656_s21  ;;  %744 = vrot.lane.b32.xlu0 %v1815_v15, %s7654_s30 }
 0x17b   : > { %v1115_v30 = vpop.permute.xlu1 %1114  ;;  %v924_v31 = vpop.permute.xlu0 %923 }
 0x17c   : > { %1199 = vst.msk [vmem:[#allocation8 + $0x60] sm:$0xff] %vm1186_vm6, %v1115_v30 }
 0x17d   : > { %1007 = vst.msk [vmem:[#allocation8 + $0x68] sm:$0xff] %vm993_vm5, %v924_v31  ;;  %2090 = vrot.lane.b32.xlu1 %v2009_v32, %s10602_s14  ;;  %1512 = vrot.lane.b32.xlu0 %v2008_v22, %s10623_s23 }
 0x17f   : > { %v1884_v34 = vpop.permute.xlu1 %1883  ;;  %v1693_v36 = vpop.permute.xlu0 %1692 }
 0x180   : > { %1970 = vst.msk [vmem:[#allocation8 + $0x50] sm:$0xff] %vm1959_vm10, %v1884_v34 }
 0x181   : > { %1778 = vst.msk [vmem:[#allocation8 + $0x58] sm:$0xff] %vm1766_vm9, %v1693_v36  ;;  %937 = vrot.lane.b32.xlu1 %v2008_v22, %s10624_s16  ;;  %746 = vrot.lane.b32.xlu0 %v1816_v23, %s7654_s30 }
 0x183   : > { %v1308_v37 = vpop.permute.xlu1 %1307  ;;  %v1117_v55 = vpop.permute.xlu0 %1116 }
 0x184   : > { %1392 = vst.msk [vmem:[#allocation8 + $0x60] sm:$0xff] %vm1379_vm7, %v1308_v37 }
 0x185   : > { %1200 = vst.msk [vmem:[#allocation8 + $0x68] sm:$0xff] %vm1186_vm6, %v1117_v55  ;;  %1706 = vrot.lane.b32.xlu1 %v8186_v54, %s10625_s24  ;;  %1514 = vrot.lane.b32.xlu0 %v2009_v32, %s10623_s23 }
 0x187   : > { %v2077_v40 = vpop.permute.xlu1 %2076  ;;  %v1886_v41 = vpop.permute.xlu0 %1885 }
 0x188   : > { %2163 = vst.msk [vmem:[#allocation8 + $0x50] sm:$0xff] %vm2152_vm11, %v2077_v40  ;;  %v1821_v40 = vld [vmem:[#allocation2 + $0x1a8] sm:$0xff] }
 0x189   : > { %1971 = vst.msk [vmem:[#allocation8 + $0x58] sm:$0xff] %vm1959_vm10, %v1886_v41  ;;  %1130 = vrot.lane.b32.xlu1 %v8186_v54, %s10626_s15  ;;  %939 = vrot.lane.b32.xlu0 %v2009_v32, %s10624_s16 }
 0x18b   : > { %v1310_v43 = vpop.permute.xlu1 %1309  ;;  %v733_v35 = vpop.permute.xlu0 %732 }
 0x18c   : > { %1393 = vst.msk [vmem:[#allocation8 + $0x68] sm:$0xff] %vm1379_vm7, %v1310_v43 }
 0x18d   : > { %815 = vst.msk [vmem:[#allocation8 + $0x70] sm:$0xff] %vm800_vm4, %v733_v35  ;;  %1899 = vrot.lane.b32.xlu1 %v1817_v42, %s7659_s27  ;;  %1708 = vrot.lane.b32.xlu0 %v8202_v62, %s10625_s24 }
 0x18f   : > { %v2079_v54 = vpop.permute.xlu1 %2078  ;;  %v1501_v48 = vpop.permute.xlu0 %1500  ;;  %v2195_v49 = vld [vmem:[#allocation8 + $0x50] sm:$0xff] }
 0x190   : > { %2164 = vst.msk [vmem:[#allocation8 + $0x58] sm:$0xff] %vm2152_vm11, %v2079_v54  ;;  %7314 = vmatprep.mubr.msk.f32.mxu0 %vm2228_vm12, %v2195_v49 }
 0x191   : > { %1585 = vst.msk [vmem:[#allocation8 + $0x60] sm:$0xff] %vm1572_vm8, %v1501_v48  ;;  %1323 = vrot.lane.b32.xlu1 %v1817_v42, %s7656_s21  ;;  %1132 = vrot.lane.b32.xlu0 %v8202_v62, %s10626_s15  ;;  %v2011_v62 = vld [vmem:[#allocation2 + $0x171] sm:$0xff] }
 0x192   : > { %v1822_v48 = vld [vmem:[#allocation2 + $0x1b0] sm:$0xff] }
 0x193   : > { %v926_v53 = vpop.permute.xlu1 %925  ;;  %v735_v1 = vpop.permute.xlu0 %734 }
 0x194   : > { %1008 = vst.msk [vmem:[#allocation8 + $0x70] sm:$0xff] %vm993_vm5, %v926_v53 }
 0x195   : > { %816 = vst.msk [vmem:[#allocation8 + $0x78] sm:$0xff] %vm800_vm4, %v735_v1  ;;  %2092 = vrot.lane.b32.xlu1 %v2010_v50, %s10602_s14  ;;  %1901 = vrot.lane.b32.xlu0 %v1818_v51, %s7659_s27 }
 0x197   : > { %v1695_v57 = vpop.permute.xlu1 %1694  ;;  %v1503_v58 = vpop.permute.xlu0 %1502  ;;  %v2196_v59 = vld [vmem:[#allocation8 + $0x58] sm:$0xff] }
 0x198   : > { %1779 = vst.msk [vmem:[#allocation8 + $0x60] sm:$0xff] %vm1766_vm9, %v1695_v57  ;;  %7315 = vmatmul.mubr.msk.f32.gmra.mxu0 %vm2228_vm12, %v2196_v59  ;;  %v2015_v59 = vld [vmem:[#allocation2 + $0x1b1] sm:$0xff] }
 0x199   : > { %1586 = vst.msk [vmem:[#allocation8 + $0x68] sm:$0xff] %vm1572_vm8, %v1503_v58  ;;  %1325 = vrot.lane.b32.xlu1 %v1818_v51, %s7656_s21  ;;  %748 = vrot.lane.b32.xlu0 %v1817_v42, %s7654_s30 }
 0x19b   : > { %v1119_v60 = vpop.permute.xlu1 %1118  ;;  %v928_v61 = vpop.permute.xlu0 %927 }
 0x19c   : > { %1201 = vst.msk [vmem:[#allocation8 + $0x70] sm:$0xff] %vm1186_vm6, %v1119_v60 }
 0x19d   : > { %1009 = vst.msk [vmem:[#allocation8 + $0x78] sm:$0xff] %vm993_vm5, %v928_v61  ;;  %2094 = vrot.lane.b32.xlu1 %v2011_v62, %s10602_s14  ;;  %1516 = vrot.lane.b32.xlu0 %v2010_v50, %s10623_s23 }
 0x19f   : > { %v1888_v63 = vpop.permute.xlu1 %1887  ;;  %v1697_v2 = vpop.permute.xlu0 %1696 }
 0x1a0   : > { %1972 = vst.msk [vmem:[#allocation8 + $0x60] sm:$0xff] %vm1959_vm10, %v1888_v63 }
 0x1a1   : > { %1780 = vst.msk [vmem:[#allocation8 + $0x68] sm:$0xff] %vm1766_vm9, %v1697_v2  ;;  %941 = vrot.lane.b32.xlu1 %v2010_v50, %s10624_s16  ;;  %750 = vrot.lane.b32.xlu0 %v1818_v51, %s7654_s30 }
 0x1a3   : > { %v1312_v3 = vpop.permute.xlu1 %1311  ;;  %v1121_v8 = vpop.permute.xlu0 %1120 }
 0x1a4   : > { %1394 = vst.msk [vmem:[#allocation8 + $0x70] sm:$0xff] %vm1379_vm7, %v1312_v3 }
 0x1a5   : > { %1202 = vst.msk [vmem:[#allocation8 + $0x78] sm:$0xff] %vm1186_vm6, %v1121_v8  ;;  %1710 = vrot.lane.b32.xlu1 %v8236_v18, %s10625_s24  ;;  %1518 = vrot.lane.b32.xlu0 %v2011_v62, %s10623_s23 }
 0x1a7   : > { %v2081_v5 = vpop.permute.xlu1 %2080  ;;  %v1890_v6 = vpop.permute.xlu0 %1889 }
 0x1a8   : > { %2165 = vst.msk [vmem:[#allocation8 + $0x60] sm:$0xff] %vm2152_vm11, %v2081_v5 }
 0x1a9   : > { %1973 = vst.msk [vmem:[#allocation8 + $0x68] sm:$0xff] %vm1959_vm10, %v1890_v6  ;;  %1134 = vrot.lane.b32.xlu1 %v8236_v18, %s10626_s15  ;;  %943 = vrot.lane.b32.xlu0 %v2011_v62, %s10624_s16  ;;  %v2012_v18 = vld [vmem:[#allocation2 + $0x189] sm:$0xff] }
 0x1ab   : > { %v1314_v9 = vpop.permute.xlu1 %1313  ;;  %v737_v10 = vpop.permute.xlu0 %736 }
 0x1ac   : > { %1395 = vst.msk [vmem:[#allocation8 + $0x78] sm:$0xff] %vm1379_vm7, %v1314_v9 }
 0x1ad   : > { %817 = vst.msk [vmem:[#allocation8 + $0x80] sm:$0xff] %vm800_vm4, %v737_v10  ;;  %1903 = vrot.lane.b32.xlu1 %v1819_v7, %s7659_s27  ;;  %1712 = vrot.lane.b32.xlu0 %v8252_v26, %s10625_s24  ;;  %v1823_v10 = vld [vmem:[#allocation2 + $0x1c8] sm:$0xff] }
 0x1af   : > { %v2083_v47 = vpop.permute.xlu1 %2082  ;;  %v1505_v12 = vpop.permute.xlu0 %1504  ;;  %v2197_v13 = vld [vmem:[#allocation8 + $0x60] sm:$0xff] }
 0x1b0   : > { %2166 = vst.msk [vmem:[#allocation8 + $0x68] sm:$0xff] %vm2152_vm11, %v2083_v47  ;;  %7317 = vmatprep.mubr.msk.f32.mxu0 %vm2228_vm12, %v2197_v13 }
 0x1b1   : > { %1587 = vst.msk [vmem:[#allocation8 + $0x70] sm:$0xff] %vm1572_vm8, %v1505_v12  ;;  %1327 = vrot.lane.b32.xlu1 %v1819_v7, %s7656_s21  ;;  %1136 = vrot.lane.b32.xlu0 %v8252_v26, %s10626_s15 }
 0x1b3   : > { %v930_v15 = vpop.permute.xlu1 %929  ;;  %v739_v16 = vpop.permute.xlu0 %738 }
 0x1b4   : > { %1010 = vst.msk [vmem:[#allocation8 + $0x80] sm:$0xff] %vm993_vm5, %v930_v15  ;;  %v1824_v15 = vld [vmem:[#allocation2 + $0x1d0] sm:$0xff] }
 0x1b5   : > { %818 = vst.msk [vmem:[#allocation8 + $0x88] sm:$0xff] %vm800_vm4, %v739_v16  ;;  %2096 = vrot.lane.b32.xlu1 %v2012_v18, %s10602_s14  ;;  %1905 = vrot.lane.b32.xlu0 %v1820_v14, %s7659_s27 }
 0x1b7   : > { %v1699_v25 = vpop.permute.xlu1 %1698  ;;  %v1507_v20 = vpop.permute.xlu0 %1506  ;;  %v2198_v26 = vld [vmem:[#allocation8 + $0x68] sm:$0xff] }
 0x1b8   : > { %1781 = vst.msk [vmem:[#allocation8 + $0x70] sm:$0xff] %vm1766_vm9, %v1699_v25  ;;  %v7301_v21 = vpop.f32.mrf.mxu0  ;;  %7318 = vmatmul.mubr.msk.f32.gmra.mxu0 %vm2228_vm12, %v2198_v26 }
 0x1b9   : > { %1588 = vst.msk [vmem:[#allocation8 + $0x78] sm:$0xff] %vm1572_vm8, %v1507_v20  ;;  %v2401_v22 = vadd.f32 %v7301_v21, %v8551_v17  ;;  %1329 = vrot.lane.b32.xlu1 %v1820_v14, %s7656_s21  ;;  %752 = vrot.lane.b32.xlu0 %v1819_v7, %s7654_s30 }
 0x1ba   : > { %v2395_v23 = vpop.f32.mrf.mxu0 }
 0x1bb   : > { %v2555_v52 = vmax.f32 %v2401_v22, 0.0  ;;  %v2396_v27 = vadd.f32 %v8551_v17, %v2395_v23  ;;  %v1123_v28 = vpop.permute.xlu1 %1122  ;;  %v932_v29 = vpop.permute.xlu0 %931 }
 0x1bc   : > { %1203 = vst.msk [vmem:[#allocation8 + $0x80] sm:$0xff] %vm1186_vm6, %v1123_v28 }
 0x1bd   : > { %1011 = vst.msk [vmem:[#allocation8 + $0x88] sm:$0xff] %vm993_vm5, %v932_v29  ;;  %v2554_v32 = vmax.f32 %v2396_v27, 0.0  ;;  %2098 = vrot.lane.b32.xlu1 %v2013_v24, %s10602_s14  ;;  %1520 = vrot.lane.b32.xlu0 %v2012_v18, %s10623_s23 }
 0x1be   : > { %2630 = vst.msk [vmem:[#allocation3 + $0x30] sm:$0xff] %vm2586_vm13, %v2555_v52 }
 0x1bf   : > { %2629 = vst.msk [vmem:[#allocation3 + $0x28] sm:$0xff] %vm2586_vm13, %v2554_v32  ;;  %v1892_v30 = vpop.permute.xlu1 %1891  ;;  %v1701_v31 = vpop.permute.xlu0 %1700 }
 0x1c0   : > { %1974 = vst.msk [vmem:[#allocation8 + $0x70] sm:$0xff] %vm1959_vm10, %v1892_v30 }
 0x1c1   : > { %1782 = vst.msk [vmem:[#allocation8 + $0x78] sm:$0xff] %vm1766_vm9, %v1701_v31  ;;  %945 = vrot.lane.b32.xlu1 %v2012_v18, %s10624_s16  ;;  %754 = vrot.lane.b32.xlu0 %v1820_v14, %s7654_s30 }
 0x1c3   : > { %v1316_v33 = vpop.permute.xlu1 %1315  ;;  %v1125_v34 = vpop.permute.xlu0 %1124 }
 0x1c4   : > { %1396 = vst.msk [vmem:[#allocation8 + $0x80] sm:$0xff] %vm1379_vm7, %v1316_v33 }
 0x1c5   : > { %1204 = vst.msk [vmem:[#allocation8 + $0x88] sm:$0xff] %vm1186_vm6, %v1125_v34  ;;  %1714 = vrot.lane.b32.xlu1 %v8371_v45, %s10625_s24  ;;  %1522 = vrot.lane.b32.xlu0 %v2013_v24, %s10623_s23 }
 0x1c6   : > { %v8577_v36 = vld [vmem:[#allocation3 + $0x2f] sm:$0xff]  ;;  %v8579_v37 = vld [vmem:[#allocation3 + $0x27] sm:$0xff] }
 0x1c7   : > { %v2085_v55 = vpop.permute.xlu1 %2084  ;;  %v1894_v39 = vpop.permute.xlu0 %1893  ;;  %2695 = vst.msk [vmem:[#allocation9 + $0x10] sm:$0xff] %vm2586_vm13, %v8579_v37  ;;  %2696 = vst.msk [vmem:[#allocation9 + $0x18] sm:$0xff] %vm2586_vm13, %v8577_v36 }
 0x1c8   : > { %2167 = vst.msk [vmem:[#allocation8 + $0x70] sm:$0xff] %vm2152_vm11, %v2085_v55 }
 0x1c9   : > { %1975 = vst.msk [vmem:[#allocation8 + $0x78] sm:$0xff] %vm1959_vm10, %v1894_v39  ;;  %1138 = vrot.lane.b32.xlu1 %v8371_v45, %s10626_s15  ;;  %947 = vrot.lane.b32.xlu0 %v2013_v24, %s10624_s16  ;;  %v2014_v45 = vld [vmem:[#allocation2 + $0x1a9] sm:$0xff]  ;;  %v2017_v24 = vld [vmem:[#allocation2 + $0x1d1] sm:$0xff] }
 0x1cb   : > { %v1318_v41 = vpop.permute.xlu1 %1317  ;;  %v741_v42 = vpop.permute.xlu0 %740 }
 0x1cc   : > { %1397 = vst.msk [vmem:[#allocation8 + $0x88] sm:$0xff] %vm1379_vm7, %v1318_v41 }
 0x1cd   : > { %819 = vst.msk [vmem:[#allocation8 + $0x90] sm:$0xff] %vm800_vm4, %v741_v42  ;;  %1907 = vrot.lane.b32.xlu1 %v1821_v40, %s7659_s27  ;;  %1716 = vrot.lane.b32.xlu0 %v8389_v56, %s10625_s24  ;;  %v1825_v42 = vld [vmem:[#allocation2 + $0x1e8] sm:$0xff] }
 0x1cf   : > { %v2087_v43 = vpop.permute.xlu1 %2086  ;;  %v1509_v35 = vpop.permute.xlu0 %1508  ;;  %v2199_v54 = vld [vmem:[#allocation8 + $0x70] sm:$0xff] }
 0x1d0   : > { %2168 = vst.msk [vmem:[#allocation8 + $0x78] sm:$0xff] %vm2152_vm11, %v2087_v43  ;;  %7320 = vmatprep.mubr.msk.f32.mxu0 %vm2228_vm12, %v2199_v54 }
 0x1d1   : > { %1589 = vst.msk [vmem:[#allocation8 + $0x80] sm:$0xff] %vm1572_vm8, %v1509_v35  ;;  %1331 = vrot.lane.b32.xlu1 %v1821_v40, %s7656_s21  ;;  %1140 = vrot.lane.b32.xlu0 %v8389_v56, %s10626_s15 }
 0x1d3   : > { %v934_v49 = vpop.permute.xlu1 %933  ;;  %v743_v50 = vpop.permute.xlu0 %742 }
 0x1d4   : > { %1012 = vst.msk [vmem:[#allocation8 + $0x90] sm:$0xff] %vm993_vm5, %v934_v49  ;;  %v1826_v49 = vld [vmem:[#allocation2 + $0x1f0] sm:$0xff] }
 0x1d5   : > { %820 = vst.msk [vmem:[#allocation8 + $0x98] sm:$0xff] %vm800_vm4, %v743_v50  ;;  %2100 = vrot.lane.b32.xlu1 %v2014_v45, %s10602_s14  ;;  %1909 = vrot.lane.b32.xlu0 %v1822_v48, %s7659_s27 }
 0x1d7   : > { %v1703_v51 = vpop.permute.xlu1 %1702  ;;  %v1511_v53 = vpop.permute.xlu0 %1510  ;;  %v2200_v1 = vld [vmem:[#allocation8 + $0x78] sm:$0xff] }
 0x1d8   : > { %1783 = vst.msk [vmem:[#allocation8 + $0x80] sm:$0xff] %vm1766_vm9, %v1703_v51  ;;  %v7304_v56 = vpop.f32.mrf.mxu0  ;;  %7321 = vmatmul.mubr.msk.f32.gmra.mxu0 %vm2228_vm12, %v2200_v1 }
 0x1d9   : > { %1590 = vst.msk [vmem:[#allocation8 + $0x88] sm:$0xff] %vm1572_vm8, %v1511_v53  ;;  %v2411_v57 = vadd.f32 %v7304_v56, %v8551_v17  ;;  %1333 = vrot.lane.b32.xlu1 %v1822_v48, %s7656_s21  ;;  %756 = vrot.lane.b32.xlu0 %v1821_v40, %s7654_s30 }
 0x1da   : > { %v2405_v58 = vpop.f32.mrf.mxu0 }
 0x1db   : > { %v2557_v62 = vmax.f32 %v2411_v57, 0.0  ;;  %v2406_v60 = vadd.f32 %v8551_v17, %v2405_v58  ;;  %v1127_v61 = vpop.permute.xlu1 %1126  ;;  %v936_v44 = vpop.permute.xlu0 %935 }
 0x1dc   : > { %1205 = vst.msk [vmem:[#allocation8 + $0x90] sm:$0xff] %vm1186_vm6, %v1127_v61 }
 0x1dd   : > { %1013 = vst.msk [vmem:[#allocation8 + $0x98] sm:$0xff] %vm993_vm5, %v936_v44  ;;  %v2556_v63 = vmax.f32 %v2406_v60, 0.0  ;;  %2102 = vrot.lane.b32.xlu1 %v2015_v59, %s10602_s14  ;;  %1524 = vrot.lane.b32.xlu0 %v2014_v45, %s10623_s23 }
 0x1de   : > { %2632 = vst.msk [vmem:[#allocation3 + $0x50] sm:$0xff] %vm2586_vm13, %v2557_v62 }
 0x1df   : > { %2631 = vst.msk [vmem:[#allocation3 + $0x48] sm:$0xff] %vm2586_vm13, %v2556_v63  ;;  %v1896_v2 = vpop.permute.xlu1 %1895  ;;  %v1705_v3 = vpop.permute.xlu0 %1704 }
 0x1e0   : > { %1976 = vst.msk [vmem:[#allocation8 + $0x80] sm:$0xff] %vm1959_vm10, %v1896_v2 }
 0x1e1   : > { %1784 = vst.msk [vmem:[#allocation8 + $0x88] sm:$0xff] %vm1766_vm9, %v1705_v3  ;;  %949 = vrot.lane.b32.xlu1 %v2014_v45, %s10624_s16  ;;  %758 = vrot.lane.b32.xlu0 %v1822_v48, %s7654_s30 }
 0x1e3   : > { %v1320_v8 = vpop.permute.xlu1 %1319  ;;  %v1129_v4 = vpop.permute.xlu0 %1128 }
 0x1e4   : > { %1398 = vst.msk [vmem:[#allocation8 + $0x90] sm:$0xff] %vm1379_vm7, %v1320_v8  ;;  %v1634_v8 = vld [vmem:[#allocation2 + $0x207] sm:$0xff] }
 0x1e5   : > { %1206 = vst.msk [vmem:[#allocation8 + $0x98] sm:$0xff] %vm1186_vm6, %v1129_v4  ;;  %1718 = vrot.lane.b32.xlu1 %v8423_v11, %s10625_s24  ;;  %1526 = vrot.lane.b32.xlu0 %v2015_v59, %s10623_s23 }
 0x1e6   : > { %v8627_v5 = vld [vmem:[#allocation3 + $0x47] sm:$0xff]  ;;  %v8629_v6 = vld [vmem:[#allocation3 + $0x4f] sm:$0xff] }
 0x1e7   : > { %v2089_v7 = vpop.permute.xlu1 %2088  ;;  %v1898_v9 = vpop.permute.xlu0 %1897  ;;  %2697 = vst.msk [vmem:[#allocation9 + $0x20] sm:$0xff] %vm2586_vm13, %v8627_v5  ;;  %2698 = vst.msk [vmem:[#allocation9 + $0x28] sm:$0xff] %vm2586_vm13, %v8629_v6 }
 0x1e8   : > { %2169 = vst.msk [vmem:[#allocation8 + $0x80] sm:$0xff] %vm2152_vm11, %v2089_v7 }
 0x1e9   : > { %1977 = vst.msk [vmem:[#allocation8 + $0x88] sm:$0xff] %vm1959_vm10, %v1898_v9  ;;  %1142 = vrot.lane.b32.xlu1 %v8423_v11, %s10626_s15  ;;  %951 = vrot.lane.b32.xlu0 %v2015_v59, %s10624_s16  ;;  %v2016_v11 = vld [vmem:[#allocation2 + $0x1c9] sm:$0xff]  ;;  %v2019_v59 = vld [vmem:[#allocation2 + $0x1f1] sm:$0xff] }
 0x1eb   : > { %v1322_v47 = vpop.permute.xlu1 %1321  ;;  %v745_v12 = vpop.permute.xlu0 %744 }
 0x1ec   : > { %1399 = vst.msk [vmem:[#allocation8 + $0x98] sm:$0xff] %vm1379_vm7, %v1322_v47 }
 0x1ed   : > { %821 = vst.msk [vmem:[#allocation8 + $0xa0] sm:$0xff] %vm800_vm4, %v745_v12  ;;  %1911 = vrot.lane.b32.xlu1 %v1823_v10, %s7659_s27  ;;  %1720 = vrot.lane.b32.xlu0 %v8439_v19, %s10625_s24 }
 0x1ef   : > { %v2091_v13 = vpop.permute.xlu1 %2090  ;;  %v1513_v18 = vpop.permute.xlu0 %1512  ;;  %v2201_v14 = vld [vmem:[#allocation8 + $0x80] sm:$0xff] }
 0x1f0   : > { %2170 = vst.msk [vmem:[#allocation8 + $0x88] sm:$0xff] %vm2152_vm11, %v2091_v13  ;;  %7323 = vmatprep.mubr.msk.f32.mxu0 %vm2228_vm12, %v2201_v14  ;;  %v1827_v13 = vld [vmem:[#allocation2 + $0x208] sm:$0xff] }
 0x1f1   : > { %1591 = vst.msk [vmem:[#allocation8 + $0x90] sm:$0xff] %vm1572_vm8, %v1513_v18  ;;  %1335 = vrot.lane.b32.xlu1 %v1823_v10, %s7656_s21  ;;  %1144 = vrot.lane.b32.xlu0 %v8439_v19, %s10626_s15  ;;  %v1635_v18 = vld [vmem:[#allocation2 + $0x20f] sm:$0xff] }
 0x1f3   : > { %v938_v16 = vpop.permute.xlu1 %937  ;;  %v747_v25 = vpop.permute.xlu0 %746 }
 0x1f4   : > { %1014 = vst.msk [vmem:[#allocation8 + $0xa0] sm:$0xff] %vm993_vm5, %v938_v16 }
 0x1f5   : > { %822 = vst.msk [vmem:[#allocation8 + $0xa8] sm:$0xff] %vm800_vm4, %v747_v25  ;;  %2104 = vrot.lane.b32.xlu1 %v2016_v11, %s10602_s14  ;;  %1913 = vrot.lane.b32.xlu0 %v1824_v15, %s7659_s27 }
 0x1f7   : > { %v1707_v20 = vpop.permute.xlu1 %1706  ;;  %v1515_v26 = vpop.permute.xlu0 %1514  ;;  %v2202_v21 = vld [vmem:[#allocation8 + $0x88] sm:$0xff] }
 0x1f8   : > { %1785 = vst.msk [vmem:[#allocation8 + $0x90] sm:$0xff] %vm1766_vm9, %v1707_v20  ;;  %v7307_v19 = vpop.f32.mrf.mxu0  ;;  %7324 = vmatmul.mubr.msk.f32.gmra.mxu0 %vm2228_vm12, %v2202_v21  ;;  %v2020_v20 = vld [vmem:[#allocation2 + $0x209] sm:$0xff] }
 0x1f9   : > { %1592 = vst.msk [vmem:[#allocation8 + $0x98] sm:$0xff] %vm1572_vm8, %v1515_v26  ;;  %v2421_v22 = vadd.f32 %v7307_v19, %v8551_v17  ;;  %1337 = vrot.lane.b32.xlu1 %v1824_v15, %s7656_s21  ;;  %760 = vrot.lane.b32.xlu0 %v1823_v10, %s7654_s30  ;;  %v1828_v26 = vld [vmem:[#allocation2 + $0x210] sm:$0xff] }
 0x1fa   : > { %v2415_v23 = vpop.f32.mrf.mxu0 }
 0x1fb   : > { %v2559_v52 = vmax.f32 %v2421_v22, 0.0  ;;  %v2416_v27 = vadd.f32 %v8551_v17, %v2415_v23  ;;  %v1131_v28 = vpop.permute.xlu1 %1130  ;;  %v940_v29 = vpop.permute.xlu0 %939 }
 0x1fc   : > { %1207 = vst.msk [vmem:[#allocation8 + $0xa0] sm:$0xff] %vm1186_vm6, %v1131_v28 }
 0x1fd   : > { %1015 = vst.msk [vmem:[#allocation8 + $0xa8] sm:$0xff] %vm993_vm5, %v940_v29  ;;  %v2558_v32 = vmax.f32 %v2416_v27, 0.0  ;;  %2106 = vrot.lane.b32.xlu1 %v2017_v24, %s10602_s14  ;;  %1528 = vrot.lane.b32.xlu0 %v2016_v11, %s10623_s23  ;;  %v1443_v29 = vld [vmem:[#allocation2 + $0x211] sm:$0xff] }
 0x1fe   : > { %2634 = vst.msk [vmem:[#allocation3 + $0x70] sm:$0xff] %vm2586_vm13, %v2559_v52 }
 0x1ff   : > { %2633 = vst.msk [vmem:[#allocation3 + $0x68] sm:$0xff] %vm2586_vm13, %v2558_v32  ;;  %v1900_v30 = vpop.permute.xlu1 %1899  ;;  %v1709_v31 = vpop.permute.xlu0 %1708 }
 0x200   : > { %1978 = vst.msk [vmem:[#allocation8 + $0x90] sm:$0xff] %vm1959_vm10, %v1900_v30 }
 0x201   : > { %1786 = vst.msk [vmem:[#allocation8 + $0x98] sm:$0xff] %vm1766_vm9, %v1709_v31  ;;  %953 = vrot.lane.b32.xlu1 %v2016_v11, %s10624_s16  ;;  %762 = vrot.lane.b32.xlu0 %v1824_v15, %s7654_s30 }
 0x203   : > { %v1324_v33 = vpop.permute.xlu1 %1323  ;;  %v1133_v34 = vpop.permute.xlu0 %1132 }
 0x204   : > { %1400 = vst.msk [vmem:[#allocation8 + $0xa0] sm:$0xff] %vm1379_vm7, %v1324_v33 }
 0x205   : > { %1208 = vst.msk [vmem:[#allocation8 + $0xa8] sm:$0xff] %vm1186_vm6, %v1133_v34  ;;  %1722 = vrot.lane.b32.xlu1 %v8473_v38, %s10625_s24  ;;  %1530 = vrot.lane.b32.xlu0 %v2017_v24, %s10623_s23 }
 0x206   : > { %v8677_v55 = vld [vmem:[#allocation3 + $0x67] sm:$0xff]  ;;  %v8679_v39 = vld [vmem:[#allocation3 + $0x6f] sm:$0xff] }
 0x207   : > { %v2093_v40 = vpop.permute.xlu1 %2092  ;;  %v1902_v41 = vpop.permute.xlu0 %1901  ;;  %2699 = vst.msk [vmem:[#allocation9 + $0x30] sm:$0xff] %vm2586_vm13, %v8677_v55  ;;  %2700 = vst.msk [vmem:[#allocation9 + $0x38] sm:$0xff] %vm2586_vm13, %v8679_v39 }
 0x208   : > { %2171 = vst.msk [vmem:[#allocation8 + $0x90] sm:$0xff] %vm2152_vm11, %v2093_v40  ;;  %v1637_v40 = vld [vmem:[#allocation2 + $0x22f] sm:$0xff] }
 0x209   : > { %1979 = vst.msk [vmem:[#allocation8 + $0x98] sm:$0xff] %vm1959_vm10, %v1902_v41  ;;  %1146 = vrot.lane.b32.xlu1 %v8473_v38, %s10626_s15  ;;  %955 = vrot.lane.b32.xlu0 %v2017_v24, %s10624_s16  ;;  %v2018_v38 = vld [vmem:[#allocation2 + $0x1e9] sm:$0xff] }
 0x20a   : > { %v1636_v41 = vld [vmem:[#allocation2 + $0x227] sm:$0xff] }
 0x20b   : > { %v1326_v43 = vpop.permute.xlu1 %1325  ;;  %v749_v35 = vpop.permute.xlu0 %748 }
 0x20c   : > { %1401 = vst.msk [vmem:[#allocation8 + $0xa8] sm:$0xff] %vm1379_vm7, %v1326_v43 }
 0x20d   : > { %823 = vst.msk [vmem:[#allocation8 + $0xb0] sm:$0xff] %vm800_vm4, %v749_v35  ;;  %1915 = vrot.lane.b32.xlu1 %v1825_v42, %s7659_s27  ;;  %1724 = vrot.lane.b32.xlu0 %v8489_v46, %s10625_s24  ;;  %v2662_v35 = vld [vmem:[#allocation3 + $0xf] sm:$0xff] }
 0x20e   : > { %2694 = vst.msk [vmem:[#allocation9 + $0x8] sm:$0xff] %vm2586_vm13, %v2662_v35  ;;  %v4305_v35 = vld [vmem:[%s10579_s3 + $0x18] sm:$0xff] }
 0x20f   : > { %v2095_v54 = vpop.permute.xlu1 %2094  ;;  %v1517_v45 = vpop.permute.xlu0 %1516  ;;  %v2203_v48 = vld [vmem:[#allocation8 + $0x90] sm:$0xff] }
 0x210   : > { %2172 = vst.msk [vmem:[#allocation8 + $0x98] sm:$0xff] %vm2152_vm11, %v2095_v54  ;;  %7326 = vmatprep.mubr.msk.f32.mxu0 %vm2228_vm12, %v2203_v48  ;;  %v2661_v54 = vld [vmem:[#allocation3 + $0x7] sm:$0xff] }
 0x211   : > { %1593 = vst.msk [vmem:[#allocation8 + $0xa0] sm:$0xff] %vm1572_vm8, %v1517_v45  ;;  %1339 = vrot.lane.b32.xlu1 %v1825_v42, %s7656_s21  ;;  %1148 = vrot.lane.b32.xlu0 %v8489_v46, %s10626_s15  ;;  %v1830_v45 = vld [vmem:[#allocation2 + $0x230] sm:$0xff]  ;;  %v1829_v48 = vld [vmem:[#allocation2 + $0x228] sm:$0xff] }
 0x212   : > { %2693 = vst.msk [vmem:[#allocation9] sm:$0xff] %vm2586_vm13, %v2661_v54 }
 0x213   : > { %v942_v50 = vpop.permute.xlu1 %941  ;;  %v751_v51 = vpop.permute.xlu0 %750 }
 0x214   : > { %1016 = vst.msk [vmem:[#allocation8 + $0xb0] sm:$0xff] %vm993_vm5, %v942_v50  ;;  %v2023_v50 = vld [vmem:[#allocation2 + $0x231] sm:$0xff] }
 0x215   : > { %824 = vst.msk [vmem:[#allocation8 + $0xb8] sm:$0xff] %vm800_vm4, %v751_v51  ;;  %2108 = vrot.lane.b32.xlu1 %v2018_v38, %s10602_s14  ;;  %1917 = vrot.lane.b32.xlu0 %v1826_v49, %s7659_s27  ;;  %v2022_v51 = vld [vmem:[#allocation2 + $0x229] sm:$0xff] }
 0x217   : > { %v1711_v53 = vpop.permute.xlu1 %1710  ;;  %v1519_v1 = vpop.permute.xlu0 %1518  ;;  %v2204_v56 = vld [vmem:[#allocation8 + $0x98] sm:$0xff] }
 0x218   : > { %1787 = vst.msk [vmem:[#allocation8 + $0xa0] sm:$0xff] %vm1766_vm9, %v1711_v53  ;;  %v7310_v46 = vpop.f32.mrf.mxu0  ;;  %7327 = vmatmul.mubr.msk.f32.gmra.mxu0 %vm2228_vm12, %v2204_v56 }
 0x219   : > { %1594 = vst.msk [vmem:[#allocation8 + $0xa8] sm:$0xff] %vm1572_vm8, %v1519_v1  ;;  %v2431_v57 = vadd.f32 %v7310_v46, %v8551_v17  ;;  %1341 = vrot.lane.b32.xlu1 %v1826_v49, %s7656_s21  ;;  %764 = vrot.lane.b32.xlu0 %v1825_v42, %s7654_s30 }
 0x21a   : > { %v2425_v58 = vpop.f32.mrf.mxu0 }
 0x21b   : > { %v2561_v62 = vmax.f32 %v2431_v57, 0.0  ;;  %v2426_v60 = vadd.f32 %v8551_v17, %v2425_v58  ;;  %v1135_v61 = vpop.permute.xlu1 %1134  ;;  %v944_v44 = vpop.permute.xlu0 %943  ;;  %v2726_v57 = vld [vmem:[#allocation3 + $0x10] sm:$0xff]  ;;  %v2725_v58 = vld [vmem:[#allocation3 + $0x8] sm:$0xff] }
 0x21c   : > { %1209 = vst.msk [vmem:[#allocation8 + $0xb0] sm:$0xff] %vm1186_vm6, %v1135_v61  ;;  %v2918_v61 = vld [vmem:[#allocation3 + $0x9] sm:$0xff] }
 0x21d   : > { %1017 = vst.msk [vmem:[#allocation8 + $0xb8] sm:$0xff] %vm993_vm5, %v944_v44  ;;  %v2560_v63 = vmax.f32 %v2426_v60, 0.0  ;;  %2110 = vrot.lane.b32.xlu1 %v2019_v59, %s10602_s14  ;;  %1532 = vrot.lane.b32.xlu0 %v2018_v38, %s10623_s23  ;;  %v2919_v60 = vld [vmem:[#allocation3 + $0x11] sm:$0xff] }
 0x21e   : > { %2636 = vst.msk [vmem:[#allocation3 + $0x90] sm:$0xff] %vm2586_vm13, %v2561_v62 }
 0x21f   : > { %2635 = vst.msk [vmem:[#allocation3 + $0x88] sm:$0xff] %vm2586_vm13, %v2560_v63  ;;  %v1904_v2 = vpop.permute.xlu1 %1903  ;;  %v1713_v3 = vpop.permute.xlu0 %1712 }
 0x220   : > { %1980 = vst.msk [vmem:[#allocation8 + $0xa0] sm:$0xff] %vm1959_vm10, %v1904_v2 }
 0x221   : > { %1788 = vst.msk [vmem:[#allocation8 + $0xa8] sm:$0xff] %vm1766_vm9, %v1713_v3  ;;  %957 = vrot.lane.b32.xlu1 %v2018_v38, %s10624_s16  ;;  %766 = vrot.lane.b32.xlu0 %v1826_v49, %s7654_s30  ;;  %s7661_s30 = smov 8  }
 0x223   : > { %v1328_v4 = vpop.permute.xlu1 %1327  ;;  %v1137_v7 = vpop.permute.xlu0 %1136 }
 0x224   : > { %1402 = vst.msk [vmem:[#allocation8 + $0xb0] sm:$0xff] %vm1379_vm7, %v1328_v4 }
 0x225   : > { %1210 = vst.msk [vmem:[#allocation8 + $0xb8] sm:$0xff] %vm1186_vm6, %v1137_v7  ;;  %1726 = vrot.lane.b32.xlu1 %v1634_v8, %s10625_s24  ;;  %1534 = vrot.lane.b32.xlu0 %v2019_v59, %s10623_s23 }
 0x226   : > { %v8726_v9 = vld [vmem:[#allocation3 + $0x87] sm:$0xff]  ;;  %v8728_v10 = vld [vmem:[#allocation3 + $0x8f] sm:$0xff] }
 0x227   : > { %v2097_v47 = vpop.permute.xlu1 %2096  ;;  %v1906_v12 = vpop.permute.xlu0 %1905  ;;  %2701 = vst.msk [vmem:[#allocation9 + $0x40] sm:$0xff] %vm2586_vm13, %v8726_v9  ;;  %2702 = vst.msk [vmem:[#allocation9 + $0x48] sm:$0xff] %vm2586_vm13, %v8728_v10 }
 0x228   : > { %2173 = vst.msk [vmem:[#allocation8 + $0xa0] sm:$0xff] %vm2152_vm11, %v2097_v47 }
 0x229   : > { %1981 = vst.msk [vmem:[#allocation8 + $0xa8] sm:$0xff] %vm1959_vm10, %v1906_v12  ;;  %1150 = vrot.lane.b32.xlu1 %v1634_v8, %s10626_s15  ;;  %959 = vrot.lane.b32.xlu0 %v2019_v59, %s10624_s16  ;;  %s10629_s16 = smov 32  }
 0x22b   : > { %v1330_v14 = vpop.permute.xlu1 %1329  ;;  %v753_v11 = vpop.permute.xlu0 %752 }
 0x22c   : > { %1403 = vst.msk [vmem:[#allocation8 + $0xb8] sm:$0xff] %vm1379_vm7, %v1330_v14 }
 0x22d   : > { %825 = vst.msk [vmem:[#allocation8 + $0xc0] sm:$0xff] %vm800_vm4, %v753_v11  ;;  %1919 = vrot.lane.b32.xlu1 %v1827_v13, %s7659_s27  ;;  %1728 = vrot.lane.b32.xlu0 %v1635_v18, %s10625_s24 }
 0x22f   : > { %v2099_v15 = vpop.permute.xlu1 %2098  ;;  %v1521_v16 = vpop.permute.xlu0 %1520  ;;  %v2205_v25 = vld [vmem:[#allocation8 + $0xa0] sm:$0xff] }
 0x230   : > { %2174 = vst.msk [vmem:[#allocation8 + $0xa8] sm:$0xff] %vm2152_vm11, %v2099_v15  ;;  %7329 = vmatprep.mubr.msk.f32.mxu0 %vm2228_vm12, %v2205_v25  ;;  %v3497_v25 = vld [vmem:[#allocation3 + $0x29] sm:$0xff] }
 0x231   : > { %1595 = vst.msk [vmem:[#allocation8 + $0xb0] sm:$0xff] %vm1572_vm8, %v1521_v16  ;;  %1343 = vrot.lane.b32.xlu1 %v1827_v13, %s7656_s21  ;;  %1152 = vrot.lane.b32.xlu0 %v1635_v18, %s10626_s15  ;;  %v3304_v13 = vld [vmem:[#allocation3 + $0x28] sm:$0xff]  ;;  %v3305_v16 = vld [vmem:[#allocation3 + $0x30] sm:$0xff] }
 0x233   : > { %v946_v21 = vpop.permute.xlu1 %945  ;;  %v755_v19 = vpop.permute.xlu0 %754 }
 0x234   : > { %1018 = vst.msk [vmem:[#allocation8 + $0xc0] sm:$0xff] %vm993_vm5, %v946_v21 }
 0x235   : > { %826 = vst.msk [vmem:[#allocation8 + $0xc8] sm:$0xff] %vm800_vm4, %v755_v19  ;;  %2112 = vrot.lane.b32.xlu1 %v2020_v20, %s10602_s14  ;;  %1921 = vrot.lane.b32.xlu0 %v1828_v26, %s7659_s27 }
 0x237   : > { %v1715_v22 = vpop.permute.xlu1 %1714  ;;  %v1523_v23 = vpop.permute.xlu0 %1522  ;;  %v2206_v24 = vld [vmem:[#allocation8 + $0xa8] sm:$0xff] }
 0x238   : > { %1789 = vst.msk [vmem:[#allocation8 + $0xb0] sm:$0xff] %vm1766_vm9, %v1715_v22  ;;  %v7313_v52 = vpop.f32.mrf.mxu0  ;;  %7330 = vmatmul.mubr.msk.f32.gmra.mxu0 %vm2228_vm12, %v2206_v24 }
 0x239   : > { %1596 = vst.msk [vmem:[#allocation8 + $0xb8] sm:$0xff] %vm1572_vm8, %v1523_v23  ;;  %v2441_v27 = vadd.f32 %v7313_v52, %v8551_v17  ;;  %1536 = vrot.lane.b32.xlu1 %v2020_v20, %s10623_s23  ;;  %1345 = vrot.lane.b32.xlu0 %v1828_v26, %s7656_s21  ;;  %s7662_s21 = smov 16   ;;  %v3498_v23 = vld [vmem:[#allocation3 + $0x31] sm:$0xff]  ;;  %v4310_v52 = vld [vmem:[%s10579_s3 + $0x40] sm:$0xff] }
 0x23a   : > { %v2435_v28 = vpop.f32.mrf.mxu0  ;;  %7347 = vmatprep.subr.mxu1 %v4310_v52 }
 0x23b   : > { %v2563_v32 = vmax.f32 %v2441_v27, 0.0  ;;  %v2436_v30 = vadd.f32 %v8551_v17, %v2435_v28  ;;  %v1139_v31 = vpop.permute.xlu1 %1138  ;;  %v948_v33 = vpop.permute.xlu0 %947  ;;  %7348 = vmatpush3.msra.mxu1 %v4310_v52 }
 0x23c   : > { %1211 = vst.msk [vmem:[#allocation8 + $0xc0] sm:$0xff] %vm1186_vm6, %v1139_v31 }
 0x23d   : > { %1019 = vst.msk [vmem:[#allocation8 + $0xc8] sm:$0xff] %vm993_vm5, %v948_v33  ;;  %v2562_v34 = vmax.f32 %v2436_v30, 0.0  ;;  %1538 = vrot.lane.b32.xlu1 %v1443_v29, %s10623_s23  ;;  %2114 = vrot.lane.b32.xlu0 %v1443_v29, %s10602_s14  ;;  %s7665_s23 = smov 48   ;;  %v4308_v30 = vld [vmem:[%s10579_s3 + $0x30] sm:$0xff] }
 0x23e   : > { %2638 = vst.msk [vmem:[#allocation3 + $0xb0] sm:$0xff] %vm2586_vm13, %v2563_v32  ;;  %v4309_v32 = vld [vmem:[%s10579_s3 + $0x38] sm:$0xff] }
 0x23f   : > { %2637 = vst.msk [vmem:[#allocation3 + $0xa8] sm:$0xff] %vm2586_vm13, %v2562_v34  ;;  %v1908_v42 = vpop.permute.xlu1 %1907  ;;  %v1717_v43 = vpop.permute.xlu0 %1716  ;;  %7349 = vmatprep.subr.mxu1 %v4309_v32  ;;  %v3884_v34 = vld [vmem:[#allocation3 + $0x48] sm:$0xff] }
 0x240   : > { %1982 = vst.msk [vmem:[#allocation8 + $0xb0] sm:$0xff] %vm1959_vm10, %v1908_v42  ;;  %7350 = vmatpush3.msra.mxu1 %v4309_v32 }
 0x241   : > { %1790 = vst.msk [vmem:[#allocation8 + $0xb8] sm:$0xff] %vm1766_vm9, %v1717_v43  ;;  %1732 = vrot.lane.b32.xlu1 %v1637_v40, %s10625_s24  ;;  %1730 = vrot.lane.b32.xlu0 %v1636_v41, %s10625_s24  ;;  %v4307_v40 = vld [vmem:[%s10579_s3 + $0x28] sm:$0xff]  ;;  %v4306_v43 = vld [vmem:[%s10579_s3 + $0x20] sm:$0xff]  ;;  %s10627_s24 = smov 24  }
 0x242   : > { %7351 = vmatprep.subr.mxu1 %v4308_v30 }
 0x243   : > { %v1332_v38 = vpop.permute.xlu1 %1331  ;;  %v1141_v49 = vpop.permute.xlu0 %1140  ;;  %7352 = vmatpush3.msra.mxu1 %v4308_v30 }
 0x244   : > { %1404 = vst.msk [vmem:[#allocation8 + $0xc0] sm:$0xff] %vm1379_vm7, %v1332_v38  ;;  %7353 = vmatprep.subr.mxu1 %v4307_v40  ;;  %v4077_v38 = vld [vmem:[#allocation3 + $0x49] sm:$0xff] }
 0x245   : > { %1212 = vst.msk [vmem:[#allocation8 + $0xc8] sm:$0xff] %vm1186_vm6, %v1141_v49  ;;  %1925 = vrot.lane.b32.xlu1 %v1830_v45, %s7659_s27  ;;  %1923 = vrot.lane.b32.xlu0 %v1829_v48, %s7659_s27  ;;  %s10604_s27 = smov 32   ;;  %v3885_v48 = vld [vmem:[#allocation3 + $0x50] sm:$0xff] }
 0x246   : > { %v8774_v53 = vld [vmem:[#allocation3 + $0xa7] sm:$0xff]  ;;  %v8776_v1 = vld [vmem:[#allocation3 + $0xaf] sm:$0xff]  ;;  %7354 = vmatpush3.msra.mxu1 %v4307_v40 }
 0x247   : > { %v2101_v56 = vpop.permute.xlu1 %2100  ;;  %v1910_v46 = vpop.permute.xlu0 %1909  ;;  %2703 = vst.msk [vmem:[#allocation9 + $0x50] sm:$0xff] %vm2586_vm13, %v8774_v53  ;;  %2704 = vst.msk [vmem:[#allocation9 + $0x58] sm:$0xff] %vm2586_vm13, %v8776_v1  ;;  %7355 = vmatprep.subr.mxu1 %v4306_v43 }
 0x248   : > { %2175 = vst.msk [vmem:[#allocation8 + $0xb0] sm:$0xff] %vm2152_vm11, %v2101_v56  ;;  %7356 = vmatpush3.msra.mxu1 %v4306_v43  ;;  %v4303_v56 = vld [vmem:[%s10579_s3 + $0x8] sm:$0xff] }
 0x249   : > { %1983 = vst.msk [vmem:[#allocation8 + $0xb8] sm:$0xff] %vm1959_vm10, %v1910_v46  ;;  %2118 = vrot.lane.b32.xlu1 %v2023_v50, %s10602_s14  ;;  %2116 = vrot.lane.b32.xlu0 %v2022_v51, %s10602_s14 }
 0x24a   : > { %7357 = vmatprep.subr.mxu1 %v4305_v35 }
 0x24b   : > { %v1334_v59 = vpop.permute.xlu1 %1333  ;;  %v757_v62 = vpop.permute.xlu0 %756  ;;  %7358 = vmatpush3.msra.mxu1 %v4305_v35 }
 0x24c   : > { %1405 = vst.msk [vmem:[#allocation8 + $0xc8] sm:$0xff] %vm1379_vm7, %v1334_v59 }
 0x24d   : > { %827 = vst.msk [vmem:[#allocation8 + $0xd0] sm:$0xff] %vm800_vm4, %v757_v62  ;;  %2791 = vrot.lane.b32.xlu1 %v2726_v57, %s7661_s30  ;;  %2789 = vrot.lane.b32.xlu0 %v2725_v58, %s7661_s30  ;;  %v4302_v58 = vld [vmem:[%s10579_s3] sm:$0xff] }
 0x24f   : > { %v2103_v44 = vpop.permute.xlu1 %2102  ;;  %v1525_v63 = vpop.permute.xlu0 %1524  ;;  %v2207_v2 = vld [vmem:[#allocation8 + $0xb0] sm:$0xff] }
 0x250   : > { %2176 = vst.msk [vmem:[#allocation8 + $0xb8] sm:$0xff] %vm2152_vm11, %v2103_v44  ;;  %7332 = vmatprep.mubr.msk.f32.mxu0 %vm2228_vm12, %v2207_v2 }
 0x251   : > { %1597 = vst.msk [vmem:[#allocation8 + $0xc0] sm:$0xff] %vm1572_vm8, %v1525_v63  ;;  %2984 = vrot.lane.b32.xlu1 %v2919_v60, %s7662_s21  ;;  %2982 = vrot.lane.b32.xlu0 %v2918_v61, %s7662_s21  ;;  %v4078_v63 = vld [vmem:[#allocation3 + $0x51] sm:$0xff] }
 0x253   : > { %v950_v3 = vpop.permute.xlu1 %949  ;;  %v759_v8 = vpop.permute.xlu0 %758 }
 0x254   : > { %1020 = vst.msk [vmem:[#allocation8 + $0xd0] sm:$0xff] %vm993_vm5, %v950_v3 }
 0x255   : > { %828 = vst.msk [vmem:[#allocation8 + $0xd8] sm:$0xff] %vm800_vm4, %v759_v8  ;;  %3177 = vrot.lane.b32.xlu1 %v8577_v36, %s10602_s14  ;;  %3175 = vrot.lane.b32.xlu0 %v8579_v37, %s10602_s14 }
 0x257   : > { %v1719_v4 = vpop.permute.xlu1 %1718  ;;  %v1527_v7 = vpop.permute.xlu0 %1526  ;;  %v2208_v47 = vld [vmem:[#allocation8 + $0xb8] sm:$0xff] }
 0x258   : > { %1791 = vst.msk [vmem:[#allocation8 + $0xc0] sm:$0xff] %vm1766_vm9, %v1719_v4  ;;  %v7316_v12 = vpop.f32.mrf.mxu0  ;;  %7333 = vmatmul.mubr.msk.f32.gmra.mxu0 %vm2228_vm12, %v2208_v47 }
 0x259   : > { %1598 = vst.msk [vmem:[#allocation8 + $0xc8] sm:$0xff] %vm1572_vm8, %v1527_v7  ;;  %v2451_v18 = vadd.f32 %v7316_v12, %v8551_v17  ;;  %3368 = vrot.lane.b32.xlu0 %v3304_v13, %s10604_s27  ;;  %2793 = vrot.lane.b32.xlu1 %v3304_v13, %s7661_s30 }
 0x25a   : > { %v2445_v36 = vpop.f32.mrf.mxu0 }
 0x25b   : > { %v2565_v37 = vmax.f32 %v2451_v18, 0.0  ;;  %v2446_v14 = vadd.f32 %v8551_v17, %v2445_v36  ;;  %v1143_v11 = vpop.permute.xlu1 %1142  ;;  %v952_v15 = vpop.permute.xlu0 %951 }
 0x25c   : > { %1213 = vst.msk [vmem:[#allocation8 + $0xd0] sm:$0xff] %vm1186_vm6, %v1143_v11 }
 0x25d   : > { %1021 = vst.msk [vmem:[#allocation8 + $0xd8] sm:$0xff] %vm993_vm5, %v952_v15  ;;  %v2564_v20 = vmax.f32 %v2446_v14, 0.0  ;;  %3370 = vrot.lane.b32.xlu0 %v3305_v16, %s10604_s27  ;;  %3561 = vrot.lane.b32.xlu1 %v3497_v25, %s7664_s17 }
 0x25e   : > { %2640 = vst.msk [vmem:[#allocation3 + $0xd0] sm:$0xff] %vm2586_vm13, %v2565_v37  ;;  %v3886_v37 = vld [vmem:[#allocation3 + $0x68] sm:$0xff] }
 0x25f   : > { %2639 = vst.msk [vmem:[#allocation3 + $0xc8] sm:$0xff] %vm2586_vm13, %v2564_v20  ;;  %v1912_v26 = vpop.permute.xlu1 %1911  ;;  %v1721_v21 = vpop.permute.xlu0 %1720  ;;  %v4079_v20 = vld [vmem:[#allocation3 + $0x69] sm:$0xff] }
 0x260   : > { %1984 = vst.msk [vmem:[#allocation8 + $0xc0] sm:$0xff] %vm1959_vm10, %v1912_v26 }
 0x261   : > { %1792 = vst.msk [vmem:[#allocation8 + $0xc8] sm:$0xff] %vm1766_vm9, %v1721_v21  ;;  %2795 = vrot.lane.b32.xlu0 %v3305_v16, %s7661_s30  ;;  %2986 = vrot.lane.b32.xlu1 %v3497_v25, %s7662_s21  ;;  %v3887_v25 = vld [vmem:[#allocation3 + $0x70] sm:$0xff] }
 0x263   : > { %v1336_v19 = vpop.permute.xlu1 %1335  ;;  %v1145_v22 = vpop.permute.xlu0 %1144 }
 0x264   : > { %1406 = vst.msk [vmem:[#allocation8 + $0xd0] sm:$0xff] %vm1379_vm7, %v1336_v19 }
 0x265   : > { %1214 = vst.msk [vmem:[#allocation8 + $0xd8] sm:$0xff] %vm1186_vm6, %v1145_v22  ;;  %3563 = vrot.lane.b32.xlu0 %v3498_v23, %s7664_s17  ;;  %3755 = vrot.lane.b32.xlu1 %v8627_v5, %s7665_s23  ;;  %v8935_v22 = vld [vmem:[%s10578_s2] ss:$0 sm:$0xff] }
 0x266   : > { %v8823_v24 = vld [vmem:[#allocation3 + $0xc7] sm:$0xff]  ;;  %v8828_v27 = vld [vmem:[#allocation3 + $0xcf] sm:$0xff] }
 0x267   : > { %v2105_v28 = vpop.permute.xlu1 %2104  ;;  %v1914_v29 = vpop.permute.xlu0 %1913  ;;  %2705 = vst.msk [vmem:[#allocation9 + $0x60] sm:$0xff] %vm2586_vm13, %v8823_v24  ;;  %2706 = vst.msk [vmem:[#allocation9 + $0x68] sm:$0xff] %vm2586_vm13, %v8828_v27 }
 0x268   : > { %2177 = vst.msk [vmem:[#allocation8 + $0xc0] sm:$0xff] %vm2152_vm11, %v2105_v28 }
 0x269   : > { %1985 = vst.msk [vmem:[#allocation8 + $0xc8] sm:$0xff] %vm1959_vm10, %v1914_v29  ;;  %2988 = vrot.lane.b32.xlu0 %v3498_v23, %s7662_s21  ;;  %3179 = vrot.lane.b32.xlu1 %v8627_v5, %s10602_s14 }
 0x26b   : > { %v1338_v31 = vpop.permute.xlu1 %1337  ;;  %v761_v33 = vpop.permute.xlu0 %760 }
 0x26c   : > { %1407 = vst.msk [vmem:[#allocation8 + $0xd8] sm:$0xff] %vm1379_vm7, %v1338_v31  ;;  %v4080_v31 = vld [vmem:[#allocation3 + $0x71] sm:$0xff] }
 0x26d   : > { %829 = vst.msk [vmem:[#allocation8 + $0xe0] sm:$0xff] %vm800_vm4, %v761_v33  ;;  %3757 = vrot.lane.b32.xlu0 %v8629_v6, %s7665_s23  ;;  %3948 = vrot.lane.b32.xlu1 %v3884_v34, %s7666_s22 }
 0x26f   : > { %v2107_v5 = vpop.permute.xlu1 %2106  ;;  %v1529_v41 = vpop.permute.xlu0 %1528  ;;  %v2209_v42 = vld [vmem:[#allocation8 + $0xc0] sm:$0xff] }
 0x270   : > { %2178 = vst.msk [vmem:[#allocation8 + $0xc8] sm:$0xff] %vm2152_vm11, %v2107_v5  ;;  %7335 = vmatprep.mubr.msk.f32.mxu0 %vm2228_vm12, %v2209_v42 }
 0x271   : > { %1599 = vst.msk [vmem:[#allocation8 + $0xd0] sm:$0xff] %vm1572_vm8, %v1529_v41  ;;  %3181 = vrot.lane.b32.xlu0 %v8629_v6, %s10602_s14  ;;  %3372 = vrot.lane.b32.xlu1 %v3884_v34, %s10604_s27  ;;  %v4304_v6 = vld [vmem:[%s10579_s3 + $0x10] sm:$0xff]  ;;  %s10608_s14 = smov 64  }
 0x272   : > { %7359 = vmatprep.subr.mxu1 %v4304_v6 }
 0x273   : > { %v954_v54 = vpop.permute.xlu1 %953  ;;  %v763_v45 = vpop.permute.xlu0 %762  ;;  %7360 = vmatpush3.msra.mxu1 %v4304_v6 }
 0x274   : > { %1022 = vst.msk [vmem:[#allocation8 + $0xe0] sm:$0xff] %vm993_vm5, %v954_v54  ;;  %7361 = vmatprep.subr.mxu1 %v4303_v56 }
 0x275   : > { %830 = vst.msk [vmem:[#allocation8 + $0xe8] sm:$0xff] %vm800_vm4, %v763_v45  ;;  %3950 = vrot.lane.b32.xlu0 %v3885_v48, %s7666_s22  ;;  %4141 = vrot.lane.b32.xlu1 %v4077_v38, %s10608_s14 }
 0x276   : > { %7362 = vmatpush3.msra.mxu1 %v4303_v56  ;;  %v3889_v56 = vld [vmem:[#allocation3 + $0x90] sm:$0xff] }
 0x277   : > { %v1723_v49 = vpop.permute.xlu1 %1722  ;;  %v1531_v50 = vpop.permute.xlu0 %1530  ;;  %v2210_v51 = vld [vmem:[#allocation8 + $0xc8] sm:$0xff]  ;;  %7363 = vmatprep.subr.mxu1 %v4302_v58 }
 0x278   : > { %1793 = vst.msk [vmem:[#allocation8 + $0xd0] sm:$0xff] %vm1766_vm9, %v1723_v49  ;;  %v7319_v46 = vpop.f32.mrf.mxu0  ;;  %7336 = vmatmul.mubr.msk.f32.gmra.mxu0 %vm2228_vm12, %v2210_v51  ;;  %7364 = vmatpush3.msra.mxu1 %v4302_v58 }
 0x279   : > { %1600 = vst.msk [vmem:[#allocation8 + $0xd8] sm:$0xff] %vm1572_vm8, %v1531_v50  ;;  %v2461_v57 = vadd.f32 %v7319_v46, %v8551_v17  ;;  %2797 = vrot.lane.b32.xlu0 %v3884_v34, %s7661_s30  ;;  %3374 = vrot.lane.b32.xlu1 %v3885_v48, %s10604_s27  ;;  %v4081_v46 = vld [vmem:[#allocation3 + $0x89] sm:$0xff] }
 0x27a   : > { %v2455_v59 = vpop.f32.mrf.mxu0  ;;  %5842 = vmatprep.subr.mxu1 %v7652_v0 }
 0x27b   : > { %v2567_v62 = vmax.f32 %v2461_v57, 0.0  ;;  %v2456_v60 = vadd.f32 %v8551_v17, %v2455_v59  ;;  %v1147_v61 = vpop.permute.xlu1 %1146  ;;  %v956_v44 = vpop.permute.xlu0 %955 }
 0x27c   : > { %1215 = vst.msk [vmem:[#allocation8 + $0xe0] sm:$0xff] %vm1186_vm6, %v1147_v61 }
 0x27d   : > { %1023 = vst.msk [vmem:[#allocation8 + $0xe8] sm:$0xff] %vm993_vm5, %v956_v44  ;;  %v2566_v2 = vmax.f32 %v2456_v60, 0.0  ;;  %3565 = vrot.lane.b32.xlu0 %v4077_v38, %s7664_s17  ;;  %4143 = vrot.lane.b32.xlu1 %v4078_v63, %s10608_s14 }
 0x27e   : > { %2642 = vst.msk [vmem:[#allocation3 + $0xf0] sm:$0xff] %vm2586_vm13, %v2567_v62 }
 0x27f   : > { %2641 = vst.msk [vmem:[#allocation3 + $0xe8] sm:$0xff] %vm2586_vm13, %v2566_v2  ;;  %v1916_v17 = vpop.permute.xlu1 %1915  ;;  %v1725_v3 = vpop.permute.xlu0 %1724 }
 0x280   : > { %1986 = vst.msk [vmem:[#allocation8 + $0xd0] sm:$0xff] %vm1959_vm10, %v1916_v17  ;;  %v4082_v17 = vld [vmem:[#allocation3 + $0x91] sm:$0xff] }
 0x281   : > { %1794 = vst.msk [vmem:[#allocation8 + $0xd8] sm:$0xff] %vm1766_vm9, %v1725_v3  ;;  %2799 = vrot.lane.b32.xlu0 %v3885_v48, %s7661_s30  ;;  %2990 = vrot.lane.b32.xlu1 %v4077_v38, %s7662_s21  ;;  %v3888_v38 = vld [vmem:[#allocation3 + $0x88] sm:$0xff] }
 0x283   : > { %v1340_v8 = vpop.permute.xlu1 %1339  ;;  %v1149_v4 = vpop.permute.xlu0 %1148 }
 0x284   : > { %1408 = vst.msk [vmem:[#allocation8 + $0xe0] sm:$0xff] %vm1379_vm7, %v1340_v8 }
 0x285   : > { %1216 = vst.msk [vmem:[#allocation8 + $0xe8] sm:$0xff] %vm1186_vm6, %v1149_v4  ;;  %3567 = vrot.lane.b32.xlu0 %v4078_v63, %s7664_s17  ;;  %3759 = vrot.lane.b32.xlu1 %v8677_v55, %s7665_s23 }
 0x286   : > { %v8901_v7 = vld [vmem:[#allocation3 + $0xe7] sm:$0xff]  ;;  %v8903_v47 = vld [vmem:[#allocation3 + $0xef] sm:$0xff] }
 0x287   : > { %v2109_v12 = vpop.permute.xlu1 %2108  ;;  %v1918_v13 = vpop.permute.xlu0 %1917  ;;  %2707 = vst.msk [vmem:[#allocation9 + $0x70] sm:$0xff] %vm2586_vm13, %v8901_v7  ;;  %2708 = vst.msk [vmem:[#allocation9 + $0x78] sm:$0xff] %vm2586_vm13, %v8903_v47 }
 0x288   : > { %2179 = vst.msk [vmem:[#allocation8 + $0xd0] sm:$0xff] %vm2152_vm11, %v2109_v12 }
 0x289   : > { %1987 = vst.msk [vmem:[#allocation8 + $0xd8] sm:$0xff] %vm1959_vm10, %v1918_v13  ;;  %2992 = vrot.lane.b32.xlu0 %v4078_v63, %s7662_s21  ;;  %3183 = vrot.lane.b32.xlu1 %v8677_v55, %s10627_s24 }
 0x28b   : > { %v1342_v18 = vpop.permute.xlu1 %1341  ;;  %v765_v36 = vpop.permute.xlu0 %764 }
 0x28c   : > { %1409 = vst.msk [vmem:[#allocation8 + $0xe8] sm:$0xff] %vm1379_vm7, %v1342_v18 }
 0x28d   : > { %831 = vst.msk [vmem:[#allocation8 + $0xf0] sm:$0xff] %vm800_vm4, %v765_v36  ;;  %3761 = vrot.lane.b32.xlu0 %v8679_v39, %s7665_s23  ;;  %3952 = vrot.lane.b32.xlu1 %v3886_v37, %s7666_s22 }
 0x28f   : > { %v2111_v14 = vpop.permute.xlu1 %2110  ;;  %v1533_v11 = vpop.permute.xlu0 %1532  ;;  %v2211_v15 = vld [vmem:[#allocation8 + $0xd0] sm:$0xff] }
 0x290   : > { %2180 = vst.msk [vmem:[#allocation8 + $0xd8] sm:$0xff] %vm2152_vm11, %v2111_v14  ;;  %7338 = vmatprep.mubr.msk.f32.mxu0 %vm2228_vm12, %v2211_v15 }
 0x291   : > { %1601 = vst.msk [vmem:[#allocation8 + $0xe0] sm:$0xff] %vm1572_vm8, %v1533_v11  ;;  %3185 = vrot.lane.b32.xlu0 %v8679_v39, %s10627_s24  ;;  %3376 = vrot.lane.b32.xlu1 %v3886_v37, %s10604_s27 }
 0x293   : > { %v958_v55 = vpop.permute.xlu1 %957  ;;  %v767_v16 = vpop.permute.xlu0 %766 }
 0x294   : > { %1024 = vst.msk [vmem:[#allocation8 + $0xf0] sm:$0xff] %vm993_vm5, %v958_v55 }
 0x295   : > { %832 = vst.msk [vmem:[#allocation8 + $0xf8] sm:$0xff] %vm800_vm4, %v767_v16  ;;  %3954 = vrot.lane.b32.xlu0 %v3887_v25, %s7666_s22  ;;  %4145 = vrot.lane.b32.xlu1 %v4079_v20, %s10608_s14  ;;  %vm3657_vm4 = vcmask 392512  }
 0x297   : > { %v1727_v26 = vpop.permute.xlu1 %1726  ;;  %v1535_v21 = vpop.permute.xlu0 %1534  ;;  %v2212_v19 = vld [vmem:[#allocation8 + $0xd8] sm:$0xff] }
 0x298   : > { %1795 = vst.msk [vmem:[#allocation8 + $0xe0] sm:$0xff] %vm1766_vm9, %v1727_v26  ;;  %v7322_v39 = vpop.f32.mrf.mxu0  ;;  %7339 = vmatmul.mubr.msk.f32.gmra.mxu0 %vm2228_vm12, %v2212_v19  ;;  %v3891_v19 = vld [vmem:[#allocation3 + $0xb0] sm:$0xff] }
 0x299   : > { %1602 = vst.msk [vmem:[#allocation8 + $0xe8] sm:$0xff] %vm1572_vm8, %v1535_v21  ;;  %v2471_v23 = vadd.f32 %v8935_v22, %v7322_v39  ;;  %2801 = vrot.lane.b32.xlu0 %v3886_v37, %s7661_s30  ;;  %3378 = vrot.lane.b32.xlu1 %v3887_v25, %s10604_s27  ;;  %v4083_v39 = vld [vmem:[#allocation3 + $0xa9] sm:$0xff] }
 0x29a   : > { %v2465_v52 = vpop.f32.mrf.mxu0 }
 0x29b   : > { %v2569_v28 = vmax.f32 %v2471_v23, 0.0  ;;  %v2466_v29 = vadd.f32 %v8935_v22, %v2465_v52  ;;  %v1151_v32 = vpop.permute.xlu1 %1150  ;;  %v960_v30 = vpop.permute.xlu0 %959 }
 0x29c   : > { %1217 = vst.msk [vmem:[#allocation8 + $0xf0] sm:$0xff] %vm1186_vm6, %v1151_v32 }
 0x29d   : > { %1025 = vst.msk [vmem:[#allocation8 + $0xf8] sm:$0xff] %vm993_vm5, %v960_v30  ;;  %v2568_v33 = vmax.f32 %v2466_v29, 0.0  ;;  %3569 = vrot.lane.b32.xlu0 %v4079_v20, %s7664_s17  ;;  %4147 = vrot.lane.b32.xlu1 %v4080_v31, %s10608_s14  ;;  %vm3851_vm5 = vcmask 458112  }
 0x29e   : > { %2644 = vst.msk [vmem:[#allocation3 + $0x110] sm:$0xff] %vm2586_vm13, %v2569_v28 }
 0x29f   : > { %2643 = vst.msk [vmem:[#allocation3 + $0x108] sm:$0xff] %vm2586_vm13, %v2568_v33  ;;  %v1920_v34 = vpop.permute.xlu1 %1919  ;;  %v1729_v40 = vpop.permute.xlu0 %1728 }
 0x2a0   : > { %1988 = vst.msk [vmem:[#allocation8 + $0xe0] sm:$0xff] %vm1959_vm10, %v1920_v34 }
 0x2a1   : > { %1796 = vst.msk [vmem:[#allocation8 + $0xe8] sm:$0xff] %vm1766_vm9, %v1729_v40  ;;  %2803 = vrot.lane.b32.xlu0 %v3887_v25, %s7661_s30  ;;  %2994 = vrot.lane.b32.xlu1 %v4079_v20, %s7662_s21  ;;  %v3890_v25 = vld [vmem:[#allocation3 + $0xa8] sm:$0xff]  ;;  %v4084_v40 = vld [vmem:[#allocation3 + $0xb1] sm:$0xff] }
 0x2a3   : > { %v1344_v5 = vpop.permute.xlu1 %1343  ;;  %v1153_v41 = vpop.permute.xlu0 %1152 }
 0x2a4   : > { %1410 = vst.msk [vmem:[#allocation8 + $0xf0] sm:$0xff] %vm1379_vm7, %v1344_v5 }
 0x2a5   : > { %1218 = vst.msk [vmem:[#allocation8 + $0xf8] sm:$0xff] %vm1186_vm6, %v1153_v41  ;;  %3571 = vrot.lane.b32.xlu0 %v4080_v31, %s7664_s17  ;;  %3763 = vrot.lane.b32.xlu1 %v8726_v9, %s7665_s23  ;;  %vm4044_vm6 = vcmask 523712  }
 0x2a6   : > { %v8956_v42 = vld [vmem:[#allocation3 + $0x107] sm:$0xff]  ;;  %v8958_v43 = vld [vmem:[#allocation3 + $0x10f] sm:$0xff] }
 0x2a7   : > { %v2113_v35 = vpop.permute.xlu1 %2112  ;;  %v1922_v54 = vpop.permute.xlu0 %1921  ;;  %2709 = vst.msk [vmem:[#allocation9 + $0x80] sm:$0xff] %vm2586_vm13, %v8956_v42  ;;  %2710 = vst.msk [vmem:[#allocation9 + $0x88] sm:$0xff] %vm2586_vm13, %v8958_v43 }
 0x2a8   : > { %2181 = vst.msk [vmem:[#allocation8 + $0xe0] sm:$0xff] %vm2152_vm11, %v2113_v35 }
 0x2a9   : > { %1989 = vst.msk [vmem:[#allocation8 + $0xe8] sm:$0xff] %vm1959_vm10, %v1922_v54  ;;  %2996 = vrot.lane.b32.xlu0 %v4080_v31, %s7662_s21  ;;  %3187 = vrot.lane.b32.xlu1 %v8726_v9, %s10627_s24 }
 0x2ab   : > { %v1537_v45 = vpop.permute.xlu1 %1536  ;;  %v1346_v48 = vpop.permute.xlu0 %1345 }
 0x2ac   : > { %1603 = vst.msk [vmem:[#allocation8 + $0xf0] sm:$0xff] %vm1572_vm8, %v1537_v45 }
 0x2ad   : > { %1411 = vst.msk [vmem:[#allocation8 + $0xf8] sm:$0xff] %vm1379_vm7, %v1346_v48  ;;  %3765 = vrot.lane.b32.xlu0 %v8728_v10, %s7665_s23  ;;  %3956 = vrot.lane.b32.xlu1 %v3888_v38, %s7666_s22  ;;  %vm4237_vm7 = vcmask 589312  }
 0x2af   : > { %v1539_v6 = vpop.permute.xlu1 %1538  ;;  %v2115_v49 = vpop.permute.xlu0 %2114  ;;  %v2213_v50 = vld [vmem:[#allocation8 + $0xe0] sm:$0xff] }
 0x2b0   : > { %1604 = vst.msk [vmem:[#allocation8 + $0xf8] sm:$0xff] %vm1572_vm8, %v1539_v6  ;;  %7341 = vmatprep.mubr.msk.f32.mxu0 %vm2228_vm12, %v2213_v50  ;;  %vm4318_vm8 = vcmask 588800  }
 0x2b1   : > { %2182 = vst.msk [vmem:[#allocation8 + $0xe8] sm:$0xff] %vm2152_vm11, %v2115_v49  ;;  %3189 = vrot.lane.b32.xlu0 %v8728_v10, %s10627_s24  ;;  %3380 = vrot.lane.b32.xlu1 %v3888_v38, %s10604_s27 }
 0x2b3   : > { %v1733_v9 = vpop.permute.xlu1 %1732  ;;  %v1731_v51 = vpop.permute.xlu0 %1730 }
 0x2b4   : > { %1798 = vst.msk [vmem:[#allocation8 + $0xf8] sm:$0xff] %vm1766_vm9, %v1733_v9  ;;  %1797 = vst.msk [vmem:[#allocation8 + $0xf0] sm:$0xff] %vm1766_vm9, %v1731_v51  ;;  %v3892_v9 = vld [vmem:[#allocation3 + $0xc8] sm:$0xff]  ;;  %vm4672_vm9 = vcmask 130048  }
 0x2b5   : > { %3958 = vrot.lane.b32.xlu0 %v3889_v56, %s7666_s22  ;;  %4149 = vrot.lane.b32.xlu1 %v4081_v46, %s10608_s14  ;;  %4792 = vst.msk [vmem:[#allocation4 + $0x7] sm:$0xff] %vm4672_vm9, %v7652_v0  ;;  %4796 = vst.msk [vmem:[#allocation4 + $0xdf] sm:$0xff] %vm4672_vm9, %v7652_v0 }
 0x2b6   : > { %5378 = vst.msk [vmem:[#allocation5 + $0x7] sm:$0xff] %vm4672_vm9, %v7652_v0  ;;  %5381 = vst.msk [vmem:[#allocation5 + $0xdf] sm:$0xff] %vm4672_vm9, %v7652_v0 }
 0x2b7   : > { %v1926_v57 = vpop.permute.xlu1 %1925  ;;  %v1924_v58 = vpop.permute.xlu0 %1923 }
 0x2b8   : > { %v2214_v59 = vld [vmem:[#allocation8 + $0xe8] sm:$0xff]  ;;  %1991 = vst.msk [vmem:[#allocation8 + $0xf8] sm:$0xff] %vm1959_vm10, %v1926_v57  ;;  %1990 = vst.msk [vmem:[#allocation8 + $0xf0] sm:$0xff] %vm1959_vm10, %v1924_v58  ;;  %v7325_v10 = vpop.f32.mrf.mxu0  ;;  %v3893_v58 = vld [vmem:[#allocation3 + $0xd0] sm:$0xff]  ;;  %vm4799_vm10 = vcmask 122880  }
 0x2b9   : > { %7342 = vmatmul.mubr.msk.f32.gmra.mxu0 %vm2228_vm12, %v2214_v59  ;;  %v2481_v62 = vadd.f32 %v8935_v22, %v7325_v10  ;;  %2805 = vrot.lane.b32.xlu0 %v3888_v38, %s7661_s30  ;;  %v4085_v59 = vld [vmem:[#allocation3 + $0xc9] sm:$0xff]  ;;  %4809 = vst.msk [vmem:[#allocation4 + $0x40] sm:$0x1] %vm4799_vm10, %v7652_v0  ;;  %4800 = vst.msk [vmem:[#allocation4 + $0x1f] sm:$0x1] %vm4799_vm10, %v7652_v0 }
 0x2ba   : > { %3382 = vrot.lane.b32.xlu1 %v3889_v56, %s10604_s27  ;;  %v2475_v60 = vpop.f32.mrf.mxu0  ;;  %4801 = vst.msk [vmem:[#allocation4 + $0x37] sm:$0x1] %vm4799_vm10, %v7652_v0  ;;  %4802 = vst.msk [vmem:[#allocation4 + $0x4f] sm:$0x1] %vm4799_vm10, %v7652_v0 }
 0x2bb   : > { %v2571_v61 = vmax.f32 %v2481_v62, 0.0  ;;  %v2476_v44 = vadd.f32 %v8935_v22, %v2475_v60  ;;  %v2119_v63 = vpop.permute.xlu1 %2118  ;;  %v2117_v2 = vpop.permute.xlu0 %2116  ;;  %4803 = vst.msk [vmem:[#allocation4 + $0x67] sm:$0x1] %vm4799_vm10, %v7652_v0  ;;  %4804 = vst.msk [vmem:[#allocation4 + $0x7f] sm:$0x1] %vm4799_vm10, %v7652_v0 }
 0x2bc   : > { %2184 = vst.msk [vmem:[#allocation8 + $0xf8] sm:$0xff] %vm2152_vm11, %v2119_v63  ;;  %2183 = vst.msk [vmem:[#allocation8 + $0xf0] sm:$0xff] %vm2152_vm11, %v2117_v2  ;;  %vm4793_vm11 = vcmask 123904  }
 0x2bd   : > { %2646 = vst.msk [vmem:[#allocation3 + $0x130] sm:$0xff] %vm2586_vm13, %v2571_v61  ;;  %v2570_v3 = vmax.f32 %v2476_v44, 0.0  ;;  %3573 = vrot.lane.b32.xlu0 %v4081_v46, %s7664_s17 }
 0x2be   : > { %4151 = vrot.lane.b32.xlu1 %v4082_v17, %s10608_s14  ;;  %4805 = vst.msk [vmem:[#allocation4 + $0x97] sm:$0x1] %vm4799_vm10, %v7652_v0  ;;  %4806 = vst.msk [vmem:[#allocation4 + $0xaf] sm:$0x1] %vm4799_vm10, %v7652_v0 }
 0x2bf   : > { %2645 = vst.msk [vmem:[#allocation3 + $0x128] sm:$0xff] %vm2586_vm13, %v2570_v3  ;;  %v2792_v8 = vpop.permute.xlu1 %2791  ;;  %v2790_v4 = vpop.permute.xlu0 %2789 }
 0x2c0   : > { %2887 = vst.msk [vmem:[#allocation9 + $0x8] sm:$0xff] %vm2885_vm0, %v2792_v8  ;;  %2886 = vst.msk [vmem:[#allocation9] sm:$0xff] %vm2885_vm0, %v2790_v4  ;;  %v4086_v4 = vld [vmem:[#allocation3 + $0xd1] sm:$0xff] }
 0x2c1   : > { %2807 = vrot.lane.b32.xlu0 %v3889_v56, %s7661_s30  ;;  %4807 = vst.msk [vmem:[#allocation4 + $0xc7] sm:$0x1] %vm4799_vm10, %v7652_v0  ;;  %4808 = vst.msk [vmem:[#allocation4 + $0x28] sm:$0x1] %vm4799_vm10, %v7652_v0 }
 0x2c2   : > { %2998 = vrot.lane.b32.xlu1 %v4081_v46, %s7662_s21  ;;  %4810 = vst.msk [vmem:[#allocation4 + $0x58] sm:$0x1] %vm4799_vm10, %v7652_v0  ;;  %4811 = vst.msk [vmem:[#allocation4 + $0x70] sm:$0x1] %vm4799_vm10, %v7652_v0 }
 0x2c3   : > { %v2985_v12 = vpop.permute.xlu1 %2984  ;;  %v2983_v13 = vpop.permute.xlu0 %2982  ;;  %v2215_v18 = vld [vmem:[#allocation8 + $0xf0] sm:$0xff]  ;;  %v2216_v36 = vld [vmem:[#allocation8 + $0xf8] sm:$0xff]  ;;  %4812 = vst.msk [vmem:[#allocation4 + $0x88] sm:$0x1] %vm4799_vm10, %v7652_v0  ;;  %4813 = vst.msk [vmem:[#allocation4 + $0xa0] sm:$0x1] %vm4799_vm10, %v7652_v0 }
 0x2c4   : > { %3080 = vst.msk [vmem:[#allocation9 + $0x8] sm:$0xff] %vm3078_vm1, %v2985_v12  ;;  %3079 = vst.msk [vmem:[#allocation9] sm:$0xff] %vm3078_vm1, %v2983_v13  ;;  %7344 = vmatprep.mubr.msk.f32.mxu0 %vm2228_vm12, %v2215_v18 }
 0x2c5   : > { %7345 = vmatmul.mubr.msk.f32.gmra.mxu0 %vm2228_vm12, %v2216_v36  ;;  %3575 = vrot.lane.b32.xlu0 %v4082_v17, %s7664_s17  ;;  %4814 = vst.msk [vmem:[#allocation4 + $0xb8] sm:$0x1] %vm4799_vm10, %v7652_v0  ;;  %4815 = vst.msk [vmem:[#allocation4 + $0xd0] sm:$0x1] %vm4799_vm10, %v7652_v0  ;;  %vm4880_vm12 = vcmask 261248  }
 0x2c6   : > { %3767 = vrot.lane.b32.xlu1 %v8774_v53, %s7665_s23  ;;  %v9008_v37 = vld [vmem:[#allocation3 + $0x127] sm:$0xff]  ;;  %v9010_v14 = vld [vmem:[#allocation3 + $0x12f] sm:$0xff]  ;;  %5384 = vst.msk [vmem:[#allocation5 + $0x1f] sm:$0x1] %vm4799_vm10, %v7652_v0  ;;  %5385 = vst.msk [vmem:[#allocation5 + $0x37] sm:$0x1] %vm4799_vm10, %v7652_v0 }
 0x2c7   : > { %v3178_v11 = vpop.permute.xlu1 %3177  ;;  %v3176_v15 = vpop.permute.xlu0 %3175  ;;  %2711 = vst.msk [vmem:[#allocation9 + $0x90] sm:$0xff] %vm2586_vm13, %v9008_v37  ;;  %2712 = vst.msk [vmem:[#allocation9 + $0x98] sm:$0xff] %vm2586_vm13, %v9010_v14 }
 0x2c8   : > { %3273 = vst.msk [vmem:[#allocation9 + $0x8] sm:$0xff] %vm3271_vm2, %v3178_v11  ;;  %3272 = vst.msk [vmem:[#allocation9] sm:$0xff] %vm3271_vm2, %v3176_v15 }
 0x2c9   : > { %3000 = vrot.lane.b32.xlu0 %v4082_v17, %s7662_s21  ;;  %5386 = vst.msk [vmem:[#allocation5 + $0x4f] sm:$0x1] %vm4799_vm10, %v7652_v0  ;;  %5387 = vst.msk [vmem:[#allocation5 + $0x67] sm:$0x1] %vm4799_vm10, %v7652_v0 }
 0x2ca   : > { %3191 = vrot.lane.b32.xlu1 %v8774_v53, %s10627_s24  ;;  %5388 = vst.msk [vmem:[#allocation5 + $0x7f] sm:$0x1] %vm4799_vm10, %v7652_v0  ;;  %5389 = vst.msk [vmem:[#allocation5 + $0x97] sm:$0x1] %vm4799_vm10, %v7652_v0 }
 0x2cb   : > { %v3369_v55 = vpop.permute.xlu0 %3368  ;;  %v2794_v16 = vpop.permute.xlu1 %2793  ;;  %5390 = vst.msk [vmem:[#allocation5 + $0xaf] sm:$0x1] %vm4799_vm10, %v7652_v0  ;;  %5391 = vst.msk [vmem:[#allocation5 + $0xc7] sm:$0x1] %vm4799_vm10, %v7652_v0 }
 0x2cc   : > { %3465 = vst.msk [vmem:[#allocation9] sm:$0xff] %vm3464_vm3, %v3369_v55 }
 0x2cd   : > { %2888 = vst.msk [vmem:[#allocation9 + $0x10] sm:$0xff] %vm2885_vm0, %v2794_v16  ;;  %3769 = vrot.lane.b32.xlu0 %v8776_v1, %s7665_s23 }
 0x2ce   : > { %3960 = vrot.lane.b32.xlu1 %v3890_v25, %s7666_s22  ;;  %5392 = vst.msk [vmem:[#allocation5 + $0x28] sm:$0x1] %vm4799_vm10, %v7652_v0  ;;  %5393 = vst.msk [vmem:[#allocation5 + $0x40] sm:$0x1] %vm4799_vm10, %v7652_v0 }
 0x2cf   : > { %v3371_v20 = vpop.permute.xlu0 %3370  ;;  %v3562_v26 = vpop.permute.xlu1 %3561  ;;  %5394 = vst.msk [vmem:[#allocation5 + $0x58] sm:$0x1] %vm4799_vm10, %v7652_v0  ;;  %5395 = vst.msk [vmem:[#allocation5 + $0x70] sm:$0x1] %vm4799_vm10, %v7652_v0 }
 0x2d0   : > { %3466 = vst.msk [vmem:[#allocation9 + $0x8] sm:$0xff] %vm3464_vm3, %v3371_v20 }
 0x2d1   : > { %3658 = vst.msk [vmem:[#allocation9] sm:$0xff] %vm3657_vm4, %v3562_v26  ;;  %3193 = vrot.lane.b32.xlu0 %v8776_v1, %s10627_s24  ;;  %v3894_v26 = vld [vmem:[#allocation3 + $0xe8] sm:$0xff] }
 0x2d2   : > { %3384 = vrot.lane.b32.xlu1 %v3890_v25, %s10604_s27  ;;  %5396 = vst.msk [vmem:[#allocation5 + $0x88] sm:$0x1] %vm4799_vm10, %v7652_v0  ;;  %5397 = vst.msk [vmem:[#allocation5 + $0xa0] sm:$0x1] %vm4799_vm10, %v7652_v0 }
 0x2d3   : > { %v2796_v53 = vpop.permute.xlu0 %2795  ;;  %v2987_v21 = vpop.permute.xlu1 %2986  ;;  %5398 = vst.msk [vmem:[#allocation5 + $0xb8] sm:$0x1] %vm4799_vm10, %v7652_v0  ;;  %5399 = vst.msk [vmem:[#allocation5 + $0xd0] sm:$0x1] %vm4799_vm10, %v7652_v0  ;;  %vm6082_vm10 = vcmask 785920  }
 0x2d4   : > { %2889 = vst.msk [vmem:[#allocation9 + $0x18] sm:$0xff] %vm2885_vm0, %v2796_v53 }
 0x2d5   : > { %3081 = vst.msk [vmem:[#allocation9 + $0x10] sm:$0xff] %vm3078_vm1, %v2987_v21  ;;  %3962 = vrot.lane.b32.xlu0 %v3891_v19, %s7666_s22 }
 0x2d6   : > { %4153 = vrot.lane.b32.xlu1 %v4083_v39, %s10608_s14  ;;  %4794 = vst.msk [vmem:[#allocation4 + $0xf] sm:$0x3] %vm4793_vm11, %v7652_v0  ;;  %4797 = vst.msk [vmem:[#allocation4 + $0xe7] sm:$0x3] %vm4793_vm11, %v7652_v0 }
 0x2d7   : > { %v3564_v23 = vpop.permute.xlu0 %3563  ;;  %v3756_v52 = vpop.permute.xlu1 %3755  ;;  %5379 = vst.msk [vmem:[#allocation5 + $0xf] sm:$0x3] %vm4793_vm11, %v7652_v0  ;;  %5382 = vst.msk [vmem:[#allocation5 + $0xe7] sm:$0x3] %vm4793_vm11, %v7652_v0  ;;  %vm6870_vm11 = vcmask 523264  }
 0x2d8   : > { %3659 = vst.msk [vmem:[#allocation9 + $0x8] sm:$0xff] %vm3657_vm4, %v3564_v23  ;;  %v7328_v1 = vpop.f32.mrf.mxu0  ;;  %v3895_v23 = vld [vmem:[#allocation3 + $0xf0] sm:$0xff] }
 0x2d9   : > { %3852 = vst.msk [vmem:[#allocation9] sm:$0xff] %vm3851_vm5, %v3756_v52  ;;  %v2491_v28 = vadd.f32 %v8935_v22, %v7328_v1  ;;  %2809 = vrot.lane.b32.xlu0 %v3890_v25, %s7661_s30  ;;  %v4087_v52 = vld [vmem:[#allocation3 + $0xe9] sm:$0xff] }
 0x2da   : > { %3386 = vrot.lane.b32.xlu1 %v3891_v19, %s10604_s27  ;;  %v2485_v29 = vpop.f32.mrf.mxu0 }
 0x2db   : > { %v2573_v32 = vmax.f32 %v2491_v28, 0.0  ;;  %v2486_v30 = vadd.f32 %v8935_v22, %v2485_v29  ;;  %v2989_v31 = vpop.permute.xlu0 %2988  ;;  %v3180_v33 = vpop.permute.xlu1 %3179 }
 0x2dc   : > { %3082 = vst.msk [vmem:[#allocation9 + $0x18] sm:$0xff] %vm3078_vm1, %v2989_v31 }
 0x2dd   : > { %3274 = vst.msk [vmem:[#allocation9 + $0x10] sm:$0xff] %vm3271_vm2, %v3180_v33  ;;  %v2572_v34 = vmax.f32 %v2486_v30, 0.0  ;;  %3577 = vrot.lane.b32.xlu0 %v4083_v39, %s7664_s17 }
 0x2de   : > { %2648 = vst.msk [vmem:[#allocation3 + $0x150] sm:$0xff] %vm2586_vm13, %v2573_v32  ;;  %4155 = vrot.lane.b32.xlu1 %v4084_v40, %s10608_s14 }
 0x2df   : > { %2647 = vst.msk [vmem:[#allocation3 + $0x148] sm:$0xff] %vm2586_vm13, %v2572_v34  ;;  %v3758_v5 = vpop.permute.xlu0 %3757  ;;  %v3949_v41 = vpop.permute.xlu1 %3948 }
 0x2e0   : > { %3853 = vst.msk [vmem:[#allocation9 + $0x8] sm:$0xff] %vm3851_vm5, %v3758_v5 }
 0x2e1   : > { %4045 = vst.msk [vmem:[#allocation9] sm:$0xff] %vm4044_vm6, %v3949_v41  ;;  %2811 = vrot.lane.b32.xlu0 %v3891_v19, %s7661_s30  ;;  %v4088_v41 = vld [vmem:[#allocation3 + $0xf1] sm:$0xff] }
 0x2e2   : > { %3002 = vrot.lane.b32.xlu1 %v4083_v39, %s7662_s21 }
 0x2e3   : > { %v3182_v35 = vpop.permute.xlu0 %3181  ;;  %v3373_v54 = vpop.permute.xlu1 %3372 }
 0x2e4   : > { %3275 = vst.msk [vmem:[#allocation9 + $0x18] sm:$0xff] %vm3271_vm2, %v3182_v35 }
 0x2e5   : > { %3467 = vst.msk [vmem:[#allocation9 + $0x10] sm:$0xff] %vm3464_vm3, %v3373_v54  ;;  %3579 = vrot.lane.b32.xlu0 %v4084_v40, %s7664_s17 }
 0x2e6   : > { %3771 = vrot.lane.b32.xlu1 %v8823_v24, %s7665_s23  ;;  %v9056_v45 = vld [vmem:[#allocation3 + $0x147] sm:$0xff]  ;;  %v9058_v48 = vld [vmem:[#allocation3 + $0x14f] sm:$0xff] }
 0x2e7   : > { %v3951_v38 = vpop.permute.xlu0 %3950  ;;  %v4142_v6 = vpop.permute.xlu1 %4141  ;;  %2713 = vst.msk [vmem:[#allocation9 + $0xa0] sm:$0xff] %vm2586_vm13, %v9056_v45  ;;  %2714 = vst.msk [vmem:[#allocation9 + $0xa8] sm:$0xff] %vm2586_vm13, %v9058_v48 }
 0x2e8   : > { %4046 = vst.msk [vmem:[#allocation9 + $0x8] sm:$0xff] %vm4044_vm6, %v3951_v38 }
 0x2e9   : > { %4238 = vst.msk [vmem:[#allocation9] sm:$0xff] %vm4237_vm7, %v4142_v6  ;;  %3004 = vrot.lane.b32.xlu0 %v4084_v40, %s7662_s21 }
 0x2ea   : > { %3195 = vrot.lane.b32.xlu1 %v8823_v24, %s10627_s24 }
 0x2eb   : > { %v2798_v49 = vpop.permute.xlu0 %2797  ;;  %v3375_v50 = vpop.permute.xlu1 %3374 }
 0x2ec   : > { %2890 = vst.msk [vmem:[#allocation9 + $0x20] sm:$0xff] %vm2885_vm0, %v2798_v49 }
 0x2ed   : > { %3468 = vst.msk [vmem:[#allocation9 + $0x18] sm:$0xff] %vm3464_vm3, %v3375_v50  ;;  %3773 = vrot.lane.b32.xlu0 %v8828_v27, %s7665_s23 }
 0x2ee   : > { %3964 = vrot.lane.b32.xlu1 %v3892_v9, %s7666_s22 }
 0x2ef   : > { %v3566_v51 = vpop.permute.xlu0 %3565  ;;  %v4144_v56 = vpop.permute.xlu1 %4143 }
 0x2f0   : > { %v4270_v46 = vld [vmem:[#allocation9] sm:$0xff]  ;;  %3660 = vst.msk [vmem:[#allocation9 + $0x10] sm:$0xff] %vm3657_vm4, %v3566_v51 }
 0x2f1   : > { %4239 = vst.msk [vmem:[#allocation9 + $0x8] sm:$0xff] %vm4237_vm7, %v4144_v56  ;;  %7365 = vmatprep.mubr.msk.f32.mxu1 %vm4318_vm8, %v4270_v46  ;;  %3197 = vrot.lane.b32.xlu0 %v8828_v27, %s10627_s24 }
 0x2f2   : > { %3388 = vrot.lane.b32.xlu1 %v3892_v9, %s10604_s27 }
 0x2f3   : > { %v2800_v24 = vpop.permute.xlu0 %2799  ;;  %v2991_v57 = vpop.permute.xlu1 %2990 }
 0x2f4   : > { %2891 = vst.msk [vmem:[#allocation9 + $0x28] sm:$0xff] %vm2885_vm0, %v2800_v24  ;;  %v3896_v24 = vld [vmem:[#allocation3 + $0x108] sm:$0xff] }
 0x2f5   : > { %3083 = vst.msk [vmem:[#allocation9 + $0x20] sm:$0xff] %vm3078_vm1, %v2991_v57  ;;  %3966 = vrot.lane.b32.xlu0 %v3893_v58, %s7666_s22 }
 0x2f6   : > { %4157 = vrot.lane.b32.xlu1 %v4085_v59, %s10608_s14 }
 0x2f7   : > { %v3568_v10 = vpop.permute.xlu0 %3567  ;;  %v3760_v62 = vpop.permute.xlu1 %3759 }
 0x2f8   : > { %v4271_v60 = vld [vmem:[#allocation9 + $0x8] sm:$0xff]  ;;  %3661 = vst.msk [vmem:[#allocation9 + $0x18] sm:$0xff] %vm3657_vm4, %v3568_v10  ;;  %v7331_v27 = vpop.f32.mrf.mxu0 }
 0x2f9   : > { %3854 = vst.msk [vmem:[#allocation9 + $0x10] sm:$0xff] %vm3851_vm5, %v3760_v62  ;;  %7366 = vmatmul.mubr.msk.f32.vlgmr.msra.gmra.mxu1 %vm4318_vm8, %v4271_v60  ;;  %v2501_v61 = vadd.f32 %v8935_v22, %v7331_v27  ;;  %2813 = vrot.lane.b32.xlu0 %v3892_v9, %s7661_s30  ;;  %v3897_v62 = vld [vmem:[#allocation3 + $0x110] sm:$0xff] }
 0x2fa   : > { %3390 = vrot.lane.b32.xlu1 %v3893_v58, %s10604_s27  ;;  %v2495_v44 = vpop.f32.mrf.mxu0  ;;  %v4089_v60 = vld [vmem:[#allocation3 + $0x109] sm:$0xff] }
 0x2fb   : > { %v2575_v63 = vmax.f32 %v2501_v61, 0.0  ;;  %v2496_v2 = vadd.f32 %v8935_v22, %v2495_v44  ;;  %v2993_v17 = vpop.permute.xlu0 %2992  ;;  %v3184_v3 = vpop.permute.xlu1 %3183 }
 0x2fc   : > { %3084 = vst.msk [vmem:[#allocation9 + $0x28] sm:$0xff] %vm3078_vm1, %v2993_v17 }
 0x2fd   : > { %3276 = vst.msk [vmem:[#allocation9 + $0x20] sm:$0xff] %vm3271_vm2, %v3184_v3  ;;  %v2574_v8 = vmax.f32 %v2496_v2, 0.0  ;;  %3581 = vrot.lane.b32.xlu0 %v4085_v59, %s7664_s17 }
 0x2fe   : > { %2650 = vst.msk [vmem:[#allocation3 + $0x170] sm:$0xff] %vm2586_vm13, %v2575_v63  ;;  %4159 = vrot.lane.b32.xlu1 %v4086_v4, %s10608_s14 }
 0x2ff   : > { %2649 = vst.msk [vmem:[#allocation3 + $0x168] sm:$0xff] %vm2586_vm13, %v2574_v8  ;;  %v3762_v12 = vpop.permute.xlu0 %3761  ;;  %v3953_v13 = vpop.permute.xlu1 %3952 }
 0x300   : > { %3855 = vst.msk [vmem:[#allocation9 + $0x18] sm:$0xff] %vm3851_vm5, %v3762_v12 }
 0x301   : > { %4047 = vst.msk [vmem:[#allocation9 + $0x10] sm:$0xff] %vm4044_vm6, %v3953_v13  ;;  %2815 = vrot.lane.b32.xlu0 %v3893_v58, %s7661_s30  ;;  %v4090_v13 = vld [vmem:[#allocation3 + $0x111] sm:$0xff] }
 0x302   : > { %3006 = vrot.lane.b32.xlu1 %v4085_v59, %s7662_s21 }
 0x303   : > { %v3186_v18 = vpop.permute.xlu0 %3185  ;;  %v3377_v36 = vpop.permute.xlu1 %3376 }
 0x304   : > { %3277 = vst.msk [vmem:[#allocation9 + $0x28] sm:$0xff] %vm3271_vm2, %v3186_v18 }
 0x305   : > { %3469 = vst.msk [vmem:[#allocation9 + $0x20] sm:$0xff] %vm3464_vm3, %v3377_v36  ;;  %3583 = vrot.lane.b32.xlu0 %v4086_v4, %s7664_s17 }
 0x306   : > { %3775 = vrot.lane.b32.xlu1 %v8901_v7, %s7665_s23  ;;  %v9106_v11 = vld [vmem:[#allocation3 + $0x167] sm:$0xff]  ;;  %v9108_v15 = vld [vmem:[#allocation3 + $0x16f] sm:$0xff] }
 0x307   : > { %v3955_v55 = vpop.permute.xlu0 %3954  ;;  %v4146_v16 = vpop.permute.xlu1 %4145  ;;  %2715 = vst.msk [vmem:[#allocation9 + $0xb0] sm:$0xff] %vm2586_vm13, %v9106_v11  ;;  %2716 = vst.msk [vmem:[#allocation9 + $0xb8] sm:$0xff] %vm2586_vm13, %v9108_v15 }
 0x308   : > { %4048 = vst.msk [vmem:[#allocation9 + $0x18] sm:$0xff] %vm4044_vm6, %v3955_v55 }
 0x309   : > { %4240 = vst.msk [vmem:[#allocation9 + $0x10] sm:$0xff] %vm4237_vm7, %v4146_v16  ;;  %3008 = vrot.lane.b32.xlu0 %v4086_v4, %s7662_s21 }
 0x30a   : > { %3199 = vrot.lane.b32.xlu1 %v8901_v7, %s10627_s24 }
 0x30b   : > { %v2802_v25 = vpop.permute.xlu0 %2801  ;;  %v3379_v20 = vpop.permute.xlu1 %3378 }
 0x30c   : > { %2892 = vst.msk [vmem:[#allocation9 + $0x30] sm:$0xff] %vm2885_vm0, %v2802_v25 }
 0x30d   : > { %3470 = vst.msk [vmem:[#allocation9 + $0x28] sm:$0xff] %vm3464_vm3, %v3379_v20  ;;  %3777 = vrot.lane.b32.xlu0 %v8903_v47, %s7665_s23 }
 0x30e   : > { %3968 = vrot.lane.b32.xlu1 %v3894_v26, %s7666_s22 }
 0x30f   : > { %v3570_v53 = vpop.permute.xlu0 %3569  ;;  %v4148_v21 = vpop.permute.xlu1 %4147 }
 0x310   : > { %v4272_v19 = vld [vmem:[#allocation9 + $0x10] sm:$0xff]  ;;  %3662 = vst.msk [vmem:[#allocation9 + $0x20] sm:$0xff] %vm3657_vm4, %v3570_v53 }
 0x311   : > { %4241 = vst.msk [vmem:[#allocation9 + $0x18] sm:$0xff] %vm4237_vm7, %v4148_v21  ;;  %7368 = vmatprep.mubr.msk.f32.mxu1 %vm4318_vm8, %v4272_v19  ;;  %3201 = vrot.lane.b32.xlu0 %v8903_v47, %s10627_s24 }
 0x312   : > { %3392 = vrot.lane.b32.xlu1 %v3894_v26, %s10604_s27 }
 0x313   : > { %v2804_v7 = vpop.permute.xlu0 %2803  ;;  %v2995_v39 = vpop.permute.xlu1 %2994 }
 0x314   : > { %2893 = vst.msk [vmem:[#allocation9 + $0x38] sm:$0xff] %vm2885_vm0, %v2804_v7  ;;  %v3898_v7 = vld [vmem:[#allocation3 + $0x128] sm:$0xff] }
 0x315   : > { %3085 = vst.msk [vmem:[#allocation9 + $0x30] sm:$0xff] %vm3078_vm1, %v2995_v39  ;;  %3970 = vrot.lane.b32.xlu0 %v3895_v23, %s7666_s22 }
 0x316   : > { %4161 = vrot.lane.b32.xlu1 %v4087_v52, %s10608_s14 }
 0x317   : > { %v3572_v1 = vpop.permute.xlu0 %3571  ;;  %v3764_v28 = vpop.permute.xlu1 %3763 }
 0x318   : > { %v4273_v29 = vld [vmem:[#allocation9 + $0x18] sm:$0xff]  ;;  %3663 = vst.msk [vmem:[#allocation9 + $0x28] sm:$0xff] %vm3657_vm4, %v3572_v1  ;;  %v7334_v47 = vpop.f32.mrf.mxu0 }
 0x319   : > { %3856 = vst.msk [vmem:[#allocation9 + $0x20] sm:$0xff] %vm3851_vm5, %v3764_v28  ;;  %7369 = vmatmul.mubr.msk.f32.gmra.mxu1 %vm4318_vm8, %v4273_v29  ;;  %v2511_v32 = vadd.f32 %v8935_v22, %v7334_v47  ;;  %2817 = vrot.lane.b32.xlu0 %v3894_v26, %s7661_s30  ;;  %v3899_v28 = vld [vmem:[#allocation3 + $0x130] sm:$0xff] }
 0x31a   : > { %3394 = vrot.lane.b32.xlu1 %v3895_v23, %s10604_s27  ;;  %v2505_v30 = vpop.f32.mrf.mxu0  ;;  %v4091_v29 = vld [vmem:[#allocation3 + $0x129] sm:$0xff] }
 0x31b   : > { %v2577_v31 = vmax.f32 %v2511_v32, 0.0  ;;  %v2506_v33 = vadd.f32 %v8935_v22, %v2505_v30  ;;  %v2997_v34 = vpop.permute.xlu0 %2996  ;;  %v3188_v40 = vpop.permute.xlu1 %3187 }
 0x31c   : > { %3086 = vst.msk [vmem:[#allocation9 + $0x38] sm:$0xff] %vm3078_vm1, %v2997_v34 }
 0x31d   : > { %3278 = vst.msk [vmem:[#allocation9 + $0x30] sm:$0xff] %vm3271_vm2, %v3188_v40  ;;  %v2576_v5 = vmax.f32 %v2506_v33, 0.0  ;;  %3585 = vrot.lane.b32.xlu0 %v4087_v52, %s7664_s17 }
 0x31e   : > { %2652 = vst.msk [vmem:[#allocation3 + $0x190] sm:$0xff] %vm2586_vm13, %v2577_v31  ;;  %4163 = vrot.lane.b32.xlu1 %v4088_v41, %s10608_s14 }
 0x31f   : > { %2651 = vst.msk [vmem:[#allocation3 + $0x188] sm:$0xff] %vm2586_vm13, %v2576_v5  ;;  %v3766_v35 = vpop.permute.xlu0 %3765  ;;  %v3957_v54 = vpop.permute.xlu1 %3956 }
 0x320   : > { %3857 = vst.msk [vmem:[#allocation9 + $0x28] sm:$0xff] %vm3851_vm5, %v3766_v35 }
 0x321   : > { %4049 = vst.msk [vmem:[#allocation9 + $0x20] sm:$0xff] %vm4044_vm6, %v3957_v54  ;;  %2819 = vrot.lane.b32.xlu0 %v3895_v23, %s7661_s30  ;;  %v4092_v54 = vld [vmem:[#allocation3 + $0x131] sm:$0xff] }
 0x322   : > { %3010 = vrot.lane.b32.xlu1 %v4087_v52, %s7662_s21 }
 0x323   : > { %v3190_v38 = vpop.permute.xlu0 %3189  ;;  %v3381_v6 = vpop.permute.xlu1 %3380 }
 0x324   : > { %3279 = vst.msk [vmem:[#allocation9 + $0x38] sm:$0xff] %vm3271_vm2, %v3190_v38 }
 0x325   : > { %3471 = vst.msk [vmem:[#allocation9 + $0x30] sm:$0xff] %vm3464_vm3, %v3381_v6  ;;  %3587 = vrot.lane.b32.xlu0 %v4088_v41, %s7664_s17 }
 0x326   : > { %3779 = vrot.lane.b32.xlu1 %v8956_v42, %s7665_s23  ;;  %v9156_v49 = vld [vmem:[#allocation3 + $0x187] sm:$0xff]  ;;  %v9158_v50 = vld [vmem:[#allocation3 + $0x18f] sm:$0xff] }
 0x327   : > { %v3959_v9 = vpop.permute.xlu0 %3958  ;;  %v4150_v51 = vpop.permute.xlu1 %4149  ;;  %2717 = vst.msk [vmem:[#allocation9 + $0xc0] sm:$0xff] %vm2586_vm13, %v9156_v49  ;;  %2718 = vst.msk [vmem:[#allocation9 + $0xc8] sm:$0xff] %vm2586_vm13, %v9158_v50 }
 0x328   : > { %4050 = vst.msk [vmem:[#allocation9 + $0x28] sm:$0xff] %vm4044_vm6, %v3959_v9 }
 0x329   : > { %4242 = vst.msk [vmem:[#allocation9 + $0x20] sm:$0xff] %vm4237_vm7, %v4150_v51  ;;  %3012 = vrot.lane.b32.xlu0 %v4088_v41, %s7662_s21 }
 0x32a   : > { %3203 = vrot.lane.b32.xlu1 %v8956_v42, %s10627_s24 }
 0x32b   : > { %v2806_v56 = vpop.permute.xlu0 %2805 }
 0x32c   : > { %v3383_v46 = vpop.permute.xlu1 %3382  ;;  %2894 = vst.msk [vmem:[#allocation9 + $0x40] sm:$0xff] %vm2885_vm0, %v2806_v56 }
 0x32d   : > { %3472 = vst.msk [vmem:[#allocation9 + $0x38] sm:$0xff] %vm3464_vm3, %v3383_v46  ;;  %3781 = vrot.lane.b32.xlu0 %v8958_v43, %s7665_s23 }
 0x32e   : > { %3972 = vrot.lane.b32.xlu1 %v3896_v24, %s7666_s22 }
 0x32f   : > { %v3574_v57 = vpop.permute.xlu0 %3573 }
 0x330   : > { %v4152_v58 = vpop.permute.xlu1 %4151  ;;  %v4274_v59 = vld [vmem:[#allocation9 + $0x20] sm:$0xff]  ;;  %3664 = vst.msk [vmem:[#allocation9 + $0x30] sm:$0xff] %vm3657_vm4, %v3574_v57 }
 0x331   : > { %4243 = vst.msk [vmem:[#allocation9 + $0x28] sm:$0xff] %vm4237_vm7, %v4152_v58  ;;  %7371 = vmatprep.mubr.msk.f32.mxu1 %vm4318_vm8, %v4274_v59  ;;  %3205 = vrot.lane.b32.xlu0 %v8958_v43, %s10627_s24 }
 0x332   : > { %3396 = vrot.lane.b32.xlu1 %v3896_v24, %s10604_s27 }
 0x333   : > { %v2808_v42 = vpop.permute.xlu0 %2807 }
 0x334   : > { %v2999_v10 = vpop.permute.xlu1 %2998  ;;  %2895 = vst.msk [vmem:[#allocation9 + $0x48] sm:$0xff] %vm2885_vm0, %v2808_v42 }
 0x335   : > { %3087 = vst.msk [vmem:[#allocation9 + $0x40] sm:$0xff] %vm3078_vm1, %v2999_v10  ;;  %3974 = vrot.lane.b32.xlu0 %v3897_v62, %s7666_s22 }
 0x336   : > { %4165 = vrot.lane.b32.xlu1 %v4089_v60, %s10608_s14 }
 0x337   : > { %v3576_v27 = vpop.permute.xlu0 %3575 }
 0x338   : > { %v4275_v61 = vld [vmem:[#allocation9 + $0x28] sm:$0xff]  ;;  %3665 = vst.msk [vmem:[#allocation9 + $0x38] sm:$0xff] %vm3657_vm4, %v3576_v27  ;;  %v3768_v44 = vpop.permute.xlu1 %3767  ;;  %v7337_v43 = vpop.f32.mrf.mxu0  ;;  %v3901_v27 = vld [vmem:[#allocation3 + $0x150] sm:$0xff] }
 0x339   : > { %7372 = vmatmul.mubr.msk.f32.gmra.mxu1 %vm4318_vm8, %v4275_v61  ;;  %3858 = vst.msk [vmem:[#allocation9 + $0x30] sm:$0xff] %vm3851_vm5, %v3768_v44  ;;  %v2521_v63 = vadd.f32 %v8935_v22, %v7337_v43  ;;  %2821 = vrot.lane.b32.xlu0 %v3896_v24, %s7661_s30  ;;  %v4093_v61 = vld [vmem:[#allocation3 + $0x149] sm:$0xff] }
 0x33a   : > { %3398 = vrot.lane.b32.xlu1 %v3897_v62, %s10604_s27  ;;  %v2515_v2 = vpop.f32.mrf.mxu0 }
 0x33b   : > { %v2579_v17 = vmax.f32 %v2521_v63, 0.0  ;;  %v2516_v3 = vadd.f32 %v8935_v22, %v2515_v2  ;;  %v3001_v8 = vpop.permute.xlu0 %3000  ;;  %v7524_v2 = vld [vmem:[%s10578_s2] ss:$0 sm:$0xff] }
 0x33c   : > { %3088 = vst.msk [vmem:[#allocation9 + $0x48] sm:$0xff] %vm3078_vm1, %v3001_v8  ;;  %v3192_v4 = vpop.permute.xlu1 %3191 }
 0x33d   : > { %2654 = vst.msk [vmem:[#allocation3 + $0x1b0] sm:$0xff] %vm2586_vm13, %v2579_v17  ;;  %v2578_v12 = vmax.f32 %v2516_v3, 0.0  ;;  %3589 = vrot.lane.b32.xlu0 %v4089_v60, %s7664_s17 }
 0x33e   : > { %3280 = vst.msk [vmem:[#allocation9 + $0x40] sm:$0xff] %vm3271_vm2, %v3192_v4  ;;  %4167 = vrot.lane.b32.xlu1 %v4090_v13, %s10608_s14 }
 0x33f   : > { %2653 = vst.msk [vmem:[#allocation3 + $0x1a8] sm:$0xff] %vm2586_vm13, %v2578_v12  ;;  %v3770_v18 = vpop.permute.xlu0 %3769 }
 0x340   : > { %3859 = vst.msk [vmem:[#allocation9 + $0x38] sm:$0xff] %vm3851_vm5, %v3770_v18  ;;  %v3961_v36 = vpop.permute.xlu1 %3960 }
 0x341   : > { %4051 = vst.msk [vmem:[#allocation9 + $0x30] sm:$0xff] %vm4044_vm6, %v3961_v36  ;;  %2823 = vrot.lane.b32.xlu0 %v3897_v62, %s7661_s30  ;;  %v4094_v36 = vld [vmem:[#allocation3 + $0x151] sm:$0xff] }
 0x342   : > { %3014 = vrot.lane.b32.xlu1 %v4089_v60, %s7662_s21 }
 0x343   : > { %v3194_v55 = vpop.permute.xlu0 %3193 }
 0x344   : > { %3281 = vst.msk [vmem:[#allocation9 + $0x48] sm:$0xff] %vm3271_vm2, %v3194_v55  ;;  %v3385_v16 = vpop.permute.xlu1 %3384 }
 0x345   : > { %3473 = vst.msk [vmem:[#allocation9 + $0x40] sm:$0xff] %vm3464_vm3, %v3385_v16  ;;  %3591 = vrot.lane.b32.xlu0 %v4090_v13, %s7664_s17 }
 0x346   : > { %3783 = vrot.lane.b32.xlu1 %v9008_v37, %s7665_s23  ;;  %v9214_v25 = vld [vmem:[#allocation3 + $0x1a7] sm:$0xff]  ;;  %v9216_v20 = vld [vmem:[#allocation3 + $0x1af] sm:$0xff] }
 0x347   : > { %v3963_v26 = vpop.permute.xlu0 %3962  ;;  %2719 = vst.msk [vmem:[#allocation9 + $0xd0] sm:$0xff] %vm2586_vm13, %v9214_v25  ;;  %2720 = vst.msk [vmem:[#allocation9 + $0xd8] sm:$0xff] %vm2586_vm13, %v9216_v20 }
 0x348   : > { %4052 = vst.msk [vmem:[#allocation9 + $0x38] sm:$0xff] %vm4044_vm6, %v3963_v26  ;;  %v4154_v53 = vpop.permute.xlu1 %4153 }
 0x349   : > { %4244 = vst.msk [vmem:[#allocation9 + $0x30] sm:$0xff] %vm4237_vm7, %v4154_v53  ;;  %3016 = vrot.lane.b32.xlu0 %v4090_v13, %s7662_s21 }
 0x34a   : > { %3207 = vrot.lane.b32.xlu1 %v9008_v37, %s10627_s24 }
 0x34b   : > { %v2810_v21 = vpop.permute.xlu0 %2809 }
 0x34c   : > { %2896 = vst.msk [vmem:[#allocation9 + $0x50] sm:$0xff] %vm2885_vm0, %v2810_v21  ;;  %v3387_v19 = vpop.permute.xlu1 %3386 }
 0x34d   : > { %3474 = vst.msk [vmem:[#allocation9 + $0x48] sm:$0xff] %vm3464_vm3, %v3387_v19  ;;  %3785 = vrot.lane.b32.xlu0 %v9010_v14, %s7665_s23 }
 0x34e   : > { %3976 = vrot.lane.b32.xlu1 %v3898_v7, %s7666_s22 }
 0x34f   : > { %v3578_v39 = vpop.permute.xlu0 %3577 }
 0x350   : > { %3666 = vst.msk [vmem:[#allocation9 + $0x40] sm:$0xff] %vm3657_vm4, %v3578_v39  ;;  %v4156_v23 = vpop.permute.xlu1 %4155  ;;  %v4276_v52 = vld [vmem:[#allocation9 + $0x30] sm:$0xff] }
 0x351   : > { %4245 = vst.msk [vmem:[#allocation9 + $0x38] sm:$0xff] %vm4237_vm7, %v4156_v23  ;;  %7374 = vmatprep.mubr.msk.f32.mxu1 %vm4318_vm8, %v4276_v52  ;;  %3209 = vrot.lane.b32.xlu0 %v9010_v14, %s10627_s24 }
 0x352   : > { %3400 = vrot.lane.b32.xlu1 %v3898_v7, %s10604_s27 }
 0x353   : > { %v2812_v37 = vpop.permute.xlu0 %2811 }
 0x354   : > { %2897 = vst.msk [vmem:[#allocation9 + $0x58] sm:$0xff] %vm2885_vm0, %v2812_v37  ;;  %v3003_v1 = vpop.permute.xlu1 %3002 }
 0x355   : > { %3089 = vst.msk [vmem:[#allocation9 + $0x50] sm:$0xff] %vm3078_vm1, %v3003_v1  ;;  %3978 = vrot.lane.b32.xlu0 %v3899_v28, %s7666_s22 }
 0x356   : > { %4169 = vrot.lane.b32.xlu1 %v4091_v29, %s10608_s14 }
 0x357   : > { %v3580_v47 = vpop.permute.xlu0 %3579 }
 0x358   : > { %3667 = vst.msk [vmem:[#allocation9 + $0x48] sm:$0xff] %vm3657_vm4, %v3580_v47  ;;  %v3772_v32 = vpop.permute.xlu1 %3771  ;;  %v7340_v30 = vpop.f32.mrf.mxu0  ;;  %v4277_v14 = vld [vmem:[#allocation9 + $0x38] sm:$0xff] }
 0x359   : > { %3860 = vst.msk [vmem:[#allocation9 + $0x40] sm:$0xff] %vm3851_vm5, %v3772_v32  ;;  %v2531_v31 = vadd.f32 %v8935_v22, %v7340_v30  ;;  %7375 = vmatmul.mubr.msk.f32.gmra.mxu1 %vm4318_vm8, %v4277_v14  ;;  %2825 = vrot.lane.b32.xlu0 %v3898_v7, %s7661_s30  ;;  %v3902_v30 = vld [vmem:[#allocation3 + $0x168] sm:$0xff] }
 0x35a   : > { %3402 = vrot.lane.b32.xlu1 %v3899_v28, %s10604_s27  ;;  %v2525_v33 = vpop.f32.mrf.mxu0 }
 0x35b   : > { %v2581_v34 = vmax.f32 %v2531_v31, 0.0  ;;  %v2526_v40 = vadd.f32 %v8935_v22, %v2525_v33  ;;  %v3005_v5 = vpop.permute.xlu0 %3004 }
 0x35c   : > { %3090 = vst.msk [vmem:[#allocation9 + $0x58] sm:$0xff] %vm3078_vm1, %v3005_v5  ;;  %v3196_v41 = vpop.permute.xlu1 %3195  ;;  %v4095_v5 = vld [vmem:[#allocation3 + $0x169] sm:$0xff] }
 0x35d   : > { %2656 = vst.msk [vmem:[#allocation3 + $0x1d0] sm:$0xff] %vm2586_vm13, %v2581_v34  ;;  %v2580_v35 = vmax.f32 %v2526_v40, 0.0  ;;  %3593 = vrot.lane.b32.xlu0 %v4091_v29, %s7664_s17  ;;  %v3903_v40 = vld [vmem:[#allocation3 + $0x170] sm:$0xff] }
 0x35e   : > { %3282 = vst.msk [vmem:[#allocation9 + $0x50] sm:$0xff] %vm3271_vm2, %v3196_v41  ;;  %4171 = vrot.lane.b32.xlu1 %v4092_v54, %s10608_s14 }
 0x35f   : > { %2655 = vst.msk [vmem:[#allocation3 + $0x1c8] sm:$0xff] %vm2586_vm13, %v2580_v35  ;;  %v3774_v38 = vpop.permute.xlu0 %3773 }
 0x360   : > { %3861 = vst.msk [vmem:[#allocation9 + $0x48] sm:$0xff] %vm3851_vm5, %v3774_v38  ;;  %v3965_v22 = vpop.permute.xlu1 %3964 }
 0x361   : > { %4053 = vst.msk [vmem:[#allocation9 + $0x40] sm:$0xff] %vm4044_vm6, %v3965_v22  ;;  %2827 = vrot.lane.b32.xlu0 %v3899_v28, %s7661_s30  ;;  %v4096_v22 = vld [vmem:[#allocation3 + $0x171] sm:$0xff] }
 0x362   : > { %3018 = vrot.lane.b32.xlu1 %v4091_v29, %s7662_s21 }
 0x363   : > { %v3198_v6 = vpop.permute.xlu0 %3197 }
 0x364   : > { %3283 = vst.msk [vmem:[#allocation9 + $0x58] sm:$0xff] %vm3271_vm2, %v3198_v6  ;;  %v3389_v9 = vpop.permute.xlu1 %3388 }
 0x365   : > { %3475 = vst.msk [vmem:[#allocation9 + $0x50] sm:$0xff] %vm3464_vm3, %v3389_v9  ;;  %3595 = vrot.lane.b32.xlu0 %v4092_v54, %s7664_s17 }
 0x366   : > { %3787 = vrot.lane.b32.xlu1 %v9056_v45, %s7665_s23  ;;  %v9264_v51 = vld [vmem:[#allocation3 + $0x1c7] sm:$0xff]  ;;  %v9266_v56 = vld [vmem:[#allocation3 + $0x1cf] sm:$0xff] }
 0x367   : > { %v3967_v46 = vpop.permute.xlu0 %3966  ;;  %2721 = vst.msk [vmem:[#allocation9 + $0xe0] sm:$0xff] %vm2586_vm13, %v9264_v51  ;;  %2722 = vst.msk [vmem:[#allocation9 + $0xe8] sm:$0xff] %vm2586_vm13, %v9266_v56 }
 0x368   : > { %4054 = vst.msk [vmem:[#allocation9 + $0x48] sm:$0xff] %vm4044_vm6, %v3967_v46  ;;  %v4158_v24 = vpop.permute.xlu1 %4157 }
 0x369   : > { %4246 = vst.msk [vmem:[#allocation9 + $0x40] sm:$0xff] %vm4237_vm7, %v4158_v24  ;;  %3020 = vrot.lane.b32.xlu0 %v4092_v54, %s7662_s21 }
 0x36a   : > { %3211 = vrot.lane.b32.xlu1 %v9056_v45, %s10627_s24  ;;  %v3900_v45 = vld [vmem:[#allocation3 + $0x148] sm:$0xff] }
 0x36b   : > { %v2814_v57 = vpop.permute.xlu0 %2813 }
 0x36c   : > { %2898 = vst.msk [vmem:[#allocation9 + $0x60] sm:$0xff] %vm2885_vm0, %v2814_v57  ;;  %v3391_v58 = vpop.permute.xlu1 %3390 }
 0x36d   : > { %3476 = vst.msk [vmem:[#allocation9 + $0x58] sm:$0xff] %vm3464_vm3, %v3391_v58  ;;  %3789 = vrot.lane.b32.xlu0 %v9058_v48, %s7665_s23 }
 0x36e   : > { %3980 = vrot.lane.b32.xlu1 %v3900_v45, %s7666_s22 }
 0x36f   : > { %v3582_v59 = vpop.permute.xlu0 %3581 }
 0x370   : > { %3668 = vst.msk [vmem:[#allocation9 + $0x50] sm:$0xff] %vm3657_vm4, %v3582_v59  ;;  %v4160_v42 = vpop.permute.xlu1 %4159  ;;  %v4278_v10 = vld [vmem:[#allocation9 + $0x40] sm:$0xff] }
 0x371   : > { %4247 = vst.msk [vmem:[#allocation9 + $0x48] sm:$0xff] %vm4237_vm7, %v4160_v42  ;;  %7377 = vmatprep.mubr.msk.f32.mxu1 %vm4318_vm8, %v4278_v10  ;;  %3213 = vrot.lane.b32.xlu0 %v9058_v48, %s10627_s24  ;;  %v3904_v42 = vld [vmem:[#allocation3 + $0x188] sm:$0xff] }
 0x372   : > { %3404 = vrot.lane.b32.xlu1 %v3900_v45, %s10604_s27 }
 0x373   : > { %v2816_v62 = vpop.permute.xlu0 %2815 }
 0x374   : > { %2899 = vst.msk [vmem:[#allocation9 + $0x68] sm:$0xff] %vm2885_vm0, %v2816_v62  ;;  %v3007_v60 = vpop.permute.xlu1 %3006 }
 0x375   : > { %3091 = vst.msk [vmem:[#allocation9 + $0x60] sm:$0xff] %vm3078_vm1, %v3007_v60  ;;  %3982 = vrot.lane.b32.xlu0 %v3901_v27, %s7666_s22 }
 0x376   : > { %4173 = vrot.lane.b32.xlu1 %v4093_v61, %s10608_s14 }
 0x377   : > { %v3584_v44 = vpop.permute.xlu0 %3583 }
 0x378   : > { %3669 = vst.msk [vmem:[#allocation9 + $0x58] sm:$0xff] %vm3657_vm4, %v3584_v44  ;;  %v3776_v43 = vpop.permute.xlu1 %3775  ;;  %v4279_v48 = vld [vmem:[#allocation9 + $0x48] sm:$0xff] }
 0x379   : > { %v7343_v63 = vpop.f32.mrf.mxu0  ;;  %3862 = vst.msk [vmem:[#allocation9 + $0x50] sm:$0xff] %vm3851_vm5, %v3776_v43  ;;  %7378 = vmatmul.mubr.msk.f32.gmra.mxu1 %vm4318_vm8, %v4279_v48  ;;  %2829 = vrot.lane.b32.xlu0 %v3900_v45, %s7661_s30  ;;  %v4097_v44 = vld [vmem:[#allocation3 + $0x189] sm:$0xff]  ;;  %v9450_v43 = vld [vmem:[%s10580_s4] ss:$0 sm:$0xff] }
 0x37a   : > { %v2541_v17 = vadd.f32 %v7524_v2, %v7343_v63  ;;  %3406 = vrot.lane.b32.xlu1 %v3901_v27, %s10604_s27 }
 0x37b   : > { %v2535_v3 = vpop.f32.mrf.mxu0  ;;  %v3009_v12 = vpop.permute.xlu0 %3008 }
 0x37c   : > { %v2583_v8 = vmax.f32 %v2541_v17, 0.0  ;;  %v2536_v4 = vadd.f32 %v7524_v2, %v2535_v3  ;;  %3092 = vst.msk [vmem:[#allocation9 + $0x68] sm:$0xff] %vm3078_vm1, %v3009_v12  ;;  %v3200_v13 = vpop.permute.xlu1 %3199 }
 0x37d   : > { %3284 = vst.msk [vmem:[#allocation9 + $0x60] sm:$0xff] %vm3271_vm2, %v3200_v13  ;;  %3597 = vrot.lane.b32.xlu0 %v4093_v61, %s7664_s17 }
 0x37e   : > { %2658 = vst.msk [vmem:[#allocation3 + $0x1f0] sm:$0xff] %vm2586_vm13, %v2583_v8  ;;  %v2582_v18 = vmax.f32 %v2536_v4, 0.0  ;;  %4175 = vrot.lane.b32.xlu1 %v4094_v36, %s10608_s14 }
 0x37f   : > { %v3778_v55 = vpop.permute.xlu0 %3777 }
 0x380   : > { %2657 = vst.msk [vmem:[#allocation3 + $0x1e8] sm:$0xff] %vm2586_vm13, %v2582_v18  ;;  %v3969_v16 = vpop.permute.xlu1 %3968 }
 0x381   : > { %3863 = vst.msk [vmem:[#allocation9 + $0x58] sm:$0xff] %vm3851_vm5, %v3778_v55  ;;  %2831 = vrot.lane.b32.xlu0 %v3901_v27, %s7661_s30 }
 0x382   : > { %4055 = vst.msk [vmem:[#allocation9 + $0x50] sm:$0xff] %vm4044_vm6, %v3969_v16  ;;  %3022 = vrot.lane.b32.xlu1 %v4093_v61, %s7662_s21  ;;  %v3905_v61 = vld [vmem:[#allocation3 + $0x190] sm:$0xff] }
 0x383   : > { %v3202_v26 = vpop.permute.xlu0 %3201 }
 0x384   : > { %3285 = vst.msk [vmem:[#allocation9 + $0x68] sm:$0xff] %vm3271_vm2, %v3202_v26  ;;  %v3393_v53 = vpop.permute.xlu1 %3392 }
 0x385   : > { %3477 = vst.msk [vmem:[#allocation9 + $0x60] sm:$0xff] %vm3464_vm3, %v3393_v53  ;;  %v7346_v21 = vpop.f32.mrf.mxu0  ;;  %3599 = vrot.lane.b32.xlu0 %v4094_v36, %s7664_s17 }
 0x386   : > { %v2551_v19 = vadd.f32 %v7524_v2, %v7346_v21  ;;  %3791 = vrot.lane.b32.xlu1 %v9106_v11, %s7665_s23 }
 0x387   : > { %v9379_v7 = vld [vmem:[#allocation3 + $0x1e7] sm:$0xff]  ;;  %v9381_v39 = vld [vmem:[#allocation3 + $0x1ef] sm:$0xff]  ;;  %v2545_v23 = vpop.f32.mrf.mxu0  ;;  %v3971_v52 = vpop.permute.xlu0 %3970 }
 0x388   : > { %2723 = vst.msk [vmem:[#allocation9 + $0xf0] sm:$0xff] %vm2586_vm13, %v9379_v7  ;;  %2724 = vst.msk [vmem:[#allocation9 + $0xf8] sm:$0xff] %vm2586_vm13, %v9381_v39  ;;  %v2585_v37 = vmax.f32 %v2551_v19, 0.0  ;;  %v2546_v1 = vadd.f32 %v7524_v2, %v2545_v23  ;;  %v4162_v28 = vpop.permute.xlu1 %4161 }
 0x389   : > { %4056 = vst.msk [vmem:[#allocation9 + $0x58] sm:$0xff] %vm4044_vm6, %v3971_v52  ;;  %3024 = vrot.lane.b32.xlu0 %v4094_v36, %s7662_s21  ;;  %v4098_v36 = vld [vmem:[#allocation3 + $0x191] sm:$0xff] }
 0x38a   : > { %4248 = vst.msk [vmem:[#allocation9 + $0x50] sm:$0xff] %vm4237_vm7, %v4162_v28  ;;  %v2584_v29 = vmax.f32 %v2546_v1, 0.0  ;;  %3215 = vrot.lane.b32.xlu1 %v9106_v11, %s10627_s24 }
 0x38b   : > { %2660 = vst.msk [vmem:[#allocation3 + $0x210] sm:$0xff] %vm2586_vm13, %v2585_v37  ;;  %v2818_v47 = vpop.permute.xlu0 %2817  ;;  %v3906_v37 = vld [vmem:[#allocation3 + $0x1a8] sm:$0xff] }
 0x38c   : > { %2659 = vst.msk [vmem:[#allocation3 + $0x208] sm:$0xff] %vm2586_vm13, %v2584_v29  ;;  %v3395_v32 = vpop.permute.xlu1 %3394  ;;  %vm4929_vm13 = vcmask 392448  }
 0x38d   : > { %2900 = vst.msk [vmem:[#allocation9 + $0x70] sm:$0xff] %vm2885_vm0, %v2818_v47  ;;  %3793 = vrot.lane.b32.xlu0 %v9108_v15, %s7665_s23 }
 0x38e   : > { %3478 = vst.msk [vmem:[#allocation9 + $0x68] sm:$0xff] %vm3464_vm3, %v3395_v32  ;;  %3984 = vrot.lane.b32.xlu1 %v3902_v30, %s7666_s22  ;;  %v3907_v32 = vld [vmem:[#allocation3 + $0x1b0] sm:$0xff] }
 0x38f   : > { %v3586_v14 = vpop.permute.xlu0 %3585 }
 0x390   : > { %3670 = vst.msk [vmem:[#allocation9 + $0x60] sm:$0xff] %vm3657_vm4, %v3586_v14  ;;  %v4164_v31 = vpop.permute.xlu1 %4163 }
 0x391   : > { %v4280_v33 = vld [vmem:[#allocation9 + $0x50] sm:$0xff]  ;;  %4249 = vst.msk [vmem:[#allocation9 + $0x58] sm:$0xff] %vm4237_vm7, %v4164_v31  ;;  %3217 = vrot.lane.b32.xlu0 %v9108_v15, %s10627_s24 }
 0x392   : > { %7380 = vmatprep.mubr.msk.f32.mxu1 %vm4318_vm8, %v4280_v33  ;;  %3408 = vrot.lane.b32.xlu1 %v3902_v30, %s10604_s27 }
 0x393   : > { %v2820_v11 = vpop.permute.xlu0 %2819 }
 0x394   : > { %2901 = vst.msk [vmem:[#allocation9 + $0x78] sm:$0xff] %vm2885_vm0, %v2820_v11  ;;  %v3011_v34 = vpop.permute.xlu1 %3010 }
 0x395   : > { %3093 = vst.msk [vmem:[#allocation9 + $0x70] sm:$0xff] %vm3078_vm1, %v3011_v34  ;;  %3986 = vrot.lane.b32.xlu0 %v3903_v40, %s7666_s22 }
 0x396   : > { %4177 = vrot.lane.b32.xlu1 %v4095_v5, %s10608_s14 }
 0x397   : > { %v3588_v41 = vpop.permute.xlu0 %3587 }
 0x398   : > { %3671 = vst.msk [vmem:[#allocation9 + $0x68] sm:$0xff] %vm3657_vm4, %v3588_v41  ;;  %v3780_v35 = vpop.permute.xlu1 %3779  ;;  %v4281_v54 = vld [vmem:[#allocation9 + $0x58] sm:$0xff] }
 0x399   : > { %3864 = vst.msk [vmem:[#allocation9 + $0x60] sm:$0xff] %vm3851_vm5, %v3780_v35  ;;  %7381 = vmatmul.mubr.msk.f32.gmra.mxu1 %vm4318_vm8, %v4281_v54  ;;  %2833 = vrot.lane.b32.xlu0 %v3902_v30, %s7661_s30  ;;  %v4099_v30 = vld [vmem:[#allocation3 + $0x1a9] sm:$0xff] }
 0x39a   : > { %3410 = vrot.lane.b32.xlu1 %v3903_v40, %s10604_s27 }
 0x39b   : > { %v3013_v15 = vpop.permute.xlu0 %3012 }
 0x39c   : > { %3094 = vst.msk [vmem:[#allocation9 + $0x78] sm:$0xff] %vm3078_vm1, %v3013_v15  ;;  %v3204_v38 = vpop.permute.xlu1 %3203  ;;  %v4100_v15 = vld [vmem:[#allocation3 + $0x1b1] sm:$0xff] }
 0x39d   : > { %3286 = vst.msk [vmem:[#allocation9 + $0x70] sm:$0xff] %vm3271_vm2, %v3204_v38  ;;  %3601 = vrot.lane.b32.xlu0 %v4095_v5, %s7664_s17 }
 0x39e   : > { %4179 = vrot.lane.b32.xlu1 %v4096_v22, %s10608_s14 }
 0x39f   : > { %v3782_v6 = vpop.permute.xlu0 %3781 }
 0x3a0   : > { %3865 = vst.msk [vmem:[#allocation9 + $0x68] sm:$0xff] %vm3851_vm5, %v3782_v6  ;;  %v3973_v9 = vpop.permute.xlu1 %3972 }
 0x3a1   : > { %4057 = vst.msk [vmem:[#allocation9 + $0x60] sm:$0xff] %vm4044_vm6, %v3973_v9  ;;  %2835 = vrot.lane.b32.xlu0 %v3903_v40, %s7661_s30 }
 0x3a2   : > { %3026 = vrot.lane.b32.xlu1 %v4095_v5, %s7662_s21 }
 0x3a3   : > { %v3206_v46 = vpop.permute.xlu0 %3205 }
 0x3a4   : > { %3287 = vst.msk [vmem:[#allocation9 + $0x78] sm:$0xff] %vm3271_vm2, %v3206_v46  ;;  %v3397_v24 = vpop.permute.xlu1 %3396 }
 0x3a5   : > { %3479 = vst.msk [vmem:[#allocation9 + $0x70] sm:$0xff] %vm3464_vm3, %v3397_v24  ;;  %3603 = vrot.lane.b32.xlu0 %v4096_v22, %s7664_s17 }
 0x3a6   : > { %3795 = vrot.lane.b32.xlu1 %v9156_v49, %s7665_s23 }
 0x3a7   : > { %v3975_v57 = vpop.permute.xlu0 %3974 }
 0x3a8   : > { %4058 = vst.msk [vmem:[#allocation9 + $0x68] sm:$0xff] %vm4044_vm6, %v3975_v57  ;;  %v4166_v58 = vpop.permute.xlu1 %4165 }
 0x3a9   : > { %4250 = vst.msk [vmem:[#allocation9 + $0x60] sm:$0xff] %vm4237_vm7, %v4166_v58  ;;  %3028 = vrot.lane.b32.xlu0 %v4096_v22, %s7662_s21 }
 0x3aa   : > { %3219 = vrot.lane.b32.xlu1 %v9156_v49, %s10627_s24 }
 0x3ab   : > { %v2822_v45 = vpop.permute.xlu0 %2821 }
 0x3ac   : > { %2902 = vst.msk [vmem:[#allocation9 + $0x80] sm:$0xff] %vm2885_vm0, %v2822_v45  ;;  %v3399_v59 = vpop.permute.xlu1 %3398 }
 0x3ad   : > { %3480 = vst.msk [vmem:[#allocation9 + $0x78] sm:$0xff] %vm3464_vm3, %v3399_v59  ;;  %3797 = vrot.lane.b32.xlu0 %v9158_v50, %s7665_s23 }
 0x3ae   : > { %3988 = vrot.lane.b32.xlu1 %v3904_v42, %s7666_s22 }
 0x3af   : > { %v3590_v10 = vpop.permute.xlu0 %3589 }
 0x3b0   : > { %3672 = vst.msk [vmem:[#allocation9 + $0x70] sm:$0xff] %vm3657_vm4, %v3590_v10  ;;  %v4168_v62 = vpop.permute.xlu1 %4167  ;;  %v4282_v60 = vld [vmem:[#allocation9 + $0x60] sm:$0xff] }
 0x3b1   : > { %4251 = vst.msk [vmem:[#allocation9 + $0x68] sm:$0xff] %vm4237_vm7, %v4168_v62  ;;  %7383 = vmatprep.mubr.msk.f32.mxu1 %vm4318_vm8, %v4282_v60  ;;  %3221 = vrot.lane.b32.xlu0 %v9158_v50, %s10627_s24 }
 0x3b2   : > { %3412 = vrot.lane.b32.xlu1 %v3904_v42, %s10604_s27 }
 0x3b3   : > { %v2824_v49 = vpop.permute.xlu0 %2823 }
 0x3b4   : > { %2903 = vst.msk [vmem:[#allocation9 + $0x88] sm:$0xff] %vm2885_vm0, %v2824_v49  ;;  %v3015_v27 = vpop.permute.xlu1 %3014 }
 0x3b5   : > { %3095 = vst.msk [vmem:[#allocation9 + $0x80] sm:$0xff] %vm3078_vm1, %v3015_v27  ;;  %3990 = vrot.lane.b32.xlu0 %v3905_v61, %s7666_s22  ;;  %v3908_v27 = vld [vmem:[#allocation3 + $0x1c8] sm:$0xff] }
 0x3b6   : > { %4181 = vrot.lane.b32.xlu1 %v4097_v44, %s10608_s14 }
 0x3b7   : > { %v3592_v50 = vpop.permute.xlu0 %3591 }
 0x3b8   : > { %3673 = vst.msk [vmem:[#allocation9 + $0x78] sm:$0xff] %vm3657_vm4, %v3592_v50  ;;  %v3784_v63 = vpop.permute.xlu1 %3783  ;;  %v4283_v2 = vld [vmem:[#allocation9 + $0x68] sm:$0xff] }
 0x3b9   : > { %v7367_v48 = vpop.f32.mrf.mxu1  ;;  %3866 = vst.msk [vmem:[#allocation9 + $0x70] sm:$0xff] %vm3851_vm5, %v3784_v63  ;;  %7384 = vmatmul.mubr.msk.f32.gmra.mxu1 %vm4318_vm8, %v4283_v2  ;;  %2837 = vrot.lane.b32.xlu0 %v3904_v42, %s7661_s30  ;;  %v3909_v2 = vld [vmem:[#allocation3 + $0x1d0] sm:$0xff] }
 0x3ba   : > { %v4487_v17 = vadd.f32 %v7367_v48, %v9450_v43  ;;  %3414 = vrot.lane.b32.xlu1 %v3905_v61, %s10604_s27 }
 0x3bb   : > { %v4481_v3 = vpop.f32.mrf.mxu1  ;;  %v3017_v12 = vpop.permute.xlu0 %3016 }
 0x3bc   : > { %v4641_v8 = vmax.f32 %v4487_v17, 0.0  ;;  %v4482_v4 = vadd.f32 %v9450_v43, %v4481_v3  ;;  %3096 = vst.msk [vmem:[#allocation9 + $0x88] sm:$0xff] %vm3078_vm1, %v3017_v12  ;;  %v3208_v13 = vpop.permute.xlu1 %3207  ;;  %v4101_v17 = vld [vmem:[#allocation3 + $0x1c9] sm:$0xff] }
 0x3bd   : > { %3288 = vst.msk [vmem:[#allocation9 + $0x80] sm:$0xff] %vm3271_vm2, %v3208_v13  ;;  %3605 = vrot.lane.b32.xlu0 %v4097_v44, %s7664_s17 }
 0x3be   : > { %4674 = vst.msk [vmem:[#allocation14 + $0x8] sm:$0xff] %vm4672_vm9, %v4641_v8  ;;  %v4640_v18 = vmax.f32 %v4482_v4, 0.0  ;;  %4183 = vrot.lane.b32.xlu1 %v4098_v36, %s10608_s14 }
 0x3bf   : > { %v3786_v55 = vpop.permute.xlu0 %3785 }
 0x3c0   : > { %4673 = vst.msk [vmem:[#allocation14] sm:$0xff] %vm4672_vm9, %v4640_v18  ;;  %v3977_v16 = vpop.permute.xlu1 %3976 }
 0x3c1   : > { %3867 = vst.msk [vmem:[#allocation9 + $0x78] sm:$0xff] %vm3851_vm5, %v3786_v55  ;;  %2839 = vrot.lane.b32.xlu0 %v3905_v61, %s7661_s30 }
 0x3c2   : > { %4059 = vst.msk [vmem:[#allocation9 + $0x70] sm:$0xff] %vm4044_vm6, %v3977_v16  ;;  %3030 = vrot.lane.b32.xlu1 %v4097_v44, %s7662_s21 }
 0x3c3   : > { %v3210_v26 = vpop.permute.xlu0 %3209 }
 0x3c4   : > { %3289 = vst.msk [vmem:[#allocation9 + $0x88] sm:$0xff] %vm3271_vm2, %v3210_v26  ;;  %v3401_v53 = vpop.permute.xlu1 %3400 }
 0x3c5   : > { %3481 = vst.msk [vmem:[#allocation9 + $0x80] sm:$0xff] %vm3464_vm3, %v3401_v53  ;;  %3607 = vrot.lane.b32.xlu0 %v4098_v36, %s7664_s17  ;;  %v4102_v53 = vld [vmem:[#allocation3 + $0x1d1] sm:$0xff] }
 0x3c6   : > { %3799 = vrot.lane.b32.xlu1 %v9214_v25, %s7665_s23 }
 0x3c7   : > { %v3979_v21 = vpop.permute.xlu0 %3978  ;;  %v4705_v9 = vld [vmem:[#allocation14] ss:$2 sm:$0xff]  ;;  %v4737_v46 = vld [vmem:[#allocation14 + $0x1] ss:$2 sm:$0xff] }
 0x3c8   : > { %4060 = vst.msk [vmem:[#allocation9 + $0x78] sm:$0xff] %vm4044_vm6, %v3979_v21  ;;  %v4170_v19 = vpop.permute.xlu1 %4169  ;;  %v4768_v45 = vmax.f32 %v4705_v9, %v4737_v46 }
 0x3c9   : > { %4252 = vst.msk [vmem:[#allocation9 + $0x70] sm:$0xff] %vm4237_vm7, %v4170_v19  ;;  %3032 = vrot.lane.b32.xlu0 %v4098_v36, %s7662_s21 }
 0x3ca   : > { %3223 = vrot.lane.b32.xlu1 %v9214_v25, %s10627_s24 }
 0x3cb   : > { %v2826_v23 = vpop.permute.xlu0 %2825 }
 0x3cc   : > { %2904 = vst.msk [vmem:[#allocation9 + $0x90] sm:$0xff] %vm2885_vm0, %v2826_v23  ;;  %v3403_v52 = vpop.permute.xlu1 %3402 }
 0x3cd   : > { %3482 = vst.msk [vmem:[#allocation9 + $0x88] sm:$0xff] %vm3464_vm3, %v3403_v52  ;;  %3801 = vrot.lane.b32.xlu0 %v9216_v20, %s7665_s23 }
 0x3ce   : > { %3992 = vrot.lane.b32.xlu1 %v3906_v37, %s7666_s22 }
 0x3cf   : > { %v3594_v1 = vpop.permute.xlu0 %3593 }
 0x3d0   : > { %3674 = vst.msk [vmem:[#allocation9 + $0x80] sm:$0xff] %vm3657_vm4, %v3594_v1  ;;  %v4172_v28 = vpop.permute.xlu1 %4171  ;;  %v4284_v29 = vld [vmem:[#allocation9 + $0x70] sm:$0xff] }
 0x3d1   : > { %4253 = vst.msk [vmem:[#allocation9 + $0x78] sm:$0xff] %vm4237_vm7, %v4172_v28  ;;  %7386 = vmatprep.mubr.msk.f32.mxu1 %vm4318_vm8, %v4284_v29  ;;  %3225 = vrot.lane.b32.xlu0 %v9216_v20, %s10627_s24 }
 0x3d2   : > { %3416 = vrot.lane.b32.xlu1 %v3906_v37, %s10604_s27 }
 0x3d3   : > { %v2828_v25 = vpop.permute.xlu0 %2827 }
 0x3d4   : > { %2905 = vst.msk [vmem:[#allocation9 + $0x98] sm:$0xff] %vm2885_vm0, %v2828_v25  ;;  %v3019_v47 = vpop.permute.xlu1 %3018  ;;  %v3910_v25 = vld [vmem:[#allocation3 + $0x1e8] sm:$0xff] }
 0x3d5   : > { %3097 = vst.msk [vmem:[#allocation9 + $0x90] sm:$0xff] %vm3078_vm1, %v3019_v47  ;;  %3994 = vrot.lane.b32.xlu0 %v3907_v32, %s7666_s22 }
 0x3d6   : > { %4185 = vrot.lane.b32.xlu1 %v4099_v30, %s10608_s14 }
 0x3d7   : > { %v3596_v14 = vpop.permute.xlu0 %3595 }
 0x3d8   : > { %3675 = vst.msk [vmem:[#allocation9 + $0x88] sm:$0xff] %vm3657_vm4, %v3596_v14  ;;  %v3788_v31 = vpop.permute.xlu1 %3787  ;;  %v4285_v20 = vld [vmem:[#allocation9 + $0x78] sm:$0xff] }
 0x3d9   : > { %v7370_v33 = vpop.f32.mrf.mxu1  ;;  %3868 = vst.msk [vmem:[#allocation9 + $0x80] sm:$0xff] %vm3851_vm5, %v3788_v31  ;;  %7387 = vmatmul.mubr.msk.f32.gmra.mxu1 %vm4318_vm8, %v4285_v20  ;;  %2841 = vrot.lane.b32.xlu0 %v3906_v37, %s7661_s30  ;;  %v3911_v31 = vld [vmem:[#allocation3 + $0x1f0] sm:$0xff] }
 0x3da   : > { %v4497_v11 = vadd.f32 %v7370_v33, %v9450_v43  ;;  %3418 = vrot.lane.b32.xlu1 %v3907_v32, %s10604_s27  ;;  %v4103_v33 = vld [vmem:[#allocation3 + $0x1e9] sm:$0xff] }
 0x3db   : > { %v4491_v34 = vpop.f32.mrf.mxu1  ;;  %v3021_v41 = vpop.permute.xlu0 %3020 }
 0x3dc   : > { %v4643_v40 = vmax.f32 %v4497_v11, 0.0  ;;  %v4492_v5 = vadd.f32 %v9450_v43, %v4491_v34  ;;  %3098 = vst.msk [vmem:[#allocation9 + $0x98] sm:$0xff] %vm3078_vm1, %v3021_v41  ;;  %v3212_v35 = vpop.permute.xlu1 %3211 }
 0x3dd   : > { %3290 = vst.msk [vmem:[#allocation9 + $0x90] sm:$0xff] %vm3271_vm2, %v3212_v35  ;;  %3609 = vrot.lane.b32.xlu0 %v4099_v30, %s7664_s17 }
 0x3de   : > { %4676 = vst.msk [vmem:[#allocation14 + $0x18] sm:$0xff] %vm4672_vm9, %v4643_v40  ;;  %v4642_v54 = vmax.f32 %v4492_v5, 0.0  ;;  %4187 = vrot.lane.b32.xlu1 %v4100_v15, %s10608_s14 }
 0x3df   : > { %v3790_v38 = vpop.permute.xlu0 %3789 }
 0x3e0   : > { %4675 = vst.msk [vmem:[#allocation14 + $0x10] sm:$0xff] %vm4672_vm9, %v4642_v54  ;;  %v3981_v22 = vpop.permute.xlu1 %3980 }
 0x3e1   : > { %3869 = vst.msk [vmem:[#allocation9 + $0x88] sm:$0xff] %vm3851_vm5, %v3790_v38  ;;  %2843 = vrot.lane.b32.xlu0 %v3907_v32, %s7661_s30  ;;  %v4104_v38 = vld [vmem:[#allocation3 + $0x1f1] sm:$0xff] }
 0x3e2   : > { %4061 = vst.msk [vmem:[#allocation9 + $0x80] sm:$0xff] %vm4044_vm6, %v3981_v22  ;;  %3034 = vrot.lane.b32.xlu1 %v4099_v30, %s7662_s21 }
 0x3e3   : > { %v3214_v6 = vpop.permute.xlu0 %3213 }
 0x3e4   : > { %3291 = vst.msk [vmem:[#allocation9 + $0x98] sm:$0xff] %vm3271_vm2, %v3214_v6  ;;  %v3405_v24 = vpop.permute.xlu1 %3404 }
 0x3e5   : > { %3483 = vst.msk [vmem:[#allocation9 + $0x90] sm:$0xff] %vm3464_vm3, %v3405_v24  ;;  %3611 = vrot.lane.b32.xlu0 %v4100_v15, %s7664_s17 }
 0x3e6   : > { %3803 = vrot.lane.b32.xlu1 %v9264_v51, %s7665_s23 }
 0x3e7   : > { %v4707_v57 = vld [vmem:[#allocation14 + $0x10] ss:$2 sm:$0xff]  ;;  %v4739_v58 = vld [vmem:[#allocation14 + $0x11] ss:$2 sm:$0xff]  ;;  %v3983_v42 = vpop.permute.xlu0 %3982 }
 0x3e8   : > { %v4769_v59 = vmax.f32 %v4707_v57, %v4739_v58  ;;  %4062 = vst.msk [vmem:[#allocation9 + $0x88] sm:$0xff] %vm4044_vm6, %v3983_v42  ;;  %v4174_v10 = vpop.permute.xlu1 %4173 }
 0x3e9   : > { %4254 = vst.msk [vmem:[#allocation9 + $0x80] sm:$0xff] %vm4237_vm7, %v4174_v10  ;;  %3036 = vrot.lane.b32.xlu0 %v4100_v15, %s7662_s21 }
 0x3ea   : > { %v4784_v62 = vmax.f32 %v4768_v45, %v4769_v59  ;;  %3227 = vrot.lane.b32.xlu1 %v9264_v51, %s10627_s24  ;;  %v3719_v45 = vld [vmem:[#allocation3 + $0x207] sm:$0xff] }
 0x3eb   : > { %v2830_v60 = vpop.permute.xlu0 %2829 }
 0x3ec   : > { %4816 = vst.msk [vmem:[#allocation4 + $0x20] sm:$0xff] %vm4672_vm9, %v4784_v62  ;;  %v3407_v49 = vpop.permute.xlu1 %3406 }
 0x3ed   : > { %2906 = vst.msk [vmem:[#allocation9 + $0xa0] sm:$0xff] %vm2885_vm0, %v2830_v60  ;;  %3805 = vrot.lane.b32.xlu0 %v9266_v56, %s7665_s23 }
 0x3ee   : > { %3484 = vst.msk [vmem:[#allocation9 + $0x98] sm:$0xff] %vm3464_vm3, %v3407_v49  ;;  %3996 = vrot.lane.b32.xlu1 %v3908_v27, %s7666_s22 }
 0x3ef   : > { %v3598_v61 = vpop.permute.xlu0 %3597 }
 0x3f0   : > { %3676 = vst.msk [vmem:[#allocation9 + $0x90] sm:$0xff] %vm3657_vm4, %v3598_v61  ;;  %v4176_v44 = vpop.permute.xlu1 %4175  ;;  %v4286_v50 = vld [vmem:[#allocation9 + $0x80] sm:$0xff] }
 0x3f1   : > { %4255 = vst.msk [vmem:[#allocation9 + $0x88] sm:$0xff] %vm4237_vm7, %v4176_v44  ;;  %7389 = vmatprep.mubr.msk.f32.mxu1 %vm4318_vm8, %v4286_v50  ;;  %3229 = vrot.lane.b32.xlu0 %v9266_v56, %s10627_s24  ;;  %v3720_v50 = vld [vmem:[#allocation3 + $0x20f] sm:$0xff] }
 0x3f2   : > { %3420 = vrot.lane.b32.xlu1 %v3908_v27, %s10604_s27 }
 0x3f3   : > { %v9537_v51 = vld [vmem:[#allocation4 + $0x1f] sm:$0xff]  ;;  %v2832_v63 = vpop.permute.xlu0 %2831 }
 0x3f4   : > { %4833 = vst.msk [vmem:[#allocation10 + $0x10] sm:$0xff] %vm4672_vm9, %v9537_v51  ;;  %v3023_v48 = vpop.permute.xlu1 %3022 }
 0x3f5   : > { %2907 = vst.msk [vmem:[#allocation9 + $0xa8] sm:$0xff] %vm2885_vm0, %v2832_v63  ;;  %3998 = vrot.lane.b32.xlu0 %v3909_v2, %s7666_s22  ;;  %v3912_v63 = vld [vmem:[#allocation3 + $0x208] sm:$0xff] }
 0x3f6   : > { %3099 = vst.msk [vmem:[#allocation9 + $0xa0] sm:$0xff] %vm3078_vm1, %v3023_v48  ;;  %4189 = vrot.lane.b32.xlu1 %v4101_v17, %s10608_s14 }
 0x3f7   : > { %v3600_v56 = vpop.permute.xlu0 %3599 }
 0x3f8   : > { %3677 = vst.msk [vmem:[#allocation9 + $0x98] sm:$0xff] %vm3657_vm4, %v3600_v56  ;;  %v3792_v3 = vpop.permute.xlu1 %3791  ;;  %v4287_v4 = vld [vmem:[#allocation9 + $0x88] sm:$0xff] }
 0x3f9   : > { %v7373_v8 = vpop.f32.mrf.mxu1  ;;  %3870 = vst.msk [vmem:[#allocation9 + $0x90] sm:$0xff] %vm3851_vm5, %v3792_v3  ;;  %7390 = vmatmul.mubr.msk.f32.gmra.mxu1 %vm4318_vm8, %v4287_v4  ;;  %2845 = vrot.lane.b32.xlu0 %v3908_v27, %s7661_s30 }
 0x3fa   : > { %v4507_v12 = vadd.f32 %v7373_v8, %v9450_v43  ;;  %3422 = vrot.lane.b32.xlu1 %v3909_v2, %s10604_s27 }
 0x3fb   : > { %v4501_v13 = vpop.f32.mrf.mxu1  ;;  %v3025_v55 = vpop.permute.xlu0 %3024 }
 0x3fc   : > { %v4645_v18 = vmax.f32 %v4507_v12, 0.0  ;;  %v4502_v36 = vadd.f32 %v9450_v43, %v4501_v13  ;;  %3100 = vst.msk [vmem:[#allocation9 + $0xa8] sm:$0xff] %vm3078_vm1, %v3025_v55  ;;  %v3216_v16 = vpop.permute.xlu1 %3215  ;;  %v3913_v12 = vld [vmem:[#allocation3 + $0x210] sm:$0xff] }
 0x3fd   : > { %3292 = vst.msk [vmem:[#allocation9 + $0xa0] sm:$0xff] %vm3271_vm2, %v3216_v16  ;;  %3613 = vrot.lane.b32.xlu0 %v4101_v17, %s7664_s17  ;;  %v4105_v13 = vld [vmem:[#allocation3 + $0x209] sm:$0xff] }
 0x3fe   : > { %4678 = vst.msk [vmem:[#allocation14 + $0x28] sm:$0xff] %vm4672_vm9, %v4645_v18  ;;  %v4644_v26 = vmax.f32 %v4502_v36, 0.0  ;;  %4191 = vrot.lane.b32.xlu1 %v4102_v53, %s10608_s14  ;;  %v5231_v18 = vld [vmem:[#allocation17 + $0x78] sm:$0xff]  ;;  %v5230_v36 = vld [vmem:[#allocation17 + $0x70] sm:$0xff] }
 0x3ff   : > { %v3794_v21 = vpop.permute.xlu0 %3793  ;;  %5266 = vmatpush1.msra.mxu0 %v5231_v18 }
 0x400   : > { %4677 = vst.msk [vmem:[#allocation14 + $0x20] sm:$0xff] %vm4672_vm9, %v4644_v26  ;;  %v3985_v19 = vpop.permute.xlu1 %3984  ;;  %5267 = vmatprep.subr.mxu0 %v7652_v0 }
 0x401   : > { %3871 = vst.msk [vmem:[#allocation9 + $0x98] sm:$0xff] %vm3851_vm5, %v3794_v21  ;;  %2847 = vrot.lane.b32.xlu0 %v3909_v2, %s7661_s30  ;;  %5268 = vmatpush1.msra.mxu0 %v5230_v36  ;;  %v5229_v21 = vld [vmem:[#allocation17 + $0x68] sm:$0xff] }
 0x402   : > { %4063 = vst.msk [vmem:[#allocation9 + $0x90] sm:$0xff] %vm4044_vm6, %v3985_v19  ;;  %3038 = vrot.lane.b32.xlu1 %v4101_v17, %s7662_s21  ;;  %5269 = vmatprep.subr.mxu0 %v7652_v0 }
 0x403   : > { %v3218_v23 = vpop.permute.xlu0 %3217  ;;  %5270 = vmatpush1.msra.mxu0 %v5229_v21 }
 0x404   : > { %3293 = vst.msk [vmem:[#allocation9 + $0xa8] sm:$0xff] %vm3271_vm2, %v3218_v23  ;;  %v3409_v52 = vpop.permute.xlu1 %3408  ;;  %5271 = vmatprep.subr.mxu0 %v7652_v0 }
 0x405   : > { %3485 = vst.msk [vmem:[#allocation9 + $0xa0] sm:$0xff] %vm3464_vm3, %v3409_v52  ;;  %3615 = vrot.lane.b32.xlu0 %v4102_v53, %s7664_s17 }
 0x406   : > { %3807 = vrot.lane.b32.xlu1 %v9379_v7, %s7665_s23 }
 0x407   : > { %v3987_v37 = vpop.permute.xlu0 %3986  ;;  %v4709_v57 = vld [vmem:[#allocation14 + $0x20] ss:$2 sm:$0xff]  ;;  %v4741_v58 = vld [vmem:[#allocation14 + $0x21] ss:$2 sm:$0xff] }
 0x408   : > { %4064 = vst.msk [vmem:[#allocation9 + $0x98] sm:$0xff] %vm4044_vm6, %v3987_v37  ;;  %v4178_v1 = vpop.permute.xlu1 %4177  ;;  %v4770_v62 = vmax.f32 %v4709_v57, %v4741_v58  ;;  %v5220_v57 = vld [vmem:[#allocation17 + $0x20] sm:$0xff] }
 0x409   : > { %4256 = vst.msk [vmem:[#allocation9 + $0x90] sm:$0xff] %vm4237_vm7, %v4178_v1  ;;  %3040 = vrot.lane.b32.xlu0 %v4102_v53, %s7662_s21  ;;  %v5228_v1 = vld [vmem:[#allocation17 + $0x60] sm:$0xff] }
 0x40a   : > { %3231 = vrot.lane.b32.xlu1 %v9379_v7, %s10627_s24  ;;  %5272 = vmatpush1.msra.mxu0 %v5228_v1 }
 0x40b   : > { %v2834_v28 = vpop.permute.xlu0 %2833  ;;  %5273 = vmatprep.subr.mxu0 %v7652_v0 }
 0x40c   : > { %2908 = vst.msk [vmem:[#allocation9 + $0xb0] sm:$0xff] %vm2885_vm0, %v2834_v28  ;;  %v3411_v29 = vpop.permute.xlu1 %3410 }
 0x40d   : > { %3486 = vst.msk [vmem:[#allocation9 + $0xa8] sm:$0xff] %vm3464_vm3, %v3411_v29  ;;  %3809 = vrot.lane.b32.xlu0 %v9381_v39, %s7665_s23 }
 0x40e   : > { %4000 = vrot.lane.b32.xlu1 %v3910_v25, %s7666_s22 }
 0x40f   : > { %v3602_v47 = vpop.permute.xlu0 %3601 }
 0x410   : > { %3678 = vst.msk [vmem:[#allocation9 + $0xa0] sm:$0xff] %vm3657_vm4, %v3602_v47  ;;  %v4180_v32 = vpop.permute.xlu1 %4179  ;;  %v4288_v30 = vld [vmem:[#allocation9 + $0x90] sm:$0xff] }
 0x411   : > { %4257 = vst.msk [vmem:[#allocation9 + $0x98] sm:$0xff] %vm4237_vm7, %v4180_v32  ;;  %7392 = vmatprep.mubr.msk.f32.mxu1 %vm4318_vm8, %v4288_v30  ;;  %3233 = vrot.lane.b32.xlu0 %v9381_v39, %s10627_s24  ;;  %v4106_v47 = vld [vmem:[#allocation3 + $0x211] sm:$0xff] }
 0x412   : > { %3424 = vrot.lane.b32.xlu1 %v3910_v25, %s10604_s27  ;;  %v5227_v32 = vld [vmem:[#allocation17 + $0x58] sm:$0xff] }
 0x413   : > { %v2836_v7 = vpop.permute.xlu0 %2835  ;;  %5274 = vmatpush1.msra.mxu0 %v5227_v32 }
 0x414   : > { %2909 = vst.msk [vmem:[#allocation9 + $0xb8] sm:$0xff] %vm2885_vm0, %v2836_v7  ;;  %v3027_v14 = vpop.permute.xlu1 %3026  ;;  %v3721_v7 = vld [vmem:[#allocation3 + $0x227] sm:$0xff]  ;;  %5275 = vmatprep.subr.mxu0 %v7652_v0 }
 0x415   : > { %3101 = vst.msk [vmem:[#allocation9 + $0xb0] sm:$0xff] %vm3078_vm1, %v3027_v14  ;;  %4002 = vrot.lane.b32.xlu0 %v3911_v31, %s7666_s22 }
 0x416   : > { %4193 = vrot.lane.b32.xlu1 %v4103_v33, %s10608_s14 }
 0x417   : > { %v3604_v20 = vpop.permute.xlu0 %3603 }
 0x418   : > { %3679 = vst.msk [vmem:[#allocation9 + $0xa8] sm:$0xff] %vm3657_vm4, %v3604_v20  ;;  %v3796_v11 = vpop.permute.xlu1 %3795  ;;  %v4289_v34 = vld [vmem:[#allocation9 + $0x98] sm:$0xff] }
 0x419   : > { %3872 = vst.msk [vmem:[#allocation9 + $0xa0] sm:$0xff] %vm3851_vm5, %v3796_v11  ;;  %v7376_v39 = vpop.f32.mrf.mxu1  ;;  %7393 = vmatmul.mubr.msk.f32.gmra.mxu1 %vm4318_vm8, %v4289_v34  ;;  %2849 = vrot.lane.b32.xlu0 %v3910_v25, %s7661_s30  ;;  %v4824_v11 = vld [vmem:[#allocation4 + $0x7] sm:$0xff] }
 0x41a   : > { %v4517_v40 = vadd.f32 %v7376_v39, %v9450_v43  ;;  %3426 = vrot.lane.b32.xlu1 %v3911_v31, %s10604_s27  ;;  %v5225_v34 = vld [vmem:[#allocation17 + $0x48] sm:$0xff]  ;;  %4832 = vst.msk [vmem:[#allocation10] sm:$0xff] %vm4672_vm9, %v4824_v11 }
 0x41b   : > { %v4511_v5 = vpop.f32.mrf.mxu1  ;;  %v3029_v41 = vpop.permute.xlu0 %3028  ;;  %v3914_v39 = vld [vmem:[#allocation3 + $0x228] sm:$0xff] }
 0x41c   : > { %v4647_v35 = vmax.f32 %v4517_v40, 0.0  ;;  %v4512_v54 = vadd.f32 %v9450_v43, %v4511_v5  ;;  %3102 = vst.msk [vmem:[#allocation9 + $0xb8] sm:$0xff] %vm3078_vm1, %v3029_v41  ;;  %v3220_v15 = vpop.permute.xlu1 %3219  ;;  %v3915_v5 = vld [vmem:[#allocation3 + $0x230] sm:$0xff]  ;;  %v5224_v41 = vld [vmem:[#allocation17 + $0x40] sm:$0xff] }
 0x41d   : > { %3294 = vst.msk [vmem:[#allocation9 + $0xb0] sm:$0xff] %vm3271_vm2, %v3220_v15  ;;  %3617 = vrot.lane.b32.xlu0 %v4103_v33, %s7664_s17  ;;  %v4107_v15 = vld [vmem:[#allocation3 + $0x229] sm:$0xff] }
 0x41e   : > { %4680 = vst.msk [vmem:[#allocation14 + $0x38] sm:$0xff] %vm4672_vm9, %v4647_v35  ;;  %v4646_v22 = vmax.f32 %v4512_v54, 0.0  ;;  %4195 = vrot.lane.b32.xlu1 %v4104_v38, %s10608_s14  ;;  %v5223_v54 = vld [vmem:[#allocation17 + $0x38] sm:$0xff] }
 0x41f   : > { %v3798_v6 = vpop.permute.xlu0 %3797 }
 0x420   : > { %4679 = vst.msk [vmem:[#allocation14 + $0x30] sm:$0xff] %vm4672_vm9, %v4646_v22  ;;  %v3989_v9 = vpop.permute.xlu1 %3988  ;;  %v4108_v22 = vld [vmem:[#allocation3 + $0x231] sm:$0xff] }
 0x421   : > { %3873 = vst.msk [vmem:[#allocation9 + $0xa8] sm:$0xff] %vm3851_vm5, %v3798_v6  ;;  %2851 = vrot.lane.b32.xlu0 %v3911_v31, %s7661_s30  ;;  %v3722_v31 = vld [vmem:[#allocation3 + $0x22f] sm:$0xff]  ;;  %s7668_s30 = smov 80  }
 0x422   : > { %4065 = vst.msk [vmem:[#allocation9 + $0xa0] sm:$0xff] %vm4044_vm6, %v3989_v9  ;;  %3042 = vrot.lane.b32.xlu1 %v4103_v33, %s7662_s21  ;;  %v5226_v33 = vld [vmem:[#allocation17 + $0x50] sm:$0xff] }
 0x423   : > { %v3222_v46 = vpop.permute.xlu0 %3221  ;;  %5276 = vmatpush1.msra.mxu0 %v5226_v33  ;;  %v5222_v6 = vld [vmem:[#allocation17 + $0x30] sm:$0xff] }
 0x424   : > { %3295 = vst.msk [vmem:[#allocation9 + $0xb8] sm:$0xff] %vm3271_vm2, %v3222_v46  ;;  %v3413_v24 = vpop.permute.xlu1 %3412  ;;  %5277 = vmatprep.subr.mxu0 %v7652_v0  ;;  %v5221_v46 = vld [vmem:[#allocation17 + $0x28] sm:$0xff] }
 0x425   : > { %3487 = vst.msk [vmem:[#allocation9 + $0xb0] sm:$0xff] %vm3464_vm3, %v3413_v24  ;;  %3619 = vrot.lane.b32.xlu0 %v4104_v38, %s7664_s17  ;;  %5278 = vmatpush1.msra.mxu0 %v5225_v34  ;;  %v4840_v24 = vld [vmem:[#allocation4 + $0x8] sm:$0xff] }
 0x426   : > { %3811 = vrot.lane.b32.xlu1 %v3719_v45, %s7665_s23  ;;  %5279 = vmatprep.subr.mxu0 %v7652_v0 }
 0x427   : > { %v4711_v59 = vld [vmem:[#allocation14 + $0x30] ss:$2 sm:$0xff]  ;;  %v4743_v42 = vld [vmem:[#allocation14 + $0x31] ss:$2 sm:$0xff]  ;;  %v3991_v10 = vpop.permute.xlu0 %3990  ;;  %5280 = vmatpush1.msra.mxu0 %v5224_v41 }
 0x428   : > { %v4771_v60 = vmax.f32 %v4711_v59, %v4743_v42  ;;  %4066 = vst.msk [vmem:[#allocation9 + $0xa8] sm:$0xff] %vm4044_vm6, %v3991_v10  ;;  %v4182_v49 = vpop.permute.xlu1 %4181  ;;  %5281 = vmatprep.subr.mxu0 %v7652_v0  ;;  %v5219_v42 = vld [vmem:[#allocation17 + $0x18] sm:$0xff] }
 0x429   : > { %4258 = vst.msk [vmem:[#allocation9 + $0xa0] sm:$0xff] %vm4237_vm7, %v4182_v49  ;;  %3044 = vrot.lane.b32.xlu0 %v4104_v38, %s7662_s21  ;;  %5282 = vmatpush1.msra.mxu0 %v5223_v54 }
 0x42a   : > { %v4785_v27 = vmax.f32 %v4770_v62, %v4771_v60  ;;  %3235 = vrot.lane.b32.xlu1 %v3719_v45, %s10627_s24  ;;  %5283 = vmatprep.subr.mxu0 %v7652_v0  ;;  %v4889_v45 = vld [vmem:[#allocation4 + $0x9] sm:$0xff] }
 0x42b   : > { %v2838_v61 = vpop.permute.xlu0 %2837  ;;  %5284 = vmatpush1.msra.mxu0 %v5222_v6  ;;  %v5218_v62 = vld [vmem:[#allocation17 + $0x10] sm:$0xff] }
 0x42c   : > { %4817 = vst.msk [vmem:[#allocation4 + $0x38] sm:$0xff] %vm4672_vm9, %v4785_v27  ;;  %v3415_v44 = vpop.permute.xlu1 %3414  ;;  %5285 = vmatprep.subr.mxu0 %v7652_v0  ;;  %v4987_v27 = vld [vmem:[#allocation4 + $0x20] sm:$0xff] }
 0x42d   : > { %2910 = vst.msk [vmem:[#allocation9 + $0xc0] sm:$0xff] %vm2885_vm0, %v2838_v61  ;;  %3813 = vrot.lane.b32.xlu0 %v3720_v50, %s7665_s23  ;;  %5286 = vmatpush1.msra.mxu0 %v5221_v46  ;;  %v5217_v61 = vld [vmem:[#allocation17 + $0x8] sm:$0xff] }
 0x42e   : > { %3488 = vst.msk [vmem:[#allocation9 + $0xb8] sm:$0xff] %vm3464_vm3, %v3415_v44  ;;  %4004 = vrot.lane.b32.xlu1 %v3912_v63, %s7666_s22  ;;  %5287 = vmatprep.subr.mxu0 %v7652_v0 }
 0x42f   : > { %v3606_v48 = vpop.permute.xlu0 %3605  ;;  %5288 = vmatpush1.msra.mxu0 %v5220_v57 }
 0x430   : > { %3680 = vst.msk [vmem:[#allocation9 + $0xb0] sm:$0xff] %vm3657_vm4, %v3606_v48  ;;  %v4184_v2 = vpop.permute.xlu1 %4183  ;;  %v4290_v17 = vld [vmem:[#allocation9 + $0xa0] sm:$0xff]  ;;  %5289 = vmatprep.subr.mxu0 %v7652_v0 }
 0x431   : > { %4259 = vst.msk [vmem:[#allocation9 + $0xa8] sm:$0xff] %vm4237_vm7, %v4184_v2  ;;  %7395 = vmatprep.mubr.msk.f32.mxu1 %vm4318_vm8, %v4290_v17  ;;  %3237 = vrot.lane.b32.xlu0 %v3720_v50, %s10627_s24  ;;  %v5216_v50 = vld [vmem:[#allocation17] sm:$0xff] }
 0x432   : > { %3428 = vrot.lane.b32.xlu1 %v3912_v63, %s10604_s27  ;;  %5290 = vmatpush1.msra.mxu0 %v5219_v42  ;;  %v5036_v48 = vld [vmem:[#allocation4 + $0x21] sm:$0xff] }
 0x433   : > { %v2840_v56 = vpop.permute.xlu0 %2839  ;;  %v9622_v3 = vld [vmem:[#allocation4 + $0x39] sm:$0xff]  ;;  %5291 = vmatprep.subr.mxu0 %v7652_v0 }
 0x434   : > { %v9624_v8 = vld [vmem:[#allocation4 + $0x37] sm:$0xff]  ;;  %2911 = vst.msk [vmem:[#allocation9 + $0xc8] sm:$0xff] %vm2885_vm0, %v2840_v56  ;;  %v3031_v4 = vpop.permute.xlu1 %3030  ;;  %5292 = vmatpush1.msra.mxu0 %v5218_v62 }
 0x435   : > { %5192 = vst.msk [vmem:[#allocation10 + $0x8] sm:$0xff] %vm4672_vm9, %v9622_v3  ;;  %4834 = vst.msk [vmem:[#allocation10 + $0x20] sm:$0xff] %vm4672_vm9, %v9624_v8  ;;  %4006 = vrot.lane.b32.xlu0 %v3913_v12, %s7666_s22  ;;  %5293 = vmatprep.subr.mxu0 %v7652_v0 }
 0x436   : > { %3103 = vst.msk [vmem:[#allocation9 + $0xc0] sm:$0xff] %vm3078_vm1, %v3031_v4  ;;  %4197 = vrot.lane.b32.xlu1 %v4105_v13, %s10608_s14  ;;  %5294 = vmatpush1.msra.mxu0 %v5217_v61  ;;  %v5232_v4 = vld [vmem:[#allocation17 + $0x80] sm:$0xff] }
 0x437   : > { %v3608_v55 = vpop.permute.xlu0 %3607  ;;  %5295 = vmatprep.subr.mxu0 %v7652_v0 }
 0x438   : > { %3681 = vst.msk [vmem:[#allocation9 + $0xb8] sm:$0xff] %vm3657_vm4, %v3608_v55  ;;  %v3800_v16 = vpop.permute.xlu1 %3799  ;;  %v4291_v26 = vld [vmem:[#allocation9 + $0xa8] sm:$0xff]  ;;  %5296 = vmatpush1.msra.mxu0 %v5216_v50 }
 0x439   : > { %3874 = vst.msk [vmem:[#allocation9 + $0xb0] sm:$0xff] %vm3851_vm5, %v3800_v16  ;;  %v7379_v53 = vpop.f32.mrf.mxu1  ;;  %7396 = vmatmul.mubr.msk.f32.gmra.mxu1 %vm4318_vm8, %v4291_v26  ;;  %3430 = vrot.lane.b32.xlu0 %v3913_v12, %s10604_s27 }
 0x43a   : > { %v4527_v19 = vadd.f32 %v7379_v53, %v9450_v43  ;;  %3621 = vrot.lane.b32.xlu1 %v4105_v13, %s7664_s17  ;;  %5325 = vmatprep.subr.mxu0 %v7652_v0  ;;  %v5135_v53 = vld [vmem:[#allocation4 + $0x38] sm:$0xff] }
 0x43b   : > { %v4521_v23 = vpop.f32.mrf.mxu1  ;;  %v3033_v52 = vpop.permute.xlu0 %3032 }
 0x43c   : > { %v5201_v37 = vld [vmem:[#allocation10 + $0x8] sm:$0xff]  ;;  %v4649_v28 = vmax.f32 %v4527_v19, 0.0  ;;  %v4522_v29 = vadd.f32 %v9450_v43, %v4521_v23  ;;  %3104 = vst.msk [vmem:[#allocation9 + $0xc8] sm:$0xff] %vm3078_vm1, %v3033_v52  ;;  %v3224_v25 = vpop.permute.xlu1 %3223 }
 0x43d   : > { %7076 = vmatprep.mubr.msk.f32.mxu0 %vm4672_vm9, %v5201_v37  ;;  %3296 = vst.msk [vmem:[#allocation9 + $0xc0] sm:$0xff] %vm3271_vm2, %v3224_v25  ;;  %4199 = vrot.lane.b32.xlu0 %v4106_v47, %s10608_s14 }
 0x43e   : > { %4682 = vst.msk [vmem:[#allocation14 + $0x48] sm:$0xff] %vm4672_vm9, %v4649_v28  ;;  %v4648_v30 = vmax.f32 %v4522_v29, 0.0  ;;  %3623 = vrot.lane.b32.xlu1 %v4106_v47, %s7664_s17  ;;  %s10606_s17 = smov 96  }
 0x43f   : > { %v3802_v14 = vpop.permute.xlu0 %3801 }
 0x440   : > { %4681 = vst.msk [vmem:[#allocation14 + $0x40] sm:$0xff] %vm4672_vm9, %v4648_v30  ;;  %v3993_v20 = vpop.permute.xlu1 %3992 }
 0x441   : > { %3875 = vst.msk [vmem:[#allocation9 + $0xb8] sm:$0xff] %vm3851_vm5, %v3802_v14  ;;  %3815 = vrot.lane.b32.xlu0 %v3721_v7, %s7665_s23 }
 0x442   : > { %4067 = vst.msk [vmem:[#allocation9 + $0xb0] sm:$0xff] %vm4044_vm6, %v3993_v20  ;;  %3817 = vrot.lane.b32.xlu1 %v3722_v31, %s7665_s23 }
 0x443   : > { %v3226_v40 = vpop.permute.xlu0 %3225 }
 0x444   : > { %3297 = vst.msk [vmem:[#allocation9 + $0xc8] sm:$0xff] %vm3271_vm2, %v3226_v40  ;;  %v3417_v35 = vpop.permute.xlu1 %3416 }
 0x445   : > { %3489 = vst.msk [vmem:[#allocation9 + $0xc0] sm:$0xff] %vm3464_vm3, %v3417_v35  ;;  %4008 = vrot.lane.b32.xlu0 %v3914_v39, %s7666_s22 }
 0x446   : > { %4010 = vrot.lane.b32.xlu1 %v3915_v5, %s7666_s22  ;;  %s7670_s22 = smov 112  }
 0x447   : > { %v3995_v38 = vpop.permute.xlu0 %3994  ;;  %v4713_v37 = vld [vmem:[#allocation14 + $0x40] ss:$2 sm:$0xff]  ;;  %v4745_v1 = vld [vmem:[#allocation14 + $0x41] ss:$2 sm:$0xff] }
 0x448   : > { %4068 = vst.msk [vmem:[#allocation9 + $0xb8] sm:$0xff] %vm4044_vm6, %v3995_v38  ;;  %v4186_v9 = vpop.permute.xlu1 %4185  ;;  %v4772_v47 = vmax.f32 %v4713_v37, %v4745_v1 }
 0x449   : > { %4260 = vst.msk [vmem:[#allocation9 + $0xb0] sm:$0xff] %vm4237_vm7, %v4186_v9  ;;  %4201 = vrot.lane.b32.xlu0 %v4107_v15, %s10608_s14 }
 0x44a   : > { %4203 = vrot.lane.b32.xlu1 %v4108_v22, %s10608_s14 }
 0x44b   : > { %v2842_v58 = vpop.permute.xlu0 %2841 }
 0x44c   : > { %2912 = vst.msk [vmem:[#allocation9 + $0xd0] sm:$0xff] %vm2885_vm0, %v2842_v58  ;;  %v3419_v59 = vpop.permute.xlu1 %3418 }
 0x44d   : > { %3490 = vst.msk [vmem:[#allocation9 + $0xc8] sm:$0xff] %vm3464_vm3, %v3419_v59  ;;  %4856 = vrot.lane.b32.xlu0 %v4840_v24, %s7662_s21 }
 0x44e   : > { %4905 = vrot.lane.b32.xlu1 %v4889_v45, %s10604_s27 }
 0x44f   : > { %v3610_v10 = vpop.permute.xlu0 %3609 }
 0x450   : > { %3682 = vst.msk [vmem:[#allocation9 + $0xc0] sm:$0xff] %vm3657_vm4, %v3610_v10  ;;  %v4188_v60 = vpop.permute.xlu1 %4187  ;;  %v4292_v49 = vld [vmem:[#allocation9 + $0xb0] sm:$0xff] }
 0x451   : > { %4261 = vst.msk [vmem:[#allocation9 + $0xb8] sm:$0xff] %vm4237_vm7, %v4188_v60  ;;  %7398 = vmatprep.mubr.msk.f32.mxu1 %vm4318_vm8, %v4292_v49  ;;  %4954 = vrot.lane.b32.xlu0 %v9537_v51, %s7665_s23  ;;  %v5233_v51 = vld [vmem:[#allocation17 + $0x88] sm:$0xff] }
 0x452   : > { %5003 = vrot.lane.b32.xlu1 %v4987_v27, %s10608_s14  ;;  %5326 = vmatpush2.msra.mxu0 %v5233_v51 }
 0x453   : > { %v2844_v44 = vpop.permute.xlu0 %2843  ;;  %5327 = vmatprep.subr.mxu0 %v7652_v0 }
 0x454   : > { %2913 = vst.msk [vmem:[#allocation9 + $0xd8] sm:$0xff] %vm2885_vm0, %v2844_v44  ;;  %v3035_v63 = vpop.permute.xlu1 %3034  ;;  %5328 = vmatpush2.msra.mxu0 %v5232_v4 }
 0x455   : > { %3105 = vst.msk [vmem:[#allocation9 + $0xd0] sm:$0xff] %vm3078_vm1, %v3035_v63  ;;  %4858 = vrot.lane.b32.xlu0 %v4987_v27, %s7662_s21 }
 0x456   : > { %5052 = vrot.lane.b32.xlu1 %v5036_v48, %s7668_s30 }
 0x457   : > { %v3612_v2 = vpop.permute.xlu0 %3611 }
 0x458   : > { %3683 = vst.msk [vmem:[#allocation9 + $0xc8] sm:$0xff] %vm3657_vm4, %v3612_v2  ;;  %v3804_v17 = vpop.permute.xlu1 %3803  ;;  %v4293_v56 = vld [vmem:[#allocation9 + $0xb8] sm:$0xff] }
 0x459   : > { %3876 = vst.msk [vmem:[#allocation9 + $0xc0] sm:$0xff] %vm3851_vm5, %v3804_v17  ;;  %v7382_v12 = vpop.f32.mrf.mxu1  ;;  %7399 = vmatmul.mubr.msk.f32.gmra.mxu1 %vm4318_vm8, %v4293_v56  ;;  %4907 = vrot.lane.b32.xlu0 %v5036_v48, %s10604_s27  ;;  %v9764_v17 = vld [vmem:[%s10580_s4] ss:$0 sm:$0xff] }
 0x45a   : > { %v4537_v13 = vadd.f32 %v7382_v12, %v9450_v43  ;;  %5102 = vrot.lane.b32.xlu1 %v9624_v8, %s10606_s17 }
 0x45b   : > { %v4531_v18 = vpop.f32.mrf.mxu1  ;;  %v3037_v36 = vpop.permute.xlu0 %3036 }
 0x45c   : > { %v4651_v55 = vmax.f32 %v4537_v13, 0.0  ;;  %v4532_v16 = vadd.f32 %v9450_v43, %v4531_v18  ;;  %3106 = vst.msk [vmem:[#allocation9 + $0xd8] sm:$0xff] %vm3078_vm1, %v3037_v36  ;;  %v3228_v26 = vpop.permute.xlu1 %3227 }
 0x45d   : > { %3298 = vst.msk [vmem:[#allocation9 + $0xd0] sm:$0xff] %vm3271_vm2, %v3228_v26  ;;  %4956 = vrot.lane.b32.xlu0 %v9624_v8, %s7665_s23 }
 0x45e   : > { %4684 = vst.msk [vmem:[#allocation14 + $0x58] sm:$0xff] %vm4672_vm9, %v4651_v55  ;;  %v4650_v21 = vmax.f32 %v4532_v16, 0.0  ;;  %5151 = vrot.lane.b32.xlu1 %v5135_v53, %s7670_s22 }
 0x45f   : > { %v3806_v19 = vpop.permute.xlu0 %3805 }
 0x460   : > { %4683 = vst.msk [vmem:[#allocation14 + $0x50] sm:$0xff] %vm4672_vm9, %v4650_v21  ;;  %v3997_v23 = vpop.permute.xlu1 %3996 }
 0x461   : > { %3877 = vst.msk [vmem:[#allocation9 + $0xc8] sm:$0xff] %vm3851_vm5, %v3806_v19  ;;  %5005 = vrot.lane.b32.xlu0 %v5135_v53, %s10608_s14 }
 0x462   : > { %4069 = vst.msk [vmem:[#allocation9 + $0xc0] sm:$0xff] %vm4044_vm6, %v3997_v23  ;;  %4860 = vrot.lane.b32.xlu1 %v5135_v53, %s7662_s21 }
 0x463   : > { %v3230_v52 = vpop.permute.xlu0 %3229 }
 0x464   : > { %3299 = vst.msk [vmem:[#allocation9 + $0xd8] sm:$0xff] %vm3271_vm2, %v3230_v52  ;;  %v3421_v8 = vpop.permute.xlu1 %3420 }
 0x465   : > { %3491 = vst.msk [vmem:[#allocation9 + $0xd0] sm:$0xff] %vm3464_vm3, %v3421_v8  ;;  %5054 = vrot.lane.b32.xlu0 %v9622_v3, %s7668_s30 }
 0x466   : > { %4909 = vrot.lane.b32.xlu1 %v9622_v3, %s10604_s27 }
 0x467   : > { %v4715_v28 = vld [vmem:[#allocation14 + $0x50] ss:$2 sm:$0xff]  ;;  %v4747_v29 = vld [vmem:[#allocation14 + $0x51] ss:$2 sm:$0xff]  ;;  %v3999_v25 = vpop.permute.xlu0 %3998 }
 0x468   : > { %v4773_v32 = vmax.f32 %v4715_v28, %v4747_v29  ;;  %4070 = vst.msk [vmem:[#allocation9 + $0xc8] sm:$0xff] %vm4044_vm6, %v3999_v25  ;;  %v4190_v30 = vpop.permute.xlu1 %4189 }
 0x469   : > { %4262 = vst.msk [vmem:[#allocation9 + $0xc0] sm:$0xff] %vm4237_vm7, %v4190_v30 }
 0x46a   : > { %v4786_v7 = vmax.f32 %v4772_v47, %v4773_v32 }
 0x46b   : > { %v2846_v14 = vpop.permute.xlu0 %2845 }
 0x46c   : > { %2914 = vst.msk [vmem:[#allocation9 + $0xe0] sm:$0xff] %vm2885_vm0, %v2846_v14  ;;  %v3423_v31 = vpop.permute.xlu1 %3422 }
 0x46d   : > { %4818 = vst.msk [vmem:[#allocation4 + $0x50] sm:$0xff] %vm4672_vm9, %v4786_v7 }
 0x46e   : > { %3492 = vst.msk [vmem:[#allocation9 + $0xd8] sm:$0xff] %vm3464_vm3, %v3423_v31 }
 0x46f   : > { %v3614_v3 = vpop.permute.xlu0 %3613 }
 0x470   : > { %3684 = vst.msk [vmem:[#allocation9 + $0xd0] sm:$0xff] %vm3657_vm4, %v3614_v3  ;;  %v4192_v33 = vpop.permute.xlu1 %4191  ;;  %v4294_v20 = vld [vmem:[#allocation9 + $0xc0] sm:$0xff] }
 0x471   : > { %4263 = vst.msk [vmem:[#allocation9 + $0xc8] sm:$0xff] %vm4237_vm7, %v4192_v33  ;;  %7401 = vmatprep.mubr.msk.f32.mxu1 %vm4318_vm8, %v4294_v20 }
 0x473   : > { %v2848_v11 = vpop.permute.xlu0 %2847 }
 0x474   : > { %v4940_v34 = vld [vmem:[#allocation4 + $0x4f] sm:$0xff]  ;;  %2915 = vst.msk [vmem:[#allocation9 + $0xe8] sm:$0xff] %vm2885_vm0, %v2848_v11  ;;  %v3039_v40 = vpop.permute.xlu1 %3038 }
 0x475   : > { %v5038_v39 = vld [vmem:[#allocation4 + $0x51] sm:$0xff]  ;;  %4958 = vrot.lane.b32.xlu1 %v4940_v34, %s7665_s23  ;;  %5104 = vrot.lane.b32.xlu0 %v4940_v34, %s10606_s17  ;;  %4835 = vst.msk [vmem:[#allocation10 + $0x30] sm:$0xff] %vm4672_vm9, %v4940_v34 }
 0x476   : > { %5193 = vst.msk [vmem:[#allocation10 + $0x18] sm:$0xff] %vm4672_vm9, %v5038_v39  ;;  %v4989_v41 = vld [vmem:[#allocation4 + $0x50] sm:$0xff] }
 0x477   : > { %3107 = vst.msk [vmem:[#allocation9 + $0xe0] sm:$0xff] %vm3078_vm1, %v3039_v40  ;;  %v3616_v5 = vpop.permute.xlu0 %3615 }
 0x478   : > { %3685 = vst.msk [vmem:[#allocation9 + $0xd8] sm:$0xff] %vm3657_vm4, %v3616_v5  ;;  %v3808_v35 = vpop.permute.xlu1 %3807  ;;  %v4295_v54 = vld [vmem:[#allocation9 + $0xc8] sm:$0xff] }
 0x479   : > { %5007 = vrot.lane.b32.xlu1 %v4989_v41, %s10608_s14  ;;  %5153 = vrot.lane.b32.xlu0 %v4989_v41, %s7670_s22  ;;  %3878 = vst.msk [vmem:[#allocation9 + $0xd0] sm:$0xff] %vm3851_vm5, %v3808_v35  ;;  %v7385_v15 = vpop.f32.mrf.mxu1 }
 0x47a   : > { %7402 = vmatmul.mubr.msk.f32.gmra.mxu1 %vm4318_vm8, %v4295_v54  ;;  %v4547_v38 = vadd.f32 %v7385_v15, %v9450_v43 }
 0x47b   : > { %v4541_v22 = vpop.f32.mrf.mxu1  ;;  %v3041_v6 = vpop.permute.xlu0 %3040 }
 0x47c   : > { %v4653_v9 = vmax.f32 %v4547_v38, 0.0  ;;  %v4542_v46 = vadd.f32 %v9450_v43, %v4541_v22  ;;  %3108 = vst.msk [vmem:[#allocation9 + $0xe8] sm:$0xff] %vm3078_vm1, %v3041_v6  ;;  %v3232_v24 = vpop.permute.xlu1 %3231 }
 0x47d   : > { %5056 = vrot.lane.b32.xlu1 %v5038_v39, %s7668_s30  ;;  %4862 = vrot.lane.b32.xlu0 %v4989_v41, %s7662_s21  ;;  %3300 = vst.msk [vmem:[#allocation9 + $0xe0] sm:$0xff] %vm3271_vm2, %v3232_v24 }
 0x47e   : > { %4686 = vst.msk [vmem:[#allocation14 + $0x68] sm:$0xff] %vm4672_vm9, %v4653_v9  ;;  %v4652_v57 = vmax.f32 %v4542_v46, 0.0 }
 0x47f   : > { %v3810_v58 = vpop.permute.xlu0 %3809 }
 0x480   : > { %4685 = vst.msk [vmem:[#allocation14 + $0x60] sm:$0xff] %vm4672_vm9, %v4652_v57  ;;  %v4001_v45 = vpop.permute.xlu1 %4000 }
 0x481   : > { %3879 = vst.msk [vmem:[#allocation9 + $0xd8] sm:$0xff] %vm3851_vm5, %v3810_v58  ;;  %4911 = vrot.lane.b32.xlu0 %v5038_v39, %s10604_s27 }
 0x482   : > { %4071 = vst.msk [vmem:[#allocation9 + $0xd0] sm:$0xff] %vm4044_vm6, %v4001_v45 }
 0x483   : > { %v3234_v43 = vpop.permute.xlu0 %3233 }
 0x484   : > { %3301 = vst.msk [vmem:[#allocation9 + $0xe8] sm:$0xff] %vm3271_vm2, %v3234_v43  ;;  %v3425_v59 = vpop.permute.xlu1 %3424 }
 0x485   : > { %3493 = vst.msk [vmem:[#allocation9 + $0xe0] sm:$0xff] %vm3464_vm3, %v3425_v59 }
 0x487   : > { %v4003_v42 = vpop.permute.xlu0 %4002  ;;  %v4717_v19 = vld [vmem:[#allocation14 + $0x60] ss:$2 sm:$0xff]  ;;  %v4749_v23 = vld [vmem:[#allocation14 + $0x61] ss:$2 sm:$0xff] }
 0x488   : > { %4072 = vst.msk [vmem:[#allocation9 + $0xd8] sm:$0xff] %vm4044_vm6, %v4003_v42  ;;  %v4194_v10 = vpop.permute.xlu1 %4193  ;;  %v4774_v1 = vmax.f32 %v4717_v19, %v4749_v23 }
 0x489   : > { %4264 = vst.msk [vmem:[#allocation9 + $0xd0] sm:$0xff] %vm4237_vm7, %v4194_v10 }
 0x48b   : > { %v2850_v62 = vpop.permute.xlu0 %2849 }
 0x48c   : > { %2916 = vst.msk [vmem:[#allocation9 + $0xf0] sm:$0xff] %vm2885_vm0, %v2850_v62  ;;  %v3427_v60 = vpop.permute.xlu1 %3426 }
 0x48d   : > { %3494 = vst.msk [vmem:[#allocation9 + $0xe8] sm:$0xff] %vm3464_vm3, %v3427_v60 }
 0x48f   : > { %v3618_v49 = vpop.permute.xlu0 %3617 }
 0x490   : > { %3686 = vst.msk [vmem:[#allocation9 + $0xe0] sm:$0xff] %vm3657_vm4, %v3618_v49  ;;  %v4196_v27 = vpop.permute.xlu1 %4195  ;;  %v4296_v61 = vld [vmem:[#allocation9 + $0xd0] sm:$0xff] }
 0x491   : > { %4265 = vst.msk [vmem:[#allocation9 + $0xd8] sm:$0xff] %vm4237_vm7, %v4196_v27  ;;  %7404 = vmatprep.mubr.msk.f32.mxu1 %vm4318_vm8, %v4296_v61 }
 0x493   : > { %v2852_v44 = vpop.permute.xlu0 %2851 }
 0x494   : > { %2917 = vst.msk [vmem:[#allocation9 + $0xf8] sm:$0xff] %vm2885_vm0, %v2852_v44  ;;  %v3043_v50 = vpop.permute.xlu1 %3042  ;;  %vm5076_vm0 = vcmask 786048  }
 0x495   : > { %3109 = vst.msk [vmem:[#allocation9 + $0xf0] sm:$0xff] %vm3078_vm1, %v3043_v50 }
 0x497   : > { %v3620_v63 = vpop.permute.xlu0 %3619 }
 0x498   : > { %3687 = vst.msk [vmem:[#allocation9 + $0xe8] sm:$0xff] %vm3657_vm4, %v3620_v63  ;;  %v3812_v48 = vpop.permute.xlu1 %3811  ;;  %v4297_v51 = vld [vmem:[#allocation9 + $0xd8] sm:$0xff] }
 0x499   : > { %3880 = vst.msk [vmem:[#allocation9 + $0xe0] sm:$0xff] %vm3851_vm5, %v3812_v48  ;;  %v7388_v2 = vpop.f32.mrf.mxu1  ;;  %7405 = vmatmul.mubr.msk.f32.gmra.mxu1 %vm4318_vm8, %v4297_v51  ;;  %v5203_v48 = vld [vmem:[#allocation10 + $0x18] sm:$0xff] }
 0x49a   : > { %v4557_v56 = vadd.f32 %v9764_v17, %v7388_v2 }
 0x49b   : > { %v4551_v4 = vpop.f32.mrf.mxu1  ;;  %v3045_v12 = vpop.permute.xlu0 %3044 }
 0x49c   : > { %v4655_v13 = vmax.f32 %v4557_v56, 0.0  ;;  %v4552_v18 = vadd.f32 %v9764_v17, %v4551_v4  ;;  %3110 = vst.msk [vmem:[#allocation9 + $0xf8] sm:$0xff] %vm3078_vm1, %v3045_v12  ;;  %v3236_v36 = vpop.permute.xlu1 %3235  ;;  %vm5126_vm1 = vcmask 917248  }
 0x49d   : > { %3302 = vst.msk [vmem:[#allocation9 + $0xf0] sm:$0xff] %vm3271_vm2, %v3236_v36 }
 0x49e   : > { %4688 = vst.msk [vmem:[#allocation14 + $0x78] sm:$0xff] %vm4672_vm9, %v4655_v13  ;;  %v4654_v55 = vmax.f32 %v4552_v18, 0.0 }
 0x49f   : > { %v3814_v16 = vpop.permute.xlu0 %3813 }
 0x4a0   : > { %4687 = vst.msk [vmem:[#allocation14 + $0x70] sm:$0xff] %vm4672_vm9, %v4654_v55  ;;  %v4005_v26 = vpop.permute.xlu1 %4004 }
 0x4a1   : > { %3881 = vst.msk [vmem:[#allocation9 + $0xe8] sm:$0xff] %vm3851_vm5, %v3814_v16 }
 0x4a2   : > { %4073 = vst.msk [vmem:[#allocation9 + $0xe0] sm:$0xff] %vm4044_vm6, %v4005_v26 }
 0x4a3   : > { %v3238_v53 = vpop.permute.xlu0 %3237 }
 0x4a4   : > { %3303 = vst.msk [vmem:[#allocation9 + $0xf8] sm:$0xff] %vm3271_vm2, %v3238_v53  ;;  %v3429_v21 = vpop.permute.xlu1 %3428  ;;  %vm5175_vm2 = vcmask 1048448  }
 0x4a5   : > { %3495 = vst.msk [vmem:[#allocation9 + $0xf0] sm:$0xff] %vm3464_vm3, %v3429_v21 }
 0x4a7   : > { %v4719_v52 = vld [vmem:[#allocation14 + $0x70] ss:$2 sm:$0xff]  ;;  %v4751_v8 = vld [vmem:[#allocation14 + $0x71] ss:$2 sm:$0xff]  ;;  %v4007_v37 = vpop.permute.xlu0 %4006 }
 0x4a8   : > { %v4775_v28 = vmax.f32 %v4719_v52, %v4751_v8  ;;  %4074 = vst.msk [vmem:[#allocation9 + $0xe8] sm:$0xff] %vm4044_vm6, %v4007_v37  ;;  %v4198_v29 = vpop.permute.xlu1 %4197 }
 0x4a9   : > { %4266 = vst.msk [vmem:[#allocation9 + $0xe0] sm:$0xff] %vm4237_vm7, %v4198_v29 }
 0x4aa   : > { %v4787_v25 = vmax.f32 %v4774_v1, %v4775_v28 }
 0x4ab   : > { %v3431_v47 = vpop.permute.xlu0 %3430 }
 0x4ac   : > { %3496 = vst.msk [vmem:[#allocation9 + $0xf8] sm:$0xff] %vm3464_vm3, %v3431_v47  ;;  %v3622_v32 = vpop.permute.xlu1 %3621  ;;  %vm5955_vm3 = vcmask 261120  }
 0x4ad   : > { %4819 = vst.msk [vmem:[#allocation4 + $0x68] sm:$0xff] %vm4672_vm9, %v4787_v25 }
 0x4ae   : > { %3688 = vst.msk [vmem:[#allocation9 + $0xf0] sm:$0xff] %vm3657_vm4, %v3622_v32 }
 0x4af   : > { %v4200_v30 = vpop.permute.xlu0 %4199  ;;  %6007 = vst.msk [vmem:[#allocation6 + $0x7] sm:$0xff] %vm5955_vm3, %v7652_v0  ;;  %6011 = vst.msk [vmem:[#allocation6 + $0x7f] sm:$0xff] %vm5955_vm3, %v7652_v0 }
 0x4b0   : > { %4267 = vst.msk [vmem:[#allocation9 + $0xe8] sm:$0xff] %vm4237_vm7, %v4200_v30  ;;  %v3624_v7 = vpop.permute.xlu1 %3623  ;;  %v4298_v14 = vld [vmem:[#allocation9 + $0xe0] sm:$0xff] }
 0x4b1   : > { %3689 = vst.msk [vmem:[#allocation9 + $0xf8] sm:$0xff] %vm3657_vm4, %v3624_v7  ;;  %7407 = vmatprep.mubr.msk.f32.mxu1 %vm4318_vm8, %v4298_v14  ;;  %vm6008_vm4 = vcmask 254976  }
 0x4b2   : > { %6442 = vst.msk [vmem:[#allocation7 + $0x7] sm:$0xff] %vm5955_vm3, %v7652_v0  ;;  %6445 = vst.msk [vmem:[#allocation7 + $0x7f] sm:$0xff] %vm5955_vm3, %v7652_v0 }
 0x4b3   : > { %v3816_v31 = vpop.permute.xlu0 %3815  ;;  %6009 = vst.msk [vmem:[#allocation6 + $0xf] sm:$0x3] %vm6008_vm4, %v7652_v0  ;;  %6012 = vst.msk [vmem:[#allocation6 + $0x87] sm:$0x3] %vm6008_vm4, %v7652_v0 }
 0x4b4   : > { %v5088_v3 = vld [vmem:[#allocation4 + $0x67] sm:$0xff]  ;;  %3882 = vst.msk [vmem:[#allocation9 + $0xf0] sm:$0xff] %vm3851_vm5, %v3816_v31  ;;  %v3818_v20 = vpop.permute.xlu1 %3817 }
 0x4b5   : > { %v5039_v33 = vld [vmem:[#allocation4 + $0x69] sm:$0xff]  ;;  %5106 = vrot.lane.b32.xlu1 %v5088_v3, %s10606_s17  ;;  %4960 = vrot.lane.b32.xlu0 %v5088_v3, %s7665_s23  ;;  %4836 = vst.msk [vmem:[#allocation10 + $0x40] sm:$0xff] %vm4672_vm9, %v5088_v3 }
 0x4b6   : > { %5194 = vst.msk [vmem:[#allocation10 + $0x28] sm:$0xff] %vm4672_vm9, %v5039_v33  ;;  %v5137_v34 = vld [vmem:[#allocation4 + $0x68] sm:$0xff] }
 0x4b7   : > { %3883 = vst.msk [vmem:[#allocation9 + $0xf8] sm:$0xff] %vm3851_vm5, %v3818_v20  ;;  %v4009_v11 = vpop.permute.xlu0 %4008  ;;  %v4299_v39 = vld [vmem:[#allocation9 + $0xe8] sm:$0xff]  ;;  %vm6019_vm5 = vcmask 258048  }
 0x4b8   : > { %4075 = vst.msk [vmem:[#allocation9 + $0xf0] sm:$0xff] %vm4044_vm6, %v4009_v11  ;;  %v4011_v40 = vpop.permute.xlu1 %4010  ;;  %7408 = vmatmul.mubr.msk.f32.gmra.mxu1 %vm4318_vm8, %v4299_v39 }
 0x4b9   : > { %5155 = vrot.lane.b32.xlu1 %v5137_v34, %s7670_s22  ;;  %5009 = vrot.lane.b32.xlu0 %v5137_v34, %s10608_s14  ;;  %4076 = vst.msk [vmem:[#allocation9 + $0xf8] sm:$0xff] %vm4044_vm6, %v4011_v40  ;;  %v7391_v5 = vpop.f32.mrf.mxu1  ;;  %vm6014_vm6 = vcmask 253952  }
 0x4ba   : > { %v4567_v41 = vadd.f32 %v9764_v17, %v7391_v5  ;;  %6443 = vst.msk [vmem:[#allocation7 + $0xf] sm:$0x3] %vm6008_vm4, %v7652_v0  ;;  %6446 = vst.msk [vmem:[#allocation7 + $0x87] sm:$0x3] %vm6008_vm4, %v7652_v0 }
 0x4bb   : > { %v4561_v35 = vpop.f32.mrf.mxu1  ;;  %v4202_v54 = vpop.permute.xlu0 %4201  ;;  %6020 = vst.msk [vmem:[#allocation6 + $0x24] sm:$0x1f] %vm6019_vm5, %v7652_v0  ;;  %6021 = vst.msk [vmem:[#allocation6 + $0x3c] sm:$0x1f] %vm6019_vm5, %v7652_v0 }
 0x4bc   : > { %v4657_v15 = vmax.f32 %v4567_v41, 0.0  ;;  %v4562_v38 = vadd.f32 %v9764_v17, %v4561_v35  ;;  %4268 = vst.msk [vmem:[#allocation9 + $0xf0] sm:$0xff] %vm4237_vm7, %v4202_v54  ;;  %v4204_v22 = vpop.permute.xlu1 %4203 }
 0x4bd   : > { %4864 = vrot.lane.b32.xlu1 %v5137_v34, %s7662_s21  ;;  %5058 = vrot.lane.b32.xlu0 %v5039_v33, %s7668_s30  ;;  %4269 = vst.msk [vmem:[#allocation9 + $0xf8] sm:$0xff] %vm4237_vm7, %v4204_v22  ;;  %v5205_v47 = vld [vmem:[#allocation10 + $0x28] sm:$0xff]  ;;  %vm6024_vm7 = vcmask 257024  }
 0x4be   : > { %4690 = vst.msk [vmem:[#allocation14 + $0x88] sm:$0xff] %vm4672_vm9, %v4657_v15  ;;  %v4656_v6 = vmax.f32 %v4562_v38, 0.0 }
 0x4bf   : > { %v4857_v9 = vpop.permute.xlu0 %4856  ;;  %6022 = vst.msk [vmem:[#allocation6 + $0x54] sm:$0x1f] %vm6019_vm5, %v7652_v0  ;;  %6023 = vst.msk [vmem:[#allocation6 + $0x6c] sm:$0x1f] %vm6019_vm5, %v7652_v0 }
 0x4c0   : > { %4689 = vst.msk [vmem:[#allocation14 + $0x80] sm:$0xff] %vm4672_vm9, %v4656_v6  ;;  %v4906_v46 = vpop.permute.xlu1 %4905 }
 0x4c1   : > { %4881 = vst.msk [vmem:[#allocation10] sm:$0xff] %vm4880_vm12, %v4857_v9  ;;  %4913 = vrot.lane.b32.xlu1 %v5039_v33, %s10604_s27 }
 0x4c2   : > { %4930 = vst.msk [vmem:[#allocation10] sm:$0xff] %vm4929_vm13, %v4906_v46 }
 0x4c3   : > { %v4955_v24 = vpop.permute.xlu0 %4954  ;;  %v4300_v57 = vld [vmem:[#allocation9 + $0xf0] sm:$0xff]  ;;  %6452 = vst.msk [vmem:[#allocation7 + $0x24] sm:$0x1f] %vm6019_vm5, %v7652_v0  ;;  %6453 = vst.msk [vmem:[#allocation7 + $0x3c] sm:$0x1f] %vm6019_vm5, %v7652_v0 }
 0x4c4   : > { %v5004_v58 = vpop.permute.xlu1 %5003  ;;  %4979 = vst.msk [vmem:[#allocation10] sm:$0xff] %vm4978_vm14, %v4955_v24  ;;  %7410 = vmatprep.mubr.msk.f32.mxu1 %vm4318_vm8, %v4300_v57  ;;  %v4301_v45 = vld [vmem:[#allocation9 + $0xf8] sm:$0xff] }
 0x4c5   : > { %7411 = vmatmul.mubr.msk.f32.gmra.mxu1 %vm4318_vm8, %v4301_v45  ;;  %5028 = vst.msk [vmem:[#allocation10] sm:$0xff] %vm5027_vm15, %v5004_v58  ;;  %vm6057_vm8 = vcmask 523520  }
 0x4c6   : > { %6454 = vst.msk [vmem:[#allocation7 + $0x54] sm:$0x1f] %vm6019_vm5, %v7652_v0  ;;  %6455 = vst.msk [vmem:[#allocation7 + $0x6c] sm:$0x1f] %vm6019_vm5, %v7652_v0 }
 0x4c7   : > { %v4859_v43 = vpop.permute.xlu0 %4858  ;;  %v4721_v13 = vld [vmem:[#allocation14 + $0x80] ss:$2 sm:$0xff]  ;;  %v4753_v18 = vld [vmem:[#allocation14 + $0x81] ss:$2 sm:$0xff]  ;;  %6015 = vst.msk [vmem:[#allocation6 + $0x1f] sm:$0x1] %vm6014_vm6, %v7652_v0 }
 0x4c8   : > { %v5053_v59 = vpop.permute.xlu1 %5052  ;;  %4882 = vst.msk [vmem:[#allocation10 + $0x10] sm:$0xff] %vm4880_vm12, %v4859_v43  ;;  %v4776_v53 = vmax.f32 %v4721_v13, %v4753_v18 }
 0x4c9   : > { %5077 = vst.msk [vmem:[#allocation10] sm:$0xff] %vm5076_vm0, %v5053_v59 }
 0x4ca   : > { %6016 = vst.msk [vmem:[#allocation6 + $0x37] sm:$0x1] %vm6014_vm6, %v7652_v0  ;;  %6017 = vst.msk [vmem:[#allocation6 + $0x4f] sm:$0x1] %vm6014_vm6, %v7652_v0 }
 0x4cb   : > { %v4908_v42 = vpop.permute.xlu0 %4907  ;;  %6018 = vst.msk [vmem:[#allocation6 + $0x67] sm:$0x1] %vm6014_vm6, %v7652_v0  ;;  %6448 = vst.msk [vmem:[#allocation7 + $0x1f] sm:$0x1] %vm6014_vm6, %v7652_v0 }
 0x4cc   : > { %v5103_v10 = vpop.permute.xlu1 %5102  ;;  %4931 = vst.msk [vmem:[#allocation10 + $0x10] sm:$0xff] %vm4929_vm13, %v4908_v42 }
 0x4cd   : > { %5127 = vst.msk [vmem:[#allocation10] sm:$0xff] %vm5126_vm1, %v5103_v10 }
 0x4ce   : > { %6449 = vst.msk [vmem:[#allocation7 + $0x37] sm:$0x1] %vm6014_vm6, %v7652_v0  ;;  %6450 = vst.msk [vmem:[#allocation7 + $0x4f] sm:$0x1] %vm6014_vm6, %v7652_v0 }
 0x4cf   : > { %v4957_v62 = vpop.permute.xlu0 %4956  ;;  %6451 = vst.msk [vmem:[#allocation7 + $0x67] sm:$0x1] %vm6014_vm6, %v7652_v0 }
 0x4d0   : > { %v5152_v60 = vpop.permute.xlu1 %5151  ;;  %4980 = vst.msk [vmem:[#allocation10 + $0x10] sm:$0xff] %vm4978_vm14, %v4957_v62 }
 0x4d1   : > { %5176 = vst.msk [vmem:[#allocation10] sm:$0xff] %vm5175_vm2, %v5152_v60 }
 0x4d3   : > { %v5006_v49 = vpop.permute.xlu0 %5005 }
 0x4d4   : > { %v4861_v27 = vpop.permute.xlu1 %4860  ;;  %5029 = vst.msk [vmem:[#allocation10 + $0x10] sm:$0xff] %vm5027_vm15, %v5006_v49 }
 0x4d5   : > { %4883 = vst.msk [vmem:[#allocation10 + $0x20] sm:$0xff] %vm4880_vm12, %v4861_v27 }
 0x4d7   : > { %v5055_v61 = vpop.permute.xlu0 %5054 }
 0x4d8   : > { %v4910_v44 = vpop.permute.xlu1 %4909  ;;  %5078 = vst.msk [vmem:[#allocation10 + $0x10] sm:$0xff] %vm5076_vm0, %v5055_v61  ;;  %v5200_v50 = vld [vmem:[#allocation10] sm:$0xff] }
 0x4d9   : > { %4932 = vst.msk [vmem:[#allocation10 + $0x20] sm:$0xff] %vm4929_vm13, %v4910_v44  ;;  %v7394_v63 = vpop.f32.mrf.mxu1  ;;  %5330 = vmatmul.mubr.f32.vlgmr.msra.gmra.mxu0 %v5200_v50 }
 0x4da   : > { %v4577_v51 = vadd.f32 %v9764_v17, %v7394_v63  ;;  %7077 = vmatprep.mubr.msk.f32.mxu0 %vm4672_vm9, %v5203_v48 }
 0x4db   : > { %v4571_v2 = vpop.f32.mrf.mxu1 }
 0x4dc   : > { %v4659_v56 = vmax.f32 %v4577_v51, 0.0  ;;  %v4572_v4 = vadd.f32 %v9764_v17, %v4571_v2 }
 0x4de   : > { %4692 = vst.msk [vmem:[#allocation14 + $0x98] sm:$0xff] %vm4672_vm9, %v4659_v56  ;;  %v4658_v12 = vmax.f32 %v4572_v4, 0.0 }
 0x4e0   : > { %4691 = vst.msk [vmem:[#allocation14 + $0x90] sm:$0xff] %vm4672_vm9, %v4658_v12 }
 0x4e7   : > { %v4959_v36 = vpop.permute.xlu1 %4958  ;;  %v5105_v55 = vpop.permute.xlu0 %5104  ;;  %v4723_v16 = vld [vmem:[#allocation14 + $0x90] ss:$2 sm:$0xff]  ;;  %v4755_v26 = vld [vmem:[#allocation14 + $0x91] ss:$2 sm:$0xff] }
 0x4e8   : > { %4981 = vst.msk [vmem:[#allocation10 + $0x20] sm:$0xff] %vm4978_vm14, %v4959_v36  ;;  %v4777_v21 = vmax.f32 %v4723_v16, %v4755_v26 }
 0x4e9   : > { %5128 = vst.msk [vmem:[#allocation10 + $0x10] sm:$0xff] %vm5126_vm1, %v5105_v55 }
 0x4ea   : > { %v4788_v52 = vmax.f32 %v4776_v53, %v4777_v21 }
 0x4eb   : > { %v5008_v19 = vpop.permute.xlu1 %5007  ;;  %v5154_v23 = vpop.permute.xlu0 %5153 }
 0x4ec   : > { %5030 = vst.msk [vmem:[#allocation10 + $0x20] sm:$0xff] %vm5027_vm15, %v5008_v19 }
 0x4ed   : > { %5177 = vst.msk [vmem:[#allocation10 + $0x10] sm:$0xff] %vm5175_vm2, %v5154_v23 }
 0x4ee   : > { %4820 = vst.msk [vmem:[#allocation4 + $0x80] sm:$0xff] %vm4672_vm9, %v4788_v52 }
 0x4ef   : > { %v5057_v8 = vpop.permute.xlu1 %5056  ;;  %v4863_v37 = vpop.permute.xlu0 %4862 }
 0x4f0   : > { %5079 = vst.msk [vmem:[#allocation10 + $0x20] sm:$0xff] %vm5076_vm0, %v5057_v8 }
 0x4f1   : > { %4884 = vst.msk [vmem:[#allocation10 + $0x30] sm:$0xff] %vm4880_vm12, %v4863_v37 }
 0x4f3   : > { %v4912_v1 = vpop.permute.xlu0 %4911 }
 0x4f4   : > { %v5202_v28 = vld [vmem:[#allocation10 + $0x10] sm:$0xff]  ;;  %4933 = vst.msk [vmem:[#allocation10 + $0x30] sm:$0xff] %vm4929_vm13, %v4912_v1 }
 0x4f5   : > { %5335 = vmatmul.mubr.f32.gmra.mxu0 %v5202_v28  ;;  %v4942_v29 = vld [vmem:[#allocation4 + $0x7f] sm:$0xff] }
 0x4f6   : > { %v5040_v25 = vld [vmem:[#allocation4 + $0x81] sm:$0xff]  ;;  %4962 = vrot.lane.b32.xlu1 %v4942_v29, %s7665_s23  ;;  %5108 = vrot.lane.b32.xlu0 %v4942_v29, %s10606_s17  ;;  %4837 = vst.msk [vmem:[#allocation10 + $0x50] sm:$0xff] %vm4672_vm9, %v4942_v29 }
 0x4f7   : > { %5195 = vst.msk [vmem:[#allocation10 + $0x38] sm:$0xff] %vm4672_vm9, %v5040_v25  ;;  %7078 = vmatprep.mubr.msk.f32.mxu0 %vm4672_vm9, %v5205_v47  ;;  %v4991_v32 = vld [vmem:[#allocation4 + $0x80] sm:$0xff] }
 0x4f9   : > { %v7397_v30 = vpop.f32.mrf.mxu1 }
 0x4fa   : > { %5011 = vrot.lane.b32.xlu1 %v4991_v32, %s10608_s14  ;;  %5157 = vrot.lane.b32.xlu0 %v4991_v32, %s7670_s22  ;;  %v4587_v7 = vadd.f32 %v9764_v17, %v7397_v30 }
 0x4fb   : > { %v4581_v14 = vpop.f32.mrf.mxu1 }
 0x4fc   : > { %v4661_v31 = vmax.f32 %v4587_v7, 0.0  ;;  %v4582_v3 = vadd.f32 %v9764_v17, %v4581_v14 }
 0x4fe   : > { %5060 = vrot.lane.b32.xlu1 %v5040_v25, %s7668_s30  ;;  %4866 = vrot.lane.b32.xlu0 %v4991_v32, %s7662_s21  ;;  %4694 = vst.msk [vmem:[#allocation14 + $0xa8] sm:$0xff] %vm4672_vm9, %v4661_v31  ;;  %v4660_v33 = vmax.f32 %v4582_v3, 0.0  ;;  %v5207_v62 = vld [vmem:[#allocation10 + $0x38] sm:$0xff] }
 0x500   : > { %4693 = vst.msk [vmem:[#allocation14 + $0xa0] sm:$0xff] %vm4672_vm9, %v4660_v33 }
 0x502   : > { %4915 = vrot.lane.b32.xlu0 %v5040_v25, %s10604_s27 }
 0x507   : > { %v4725_v41 = vld [vmem:[#allocation14 + $0xa0] ss:$2 sm:$0xff]  ;;  %v4757_v35 = vld [vmem:[#allocation14 + $0xa1] ss:$2 sm:$0xff] }
 0x508   : > { %v4778_v6 = vmax.f32 %v4725_v41, %v4757_v35 }
 0x519   : > { %v7400_v20 = vpop.f32.mrf.mxu1 }
 0x51a   : > { %v4597_v11 = vadd.f32 %v9764_v17, %v7400_v20 }
 0x51b   : > { %v4591_v34 = vpop.f32.mrf.mxu1 }
 0x51c   : > { %v4663_v39 = vmax.f32 %v4597_v11, 0.0  ;;  %v4592_v40 = vadd.f32 %v9764_v17, %v4591_v34 }
 0x51e   : > { %4696 = vst.msk [vmem:[#allocation14 + $0xb8] sm:$0xff] %vm4672_vm9, %v4663_v39  ;;  %v4662_v5 = vmax.f32 %v4592_v40, 0.0 }
 0x520   : > { %4695 = vst.msk [vmem:[#allocation14 + $0xb0] sm:$0xff] %vm4672_vm9, %v4662_v5 }
 0x527   : > { %v5107_v54 = vpop.permute.xlu1 %5106  ;;  %v4961_v15 = vpop.permute.xlu0 %4960  ;;  %v4727_v38 = vld [vmem:[#allocation14 + $0xb0] ss:$2 sm:$0xff]  ;;  %v4759_v22 = vld [vmem:[#allocation14 + $0xb1] ss:$2 sm:$0xff] }
 0x528   : > { %5129 = vst.msk [vmem:[#allocation10 + $0x20] sm:$0xff] %vm5126_vm1, %v5107_v54  ;;  %v4779_v9 = vmax.f32 %v4727_v38, %v4759_v22 }
 0x529   : > { %4982 = vst.msk [vmem:[#allocation10 + $0x30] sm:$0xff] %vm4978_vm14, %v4961_v15 }
 0x52a   : > { %v4789_v57 = vmax.f32 %v4778_v6, %v4779_v9  ;;  %v9906_v9 = vld [vmem:[%s10582_s6] ss:$0 sm:$0xff] }
 0x52b   : > { %v5156_v46 = vpop.permute.xlu1 %5155  ;;  %v5010_v24 = vpop.permute.xlu0 %5009 }
 0x52c   : > { %5178 = vst.msk [vmem:[#allocation10 + $0x20] sm:$0xff] %vm5175_vm2, %v5156_v46 }
 0x52d   : > { %5031 = vst.msk [vmem:[#allocation10 + $0x30] sm:$0xff] %vm5027_vm15, %v5010_v24 }
 0x52e   : > { %4821 = vst.msk [vmem:[#allocation4 + $0x98] sm:$0xff] %vm4672_vm9, %v4789_v57 }
 0x52f   : > { %v4865_v58 = vpop.permute.xlu1 %4864  ;;  %v5059_v45 = vpop.permute.xlu0 %5058 }
 0x530   : > { %4885 = vst.msk [vmem:[#allocation10 + $0x40] sm:$0xff] %vm4880_vm12, %v4865_v58  ;;  %v5808_v58 = vld [vmem:[#allocation20 + $0x78] sm:$0xff] }
 0x531   : > { %5080 = vst.msk [vmem:[#allocation10 + $0x30] sm:$0xff] %vm5076_vm0, %v5059_v45  ;;  %v5807_v45 = vld [vmem:[#allocation20 + $0x70] sm:$0xff]  ;;  %5843 = vmatpush1.msra.mxu1 %v5808_v58 }
 0x532   : > { %5844 = vmatprep.subr.mxu1 %v7652_v0 }
 0x533   : > { %v4914_v43 = vpop.permute.xlu1 %4913  ;;  %v5204_v59 = vld [vmem:[#allocation10 + $0x20] sm:$0xff]  ;;  %5845 = vmatpush1.msra.mxu1 %v5807_v45 }
 0x534   : > { %4934 = vst.msk [vmem:[#allocation10 + $0x40] sm:$0xff] %vm4929_vm13, %v4914_v43  ;;  %5340 = vmatmul.mubr.f32.gmra.mxu0 %v5204_v59  ;;  %5846 = vmatprep.subr.mxu1 %v7652_v0 }
 0x535   : > { %v5090_v42 = vld [vmem:[#allocation4 + $0x97] sm:$0xff]  ;;  %7079 = vmatprep.mubr.msk.f32.mxu0 %vm4672_vm9, %v5207_v62 }
 0x536   : > { %v5041_v10 = vld [vmem:[#allocation4 + $0x99] sm:$0xff]  ;;  %5110 = vrot.lane.b32.xlu1 %v5090_v42, %s10606_s17  ;;  %4964 = vrot.lane.b32.xlu0 %v5090_v42, %s7665_s23  ;;  %4838 = vst.msk [vmem:[#allocation10 + $0x60] sm:$0xff] %vm4672_vm9, %v5090_v42  ;;  %v5805_v62 = vld [vmem:[#allocation20 + $0x60] sm:$0xff] }
 0x537   : > { %5196 = vst.msk [vmem:[#allocation10 + $0x48] sm:$0xff] %vm4672_vm9, %v5041_v10  ;;  %v5139_v60 = vld [vmem:[#allocation4 + $0x98] sm:$0xff] }
 0x538   : > { %v5408_v42 = vld [vmem:[#allocation5 + $0x7] sm:$0xff] }
 0x539   : > { %5416 = vst.msk [vmem:[#allocation11] sm:$0xff] %vm4672_vm9, %v5408_v42 }
 0x53a   : > { %5159 = vrot.lane.b32.xlu1 %v5139_v60, %s7670_s22  ;;  %5013 = vrot.lane.b32.xlu0 %v5139_v60, %s10608_s14  ;;  %v7403_v49 = vpop.f32.mrf.mxu1 }
 0x53b   : > { %v4607_v27 = vadd.f32 %v9764_v17, %v7403_v49 }
 0x53c   : > { %v4601_v61 = vpop.f32.mrf.mxu1 }
 0x53d   : > { %v4665_v44 = vmax.f32 %v4607_v27, 0.0  ;;  %v4602_v50 = vadd.f32 %v9764_v17, %v4601_v61  ;;  %v5804_v27 = vld [vmem:[#allocation20 + $0x58] sm:$0xff]  ;;  %v5093_v61 = vld [vmem:[#allocation4 + $0xdf] sm:$0xff] }
 0x53e   : > { %4868 = vrot.lane.b32.xlu1 %v5139_v60, %s7662_s21  ;;  %5062 = vrot.lane.b32.xlu0 %v5041_v10, %s7668_s30  ;;  %v5209_v47 = vld [vmem:[#allocation10 + $0x48] sm:$0xff] }
 0x53f   : > { %4698 = vst.msk [vmem:[#allocation14 + $0xc8] sm:$0xff] %vm4672_vm9, %v4665_v44  ;;  %v4664_v63 = vmax.f32 %v4602_v50, 0.0  ;;  %v5191_v60 = vld [vmem:[#allocation4 + $0xe1] sm:$0xff] }
 0x540   : > { %5199 = vst.msk [vmem:[#allocation10 + $0x78] sm:$0xff] %vm4672_vm9, %v5191_v60 }
 0x541   : > { %4697 = vst.msk [vmem:[#allocation14 + $0xc0] sm:$0xff] %vm4672_vm9, %v4664_v63 }
 0x542   : > { %4917 = vrot.lane.b32.xlu1 %v5041_v10, %s10604_s27  ;;  %v5806_v10 = vld [vmem:[#allocation20 + $0x68] sm:$0xff] }
 0x543   : > { %5847 = vmatpush1.msra.mxu1 %v5806_v10 }
 0x544   : > { %5848 = vmatprep.subr.mxu1 %v7652_v0 }
 0x545   : > { %5849 = vmatpush1.msra.mxu1 %v5805_v62 }
 0x546   : > { %5850 = vmatprep.subr.mxu1 %v7652_v0 }
 0x547   : > { %5851 = vmatpush1.msra.mxu1 %v5804_v27  ;;  %v5215_v60 = vld [vmem:[#allocation10 + $0x78] sm:$0xff] }
 0x548   : > { %v4729_v13 = vld [vmem:[#allocation14 + $0xc0] ss:$2 sm:$0xff]  ;;  %v4761_v18 = vld [vmem:[#allocation14 + $0xc1] ss:$2 sm:$0xff]  ;;  %5852 = vmatprep.subr.mxu1 %v7652_v0 }
 0x549   : > { %v4780_v53 = vmax.f32 %v4729_v13, %v4761_v18  ;;  %v5801_v13 = vld [vmem:[#allocation20 + $0x40] sm:$0xff]  ;;  %v5472_v18 = vld [vmem:[#allocation5 + $0x9] sm:$0xff] }
 0x559   : > { %v7406_v48 = vpop.f32.mrf.mxu1 }
 0x55a   : > { %v4617_v51 = vadd.f32 %v9764_v17, %v7406_v48  ;;  %v5803_v48 = vld [vmem:[#allocation20 + $0x50] sm:$0xff] }
 0x55b   : > { %v4611_v2 = vpop.f32.mrf.mxu1  ;;  %5853 = vmatpush1.msra.mxu1 %v5803_v48 }
 0x55c   : > { %v4667_v56 = vmax.f32 %v4617_v51, 0.0  ;;  %v4612_v4 = vadd.f32 %v9764_v17, %v4611_v2  ;;  %v5142_v51 = vld [vmem:[#allocation4 + $0xe0] sm:$0xff]  ;;  %v5424_v2 = vld [vmem:[#allocation5 + $0x8] sm:$0xff]  ;;  %5854 = vmatprep.subr.mxu1 %v7652_v0 }
 0x55e   : > { %4700 = vst.msk [vmem:[#allocation14 + $0xd8] sm:$0xff] %vm4672_vm9, %v4667_v56  ;;  %v4666_v12 = vmax.f32 %v4612_v4, 0.0 }
 0x560   : > { %4699 = vst.msk [vmem:[#allocation14 + $0xd0] sm:$0xff] %vm4672_vm9, %v4666_v12  ;;  %v5802_v12 = vld [vmem:[#allocation20 + $0x48] sm:$0xff] }
 0x561   : > { %5855 = vmatpush1.msra.mxu1 %v5802_v12 }
 0x562   : > { %5856 = vmatprep.subr.mxu1 %v7652_v0 }
 0x563   : > { %5857 = vmatpush1.msra.mxu1 %v5801_v13 }
 0x564   : > { %5858 = vmatprep.subr.mxu1 %v7652_v0 }
 0x567   : > { %v4731_v16 = vld [vmem:[#allocation14 + $0xd0] ss:$2 sm:$0xff]  ;;  %v4763_v26 = vld [vmem:[#allocation14 + $0xd1] ss:$2 sm:$0xff] }
 0x568   : > { %v4963_v36 = vpop.permute.xlu1 %4962  ;;  %v5109_v55 = vpop.permute.xlu0 %5108  ;;  %v4781_v21 = vmax.f32 %v4731_v16, %v4763_v26  ;;  %v5800_v16 = vld [vmem:[#allocation20 + $0x38] sm:$0xff] }
 0x569   : > { %4983 = vst.msk [vmem:[#allocation10 + $0x40] sm:$0xff] %vm4978_vm14, %v4963_v36  ;;  %5859 = vmatpush1.msra.mxu1 %v5800_v16 }
 0x56a   : > { %5130 = vst.msk [vmem:[#allocation10 + $0x30] sm:$0xff] %vm5126_vm1, %v5109_v55  ;;  %v4790_v52 = vmax.f32 %v4780_v53, %v4781_v21  ;;  %v5799_v21 = vld [vmem:[#allocation20 + $0x30] sm:$0xff]  ;;  %5860 = vmatprep.subr.mxu1 %v7652_v0 }
 0x56b   : > { %5861 = vmatpush1.msra.mxu1 %v5799_v21 }
 0x56c   : > { %v5012_v19 = vpop.permute.xlu1 %5011  ;;  %v5158_v23 = vpop.permute.xlu0 %5157  ;;  %4822 = vst.msk [vmem:[#allocation4 + $0xb0] sm:$0xff] %vm4672_vm9, %v4790_v52  ;;  %5862 = vmatprep.subr.mxu1 %v7652_v0 }
 0x56d   : > { %5032 = vst.msk [vmem:[#allocation10 + $0x40] sm:$0xff] %vm5027_vm15, %v5012_v19 }
 0x56e   : > { %5179 = vst.msk [vmem:[#allocation10 + $0x30] sm:$0xff] %vm5175_vm2, %v5158_v23 }
 0x570   : > { %v5061_v8 = vpop.permute.xlu1 %5060  ;;  %v4867_v37 = vpop.permute.xlu0 %4866 }
 0x571   : > { %5081 = vst.msk [vmem:[#allocation10 + $0x40] sm:$0xff] %vm5076_vm0, %v5061_v8 }
 0x572   : > { %4886 = vst.msk [vmem:[#allocation10 + $0x50] sm:$0xff] %vm4880_vm12, %v4867_v37  ;;  %v5798_v37 = vld [vmem:[#allocation20 + $0x28] sm:$0xff] }
 0x573   : > { %v4944_v29 = vld [vmem:[#allocation4 + $0xaf] sm:$0xff]  ;;  %5863 = vmatpush1.msra.mxu1 %v5798_v37 }
 0x574   : > { %v4916_v1 = vpop.permute.xlu0 %4915  ;;  %v5042_v25 = vld [vmem:[#allocation4 + $0xb1] sm:$0xff]  ;;  %4966 = vrot.lane.b32.xlu1 %v4944_v29, %s7665_s23  ;;  %5112 = vrot.lane.b32.xlu0 %v4944_v29, %s10606_s17  ;;  %4839 = vst.msk [vmem:[#allocation10 + $0x70] sm:$0xff] %vm4672_vm9, %v4944_v29 }
 0x575   : > { %v5206_v28 = vld [vmem:[#allocation10 + $0x30] sm:$0xff]  ;;  %4935 = vst.msk [vmem:[#allocation10 + $0x50] sm:$0xff] %vm4929_vm13, %v4916_v1  ;;  %5864 = vmatprep.subr.mxu1 %v7652_v0 }
 0x576   : > { %5345 = vmatmul.mubr.f32.gmra.mxu0 %v5206_v28  ;;  %5197 = vst.msk [vmem:[#allocation10 + $0x58] sm:$0xff] %vm4672_vm9, %v5042_v25  ;;  %v4993_v32 = vld [vmem:[#allocation4 + $0xb0] sm:$0xff] }
 0x577   : > { %7080 = vmatprep.mubr.msk.f32.mxu0 %vm4672_vm9, %v5209_v47  ;;  %v5797_v29 = vld [vmem:[#allocation20 + $0x20] sm:$0xff]  ;;  %v5796_v47 = vld [vmem:[#allocation20 + $0x18] sm:$0xff] }
 0x578   : > { %5015 = vrot.lane.b32.xlu1 %v4993_v32, %s10608_s14  ;;  %5161 = vrot.lane.b32.xlu0 %v4993_v32, %s7670_s22  ;;  %v7409_v30 = vpop.f32.mrf.mxu1 }
 0x579   : > { %v4627_v7 = vadd.f32 %v9764_v17, %v7409_v30  ;;  %5865 = vmatpush1.msra.mxu1 %v5797_v29  ;;  %v5794_v30 = vld [vmem:[#allocation20 + $0x8] sm:$0xff] }
 0x57a   : > { %v4621_v14 = vpop.f32.mrf.mxu1  ;;  %5866 = vmatprep.subr.mxu1 %v7652_v0 }
 0x57b   : > { %v4669_v31 = vmax.f32 %v4627_v7, 0.0  ;;  %v4622_v3 = vadd.f32 %v9764_v17, %v4621_v14  ;;  %5867 = vmatpush1.msra.mxu1 %v5796_v47 }
 0x57c   : > { %5064 = vrot.lane.b32.xlu1 %v5042_v25, %s7668_s30  ;;  %4870 = vrot.lane.b32.xlu0 %v4993_v32, %s7662_s21  ;;  %v5795_v32 = vld [vmem:[#allocation20 + $0x10] sm:$0xff] }
 0x57d   : > { %4702 = vst.msk [vmem:[#allocation14 + $0xe8] sm:$0xff] %vm4672_vm9, %v4669_v31  ;;  %v4668_v33 = vmax.f32 %v4622_v3, 0.0  ;;  %v5211_v23 = vld [vmem:[#allocation10 + $0x58] sm:$0xff]  ;;  %5868 = vmatprep.subr.mxu1 %v7652_v0  ;;  %v5793_v31 = vld [vmem:[#allocation20] sm:$0xff] }
 0x57e   : > { %5869 = vmatpush1.msra.mxu1 %v5795_v32  ;;  %v5810_v3 = vld [vmem:[#allocation20 + $0x88] sm:$0xff] }
 0x57f   : > { %4701 = vst.msk [vmem:[#allocation14 + $0xe0] sm:$0xff] %vm4672_vm9, %v4668_v33  ;;  %5870 = vmatprep.subr.mxu1 %v7652_v0 }
 0x580   : > { %4919 = vrot.lane.b32.xlu0 %v5042_v25, %s10604_s27  ;;  %5871 = vmatpush1.msra.mxu1 %v5794_v30 }
 0x581   : > { %5872 = vmatprep.subr.mxu1 %v7652_v0 }
 0x582   : > { %5873 = vmatpush1.msra.mxu1 %v5793_v31 }
 0x583   : > { %5902 = vmatprep.subr.mxu1 %v7652_v0 }
 0x584   : > { %5903 = vmatpush2.msra.mxu1 %v5810_v3 }
 0x585   : > { %v7412_v20 = vpop.f32.mrf.mxu1  ;;  %5904 = vmatprep.subr.mxu1 %v7652_v0 }
 0x586   : > { %v4637_v11 = vadd.f32 %v9764_v17, %v7412_v20  ;;  %v4733_v41 = vld [vmem:[#allocation14 + $0xe0] ss:$2 sm:$0xff]  ;;  %v4765_v35 = vld [vmem:[#allocation14 + $0xe1] ss:$2 sm:$0xff]  ;;  %v5809_v20 = vld [vmem:[#allocation20 + $0x80] sm:$0xff] }
 0x587   : > { %v4631_v34 = vpop.f32.mrf.mxu1  ;;  %v4782_v38 = vmax.f32 %v4733_v41, %v4765_v35  ;;  %5905 = vmatpush2.msra.mxu1 %v5809_v20 }
 0x588   : > { %v4671_v39 = vmax.f32 %v4637_v11, 0.0  ;;  %v4632_v40 = vadd.f32 %v9764_v17, %v4631_v34 }
 0x58a   : > { %4704 = vst.msk [vmem:[#allocation14 + $0xf8] sm:$0xff] %vm4672_vm9, %v4671_v39  ;;  %v4670_v5 = vmax.f32 %v4632_v40, 0.0 }
 0x58c   : > { %4703 = vst.msk [vmem:[#allocation14 + $0xf0] sm:$0xff] %vm4672_vm9, %v4670_v5 }
 0x593   : > { %v4735_v54 = vld [vmem:[#allocation14 + $0xf0] ss:$2 sm:$0xff]  ;;  %v4767_v15 = vld [vmem:[#allocation14 + $0xf1] ss:$2 sm:$0xff] }
 0x594   : > { %v4783_v22 = vmax.f32 %v4735_v54, %v4767_v15 }
 0x596   : > { %v4791_v6 = vmax.f32 %v4782_v38, %v4783_v22 }
 0x598   : > { %4823 = vst.msk [vmem:[#allocation4 + $0xc8] sm:$0xff] %vm4672_vm9, %v4791_v6 }
 0x599   : > { %v5331_v17 = vpop.f32.mrf.mxu0 }
 0x59a   : > { %v5332_v46 = vadd.f32 %v9906_v9, %v5331_v17 }
 0x59b   : > { %v5333_v24 = vpop.f32.mrf.mxu0 }
 0x59c   : > { %v5370_v57 = vmax.f32 %v5332_v46, 0.0 }
 0x59e   : > { %5400 = vst.msk [vmem:[#allocation5 + $0x20] sm:$0xff] %vm4672_vm9, %v5370_v57 }
 0x59f   : > { %v5092_v43 = vld [vmem:[#allocation4 + $0xc7] sm:$0xff] }
 0x5a0   : > { %v5043_v59 = vld [vmem:[#allocation4 + $0xc9] sm:$0xff]  ;;  %5114 = vrot.lane.b32.xlu1 %v5092_v43, %s10606_s17  ;;  %4968 = vrot.lane.b32.xlu0 %v5092_v43, %s7665_s23 }
 0x5a1   : > { %5198 = vst.msk [vmem:[#allocation10 + $0x68] sm:$0xff] %vm4672_vm9, %v5043_v59  ;;  %v5141_v49 = vld [vmem:[#allocation4 + $0xc8] sm:$0xff] }
 0x5a4   : > { %5163 = vrot.lane.b32.xlu1 %v5141_v49, %s7670_s22  ;;  %5017 = vrot.lane.b32.xlu0 %v5141_v49, %s10608_s14 }
 0x5a5   : > { %v5520_v44 = vld [vmem:[#allocation5 + $0x1f] sm:$0xff] }
 0x5a6   : > { %5417 = vst.msk [vmem:[#allocation11 + $0x10] sm:$0xff] %vm4672_vm9, %v5520_v44  ;;  %v5568_v52 = vld [vmem:[#allocation5 + $0x20] sm:$0xff] }
 0x5a7   : > { %v5616_v25 = vld [vmem:[#allocation5 + $0x21] sm:$0xff] }
 0x5a8   : > { %v5111_v50 = vpop.permute.xlu1 %5110  ;;  %v4965_v63 = vpop.permute.xlu0 %4964  ;;  %5066 = vrot.lane.b32.xlu1 %v5043_v59, %s7668_s30  ;;  %5116 = vrot.lane.b32.xlu0 %v5093_v61, %s10606_s17  ;;  %v5213_v22 = vld [vmem:[#allocation10 + $0x68] sm:$0xff] }
 0x5a9   : > { %5131 = vst.msk [vmem:[#allocation10 + $0x40] sm:$0xff] %vm5126_vm1, %v5111_v50 }
 0x5aa   : > { %4984 = vst.msk [vmem:[#allocation10 + $0x50] sm:$0xff] %vm4978_vm14, %v4965_v63 }
 0x5ac   : > { %v5160_v56 = vpop.permute.xlu1 %5159  ;;  %v5014_v4 = vpop.permute.xlu0 %5013  ;;  %5165 = vrot.lane.b32.xlu1 %v5142_v51, %s7670_s22  ;;  %5440 = vrot.lane.b32.xlu0 %v5424_v2, %s7662_s21 }
 0x5ad   : > { %5180 = vst.msk [vmem:[#allocation10 + $0x40] sm:$0xff] %vm5175_vm2, %v5160_v56 }
 0x5ae   : > { %5033 = vst.msk [vmem:[#allocation10 + $0x50] sm:$0xff] %vm5027_vm15, %v5014_v4 }
 0x5b0   : > { %v4869_v36 = vpop.permute.xlu1 %4868  ;;  %v5063_v55 = vpop.permute.xlu0 %5062  ;;  %5488 = vrot.lane.b32.xlu1 %v5472_v18, %s10604_s27  ;;  %5536 = vrot.lane.b32.xlu0 %v5520_v44, %s7665_s23 }
 0x5b1   : > { %4887 = vst.msk [vmem:[#allocation10 + $0x60] sm:$0xff] %vm4880_vm12, %v4869_v36 }
 0x5b2   : > { %5082 = vst.msk [vmem:[#allocation10 + $0x50] sm:$0xff] %vm5076_vm0, %v5063_v55 }
 0x5b4   : > { %v4918_v26 = vpop.permute.xlu1 %4917  ;;  %v5208_v53 = vld [vmem:[#allocation10 + $0x40] sm:$0xff]  ;;  %5584 = vrot.lane.b32.xlu1 %v5568_v52, %s10608_s14  ;;  %5442 = vrot.lane.b32.xlu0 %v5568_v52, %s7662_s21 }
 0x5b5   : > { %4936 = vst.msk [vmem:[#allocation10 + $0x60] sm:$0xff] %vm4929_vm13, %v4918_v26  ;;  %v5336_v19 = vpop.f32.mrf.mxu0  ;;  %5350 = vmatmul.mubr.f32.gmra.mxu0 %v5208_v53 }
 0x5b6   : > { %v5337_v8 = vadd.f32 %v9906_v9, %v5336_v19  ;;  %7081 = vmatprep.mubr.msk.f32.mxu0 %vm4672_vm9, %v5211_v23 }
 0x5b7   : > { %v5338_v1 = vpop.f32.mrf.mxu0 }
 0x5b8   : > { %v5371_v28 = vmax.f32 %v5337_v8, 0.0  ;;  %5632 = vrot.lane.b32.xlu1 %v5616_v25, %s7668_s30  ;;  %5490 = vrot.lane.b32.xlu0 %v5616_v25, %s10604_s27 }
 0x5ba   : > { %5401 = vst.msk [vmem:[#allocation5 + $0x38] sm:$0xff] %vm4672_vm9, %v5371_v28 }
 0x5c1   : > { %v5761_v7 = vld [vmem:[#allocation5 + $0x39] sm:$0xff] }
 0x5c2   : > { %v5665_v14 = vld [vmem:[#allocation5 + $0x37] sm:$0xff]  ;;  %5769 = vst.msk [vmem:[#allocation11 + $0x8] sm:$0xff] %vm4672_vm9, %v5761_v7 }
 0x5c3   : > { %5681 = vrot.lane.b32.xlu1 %v5665_v14, %s10606_s17  ;;  %5538 = vrot.lane.b32.xlu0 %v5665_v14, %s7665_s23  ;;  %5418 = vst.msk [vmem:[#allocation11 + $0x20] sm:$0xff] %vm4672_vm9, %v5665_v14  ;;  %v5713_v33 = vld [vmem:[#allocation5 + $0x38] sm:$0xff] }
 0x5c7   : > { %5729 = vrot.lane.b32.xlu1 %v5713_v33, %s7670_s22  ;;  %5586 = vrot.lane.b32.xlu0 %v5713_v33, %s10608_s14 }
 0x5c9   : > { %v5778_v11 = vld [vmem:[#allocation11 + $0x8] sm:$0xff] }
 0x5ca   : > { %7085 = vmatprep.mubr.msk.f32.mxu1 %vm4672_vm9, %v5778_v11 }
 0x5cb   : > { %5634 = vrot.lane.b32.xlu0 %v5761_v7, %s7668_s30  ;;  %5444 = vrot.lane.b32.xlu1 %v5713_v33, %s7662_s21 }
 0x5cf   : > { %5492 = vrot.lane.b32.xlu1 %v5761_v7, %s10604_s27 }
 0x5e6   : > { %v4967_v34 = vpop.permute.xlu1 %4966  ;;  %v5113_v39 = vpop.permute.xlu0 %5112 }
 0x5e7   : > { %4985 = vst.msk [vmem:[#allocation10 + $0x60] sm:$0xff] %vm4978_vm14, %v4967_v34 }
 0x5e8   : > { %5132 = vst.msk [vmem:[#allocation10 + $0x50] sm:$0xff] %vm5126_vm1, %v5113_v39 }
 0x5ea   : > { %v5016_v40 = vpop.permute.xlu1 %5015  ;;  %v5162_v5 = vpop.permute.xlu0 %5161 }
 0x5eb   : > { %5034 = vst.msk [vmem:[#allocation10 + $0x60] sm:$0xff] %vm5027_vm15, %v5016_v40 }
 0x5ec   : > { %5181 = vst.msk [vmem:[#allocation10 + $0x50] sm:$0xff] %vm5175_vm2, %v5162_v5 }
 0x5ee   : > { %v5065_v41 = vpop.permute.xlu1 %5064  ;;  %v4871_v35 = vpop.permute.xlu0 %4870 }
 0x5ef   : > { %5083 = vst.msk [vmem:[#allocation10 + $0x60] sm:$0xff] %vm5076_vm0, %v5065_v41 }
 0x5f0   : > { %4888 = vst.msk [vmem:[#allocation10 + $0x70] sm:$0xff] %vm4880_vm12, %v4871_v35 }
 0x5f2   : > { %v4920_v54 = vpop.permute.xlu0 %4919 }
 0x5f3   : > { %v5210_v15 = vld [vmem:[#allocation10 + $0x50] sm:$0xff]  ;;  %4937 = vst.msk [vmem:[#allocation10 + $0x70] sm:$0xff] %vm4929_vm13, %v4920_v54 }
 0x5f4   : > { %v5341_v38 = vpop.f32.mrf.mxu0  ;;  %5355 = vmatmul.mubr.f32.gmra.mxu0 %v5210_v15 }
 0x5f5   : > { %v5342_v6 = vadd.f32 %v9906_v9, %v5341_v38  ;;  %7082 = vmatprep.mubr.msk.f32.mxu0 %vm4672_vm9, %v5213_v22 }
 0x5f6   : > { %v5343_v17 = vpop.f32.mrf.mxu0 }
 0x5f7   : > { %v5372_v46 = vmax.f32 %v5342_v6, 0.0 }
 0x5f9   : > { %5402 = vst.msk [vmem:[#allocation5 + $0x50] sm:$0xff] %vm4672_vm9, %v5372_v46 }
 0x600   : > { %v5666_v24 = vld [vmem:[#allocation5 + $0x4f] sm:$0xff] }
 0x601   : > { %v5618_v57 = vld [vmem:[#allocation5 + $0x51] sm:$0xff]  ;;  %5683 = vrot.lane.b32.xlu0 %v5666_v24, %s10606_s17  ;;  %5540 = vrot.lane.b32.xlu1 %v5666_v24, %s7665_s23  ;;  %5419 = vst.msk [vmem:[#allocation11 + $0x30] sm:$0xff] %vm4672_vm9, %v5666_v24 }
 0x602   : > { %5770 = vst.msk [vmem:[#allocation11 + $0x18] sm:$0xff] %vm4672_vm9, %v5618_v57  ;;  %v5714_v58 = vld [vmem:[#allocation5 + $0x50] sm:$0xff] }
 0x605   : > { %5731 = vrot.lane.b32.xlu0 %v5714_v58, %s7670_s22  ;;  %5588 = vrot.lane.b32.xlu1 %v5714_v58, %s10608_s14 }
 0x609   : > { %5446 = vrot.lane.b32.xlu0 %v5714_v58, %s7662_s21  ;;  %5636 = vrot.lane.b32.xlu1 %v5618_v57, %s7668_s30  ;;  %v5780_v52 = vld [vmem:[#allocation11 + $0x18] sm:$0xff] }
 0x60d   : > { %5494 = vrot.lane.b32.xlu0 %v5618_v57, %s10604_s27 }
 0x612   : > { %v5115_v45 = vpop.permute.xlu1 %5114  ;;  %v4969_v43 = vpop.permute.xlu0 %4968 }
 0x613   : > { %5133 = vst.msk [vmem:[#allocation10 + $0x60] sm:$0xff] %vm5126_vm1, %v5115_v45 }
 0x614   : > { %4986 = vst.msk [vmem:[#allocation10 + $0x70] sm:$0xff] %vm4978_vm14, %v4969_v43 }
 0x616   : > { %v5164_v59 = vpop.permute.xlu1 %5163  ;;  %v5018_v42 = vpop.permute.xlu0 %5017 }
 0x617   : > { %5182 = vst.msk [vmem:[#allocation10 + $0x60] sm:$0xff] %vm5175_vm2, %v5164_v59 }
 0x618   : > { %5035 = vst.msk [vmem:[#allocation10 + $0x70] sm:$0xff] %vm5027_vm15, %v5018_v42 }
 0x61a   : > { %v5067_v10 = vpop.permute.xlu1 %5066  ;;  %v5117_v62 = vpop.permute.xlu0 %5116 }
 0x61b   : > { %5084 = vst.msk [vmem:[#allocation10 + $0x70] sm:$0xff] %vm5076_vm0, %v5067_v10 }
 0x61c   : > { %5134 = vst.msk [vmem:[#allocation10 + $0x70] sm:$0xff] %vm5126_vm1, %v5117_v62 }
 0x61e   : > { %v5166_v49 = vpop.permute.xlu1 %5165  ;;  %v5441_v27 = vpop.permute.xlu0 %5440  ;;  %v5212_v61 = vld [vmem:[#allocation10 + $0x60] sm:$0xff] }
 0x61f   : > { %5183 = vst.msk [vmem:[#allocation10 + $0x70] sm:$0xff] %vm5175_vm2, %v5166_v49  ;;  %5360 = vmatmul.mubr.f32.gmra.mxu0 %v5212_v61 }
 0x620   : > { %5464 = vst.msk [vmem:[#allocation11] sm:$0xff] %vm4880_vm12, %v5441_v27  ;;  %7083 = vmatprep.mubr.msk.f32.mxu0 %vm4672_vm9, %v5215_v60 }
 0x622   : > { %v5489_v44 = vpop.permute.xlu1 %5488  ;;  %v5537_v50 = vpop.permute.xlu0 %5536 }
 0x623   : > { %5512 = vst.msk [vmem:[#allocation11] sm:$0xff] %vm4929_vm13, %v5489_v44 }
 0x624   : > { %5560 = vst.msk [vmem:[#allocation11] sm:$0xff] %vm4978_vm14, %v5537_v50 }
 0x626   : > { %v5585_v63 = vpop.permute.xlu1 %5584  ;;  %v5214_v48 = vld [vmem:[#allocation10 + $0x70] sm:$0xff]  ;;  %v5443_v51 = vpop.permute.xlu0 %5442 }
 0x627   : > { %5608 = vst.msk [vmem:[#allocation11] sm:$0xff] %vm5027_vm15, %v5585_v63  ;;  %5365 = vmatmul.mubr.f32.gmra.mxu0 %v5214_v48 }
 0x628   : > { %5465 = vst.msk [vmem:[#allocation11 + $0x10] sm:$0xff] %vm4880_vm12, %v5443_v51 }
 0x62a   : > { %v5633_v2 = vpop.permute.xlu1 %5632  ;;  %v5491_v56 = vpop.permute.xlu0 %5490 }
 0x62b   : > { %5656 = vst.msk [vmem:[#allocation11] sm:$0xff] %vm5076_vm0, %v5633_v2 }
 0x62c   : > { %5513 = vst.msk [vmem:[#allocation11 + $0x10] sm:$0xff] %vm4929_vm13, %v5491_v56 }
 0x635   : > { %v5682_v4 = vpop.permute.xlu1 %5681  ;;  %v5539_v12 = vpop.permute.xlu0 %5538 }
 0x636   : > { %5705 = vst.msk [vmem:[#allocation11] sm:$0xff] %vm5126_vm1, %v5682_v4  ;;  %v5346_v13 = vpop.f32.mrf.mxu0 }
 0x637   : > { %5561 = vst.msk [vmem:[#allocation11 + $0x10] sm:$0xff] %vm4978_vm14, %v5539_v12  ;;  %v5347_v18 = vadd.f32 %v9906_v9, %v5346_v13  ;;  %v5768_v12 = vld [vmem:[#allocation5 + $0xe1] sm:$0xff] }
 0x638   : > { %v5348_v36 = vpop.f32.mrf.mxu0  ;;  %5776 = vst.msk [vmem:[#allocation11 + $0x78] sm:$0xff] %vm4672_vm9, %v5768_v12 }
 0x639   : > { %v5373_v55 = vmax.f32 %v5347_v18, 0.0  ;;  %v5730_v16 = vpop.permute.xlu1 %5729  ;;  %v5587_v26 = vpop.permute.xlu0 %5586 }
 0x63a   : > { %5753 = vst.msk [vmem:[#allocation11] sm:$0xff] %vm5175_vm2, %v5730_v16 }
 0x63b   : > { %5609 = vst.msk [vmem:[#allocation11 + $0x10] sm:$0xff] %vm5027_vm15, %v5587_v26 }
 0x63c   : > { %5403 = vst.msk [vmem:[#allocation5 + $0x68] sm:$0xff] %vm4672_vm9, %v5373_v55  ;;  %v10112_v55 = vld [vmem:[%s10584_s8] ss:$0 sm:$0xff] }
 0x63d   : > { %v5635_v53 = vpop.permute.xlu0 %5634  ;;  %v5445_v21 = vpop.permute.xlu1 %5444 }
 0x63e   : > { %5657 = vst.msk [vmem:[#allocation11 + $0x10] sm:$0xff] %vm5076_vm0, %v5635_v53 }
 0x63f   : > { %5466 = vst.msk [vmem:[#allocation11 + $0x20] sm:$0xff] %vm4880_vm12, %v5445_v21 }
 0x641   : > { %v5777_v19 = vld [vmem:[#allocation11] sm:$0xff]  ;;  %v5493_v23 = vpop.permute.xlu1 %5492 }
 0x642   : > { %5907 = vmatmul.mubr.f32.vlgmr.msra.gmra.mxu1 %v5777_v19  ;;  %5514 = vst.msk [vmem:[#allocation11 + $0x20] sm:$0xff] %vm4929_vm13, %v5493_v23 }
 0x643   : > { %v5523_v8 = vld [vmem:[#allocation5 + $0x67] sm:$0xff]  ;;  %7086 = vmatprep.mubr.msk.f32.mxu1 %vm4672_vm9, %v5780_v52  ;;  %v5672_v52 = vld [vmem:[#allocation5 + $0xdf] sm:$0xff] }
 0x644   : > { %v5619_v37 = vld [vmem:[#allocation5 + $0x69] sm:$0xff]  ;;  %5542 = vrot.lane.b32.xlu0 %v5523_v8, %s7665_s23  ;;  %5420 = vst.msk [vmem:[#allocation11 + $0x40] sm:$0xff] %vm4672_vm9, %v5523_v8  ;;  %5685 = vrot.lane.b32.xlu1 %v5523_v8, %s10606_s17 }
 0x645   : > { %5771 = vst.msk [vmem:[#allocation11 + $0x28] sm:$0xff] %vm4672_vm9, %v5619_v37  ;;  %v5571_v1 = vld [vmem:[#allocation5 + $0x68] sm:$0xff] }
 0x648   : > { %5590 = vrot.lane.b32.xlu0 %v5571_v1, %s10608_s14  ;;  %5733 = vrot.lane.b32.xlu1 %v5571_v1, %s7670_s22 }
 0x64c   : > { %5638 = vrot.lane.b32.xlu0 %v5619_v37, %s7668_s30  ;;  %5448 = vrot.lane.b32.xlu1 %v5571_v1, %s7662_s21  ;;  %v5782_v34 = vld [vmem:[#allocation11 + $0x28] sm:$0xff]  ;;  %v6148_v1 = vld [vmem:[#allocation6 + $0x7f] sm:$0xff] }
 0x650   : > { %5496 = vrot.lane.b32.xlu1 %v5619_v37, %s10604_s27  ;;  %v5720_v37 = vld [vmem:[#allocation5 + $0xe0] sm:$0xff] }
 0x673   : > { %v5684_v28 = vpop.permute.xlu0 %5683  ;;  %v5541_v29 = vpop.permute.xlu1 %5540 }
 0x674   : > { %5706 = vst.msk [vmem:[#allocation11 + $0x10] sm:$0xff] %vm5126_vm1, %v5684_v28  ;;  %v6037_v28 = vld [vmem:[#allocation6 + $0x8] sm:$0xff] }
 0x675   : > { %5562 = vst.msk [vmem:[#allocation11 + $0x20] sm:$0xff] %vm4978_vm14, %v5541_v29  ;;  %v5351_v25 = vpop.f32.mrf.mxu0  ;;  %v6062_v29 = vld [vmem:[#allocation6 + $0x9] sm:$0xff] }
 0x676   : > { %v5352_v47 = vadd.f32 %v9906_v9, %v5351_v25 }
 0x677   : > { %v5353_v32 = vpop.f32.mrf.mxu0  ;;  %v5732_v7 = vpop.permute.xlu0 %5731 }
 0x678   : > { %v5374_v30 = vmax.f32 %v5352_v47, 0.0  ;;  %v5589_v14 = vpop.permute.xlu1 %5588  ;;  %5754 = vst.msk [vmem:[#allocation11 + $0x10] sm:$0xff] %vm5175_vm2, %v5732_v7 }
 0x679   : > { %5610 = vst.msk [vmem:[#allocation11 + $0x20] sm:$0xff] %vm5027_vm15, %v5589_v14 }
 0x67a   : > { %5404 = vst.msk [vmem:[#allocation5 + $0x80] sm:$0xff] %vm4672_vm9, %v5374_v30 }
 0x67b   : > { %v5447_v31 = vpop.permute.xlu0 %5446 }
 0x67c   : > { %v5637_v3 = vpop.permute.xlu1 %5636  ;;  %5467 = vst.msk [vmem:[#allocation11 + $0x30] sm:$0xff] %vm4880_vm12, %v5447_v31 }
 0x67d   : > { %5658 = vst.msk [vmem:[#allocation11 + $0x20] sm:$0xff] %vm5076_vm0, %v5637_v3 }
 0x67f   : > { %v5495_v33 = vpop.permute.xlu0 %5494  ;;  %v5779_v20 = vld [vmem:[#allocation11 + $0x10] sm:$0xff] }
 0x680   : > { %5515 = vst.msk [vmem:[#allocation11 + $0x30] sm:$0xff] %vm4929_vm13, %v5495_v33  ;;  %5912 = vmatmul.mubr.f32.gmra.mxu1 %v5779_v20 }
 0x681   : > { %v5668_v11 = vld [vmem:[#allocation5 + $0x7f] sm:$0xff]  ;;  %7087 = vmatprep.mubr.msk.f32.mxu1 %vm4672_vm9, %v5782_v34 }
 0x682   : > { %v5620_v39 = vld [vmem:[#allocation5 + $0x81] sm:$0xff]  ;;  %5687 = vrot.lane.b32.xlu0 %v5668_v11, %s10606_s17  ;;  %5421 = vst.msk [vmem:[#allocation11 + $0x50] sm:$0xff] %vm4672_vm9, %v5668_v11  ;;  %5544 = vrot.lane.b32.xlu1 %v5668_v11, %s7665_s23 }
 0x683   : > { %5772 = vst.msk [vmem:[#allocation11 + $0x38] sm:$0xff] %vm4672_vm9, %v5620_v39  ;;  %v5716_v40 = vld [vmem:[#allocation5 + $0x80] sm:$0xff] }
 0x686   : > { %5735 = vrot.lane.b32.xlu0 %v5716_v40, %s7670_s22  ;;  %5592 = vrot.lane.b32.xlu1 %v5716_v40, %s10608_s14 }
 0x68a   : > { %5450 = vrot.lane.b32.xlu0 %v5716_v40, %s7662_s21  ;;  %5640 = vrot.lane.b32.xlu1 %v5620_v39, %s7668_s30  ;;  %v5784_v45 = vld [vmem:[#allocation11 + $0x38] sm:$0xff]  ;;  %v6029_v40 = vld [vmem:[#allocation6 + $0x7] sm:$0xff] }
 0x68b   : > { %6033 = vst.msk [vmem:[#allocation12] sm:$0xff] %vm5955_vm3, %v6029_v40  ;;  %v6235_v40 = vld [vmem:[%s10585_s9 + $0xb0] sm:$0xff] }
 0x68e   : > { %5498 = vrot.lane.b32.xlu0 %v5620_v39, %s10604_s27 }
 0x6b4   : > { %v5356_v35 = vpop.f32.mrf.mxu0 }
 0x6b5   : > { %v5357_v54 = vadd.f32 %v9906_v9, %v5356_v35 }
 0x6b6   : > { %v5543_v5 = vpop.permute.xlu0 %5542  ;;  %v5686_v41 = vpop.permute.xlu1 %5685 }
 0x6b7   : > { %5563 = vst.msk [vmem:[#allocation11 + $0x30] sm:$0xff] %vm4978_vm14, %v5543_v5  ;;  %v5358_v15 = vpop.f32.mrf.mxu0  ;;  %v5375_v38 = vmax.f32 %v5357_v54, 0.0 }
 0x6b8   : > { %5707 = vst.msk [vmem:[#allocation11 + $0x20] sm:$0xff] %vm5126_vm1, %v5686_v41 }
 0x6b9   : > { %5405 = vst.msk [vmem:[#allocation5 + $0x98] sm:$0xff] %vm4672_vm9, %v5375_v38 }
 0x6ba   : > { %v5591_v22 = vpop.permute.xlu0 %5590  ;;  %v5734_v6 = vpop.permute.xlu1 %5733 }
 0x6bb   : > { %5611 = vst.msk [vmem:[#allocation11 + $0x30] sm:$0xff] %vm5027_vm15, %v5591_v22 }
 0x6bc   : > { %5755 = vst.msk [vmem:[#allocation11 + $0x20] sm:$0xff] %vm5175_vm2, %v5734_v6 }
 0x6be   : > { %v5639_v17 = vpop.permute.xlu0 %5638  ;;  %v5449_v46 = vpop.permute.xlu1 %5448 }
 0x6bf   : > { %5659 = vst.msk [vmem:[#allocation11 + $0x30] sm:$0xff] %vm5076_vm0, %v5639_v17 }
 0x6c0   : > { %5468 = vst.msk [vmem:[#allocation11 + $0x40] sm:$0xff] %vm4880_vm12, %v5449_v46  ;;  %v5525_v58 = vld [vmem:[#allocation5 + $0x97] sm:$0xff] }
 0x6c1   : > { %5546 = vrot.lane.b32.xlu0 %v5525_v58, %s7665_s23  ;;  %v5621_v43 = vld [vmem:[#allocation5 + $0x99] sm:$0xff]  ;;  %5422 = vst.msk [vmem:[#allocation11 + $0x60] sm:$0xff] %vm4672_vm9, %v5525_v58  ;;  %5689 = vrot.lane.b32.xlu1 %v5525_v58, %s10606_s17 }
 0x6c2   : > { %v5497_v24 = vpop.permute.xlu1 %5496  ;;  %5773 = vst.msk [vmem:[#allocation11 + $0x48] sm:$0xff] %vm4672_vm9, %v5621_v43  ;;  %v5573_v59 = vld [vmem:[#allocation5 + $0x98] sm:$0xff] }
 0x6c3   : > { %v5781_v57 = vld [vmem:[#allocation11 + $0x20] sm:$0xff]  ;;  %5516 = vst.msk [vmem:[#allocation11 + $0x40] sm:$0xff] %vm4929_vm13, %v5497_v24 }
 0x6c4   : > { %5917 = vmatmul.mubr.f32.gmra.mxu1 %v5781_v57 }
 0x6c5   : > { %7088 = vmatprep.mubr.msk.f32.mxu1 %vm4672_vm9, %v5784_v45  ;;  %5594 = vrot.lane.b32.xlu0 %v5573_v59, %s10608_s14 }
 0x6c6   : > { %5737 = vrot.lane.b32.xlu1 %v5573_v59, %s7670_s22 }
 0x6c9   : > { %5642 = vrot.lane.b32.xlu0 %v5621_v43, %s7668_s30  ;;  %v5786_v21 = vld [vmem:[#allocation11 + $0x48] sm:$0xff] }
 0x6ca   : > { %5452 = vrot.lane.b32.xlu1 %v5573_v59, %s7662_s21 }
 0x6ce   : > { %5500 = vrot.lane.b32.xlu1 %v5621_v43, %s10604_s27 }
 0x6df   : > { %v5361_v42 = vpop.f32.mrf.mxu0 }
 0x6e0   : > { %v5362_v10 = vadd.f32 %v9906_v9, %v5361_v42 }
 0x6e1   : > { %v5363_v62 = vpop.f32.mrf.mxu0 }
 0x6e2   : > { %v5376_v60 = vmax.f32 %v5362_v10, 0.0 }
 0x6e4   : > { %5406 = vst.msk [vmem:[#allocation5 + $0xb0] sm:$0xff] %vm4672_vm9, %v5376_v60 }
 0x6e7   : > { %v5366_v49 = vpop.f32.mrf.mxu0 }
 0x6e8   : > { %v5367_v27 = vadd.f32 %v9906_v9, %v5366_v49 }
 0x6e9   : > { %v5368_v61 = vpop.f32.mrf.mxu0 }
 0x6ea   : > { %v5377_v44 = vmax.f32 %v5367_v27, 0.0 }
 0x6eb   : > { %v5670_v50 = vld [vmem:[#allocation5 + $0xaf] sm:$0xff] }
 0x6ec   : > { %v5622_v63 = vld [vmem:[#allocation5 + $0xb1] sm:$0xff]  ;;  %5407 = vst.msk [vmem:[#allocation5 + $0xc8] sm:$0xff] %vm4672_vm9, %v5377_v44  ;;  %5691 = vrot.lane.b32.xlu0 %v5670_v50, %s10606_s17  ;;  %5548 = vrot.lane.b32.xlu1 %v5670_v50, %s7665_s23  ;;  %5423 = vst.msk [vmem:[#allocation11 + $0x70] sm:$0xff] %vm4672_vm9, %v5670_v50  ;;  %v5792_v50 = vld [vmem:[#allocation11 + $0x78] sm:$0xff] }
 0x6ed   : > { %5774 = vst.msk [vmem:[#allocation11 + $0x58] sm:$0xff] %vm4672_vm9, %v5622_v63  ;;  %v5718_v0 = vld [vmem:[#allocation5 + $0xb0] sm:$0xff] }
 0x6f0   : > { %5739 = vrot.lane.b32.xlu0 %v5718_v0, %s7670_s22  ;;  %5596 = vrot.lane.b32.xlu1 %v5718_v0, %s10608_s14 }
 0x6f3   : > { %v5623_v51 = vld [vmem:[#allocation5 + $0xc9] sm:$0xff] }
 0x6f4   : > { %v5688_v9 = vpop.permute.xlu0 %5687  ;;  %v5545_v48 = vpop.permute.xlu1 %5544  ;;  %5454 = vrot.lane.b32.xlu0 %v5718_v0, %s7662_s21  ;;  %5644 = vrot.lane.b32.xlu1 %v5622_v63, %s7668_s30  ;;  %5775 = vst.msk [vmem:[#allocation11 + $0x68] sm:$0xff] %vm4672_vm9, %v5623_v51  ;;  %v5671_v2 = vld [vmem:[#allocation5 + $0xc7] sm:$0xff] }
 0x6f5   : > { %5708 = vst.msk [vmem:[#allocation11 + $0x30] sm:$0xff] %vm5126_vm1, %v5688_v9  ;;  %v5719_v36 = vld [vmem:[#allocation5 + $0xc8] sm:$0xff] }
 0x6f6   : > { %5564 = vst.msk [vmem:[#allocation11 + $0x40] sm:$0xff] %vm4978_vm14, %v5545_v48  ;;  %v5788_v11 = vld [vmem:[#allocation11 + $0x58] sm:$0xff] }
 0x6f8   : > { %v5736_v56 = vpop.permute.xlu0 %5735  ;;  %v5593_v4 = vpop.permute.xlu1 %5592  ;;  %5502 = vrot.lane.b32.xlu0 %v5622_v63, %s10604_s27  ;;  %5693 = vrot.lane.b32.xlu1 %v5671_v2, %s10606_s17 }
 0x6f9   : > { %5756 = vst.msk [vmem:[#allocation11 + $0x30] sm:$0xff] %vm5175_vm2, %v5736_v56 }
 0x6fa   : > { %5612 = vst.msk [vmem:[#allocation11 + $0x40] sm:$0xff] %vm5027_vm15, %v5593_v4 }
 0x6fb   : > { %v5790_v60 = vld [vmem:[#allocation11 + $0x68] sm:$0xff] }
 0x6fc   : > { %v5451_v13 = vpop.permute.xlu0 %5450  ;;  %v5641_v18 = vpop.permute.xlu1 %5640  ;;  %5550 = vrot.lane.b32.xlu0 %v5671_v2, %s7665_s23  ;;  %5741 = vrot.lane.b32.xlu1 %v5719_v36, %s7670_s22  ;;  %s10630_s23 = smov 64  }
 0x6fd   : > { %5469 = vst.msk [vmem:[#allocation11 + $0x50] sm:$0xff] %vm4880_vm12, %v5451_v13 }
 0x6fe   : > { %5660 = vst.msk [vmem:[#allocation11 + $0x40] sm:$0xff] %vm5076_vm0, %v5641_v18  ;;  %v6244_v18 = vld [vmem:[%s10585_s9 + $0xf8] sm:$0xff] }
 0x6ff   : > { %7187 = vmatprep.subr.mxu1 %v6244_v18 }
 0x700   : > { %v5499_v16 = vpop.permute.xlu0 %5498  ;;  %v5783_v26 = vld [vmem:[#allocation11 + $0x30] sm:$0xff]  ;;  %5598 = vrot.lane.b32.xlu0 %v5719_v36, %s10608_s14  ;;  %5646 = vrot.lane.b32.xlu1 %v5623_v51, %s7668_s30  ;;  %v6228_v36 = vld [vmem:[%s10585_s9 + $0x78] sm:$0xff] }
 0x701   : > { %5517 = vst.msk [vmem:[#allocation11 + $0x50] sm:$0xff] %vm4929_vm13, %v5499_v16  ;;  %5922 = vmatmul.mubr.f32.gmra.mxu1 %v5783_v26  ;;  %v6243_v16 = vld [vmem:[%s10585_s9 + $0xf0] sm:$0xff] }
 0x702   : > { %v5908_v53 = vpop.f32.mrf.mxu1  ;;  %7089 = vmatprep.mubr.msk.f32.mxu1 %vm4672_vm9, %v5786_v21  ;;  %7188 = vmatpush3.msra.mxu1 %v6228_v36  ;;  %v6227_v26 = vld [vmem:[%s10585_s9 + $0x70] sm:$0xff]  ;;  %v6226_v21 = vld [vmem:[%s10585_s9 + $0x68] sm:$0xff] }
 0x703   : > { %v5909_v19 = vadd.f32 %v10112_v55, %v5908_v53  ;;  %7189 = vmatprep.subr.mxu1 %v6243_v16  ;;  %v6242_v53 = vld [vmem:[%s10585_s9 + $0xe8] sm:$0xff] }
 0x704   : > { %v5910_v23 = vpop.f32.mrf.mxu1  ;;  %5695 = vrot.lane.b32.xlu0 %v5672_v52, %s10606_s17  ;;  %5743 = vrot.lane.b32.xlu1 %v5720_v37, %s7670_s22  ;;  %v6225_v52 = vld [vmem:[%s10585_s9 + $0x60] sm:$0xff]  ;;  %v6240_v37 = vld [vmem:[%s10585_s9 + $0xd8] sm:$0xff]  ;;  %s7671_s22 = smov [#allocation22]  }
 0x705   : > { %v5947_v8 = vmax.f32 %v5909_v19, 0.0  ;;  %7190 = vmatpush3.msra.mxu1 %v6227_v26  ;;  %v6241_v19 = vld [vmem:[%s10585_s9 + $0xe0] sm:$0xff]  ;;  %s7582_s15 = sshll.u32 %s7671_s22, 4  ;;  %s7583_s15 = int_to_ptr.vmem [resolvable:$false] %s7582_s15 }
 0x706   : > { %7191 = vmatprep.subr.mxu1 %v6242_v53 }
 0x707   : > { %5956 = vst.msk [vmem:[#allocation15] sm:$0xff] %vm5955_vm3, %v5947_v8  ;;  %7192 = vmatpush3.msra.mxu1 %v6226_v21 }
 0x708   : > { %6159 = vrot.lane.b32.xlu0 %v6148_v1, %s10608_s14  ;;  %6045 = vrot.lane.b32.xlu1 %v6037_v28, %s10604_s27  ;;  %v6224_v28 = vld [vmem:[%s10585_s9 + $0x58] sm:$0xff] }
 0x709   : > { %7193 = vmatprep.subr.mxu1 %v6241_v19 }
 0x70a   : > { %7194 = vmatpush3.msra.mxu1 %v6225_v52 }
 0x70b   : > { %7195 = vmatprep.subr.mxu1 %v6240_v37 }
 0x70c   : > { %6070 = vrot.lane.b32.xlu1 %v6062_v29, %s10608_s14  ;;  %7196 = vmatpush3.msra.mxu1 %v6224_v28 }
 0x70e   : > { %v5964_v5 = vld [vmem:[#allocation15] ss:$2 sm:$0xf]  ;;  %v5980_v41 = vld [vmem:[#allocation15 + $0x1] ss:$2 sm:$0xf] }
 0x70f   : > { %v5995_v15 = vmax.f32 %v5964_v5, %v5980_v41 }
 0x733   : > { %v5547_v25 = vpop.permute.xlu0 %5546  ;;  %v5690_v47 = vpop.permute.xlu1 %5689 }
 0x734   : > { %5565 = vst.msk [vmem:[#allocation11 + $0x50] sm:$0xff] %vm4978_vm14, %v5547_v25  ;;  %v6239_v25 = vld [vmem:[%s10585_s9 + $0xd0] sm:$0xff] }
 0x735   : > { %5709 = vst.msk [vmem:[#allocation11 + $0x40] sm:$0xff] %vm5126_vm1, %v5690_v47  ;;  %7197 = vmatprep.subr.mxu1 %v6239_v25  ;;  %v6223_v47 = vld [vmem:[%s10585_s9 + $0x50] sm:$0xff] }
 0x736   : > { %7198 = vmatpush3.msra.mxu1 %v6223_v47 }
 0x737   : > { %v5595_v32 = vpop.permute.xlu0 %5594 }
 0x738   : > { %5613 = vst.msk [vmem:[#allocation11 + $0x50] sm:$0xff] %vm5027_vm15, %v5595_v32  ;;  %v5738_v30 = vpop.permute.xlu1 %5737 }
 0x739   : > { %5757 = vst.msk [vmem:[#allocation11 + $0x40] sm:$0xff] %vm5175_vm2, %v5738_v30  ;;  %v6238_v30 = vld [vmem:[%s10585_s9 + $0xc8] sm:$0xff] }
 0x73a   : > { %7199 = vmatprep.subr.mxu1 %v6238_v30 }
 0x73b   : > { %v5643_v7 = vpop.permute.xlu0 %5642 }
 0x73c   : > { %5661 = vst.msk [vmem:[#allocation11 + $0x50] sm:$0xff] %vm5076_vm0, %v5643_v7  ;;  %v5453_v14 = vpop.permute.xlu1 %5452  ;;  %v6222_v7 = vld [vmem:[%s10585_s9 + $0x48] sm:$0xff] }
 0x73d   : > { %5470 = vst.msk [vmem:[#allocation11 + $0x60] sm:$0xff] %vm4880_vm12, %v5453_v14  ;;  %7200 = vmatpush3.msra.mxu1 %v6222_v7  ;;  %v6237_v14 = vld [vmem:[%s10585_s9 + $0xc0] sm:$0xff] }
 0x73e   : > { %7201 = vmatprep.subr.mxu1 %v6237_v14 }
 0x740   : > { %v5501_v31 = vpop.permute.xlu1 %5500  ;;  %v5913_v3 = vpop.f32.mrf.mxu1  ;;  %v5785_v33 = vld [vmem:[#allocation11 + $0x40] sm:$0xff] }
 0x741   : > { %5518 = vst.msk [vmem:[#allocation11 + $0x60] sm:$0xff] %vm4929_vm13, %v5501_v31  ;;  %v5914_v20 = vadd.f32 %v10112_v55, %v5913_v3  ;;  %5927 = vmatmul.mubr.f32.gmra.mxu1 %v5785_v33  ;;  %v6221_v31 = vld [vmem:[%s10585_s9 + $0x40] sm:$0xff]  ;;  %v6236_v33 = vld [vmem:[%s10585_s9 + $0xb8] sm:$0xff] }
 0x742   : > { %7090 = vmatprep.mubr.msk.f32.mxu1 %vm4672_vm9, %v5788_v11  ;;  %v5915_v34 = vpop.f32.mrf.mxu1  ;;  %7202 = vmatpush3.msra.mxu1 %v6221_v31  ;;  %v6220_v11 = vld [vmem:[%s10585_s9 + $0x38] sm:$0xff] }
 0x743   : > { %v5948_v39 = vmax.f32 %v5914_v20, 0.0  ;;  %7203 = vmatprep.subr.mxu1 %v6236_v33 }
 0x744   : > { %7204 = vmatpush3.msra.mxu1 %v6220_v11 }
 0x745   : > { %5957 = vst.msk [vmem:[#allocation15 + $0x8] sm:$0xff] %vm5955_vm3, %v5948_v39  ;;  %7205 = vmatprep.subr.mxu1 %v6235_v40 }
 0x74c   : > { %v5966_v35 = vld [vmem:[#allocation15 + $0x8] ss:$2 sm:$0xf]  ;;  %v5982_v54 = vld [vmem:[#allocation15 + $0x9] ss:$2 sm:$0xf] }
 0x74d   : > { %v5996_v38 = vmax.f32 %v5966_v35, %v5982_v54 }
 0x74f   : > { %v6003_v22 = vmax.f32 %v5995_v15, %v5996_v38  ;;  %v6219_v15 = vld [vmem:[%s10585_s9 + $0x30] sm:$0xff]  ;;  %v6234_v38 = vld [vmem:[%s10585_s9 + $0xa8] sm:$0xff] }
 0x750   : > { %7206 = vmatpush3.msra.mxu1 %v6219_v15 }
 0x751   : > { %6025 = vst.msk [vmem:[#allocation6 + $0x20] sm:$0xf] %vm6024_vm7, %v6003_v22  ;;  %v6218_v22 = vld [vmem:[%s10585_s9 + $0x28] sm:$0xff]  ;;  %7207 = vmatprep.subr.mxu1 %v6234_v38  ;;  %v6247_v38 = vld [vmem:[%s10585_s9 + $0x110] sm:$0xff] }
 0x752   : > { %7208 = vmatpush3.msra.mxu1 %v6218_v22  ;;  %v6246_v22 = vld [vmem:[%s10585_s9 + $0x108] sm:$0xff] }
 0x758   : > { %v6120_v6 = vld [vmem:[#allocation6 + $0x21] sm:$0xff] }
 0x759   : > { %v6087_v17 = vld [vmem:[#allocation6 + $0x1f] sm:$0xff]  ;;  %6128 = vrot.lane.b32.xlu0 %v6120_v6, %s10604_s27 }
 0x75a   : > { %v6038_v46 = vld [vmem:[#allocation6 + $0x20] sm:$0xff]  ;;  %6095 = vrot.lane.b32.xlu1 %v6087_v17, %s10606_s17  ;;  %6034 = vst.msk [vmem:[#allocation12 + $0x18] sm:$0xff] %vm5955_vm3, %v6087_v17 }
 0x75b   : > { %6116 = vst.msk [vmem:[#allocation12 + $0x8] sm:$0xff] %vm5955_vm3, %v6038_v46 }
 0x75e   : > { %6047 = vrot.lane.b32.xlu1 %v6038_v46, %s10604_s27  ;;  %v5692_v24 = vpop.permute.xlu0 %5691  ;;  %v5549_v57 = vpop.permute.xlu1 %5548  ;;  %v6233_v46 = vld [vmem:[%s10585_s9 + $0xa0] sm:$0xff]  ;;  %s7109_s27 = sshll.u32 %s7764_s29, 6  ;;  %s10534_s29 = scalar_lea.sflag [#allocation19], %s461_s0 }
 0x75f   : > { %5710 = vst.msk [vmem:[#allocation11 + $0x50] sm:$0xff] %vm5126_vm1, %v5692_v24  ;;  %v6217_v24 = vld [vmem:[%s10585_s9 + $0x20] sm:$0xff]  ;;  %7209 = vmatprep.subr.mxu1 %v6233_v46  ;;  %s10530_s24 = scalar_lea.hbm %s10589_s13, %s7109_s27 }
 0x760   : > { %5566 = vst.msk [vmem:[#allocation11 + $0x60] sm:$0xff] %vm4978_vm14, %v5549_v57  ;;  %v6232_v57 = vld [vmem:[%s10585_s9 + $0x98] sm:$0xff]  ;;  %7210 = vmatpush3.msra.mxu1 %v6217_v24  ;;  %v6172_v46 = vld [vmem:[#allocation6 + $0x80] sm:$0xff] }
 0x761   : > { %7211 = vmatprep.subr.mxu1 %v6232_v57 }
 0x762   : > { %6072 = vrot.lane.b32.xlu1 %v6120_v6, %s10608_s14  ;;  %v5740_v58 = vpop.permute.xlu0 %5739  ;;  %v5597_v45 = vpop.permute.xlu1 %5596 }
 0x763   : > { %5758 = vst.msk [vmem:[#allocation11 + $0x50] sm:$0xff] %vm5175_vm2, %v5740_v58  ;;  %v6216_v58 = vld [vmem:[%s10585_s9 + $0x18] sm:$0xff] }
 0x764   : > { %5614 = vst.msk [vmem:[#allocation11 + $0x60] sm:$0xff] %vm5027_vm15, %v5597_v45  ;;  %v6231_v45 = vld [vmem:[%s10585_s9 + $0x90] sm:$0xff]  ;;  %7212 = vmatpush3.msra.mxu1 %v6216_v58 }
 0x765   : > { %7213 = vmatprep.subr.mxu1 %v6231_v45 }
 0x766   : > { %v5455_v43 = vpop.permute.xlu0 %5454  ;;  %v5645_v59 = vpop.permute.xlu1 %5644 }
 0x767   : > { %5471 = vst.msk [vmem:[#allocation11 + $0x70] sm:$0xff] %vm4880_vm12, %v5455_v43  ;;  %vm6896_vm12 = vcmask 517120  }
 0x768   : > { %5662 = vst.msk [vmem:[#allocation11 + $0x60] sm:$0xff] %vm5076_vm0, %v5645_v59  ;;  %v6215_v59 = vld [vmem:[%s10585_s9 + $0x10] sm:$0xff] }
 0x769   : > { %7214 = vmatpush3.msra.mxu1 %v6215_v59 }
 0x76a   : > { %v5503_v42 = vpop.permute.xlu0 %5502  ;;  %v5694_v10 = vpop.permute.xlu1 %5693  ;;  %v5787_v62 = vld [vmem:[#allocation11 + $0x50] sm:$0xff] }
 0x76b   : > { %5519 = vst.msk [vmem:[#allocation11 + $0x70] sm:$0xff] %vm4929_vm13, %v5503_v42  ;;  %5932 = vmatmul.mubr.f32.gmra.mxu1 %v5787_v62  ;;  %v6230_v42 = vld [vmem:[%s10585_s9 + $0x88] sm:$0xff]  ;;  %v6229_v62 = vld [vmem:[%s10585_s9 + $0x80] sm:$0xff] }
 0x76c   : > { %5711 = vst.msk [vmem:[#allocation11 + $0x60] sm:$0xff] %vm5126_vm1, %v5694_v10  ;;  %7091 = vmatprep.mubr.msk.f32.mxu1 %vm4672_vm9, %v5790_v60  ;;  %v6214_v10 = vld [vmem:[%s10585_s9 + $0x8] sm:$0xff]  ;;  %7215 = vmatprep.subr.mxu1 %v6230_v42  ;;  %v6213_v60 = vld [vmem:[%s10585_s9] sm:$0xff] }
 0x76d   : > { %7216 = vmatpush3.msra.mxu1 %v6214_v10 }
 0x76e   : > { %v5551_v49 = vpop.permute.xlu0 %5550  ;;  %v5742_v27 = vpop.permute.xlu1 %5741  ;;  %7217 = vmatprep.subr.mxu1 %v6229_v62 }
 0x76f   : > { %5567 = vst.msk [vmem:[#allocation11 + $0x70] sm:$0xff] %vm4978_vm14, %v5551_v49  ;;  %7218 = vmatpush3.msra.mxu1 %v6213_v60 }
 0x770   : > { %5759 = vst.msk [vmem:[#allocation11 + $0x60] sm:$0xff] %vm5175_vm2, %v5742_v27 }
 0x772   : > { %v5599_v61 = vpop.permute.xlu0 %5598  ;;  %v5647_v44 = vpop.permute.xlu1 %5646 }
 0x773   : > { %5615 = vst.msk [vmem:[#allocation11 + $0x70] sm:$0xff] %vm5027_vm15, %v5599_v61 }
 0x774   : > { %5663 = vst.msk [vmem:[#allocation11 + $0x70] sm:$0xff] %vm5076_vm0, %v5647_v44 }
 0x776   : > { %v5696_v63 = vpop.permute.xlu0 %5695  ;;  %v5744_v9 = vpop.permute.xlu1 %5743 }
 0x777   : > { %v5789_v0 = vld [vmem:[#allocation11 + $0x60] sm:$0xff]  ;;  %5712 = vst.msk [vmem:[#allocation11 + $0x70] sm:$0xff] %vm5126_vm1, %v5696_v63 }
 0x778   : > { %5937 = vmatmul.mubr.f32.gmra.mxu1 %v5789_v0  ;;  %5760 = vst.msk [vmem:[#allocation11 + $0x70] sm:$0xff] %vm5175_vm2, %v5744_v9 }
 0x779   : > { %7092 = vmatprep.mubr.msk.f32.mxu1 %vm4672_vm9, %v5792_v50  ;;  %vm6107_vm9 = vcmask 1048320  }
 0x77a   : > { %v6046_v48 = vpop.permute.xlu1 %6045  ;;  %v10201_v32 = vpop.permute.xlu0 %6159 }
 0x77b   : > { %6058 = vst.msk [vmem:[#allocation12] sm:$0xff] %vm6057_vm8, %v6046_v48 }
 0x77e   : > { %v6071_v2 = vpop.permute.xlu1 %6070 }
 0x77f   : > { %v5791_v51 = vld [vmem:[#allocation11 + $0x70] sm:$0xff]  ;;  %6083 = vst.msk [vmem:[#allocation12] sm:$0xff] %vm6082_vm10, %v6071_v2 }
 0x780   : > { %5942 = vmatmul.mubr.f32.gmra.mxu1 %v5791_v51 }
 0x784   : > { %v5918_v56 = vpop.f32.mrf.mxu1 }
 0x785   : > { %v5919_v4 = vadd.f32 %v10112_v55, %v5918_v56 }
 0x786   : > { %v5920_v12 = vpop.f32.mrf.mxu1 }
 0x787   : > { %v5949_v13 = vmax.f32 %v5919_v4, 0.0 }
 0x789   : > { %5958 = vst.msk [vmem:[#allocation15 + $0x10] sm:$0xff] %vm5955_vm3, %v5949_v13 }
 0x790   : > { %v5968_v3 = vld [vmem:[#allocation15 + $0x10] ss:$2 sm:$0xf]  ;;  %v5984_v20 = vld [vmem:[#allocation15 + $0x11] ss:$2 sm:$0xf] }
 0x791   : > { %v5997_v35 = vmax.f32 %v5968_v3, %v5984_v20 }
 0x7c1   : > { %v5923_v23 = vpop.f32.mrf.mxu1 }
 0x7c2   : > { %v5924_v8 = vadd.f32 %v10112_v55, %v5923_v23 }
 0x7c3   : > { %v5925_v1 = vpop.f32.mrf.mxu1 }
 0x7c4   : > { %v5950_v29 = vmax.f32 %v5924_v8, 0.0 }
 0x7c6   : > { %5959 = vst.msk [vmem:[#allocation15 + $0x18] sm:$0xff] %vm5955_vm3, %v5950_v29 }
 0x7cb   : > { %v6129_v34 = vpop.permute.xlu0 %6128 }
 0x7cc   : > { %v6096_v39 = vpop.permute.xlu1 %6095  ;;  %6140 = vst.msk [vmem:[#allocation12 + $0x8] sm:$0xff] %vm6057_vm8, %v6129_v34 }
 0x7cd   : > { %v5970_v5 = vld [vmem:[#allocation15 + $0x18] ss:$2 sm:$0xf]  ;;  %v5986_v41 = vld [vmem:[#allocation15 + $0x19] ss:$2 sm:$0xf] }
 0x7ce   : > { %6108 = vst.msk [vmem:[#allocation12] sm:$0xff] %vm6107_vm9, %v6096_v39  ;;  %v5998_v54 = vmax.f32 %v5970_v5, %v5986_v41  ;;  %v6248_v5 = vld [vmem:[%s10585_s9 + $0x118] sm:$0xff] }
 0x7cf   : > { %7413 = vmatprep.subr.mxu1 %v6248_v5 }
 0x7d0   : > { %v6048_v6 = vpop.permute.xlu1 %6047  ;;  %v6004_v17 = vmax.f32 %v5997_v35, %v5998_v54 }
 0x7d1   : > { %6059 = vst.msk [vmem:[#allocation12 + $0x18] sm:$0xff] %vm6057_vm8, %v6048_v6  ;;  %v6245_v6 = vld [vmem:[%s10585_s9 + $0x100] sm:$0xff] }
 0x7d2   : > { %6026 = vst.msk [vmem:[#allocation6 + $0x38] sm:$0xf] %vm6024_vm7, %v6004_v17  ;;  %v6196_v17 = vld [vmem:[#allocation6 + $0x81] sm:$0xff] }
 0x7d3   : > { %6200 = vst.msk [vmem:[#allocation12 + $0x58] sm:$0xff] %vm5955_vm3, %v6196_v17  ;;  %v6665_v17 = vld [vmem:[%s10587_s11 + $0xc0] sm:$0xff] }
 0x7d4   : > { %v6073_v43 = vpop.permute.xlu1 %6072 }
 0x7d5   : > { %6084 = vst.msk [vmem:[#allocation12 + $0x18] sm:$0xff] %vm6082_vm10, %v6073_v43  ;;  %v6201_v41 = vld [vmem:[#allocation12] sm:$0xff] }
 0x7d9   : > { %v6145_v49 = vld [vmem:[#allocation6 + $0x37] sm:$0xff] }
 0x7da   : > { %v6169_v27 = vld [vmem:[#allocation6 + $0x38] sm:$0xff]  ;;  %6153 = vrot.lane.b32.xlu0 %v6145_v49, %s10608_s14  ;;  %6097 = vrot.lane.b32.xlu1 %v6145_v49, %s10628_s20  ;;  %6035 = vst.msk [vmem:[#allocation12 + $0x30] sm:$0xff] %vm5955_vm3, %v6145_v49 }
 0x7db   : > { %v6121_v61 = vld [vmem:[#allocation6 + $0x39] sm:$0xff]  ;;  %6117 = vst.msk [vmem:[#allocation12 + $0x20] sm:$0xff] %vm5955_vm3, %v6169_v27 }
 0x7dc   : > { %6197 = vst.msk [vmem:[#allocation12 + $0x10] sm:$0xff] %vm5955_vm3, %v6121_v61 }
 0x7de   : > { %6177 = vrot.lane.b32.xlu0 %v6169_v27, %s10628_s20  ;;  %6049 = vrot.lane.b32.xlu1 %v6169_v27, %s10629_s16 }
 0x7e2   : > { %6130 = vrot.lane.b32.xlu0 %v6121_v61, %s10629_s16  ;;  %6074 = vrot.lane.b32.xlu1 %v6121_v61, %s10608_s14 }
 0x801   : > { %v5928_v44 = vpop.f32.mrf.mxu1 }
 0x802   : > { %v5929_v50 = vadd.f32 %v10112_v55, %v5928_v44 }
 0x803   : > { %v5930_v63 = vpop.f32.mrf.mxu1 }
 0x804   : > { %v5951_v0 = vmax.f32 %v5929_v50, 0.0 }
 0x806   : > { %5960 = vst.msk [vmem:[#allocation15 + $0x20] sm:$0xff] %vm5955_vm3, %v5951_v0 }
 0x80d   : > { %v5972_v56 = vld [vmem:[#allocation15 + $0x20] ss:$2 sm:$0xf]  ;;  %v5988_v4 = vld [vmem:[#allocation15 + $0x21] ss:$2 sm:$0xf] }
 0x80e   : > { %v5999_v36 = vmax.f32 %v5972_v56, %v5988_v4  ;;  %v6492_v56 = vld [vmem:[#allocation7 + $0x9] sm:$0xff] }
 0x80f   : > { %v6672_v4 = vld [vmem:[%s10587_s11 + $0xf8] sm:$0xff] }
 0x810   : > { %7239 = vmatprep.subr.mxu0 %v6672_v4  ;;  %v6644_v4 = vld [vmem:[%s10587_s11 + $0x18] sm:$0xff] }
 0x82b   : > { %v5933_v9 = vpop.f32.mrf.mxu1 }
 0x82c   : > { %v5934_v48 = vadd.f32 %v10112_v55, %v5933_v9  ;;  %v6203_v9 = vld [vmem:[#allocation12 + $0x10] sm:$0xff] }
 0x82d   : > { %v5935_v51 = vpop.f32.mrf.mxu1 }
 0x82e   : > { %v5952_v2 = vmax.f32 %v5934_v48, 0.0 }
 0x830   : > { %5961 = vst.msk [vmem:[#allocation15 + $0x28] sm:$0xff] %vm5955_vm3, %v5952_v2  ;;  %v6468_v2 = vld [vmem:[#allocation7 + $0x8] sm:$0xff] }
 0x837   : > { %v5974_v12 = vld [vmem:[#allocation15 + $0x28] ss:$2 sm:$0xf]  ;;  %v5990_v13 = vld [vmem:[#allocation15 + $0x29] ss:$2 sm:$0xf] }
 0x838   : > { %v5938_v18 = vpop.f32.mrf.mxu1  ;;  %v6000_v16 = vmax.f32 %v5974_v12, %v5990_v13  ;;  %v6460_v12 = vld [vmem:[#allocation7 + $0x7] sm:$0xff] }
 0x839   : > { %v5939_v26 = vadd.f32 %v10112_v55, %v5938_v18  ;;  %v6656_v13 = vld [vmem:[%s10587_s11 + $0x78] sm:$0xff]  ;;  %6464 = vst.msk [vmem:[#allocation13] sm:$0xff] %vm5955_vm3, %v6460_v12  ;;  %v6671_v18 = vld [vmem:[%s10587_s11 + $0xf0] sm:$0xff] }
 0x83a   : > { %v5940_v53 = vpop.f32.mrf.mxu1  ;;  %v6005_v19 = vmax.f32 %v5999_v36, %v6000_v16  ;;  %v6655_v36 = vld [vmem:[%s10587_s11 + $0x70] sm:$0xff]  ;;  %7240 = vmatpush3.msra.mxu0 %v6656_v13  ;;  %v6670_v16 = vld [vmem:[%s10587_s11 + $0xe8] sm:$0xff] }
 0x83b   : > { %v5953_v21 = vmax.f32 %v5939_v26, 0.0  ;;  %7241 = vmatprep.subr.mxu0 %v6671_v18  ;;  %v6654_v26 = vld [vmem:[%s10587_s11 + $0x68] sm:$0xff]  ;;  %v6669_v53 = vld [vmem:[%s10587_s11 + $0xe0] sm:$0xff]  ;;  %v6659_v12 = vld [vmem:[%s10587_s11 + $0x90] sm:$0xff] }
 0x83c   : > { %6027 = vst.msk [vmem:[#allocation6 + $0x50] sm:$0xf] %vm6024_vm7, %v6005_v19  ;;  %7242 = vmatpush3.msra.mxu0 %v6655_v36  ;;  %v6668_v19 = vld [vmem:[%s10587_s11 + $0xd8] sm:$0xff] }
 0x83d   : > { %5962 = vst.msk [vmem:[#allocation15 + $0x30] sm:$0xff] %vm5955_vm3, %v5953_v21  ;;  %7243 = vmatprep.subr.mxu0 %v6670_v16  ;;  %v6653_v21 = vld [vmem:[%s10587_s11 + $0x60] sm:$0xff]  ;;  %v6643_v16 = vld [vmem:[%s10587_s11 + $0x10] sm:$0xff] }
 0x83e   : > { %7244 = vmatpush3.msra.mxu0 %v6654_v26  ;;  %v6658_v26 = vld [vmem:[%s10587_s11 + $0x88] sm:$0xff] }
 0x83f   : > { %7245 = vmatprep.subr.mxu0 %v6669_v53  ;;  %v6642_v53 = vld [vmem:[%s10587_s11 + $0x8] sm:$0xff] }
 0x840   : > { %v5943_v23 = vpop.f32.mrf.mxu1  ;;  %7246 = vmatpush3.msra.mxu0 %v6653_v21  ;;  %v6657_v21 = vld [vmem:[%s10587_s11 + $0x80] sm:$0xff] }
 0x841   : > { %v5944_v52 = vadd.f32 %v10112_v55, %v5943_v23  ;;  %7247 = vmatprep.subr.mxu0 %v6668_v19 }
 0x842   : > { %v5945_v8 = vpop.f32.mrf.mxu1 }
 0x843   : > { %v5954_v37 = vmax.f32 %v5944_v52, 0.0  ;;  %v6146_v1 = vld [vmem:[#allocation6 + $0x4f] sm:$0xff] }
 0x844   : > { %v6170_v28 = vld [vmem:[#allocation6 + $0x50] sm:$0xff]  ;;  %6155 = vrot.lane.b32.xlu0 %v6146_v1, %s10608_s14  ;;  %6099 = vrot.lane.b32.xlu1 %v6146_v1, %s10628_s20  ;;  %6036 = vst.msk [vmem:[#allocation12 + $0x48] sm:$0xff] %vm5955_vm3, %v6146_v1 }
 0x845   : > { %v6122_v29 = vld [vmem:[#allocation6 + $0x51] sm:$0xff]  ;;  %6118 = vst.msk [vmem:[#allocation12 + $0x38] sm:$0xff] %vm5955_vm3, %v6170_v28  ;;  %5963 = vst.msk [vmem:[#allocation15 + $0x38] sm:$0xff] %vm5955_vm3, %v5954_v37 }
 0x846   : > { %6198 = vst.msk [vmem:[#allocation12 + $0x28] sm:$0xff] %vm5955_vm3, %v6122_v29  ;;  %v5976_v47 = vld [vmem:[#allocation15 + $0x30] ss:$2 sm:$0xf] }
 0x847   : > { %v5992_v30 = vld [vmem:[#allocation15 + $0x31] ss:$2 sm:$0xf] }
 0x848   : > { %6179 = vrot.lane.b32.xlu0 %v6170_v28, %s10628_s20  ;;  %6051 = vrot.lane.b32.xlu1 %v6170_v28, %s10629_s16  ;;  %v6001_v31 = vmax.f32 %v5976_v47, %v5992_v30 }
 0x84c   : > { %v6154_v55 = vpop.permute.xlu0 %6153  ;;  %v6098_v25 = vpop.permute.xlu1 %6097  ;;  %v5978_v7 = vld [vmem:[#allocation15 + $0x38] ss:$2 sm:$0xf]  ;;  %v5994_v14 = vld [vmem:[#allocation15 + $0x39] ss:$2 sm:$0xf]  ;;  %6132 = vrot.lane.b32.xlu0 %v6122_v29, %s10629_s16  ;;  %6076 = vrot.lane.b32.xlu1 %v6122_v29, %s10608_s14 }
 0x84d   : > { %6165 = vst.msk [vmem:[#allocation12 + $0x8] sm:$0xff] %vm6082_vm10, %v6154_v55  ;;  %v6002_v3 = vmax.f32 %v5978_v7, %v5994_v14  ;;  %v6206_v48 = vld [vmem:[#allocation12 + $0x28] sm:$0xff]  ;;  %v7093_v14 = vld [vmem:[%s10586_s10] ss:$0 sm:$0xff] }
 0x84e   : > { %6109 = vst.msk [vmem:[#allocation12 + $0x18] sm:$0xff] %vm6107_vm9, %v6098_v25 }
 0x84f   : > { %v6006_v11 = vmax.f32 %v6001_v31, %v6002_v3 }
 0x850   : > { %v6178_v33 = vpop.permute.xlu0 %6177  ;;  %v6050_v20 = vpop.permute.xlu1 %6049 }
 0x851   : > { %6189 = vst.msk [vmem:[#allocation12 + $0x8] sm:$0xff] %vm6107_vm9, %v6178_v33  ;;  %v6652_v33 = vld [vmem:[%s10587_s11 + $0x58] sm:$0xff] }
 0x852   : > { %6060 = vst.msk [vmem:[#allocation12 + $0x30] sm:$0xff] %vm6057_vm8, %v6050_v20  ;;  %v6667_v20 = vld [vmem:[%s10587_s11 + $0xd0] sm:$0xff]  ;;  %7248 = vmatpush3.msra.mxu0 %v6652_v33 }
 0x853   : > { %6028 = vst.msk [vmem:[#allocation6 + $0x68] sm:$0xf] %vm6024_vm7, %v6006_v11  ;;  %v6651_v11 = vld [vmem:[%s10587_s11 + $0x50] sm:$0xff]  ;;  %7249 = vmatprep.subr.mxu0 %v6667_v20 }
 0x854   : > { %v6131_v34 = vpop.permute.xlu0 %6130  ;;  %v6075_v39 = vpop.permute.xlu1 %6074  ;;  %7250 = vmatpush3.msra.mxu0 %v6651_v11 }
 0x855   : > { %6141 = vst.msk [vmem:[#allocation12 + $0x20] sm:$0xff] %vm6057_vm8, %v6131_v34  ;;  %v6204_v10 = vld [vmem:[#allocation12 + $0x18] sm:$0xff] }
 0x856   : > { %6085 = vst.msk [vmem:[#allocation12 + $0x30] sm:$0xff] %vm6082_vm10, %v6075_v39  ;;  %v6666_v39 = vld [vmem:[%s10587_s11 + $0xc8] sm:$0xff] }
 0x857   : > { %7251 = vmatprep.subr.mxu0 %v6666_v39 }
 0x858   : > { %v6202_v40 = vld [vmem:[#allocation12 + $0x8] sm:$0xff] }
 0x859   : > { %6332 = vmatprep.mubr.f32.mxu1 %v6202_v40 }
 0x85a   : > { %6333 = vmatmul.mubr.f32.vlgmr.msra.gmra.mxu1 %v6201_v41  ;;  %v6147_v35 = vld [vmem:[#allocation6 + $0x67] sm:$0xff] }
 0x85b   : > { %v6171_v54 = vld [vmem:[#allocation6 + $0x68] sm:$0xff]  ;;  %7414 = vmatpush3.msra.mxu1 %v6248_v5  ;;  %6157 = vrot.lane.b32.xlu0 %v6147_v35, %s10608_s14 }
 0x85c   : > { %v6123_v15 = vld [vmem:[#allocation6 + $0x69] sm:$0xff]  ;;  %6101 = vrot.lane.b32.xlu1 %v6147_v35, %s10628_s20  ;;  %6119 = vst.msk [vmem:[#allocation12 + $0x50] sm:$0xff] %vm5955_vm3, %v6171_v54  ;;  %7415 = vmatprep.subr.mxu1 %v6247_v38 }
 0x85d   : > { %6199 = vst.msk [vmem:[#allocation12 + $0x40] sm:$0xff] %vm5955_vm3, %v6123_v15  ;;  %7416 = vmatpush3.msra.mxu1 %v6247_v38 }
 0x85e   : > { %7417 = vmatprep.subr.mxu1 %v6246_v22 }
 0x85f   : > { %6181 = vrot.lane.b32.xlu0 %v6171_v54, %s10628_s20  ;;  %7418 = vmatpush3.msra.mxu1 %v6246_v22 }
 0x860   : > { %7419 = vmatprep.subr.mxu1 %v6245_v6  ;;  %6476 = vrot.lane.b32.xlu1 %v6468_v2, %s10629_s16 }
 0x861   : > { %7420 = vmatpush3.msra.mxu1 %v6245_v6  ;;  %v6650_v6 = vld [vmem:[%s10587_s11 + $0x48] sm:$0xff] }
 0x862   : > { %7252 = vmatpush3.msra.mxu0 %v6650_v6 }
 0x863   : > { %6134 = vrot.lane.b32.xlu0 %v6123_v15, %s10629_s16  ;;  %7253 = vmatprep.subr.mxu0 %v6665_v17 }
 0x864   : > { %v6209_v51 = vld [vmem:[#allocation12 + $0x40] sm:$0xff]  ;;  %6500 = vrot.lane.b32.xlu1 %v6492_v56, %s10608_s14  ;;  %s7005_s14 = sshll.u32 %s461_s0, 2 }
 0x867   : > { %6183 = vrot.lane.b32.xlu0 %v6172_v46, %s10628_s20  ;;  %v6649_v46 = vld [vmem:[%s10587_s11 + $0x40] sm:$0xff] }
 0x868   : > { %7254 = vmatpush3.msra.mxu0 %v6649_v46 }
 0x8b6   : > { %v6156_v24 = vpop.permute.xlu0 %6155  ;;  %v6100_v57 = vpop.permute.xlu1 %6099 }
 0x8b7   : > { %6166 = vst.msk [vmem:[#allocation12 + $0x20] sm:$0xff] %vm6082_vm10, %v6156_v24 }
 0x8b8   : > { %6110 = vst.msk [vmem:[#allocation12 + $0x30] sm:$0xff] %vm6107_vm9, %v6100_v57 }
 0x8ba   : > { %v6180_v58 = vpop.permute.xlu0 %6179  ;;  %v6052_v45 = vpop.permute.xlu1 %6051 }
 0x8bb   : > { %6190 = vst.msk [vmem:[#allocation12 + $0x20] sm:$0xff] %vm6107_vm9, %v6180_v58 }
 0x8bc   : > { %6061 = vst.msk [vmem:[#allocation12 + $0x48] sm:$0xff] %vm6057_vm8, %v6052_v45  ;;  %v6664_v45 = vld [vmem:[%s10587_s11 + $0xb8] sm:$0xff] }
 0x8bd   : > { %7255 = vmatprep.subr.mxu0 %v6664_v45 }
 0x8be   : > { %v6133_v43 = vpop.permute.xlu0 %6132  ;;  %v6077_v59 = vpop.permute.xlu1 %6076 }
 0x8bf   : > { %6142 = vst.msk [vmem:[#allocation12 + $0x38] sm:$0xff] %vm6057_vm8, %v6133_v43  ;;  %v6207_v50 = vld [vmem:[#allocation12 + $0x30] sm:$0xff] }
 0x8c0   : > { %6086 = vst.msk [vmem:[#allocation12 + $0x48] sm:$0xff] %vm6082_vm10, %v6077_v59 }
 0x8c2   : > { %v6205_v42 = vld [vmem:[#allocation12 + $0x20] sm:$0xff] }
 0x8c3   : > { %6337 = vmatprep.mubr.f32.mxu1 %v6205_v42 }
 0x8c4   : > { %6338 = vmatmul.mubr.f32.gmra.mxu1 %v6204_v10  ;;  %v6648_v10 = vld [vmem:[%s10587_s11 + $0x38] sm:$0xff] }
 0x8c5   : > { %7256 = vmatpush3.msra.mxu0 %v6648_v10 }
 0x8cd   : > { %v6158_v62 = vpop.permute.xlu0 %6157 }
 0x8ce   : > { %v6102_v60 = vpop.permute.xlu1 %6101  ;;  %6167 = vst.msk [vmem:[#allocation12 + $0x38] sm:$0xff] %vm6082_vm10, %v6158_v62  ;;  %v6663_v62 = vld [vmem:[%s10587_s11 + $0xb0] sm:$0xff] }
 0x8cf   : > { %6111 = vst.msk [vmem:[#allocation12 + $0x48] sm:$0xff] %vm6107_vm9, %v6102_v60  ;;  %v6647_v60 = vld [vmem:[%s10587_s11 + $0x30] sm:$0xff]  ;;  %7257 = vmatprep.subr.mxu0 %v6663_v62 }
 0x8d0   : > { %7258 = vmatpush3.msra.mxu0 %v6647_v60 }
 0x8d1   : > { %v6182_v49 = vpop.permute.xlu0 %6181 }
 0x8d2   : > { %6191 = vst.msk [vmem:[#allocation12 + $0x38] sm:$0xff] %vm6107_vm9, %v6182_v49  ;;  %v6477_v28 = vpop.permute.xlu1 %6476 }
 0x8d3   : > { %6488 = vst.msk [vmem:[#allocation13] sm:$0xff] %vm6057_vm8, %v6477_v28  ;;  %v6600_v28 = vld [vmem:[#allocation7 + $0x80] sm:$0xff] }
 0x8d5   : > { %v6135_v27 = vpop.permute.xlu0 %6134 }
 0x8d6   : > { %6143 = vst.msk [vmem:[#allocation12 + $0x50] sm:$0xff] %vm6057_vm8, %v6135_v27  ;;  %v6210_v0 = vld [vmem:[#allocation12 + $0x48] sm:$0xff]  ;;  %v6501_v47 = vpop.permute.xlu1 %6500 }
 0x8d7   : > { %6168 = vst.msk [vmem:[#allocation12 + $0x50] sm:$0xff] %vm6082_vm10, %v10201_v32  ;;  %v6212_v32 = vld [vmem:[#allocation12 + $0x58] sm:$0xff]  ;;  %6512 = vst.msk [vmem:[#allocation13] sm:$0xff] %vm6082_vm10, %v6501_v47  ;;  %v6662_v27 = vld [vmem:[%s10587_s11 + $0xa8] sm:$0xff] }
 0x8d8   : > { %7259 = vmatprep.subr.mxu0 %v6662_v27 }
 0x8d9   : > { %v6184_v61 = vpop.permute.xlu0 %6183  ;;  %v6208_v44 = vld [vmem:[#allocation12 + $0x38] sm:$0xff] }
 0x8da   : > { %6192 = vst.msk [vmem:[#allocation12 + $0x50] sm:$0xff] %vm6107_vm9, %v6184_v61  ;;  %6342 = vmatprep.mubr.f32.mxu1 %v6208_v44 }
 0x8db   : > { %6343 = vmatmul.mubr.f32.gmra.mxu1 %v6207_v50 }
 0x8e1   : > { %v6211_v63 = vld [vmem:[#allocation12 + $0x50] sm:$0xff] }
 0x8e2   : > { %6347 = vmatprep.mubr.f32.mxu1 %v6211_v63  ;;  %v6646_v63 = vld [vmem:[%s10587_s11 + $0x28] sm:$0xff] }
 0x8e3   : > { %6348 = vmatmul.mubr.f32.gmra.mxu1 %v6210_v0  ;;  %v6661_v0 = vld [vmem:[%s10587_s11 + $0xa0] sm:$0xff]  ;;  %7260 = vmatpush3.msra.mxu0 %v6646_v63 }
 0x8e4   : > { %7421 = vmatprep.mubr.msk.f32.mxu1 %vm5955_vm3, %v6203_v9  ;;  %7261 = vmatprep.subr.mxu0 %v6661_v0 }
 0x8e7   : > { %7422 = vmatmul.mubr.msk.f32.vlgmr.msra.gmra.mxu1 %vm5955_vm3, %v6206_v48 }
 0x8e8   : > { %7424 = vmatprep.mubr.msk.f32.mxu1 %vm5955_vm3, %v6209_v51  ;;  %v6645_v51 = vld [vmem:[%s10587_s11 + $0x20] sm:$0xff] }
 0x8e9   : > { %7262 = vmatpush3.msra.mxu0 %v6645_v51 }
 0x8eb   : > { %7425 = vmatmul.mubr.msk.f32.gmra.mxu1 %vm5955_vm3, %v6212_v32  ;;  %v6660_v32 = vld [vmem:[%s10587_s11 + $0x98] sm:$0xff] }
 0x8ec   : > { %7263 = vmatprep.subr.mxu0 %v6660_v32 }
 0x8ed   : > { %7264 = vmatpush3.msra.mxu0 %v6644_v4 }
 0x8ee   : > { %7265 = vmatprep.subr.mxu0 %v6659_v12 }
 0x8ef   : > { %7266 = vmatpush3.msra.mxu0 %v6643_v16 }
 0x8f0   : > { %7267 = vmatprep.subr.mxu0 %v6658_v26 }
 0x8f1   : > { %7268 = vmatpush3.msra.mxu0 %v6642_v53 }
 0x8f2   : > { %7269 = vmatprep.subr.mxu0 %v6657_v21 }
 0x91a   : > { %v7219_v23 = vpop.f32.mrf.mxu1 }
 0x91c   : > { %v7220_v52 = vpop.f32.mrf.mxu1 }
 0x91d   : > { %v7221_v30 = vadd.f32 %v7220_v52, %v7219_v23  ;;  %v6641_v23 = vld [vmem:[%s10587_s11] sm:$0xff] }
 0x91e   : > { %7270 = vmatpush3.msra.mxu0 %v6641_v23 }
 0x91f   : > { %v6335_v41 = vadd.f32 %v7221_v30, %v7093_v14 }
 0x984   : > { %v7222_v8 = vpop.f32.mrf.mxu1 }
 0x986   : > { %v7223_v37 = vpop.f32.mrf.mxu1 }
 0x987   : > { %v7224_v55 = vadd.f32 %v7223_v37, %v7222_v8  ;;  %v6676_v8 = vld [vmem:[%s10587_s11 + $0x118] sm:$0xff]  ;;  %v6576_v37 = vld [vmem:[#allocation7 + $0x7f] sm:$0xff] }
 0x988   : > { %7427 = vmatprep.subr.mxu0 %v6676_v8 }
 0x989   : > { %v6340_v3 = vadd.f32 %v7224_v55, %v7093_v14 }
 0x99b   : > { %v7225_v1 = vpop.f32.mrf.mxu1 }
 0x99d   : > { %v7226_v29 = vpop.f32.mrf.mxu1 }
 0x99e   : > { %v7227_v40 = vadd.f32 %v7226_v29, %v7225_v1  ;;  %v6624_v1 = vld [vmem:[#allocation7 + $0x81] sm:$0xff] }
 0x99f   : > { %6628 = vst.msk [vmem:[#allocation13 + $0x58] sm:$0xff] %vm5955_vm3, %v6624_v1 }
 0x9a0   : > { %v6345_v58 = vadd.f32 %v7227_v40, %v7093_v14  ;;  %v6675_v40 = vld [vmem:[%s10587_s11 + $0x110] sm:$0xff] }
 0x9a3   : > { %v7228_v25 = vpop.f32.mrf.mxu1 }
 0x9a5   : > { %v7229_v7 = vpop.f32.mrf.mxu1 }
 0x9a6   : > { %v7230_v31 = vadd.f32 %v7229_v7, %v7228_v25  ;;  %v6640_v27 = vld [vmem:[#allocation13 + $0x58] sm:$0xff] }
 0x9a7   : > { %v7423_v34 = vpop.f32.mrf.mxu1 }
 0x9a8   : > { %v6425_v5 = vadd.f32 %v7423_v34, %v6340_v3  ;;  %v6350_v38 = vadd.f32 %v7230_v31, %v7093_v14 }
 0x9a9   : > { %v6419_v35 = vpop.f32.mrf.mxu1 }
 0x9aa   : > { %v6439_v54 = vmax.f32 %v6425_v5, 0.0  ;;  %v6420_v15 = vadd.f32 %v6419_v35, %v6335_v41  ;;  %v6674_v35 = vld [vmem:[%s10587_s11 + $0x108] sm:$0xff] }
 0x9ab   : > { %v7426_v22 = vpop.f32.mrf.mxu1 }
 0x9ac   : > { %6457 = vst.msk [vmem:[#allocation7 + $0x38] sm:$0xf] %vm6024_vm7, %v6439_v54  ;;  %v6438_v24 = vmax.f32 %v6420_v15, 0.0  ;;  %v6435_v57 = vadd.f32 %v7426_v22, %v6350_v38  ;;  %v6673_v54 = vld [vmem:[%s10587_s11 + $0x100] sm:$0xff] }
 0x9ad   : > { %v6429_v43 = vpop.f32.mrf.mxu1 }
 0x9ae   : > { %6456 = vst.msk [vmem:[#allocation7 + $0x20] sm:$0xf] %vm6024_vm7, %v6438_v24  ;;  %v6441_v59 = vmax.f32 %v6435_v57, 0.0  ;;  %v6430_v42 = vadd.f32 %v6429_v43, %v6345_v58 }
 0x9b0   : > { %6459 = vst.msk [vmem:[#allocation7 + $0x68] sm:$0xf] %vm6024_vm7, %v6441_v59  ;;  %v6440_v49 = vmax.f32 %v6430_v42, 0.0 }
 0x9b2   : > { %6458 = vst.msk [vmem:[#allocation7 + $0x50] sm:$0xf] %vm6024_vm7, %v6440_v49 }
 0x9b3   : > { %v6573_v61 = vld [vmem:[#allocation7 + $0x37] sm:$0xff] }
 0x9b4   : > { %v6597_v44 = vld [vmem:[#allocation7 + $0x38] sm:$0xff]  ;;  %6581 = vrot.lane.b32.xlu0 %v6573_v61, %s10630_s23  ;;  %6526 = vrot.lane.b32.xlu1 %v6573_v61, %s10628_s20  ;;  %6466 = vst.msk [vmem:[#allocation13 + $0x30] sm:$0xff] %vm5955_vm3, %v6573_v61 }
 0x9b5   : > { %v6549_v50 = vld [vmem:[#allocation7 + $0x39] sm:$0xff]  ;;  %6545 = vst.msk [vmem:[#allocation13 + $0x20] sm:$0xff] %vm5955_vm3, %v6597_v44  ;;  %v6548_v19 = vld [vmem:[#allocation7 + $0x21] sm:$0xff] }
 0x9b6   : > { %6625 = vst.msk [vmem:[#allocation13 + $0x10] sm:$0xff] %vm5955_vm3, %v6549_v50  ;;  %v6516_v9 = vld [vmem:[#allocation7 + $0x1f] sm:$0xff] }
 0x9b7   : > { %v6469_v48 = vld [vmem:[#allocation7 + $0x20] sm:$0xff]  ;;  %6465 = vst.msk [vmem:[#allocation13 + $0x18] sm:$0xff] %vm5955_vm3, %v6516_v9  ;;  %v6599_v2 = vld [vmem:[#allocation7 + $0x68] sm:$0xff] }
 0x9b8   : > { %6544 = vst.msk [vmem:[#allocation13 + $0x8] sm:$0xff] %vm5955_vm3, %v6469_v48  ;;  %v6551_v56 = vld [vmem:[#allocation7 + $0x69] sm:$0xff]  ;;  %6605 = vrot.lane.b32.xlu0 %v6597_v44, %s10628_s20  ;;  %6480 = vrot.lane.b32.xlu1 %v6597_v44, %s10629_s16  ;;  %6547 = vst.msk [vmem:[#allocation13 + $0x50] sm:$0xff] %vm5955_vm3, %v6599_v2 }
 0x9b9   : > { %6627 = vst.msk [vmem:[#allocation13 + $0x40] sm:$0xff] %vm5955_vm3, %v6551_v56  ;;  %v6518_v13 = vld [vmem:[#allocation7 + $0x4f] sm:$0xff]  ;;  %v6575_v52 = vld [vmem:[#allocation7 + $0x67] sm:$0xff] }
 0x9ba   : > { %v6471_v18 = vld [vmem:[#allocation7 + $0x50] sm:$0xff]  ;;  %6467 = vst.msk [vmem:[#allocation13 + $0x48] sm:$0xff] %vm5955_vm3, %v6518_v13 }
 0x9bb   : > { %v6495_v36 = vld [vmem:[#allocation7 + $0x51] sm:$0xff]  ;;  %6546 = vst.msk [vmem:[#allocation13 + $0x38] sm:$0xff] %vm5955_vm3, %v6471_v18 }
 0x9bc   : > { %6626 = vst.msk [vmem:[#allocation13 + $0x28] sm:$0xff] %vm5955_vm3, %v6495_v36  ;;  %6558 = vrot.lane.b32.xlu0 %v6549_v50, %s10629_s16  ;;  %6504 = vrot.lane.b32.xlu1 %v6549_v50, %s10630_s23 }
 0x9bd   : > { %v6631_v62 = vld [vmem:[#allocation13 + $0x10] sm:$0xff] }
 0x9c0   : > { %6556 = vrot.lane.b32.xlu0 %v6548_v19, %s10629_s16  ;;  %6524 = vrot.lane.b32.xlu1 %v6516_v9, %s10628_s20  ;;  %v6637_v49 = vld [vmem:[#allocation13 + $0x40] sm:$0xff] }
 0x9c3   : > { %v6634_v60 = vld [vmem:[#allocation13 + $0x28] sm:$0xff] }
 0x9c4   : > { %6478 = vrot.lane.b32.xlu1 %v6469_v48, %s10629_s16  ;;  %6585 = vrot.lane.b32.xlu0 %v6575_v52, %s10630_s23 }
 0x9c8   : > { %6502 = vrot.lane.b32.xlu1 %v6548_v19, %s10630_s23  ;;  %6609 = vrot.lane.b32.xlu0 %v6599_v2, %s10628_s20 }
 0x9cc   : > { %6562 = vrot.lane.b32.xlu0 %v6551_v56, %s10629_s16  ;;  %6528 = vrot.lane.b32.xlu1 %v6518_v13, %s10628_s20  ;;  %v7098_v56 = vld [vmem:[%s10588_s12] ss:$0 sm:$0xff] }
 0x9d0   : > { %6583 = vrot.lane.b32.xlu0 %v6518_v13, %s10630_s23  ;;  %6482 = vrot.lane.b32.xlu1 %v6471_v18, %s10629_s16 }
 0x9d4   : > { %6607 = vrot.lane.b32.xlu0 %v6471_v18, %s10628_s20  ;;  %6506 = vrot.lane.b32.xlu1 %v6495_v36, %s10630_s23 }
 0x9d8   : > { %6560 = vrot.lane.b32.xlu0 %v6495_v36, %s10629_s16  ;;  %6530 = vrot.lane.b32.xlu1 %v6575_v52, %s10628_s20 }
 0x9dc   : > { %6587 = vrot.lane.b32.xlu0 %v6576_v37, %s10630_s23 }
 0x9e0   : > { %6611 = vrot.lane.b32.xlu0 %v6600_v28, %s10628_s20  ;;  %s463_s20 = scalar_lea.vmem [#allocation22], %s7005_s14  ;;  %s7584_s14 = scalar_lea.vmem %s7583_s15, 128 }
 0x9e1   : > { %s6913_s23 = sshll.u32 %s463_s20, 4  ;;  %s10532_s23 = int_to_ptr.vmem [resolvable:$true] %s6913_s23 }
 0x9e2   : > { %s7578_s30 = scalar_lea.vmem %s10532_s23, 64  ;;  %p7585_p11 = scmp.lt.s32.totalorder %s10532_s23, %s7583_s15 }
 0x9e3   : > { %p7579_p10 = scmp.ne.s32.totalorder %s10532_s23, %s7578_s30  ;;  %p7586_p0 = scmp.lt.s32.totalorder %s7584_s14, %s7578_s30 }
 0x9e5   : > { %p7580_p12 = pnand %p7579_p10, %p7781_p5  ;;  %p7587_p1 = por %p7586_p0, %p7585_p11 }
 0x9e7   : > { %p7581_p8 = pneg %p7580_p12 }
 0x9e9   : > { %p7588_p3 = pnand %p7587_p1, %p7581_p8 }
 0xa26   : > { %v6582_v29 = vpop.permute.xlu0 %6581  ;;  %v6527_v55 = vpop.permute.xlu1 %6526 }
 0xa2a   : > { %v6606_v25 = vpop.permute.xlu0 %6605  ;;  %v6481_v47 = vpop.permute.xlu1 %6480 }
 0xa2b   : > { %6490 = vst.msk [vmem:[#allocation13 + $0x30] sm:$0xff] %vm6057_vm8, %v6481_v47 }
 0xa2e   : > { %v6559_v30 = vpop.permute.xlu0 %6558  ;;  %v6505_v7 = vpop.permute.xlu1 %6504 }
 0xa2f   : > { %6569 = vst.msk [vmem:[#allocation13 + $0x20] sm:$0xff] %vm6057_vm8, %v6559_v30 }
 0xa30   : > { %6514 = vst.msk [vmem:[#allocation13 + $0x30] sm:$0xff] %vm6082_vm10, %v6505_v7 }
 0xa32   : > { %v6557_v14 = vpop.permute.xlu0 %6556  ;;  %v6525_v31 = vpop.permute.xlu1 %6524 }
 0xa33   : > { %6568 = vst.msk [vmem:[#allocation13 + $0x8] sm:$0xff] %vm6057_vm8, %v6557_v14 }
 0xa34   : > { %6536 = vst.msk [vmem:[#allocation13] sm:$0xff] %vm6107_vm9, %v6525_v31 }
 0xa35   : > { %6593 = vst.msk [vmem:[#allocation13 + $0x8] sm:$0xff] %vm6082_vm10, %v6582_v29 }
 0xa36   : > { %6617 = vst.msk [vmem:[#allocation13 + $0x8] sm:$0xff] %vm6107_vm9, %v6606_v25  ;;  %v6479_v3 = vpop.permute.xlu1 %6478  ;;  %v6586_v33 = vpop.permute.xlu0 %6585 }
 0xa37   : > { %6489 = vst.msk [vmem:[#allocation13 + $0x18] sm:$0xff] %vm6057_vm8, %v6479_v3 }
 0xa3a   : > { %v6503_v20 = vpop.permute.xlu1 %6502  ;;  %v6610_v11 = vpop.permute.xlu0 %6609 }
 0xa3b   : > { %6513 = vst.msk [vmem:[#allocation13 + $0x18] sm:$0xff] %vm6082_vm10, %v6503_v20  ;;  %v6629_v39 = vld [vmem:[#allocation13] sm:$0xff] }
 0xa3c   : > { %6537 = vst.msk [vmem:[#allocation13 + $0x18] sm:$0xff] %vm6107_vm9, %v6527_v55 }
 0xa3d   : > { %v6630_v34 = vld [vmem:[#allocation13 + $0x8] sm:$0xff] }
 0xa3e   : > { %6760 = vmatprep.mubr.f32.mxu0 %v6630_v34  ;;  %v6563_v5 = vpop.permute.xlu0 %6562  ;;  %v6529_v41 = vpop.permute.xlu1 %6528 }
 0xa3f   : > { %6761 = vmatmul.mubr.f32.vlgmr.msra.gmra.mxu0 %v6629_v39  ;;  %6571 = vst.msk [vmem:[#allocation13 + $0x50] sm:$0xff] %vm6057_vm8, %v6563_v5 }
 0xa40   : > { %6538 = vst.msk [vmem:[#allocation13 + $0x30] sm:$0xff] %vm6107_vm9, %v6529_v41  ;;  %7428 = vmatpush3.msra.mxu0 %v6676_v8 }
 0xa41   : > { %7429 = vmatprep.subr.mxu0 %v6675_v40 }
 0xa42   : > { %7430 = vmatpush3.msra.mxu0 %v6675_v40  ;;  %v6584_v15 = vpop.permute.xlu0 %6583  ;;  %v6483_v38 = vpop.permute.xlu1 %6482 }
 0xa43   : > { %7431 = vmatprep.subr.mxu0 %v6674_v35  ;;  %6594 = vst.msk [vmem:[#allocation13 + $0x20] sm:$0xff] %vm6082_vm10, %v6584_v15  ;;  %v6632_v58 = vld [vmem:[#allocation13 + $0x18] sm:$0xff] }
 0xa44   : > { %6491 = vst.msk [vmem:[#allocation13 + $0x48] sm:$0xff] %vm6057_vm8, %v6483_v38  ;;  %7432 = vmatpush3.msra.mxu0 %v6674_v35 }
 0xa45   : > { %7433 = vmatprep.subr.mxu0 %v6673_v54 }
 0xa46   : > { %7434 = vmatpush3.msra.mxu0 %v6673_v54  ;;  %v6608_v22 = vpop.permute.xlu0 %6607  ;;  %v6507_v6 = vpop.permute.xlu1 %6506 }
 0xa47   : > { %6618 = vst.msk [vmem:[#allocation13 + $0x20] sm:$0xff] %vm6107_vm9, %v6608_v22  ;;  %v6635_v59 = vld [vmem:[#allocation13 + $0x30] sm:$0xff] }
 0xa48   : > { %6515 = vst.msk [vmem:[#allocation13 + $0x48] sm:$0xff] %vm6082_vm10, %v6507_v6 }
 0xa4a   : > { %v6561_v17 = vpop.permute.xlu0 %6560  ;;  %v6531_v46 = vpop.permute.xlu1 %6530 }
 0xa4b   : > { %6570 = vst.msk [vmem:[#allocation13 + $0x38] sm:$0xff] %vm6057_vm8, %v6561_v17 }
 0xa4c   : > { %6539 = vst.msk [vmem:[#allocation13 + $0x48] sm:$0xff] %vm6107_vm9, %v6531_v46 }
 0xa4d   : > { %6595 = vst.msk [vmem:[#allocation13 + $0x38] sm:$0xff] %vm6082_vm10, %v6586_v33 }
 0xa4e   : > { %6619 = vst.msk [vmem:[#allocation13 + $0x38] sm:$0xff] %vm6107_vm9, %v6610_v11  ;;  %v6588_v24 = vpop.permute.xlu0 %6587  ;;  %v6633_v57 = vld [vmem:[#allocation13 + $0x20] sm:$0xff] }
 0xa4f   : > { %6596 = vst.msk [vmem:[#allocation13 + $0x50] sm:$0xff] %vm6082_vm10, %v6588_v24  ;;  %6765 = vmatprep.mubr.f32.mxu0 %v6633_v57 }
 0xa50   : > { %6766 = vmatmul.mubr.f32.gmra.mxu0 %v6632_v58 }
 0xa52   : > { %v6612_v45 = vpop.permute.xlu0 %6611 }
 0xa53   : > { %6620 = vst.msk [vmem:[#allocation13 + $0x50] sm:$0xff] %vm6107_vm9, %v6612_v45  ;;  %v6638_v10 = vld [vmem:[#allocation13 + $0x48] sm:$0xff] }
 0xa55   : > { %v6636_v43 = vld [vmem:[#allocation13 + $0x38] sm:$0xff] }
 0xa56   : > { %6770 = vmatprep.mubr.f32.mxu0 %v6636_v43 }
 0xa57   : > { %6771 = vmatmul.mubr.f32.gmra.mxu0 %v6635_v59 }
 0xa5a   : > { %v6639_v42 = vld [vmem:[#allocation13 + $0x50] sm:$0xff] }
 0xa5b   : > { %6775 = vmatprep.mubr.f32.mxu0 %v6639_v42 }
 0xa5c   : > { %6776 = vmatmul.mubr.f32.gmra.mxu0 %v6638_v10 }
 0xa5d   : > { %7435 = vmatprep.mubr.msk.f32.mxu0 %vm5955_vm3, %v6631_v62 }
 0xa60   : > { %7436 = vmatmul.mubr.msk.f32.vlgmr.msra.gmra.mxu0 %vm5955_vm3, %v6634_v60 }
 0xa61   : > { %7438 = vmatprep.mubr.msk.f32.mxu0 %vm5955_vm3, %v6637_v49 }
 0xa64   : > { %7439 = vmatmul.mubr.msk.f32.gmra.mxu0 %vm5955_vm3, %v6640_v27 }
 0xaff   : > { %v7271_v61 = vpop.f32.mrf.mxu0 }
 0xb01   : > { %v7272_v44 = vpop.f32.mrf.mxu0 }
 0xb02   : > { %v7273_v32 = vadd.f32 %v7272_v44, %v7271_v61 }
 0xb04   : > { %v6763_v16 = vadd.f32 %v7273_v32, %v7098_v56 }
 0xb10   : > { %v7274_v50 = vpop.f32.mrf.mxu0 }
 0xb12   : > { %v7275_v63 = vpop.f32.mrf.mxu0 }
 0xb13   : > { %v7276_v48 = vadd.f32 %v7275_v63, %v7274_v50 }
 0xb15   : > { %v6768_v12 = vadd.f32 %v7276_v48, %v7098_v56 }
 0xb17   : > { %v7277_v0 = vpop.f32.mrf.mxu0 }
 0xb19   : > { %v7278_v9 = vpop.f32.mrf.mxu0 }
 0xb1a   : > { %v7279_v18 = vadd.f32 %v7278_v9, %v7277_v0 }
 0xb1c   : > { %v7280_v51 = vpop.f32.mrf.mxu0  ;;  %v6773_v37 = vadd.f32 %v7279_v18, %v7098_v56 }
 0xb1e   : > { %v7281_v2 = vpop.f32.mrf.mxu0 }
 0xb1f   : > { %v7282_v4 = vadd.f32 %v7281_v2, %v7280_v51 }
 0xb20   : > { %v7437_v13 = vpop.f32.mrf.mxu0 }
 0xb21   : > { %v6853_v36 = vadd.f32 %v7437_v13, %v6768_v12  ;;  %v6778_v19 = vadd.f32 %v7282_v4, %v7098_v56 }
 0xb22   : > { %v6847_v26 = vpop.f32.mrf.mxu0 }
 0xb23   : > { %v6867_v53 = vmax.f32 %v6853_v36, 0.0  ;;  %v6848_v21 = vadd.f32 %v6847_v26, %v6763_v16 }
 0xb24   : > { %v7440_v23 = vpop.f32.mrf.mxu0 }
 0xb25   : > { %6872 = vst.msk [vmem:[#allocation16 + $0x8] sm:$0xff] %vm6870_vm11, %v6867_v53  ;;  %v6866_v52 = vmax.f32 %v6848_v21, 0.0  ;;  %v6863_v8 = vadd.f32 %v7440_v23, %v6778_v19 }
 0xb26   : > { %v6857_v1 = vpop.f32.mrf.mxu0 }
 0xb27   : > { %6871 = vst.msk [vmem:[#allocation16] sm:$0xff] %vm6870_vm11, %v6866_v52  ;;  %v6869_v28 = vmax.f32 %v6863_v8, 0.0  ;;  %v6858_v29 = vadd.f32 %v6857_v1, %v6773_v37 }
 0xb29   : > { %6874 = vst.msk [vmem:[#allocation16 + $0x18] sm:$0xff] %vm6870_vm11, %v6869_v28  ;;  %v6868_v55 = vmax.f32 %v6858_v29, 0.0 }
 0xb2b   : > { %6873 = vst.msk [vmem:[#allocation16 + $0x10] sm:$0xff] %vm6870_vm11, %v6868_v55 }
 0xb2c   : > { %v6877_v25 = vld [vmem:[#allocation16 + $0x8] ss:$2 sm:$0x3]  ;;  %v6885_v47 = vld [vmem:[#allocation16 + $0x9] ss:$2 sm:$0x3] }
 0xb2d   : > { %v6891_v31 = vmax.f32 %v6877_v25, %v6885_v47 }
 0xb2e   : > { %v6875_v30 = vld [vmem:[#allocation16] ss:$2 sm:$0x3]  ;;  %v6883_v7 = vld [vmem:[#allocation16 + $0x1] ss:$2 sm:$0x3] }
 0xb2f   : > { %v6890_v14 = vmax.f32 %v6875_v30, %v6883_v7 }
 0xb30   : > { %v6881_v3 = vld [vmem:[#allocation16 + $0x18] ss:$2 sm:$0x3]  ;;  %v6889_v33 = vld [vmem:[#allocation16 + $0x19] ss:$2 sm:$0x3] }
 0xb31   : > { %v6894_v20 = vmax.f32 %v6890_v14, %v6891_v31  ;;  %v6893_v40 = vmax.f32 %v6881_v3, %v6889_v33 }
 0xb32   : > { %v6879_v11 = vld [vmem:[#allocation16 + $0x10] ss:$2 sm:$0x3]  ;;  %v6887_v34 = vld [vmem:[#allocation16 + $0x11] ss:$2 sm:$0x3] }
 0xb33   : > { %v6892_v39 = vmax.f32 %v6879_v11, %v6887_v34  ;;  %6897 = vst.msk [vmem:[%s463_s20] sm:$0x3] %vm6896_vm12, %v6894_v20 }
 0xb35   : > { %v6895_v5 = vmax.f32 %v6892_v39, %v6893_v40 }
 0xb37   : > { %6898 = vst.msk [vmem:[%s463_s20 + $0x2] sm:$0x3] %vm6896_vm12, %v6895_v5 }
 0xb38   : > { %7591 = shalt.err (!%p7588_p3)
}
 0xb39   : > { %s7592_s0 = scalar_lea.hbm %s10530_s24, 64  ;;  %s7596_s17 = scalar_lea.hbm %s10589_s13, 128 }
 0xb3a   : > { %p7593_p2 = scmp.ne.s32.totalorder %s10530_s24, %s7592_s0  ;;  %p7597_p7 = scmp.lt.s32.totalorder %s10530_s24, %s10589_s13 }
 0xb3b   : > { %p7598_p6 = scmp.lt.s32.totalorder %s7596_s17, %s7592_s0 }
 0xb3c   : > { %p7594_p4 = pnand %p7593_p2, %p7781_p5 }
 0xb3d   : > { %p7599_p9 = por %p7598_p6, %p7597_p7 }
 0xb3e   : > { %p7595_p13 = pneg %p7594_p4 }
 0xb40   : > { %p7600_p10 = pnand %p7599_p9, %p7595_p13 }
 0xb42   : > { %7603 = shalt.err (!%p7600_p10)
}
 0xb43   : > { %s7672_s30 = smov 2  }
 0xb44   : > { %7449 = dma.vmem_to_hbm [thread:$0]  (%p7781_p5), %s10532_s23, 64, %s10530_s24, %s10534_s29, %s10629_s16, %s10629_s16, %s7672_s30  }
 0xb45 PF: > { %p7466_p12 = scmp.ge.s32.totalorder %s7646_s28, 2  ;;  %s6928_s15 = sand.u32 1, %s7634_s25  }
 0xb46   : > { %p10631_p8 = scmp.ne.s32.totalorder %s10615_s19, 0  ;;  %s6929_s14 = scalar_lea.sflag [#allocation19], %s6928_s15 }
 0xb48   : > { %p7459_p11 = pnand %p7466_p12, %p10631_p8 }
 0xb4a   : > { %p7460_p0 = pneg %p7459_p11 }
 0xb4c   : > { %7629 = dma.done.wait (%p7460_p0), %s6929_s14, 64  }
 0xb4d   : > { %7631 = vsyncadd (%p7460_p0), %s6929_s14, 4294967232  ;;  %s10632_s28 = sld [smem:[#allocation27_spill]]  ;;  %s10635_s25 = smov %s7638_s26 }
 0xb4e   : > { %s10633_s18 = sld [smem:[#allocation26_spill]] }
 0xb4f   : > { %s10634_s27 = sld [smem:[#allocation28_spill]] }
 0xb53   : > { %p25_p1 = scmp.ge.s32.totalorder %s10632_s28, 4  }
 0xb54   : > { %s10636_s26 = smov %s10633_s18 }
 0xb55   :  { %27 = sbr.rel (!%p25_p1) target bundleno = 7 (0x7), region = 187 }
 0xb5a   :  { %6934 = vsyncpa [#allocation18], 1 }
 0xb5b   :  { %6936 = vsyncpa [#allocation18 + $0x1], 1 }
 0xb5c   :  { %6937 = vsyncpa [#allocation21], 1 }
 0xb5d   :  { %6938 = vsyncpa [#allocation19], 1 }
 0xb5e   :  { %6940 = vsyncpa [#allocation19 + $0x1], 1 }

</bundles_post_ra>
